<compile_context>
chip_gen: v7x
topology: tpu7x:2x2x1
jax: 0.10.0
libtpu: 0.0.40
codegen_flags: <defaults>
</compile_context>

<pallas_src>
import functools

import jax
import jax.numpy as jnp
from jax.experimental import pallas as pl
from jax.experimental.pallas import tpu as pltpu


_LN_EPS = 1e-5


# ----------------------------- in-kernel building blocks -----------------------------

def _layernorm(z, gamma, beta, eps):
    mu = jnp.mean(z, axis=-1, keepdims=True)
    var = jnp.mean((z - mu) ** 2, axis=-1, keepdims=True)
    return (z - mu) * jax.lax.rsqrt(var + eps) * gamma + beta


def _mha_addln(x_q, x_kv, keep_kv, wqkv_ref, bqkv_ref, wo_ref, bo, gamma, beta,
               *, qkv_base, out_base, n_heads, causal, exact_softmax, eps,
               attn_store=None):
    """Multi-head attention + out-proj + residual add + LayerNorm.

    x_q:[Lq,H] f32, x_kv:[Lk,H] f32, keep_kv:[1,Lk] bool.
    Weights are per-head packed refs (see init_params), so all head selection
    is static leading-dim indexing -- no lane slicing, no cross-lane concat.
    """
    Lq, H = x_q.shape
    Lk = x_kv.shape[0]
    hd = H // n_heads
    inv_scale = 1.0 / float(hd) ** 0.5

    xq_bf = x_q.astype(jnp.bfloat16)
    xkv_bf = x_kv.astype(jnp.bfloat16)

    # key-padding (+ optional causal) mask, shared by all heads (hoisted)
    mask = keep_kv                                          # [1, Lk]
    if causal:
        qi = jax.lax.broadcasted_iota(jnp.int32, (Lq, Lk), 0)
        ki = jax.lax.broadcasted_iota(jnp.int32, (Lq, Lk), 1)
        mask = jnp.logical_and(mask, ki <= qi)              # [Lq, Lk]

    out = jnp.zeros((Lq, H), jnp.float32)
    attn_heads = []
    for h in range(n_heads):                                # static unrolled head loop
        iq = qkv_base + h
        ik = qkv_base + n_heads + h
        iv = qkv_base + 2 * n_heads + h
        qh = jnp.dot(xq_bf, wqkv_ref[iq],
                     preferred_element_type=jnp.float32) + bqkv_ref[iq]
        kh = jnp.dot(xkv_bf, wqkv_ref[ik],
                     preferred_element_type=jnp.float32) + bqkv_ref[ik]
        vh = jnp.dot(xkv_bf, wqkv_ref[iv],
                     preferred_element_type=jnp.float32) + bqkv_ref[iv]

        e = jnp.dot(qh.astype(jnp.bfloat16), kh.T.astype(jnp.bfloat16),
                    preferred_element_type=jnp.float32) * inv_scale
        e = jnp.where(mask, e, -1e10)                       # masked_fill(mask==0,-1e10)
        m = jnp.max(e, axis=-1, keepdims=True)
        p = jnp.exp(e - m)
        s = jnp.sum(p, axis=-1, keepdims=True)
        if exact_softmax:
            a = p / s                                       # exact: weights are returned
        else:
            a = p * pl.reciprocal(s, approx=True)           # EUP slot (free-ish)
        if attn_store is not None:
            attn_heads.append(a)

        ctx = jnp.dot(a.astype(jnp.bfloat16), vh.astype(jnp.bfloat16),
                      preferred_element_type=jnp.float32)
        # per-head out-projection accumulate against sublane-aligned Wo rows
        out = out + jnp.dot(ctx.astype(jnp.bfloat16), wo_ref[out_base + h],
                            preferred_element_type=jnp.float32)

    if attn_store is not None:
        attn_store[0] = jnp.stack(attn_heads, axis=0)       # single stacked store

    out = out + bo
    return _layernorm(x_q + out, gamma, beta, eps)


def _ffn_addln(x, w1, b1, w2, b2, gamma, beta, eps):
    h = jnp.dot(x.astype(jnp.bfloat16), w1,
                preferred_element_type=jnp.float32) + b1
    h = jnp.maximum(h, 0.0)                                 # ReLU
    y = jnp.dot(h.astype(jnp.bfloat16), w2,
                preferred_element_type=jnp.float32) + b2
    return _layernorm(x + y, gamma, beta, eps)


# ----------------------------- the single fused kernel -----------------------------

def _seq2seq_kernel(xsrc_ref, xtrg_ref, skeep_ref, tkeep_ref,
                    # encoder weights
                    e_wqkv_ref, e_bqkv_ref, e_wo_ref, e_bo_ref,
                    e_w1_ref, e_b1_ref, e_w2_ref, e_b2_ref, e_ln_ref,
                    # decoder weights
                    d_wqkv_ref, d_bqkv_ref, d_wo_ref, d_bo_ref,
                    d_w1_ref, d_b1_ref, d_w2_ref, d_b2_ref, d_ln_ref,
                    fcw_ref, fcb_ref,
                    # outputs
                    logits_ref, attn_ref,
                    *, n_layers, n_heads, eps):
    skeep = skeep_ref[0] > 0.5                              # [1, Ls] bool
    tkeep = tkeep_ref[0] > 0.5                              # [1, Lt] bool

    # ---------------- encoder stack ----------------
    x = xsrc_ref[0]                                         # [Ls, H] f32
    for l in range(n_layers):
        ln = e_ln_ref[2 * l]                                # [2, H]
        x = _mha_addln(x, x, skeep, e_wqkv_ref, e_bqkv_ref, e_wo_ref,
                       e_bo_ref[l], ln[0:1], ln[1:2],
                       qkv_base=3 * n_heads * l, out_base=n_heads * l,
                       n_heads=n_heads, causal=False, exact_softmax=False,
                       eps=eps)
        ln = e_ln_ref[2 * l + 1]
        x = _ffn_addln(x, e_w1_ref[l], e_b1_ref[l], e_w2_ref[l], e_b2_ref[l],
                       ln[0:1], ln[1:2], eps)
    enc = x                                                 # stays in VMEM

    # ---------------- decoder stack ----------------
    y = xtrg_ref[0]                                         # [Lt, H] f32
    for l in range(n_layers):
        last = (l == n_layers - 1)
        ln = d_ln_ref[3 * l]
        y = _mha_addln(y, y, tkeep, d_wqkv_ref, d_bqkv_ref, d_wo_ref,
                       d_bo_ref[2 * l], ln[0:1], ln[1:2],
                       qkv_base=3 * n_heads * (2 * l),
                       out_base=n_heads * (2 * l),
                       n_heads=n_heads, causal=True, exact_softmax=False,
                       eps=eps)
        ln = d_ln_ref[3 * l + 1]
        y = _mha_addln(y, enc, skeep, d_wqkv_ref, d_bqkv_ref, d_wo_ref,
                       d_bo_ref[2 * l + 1], ln[0:1], ln[1:2],
                       qkv_base=3 * n_heads * (2 * l + 1),
                       out_base=n_heads * (2 * l + 1),
                       n_heads=n_heads, causal=False, exact_softmax=last,
                       eps=eps, attn_store=attn_ref if last else None)
        ln = d_ln_ref[3 * l + 2]
        y = _ffn_addln(y, d_w1_ref[l], d_b1_ref[l], d_w2_ref[l], d_b2_ref[l],
                       ln[0:1], ln[1:2], eps)

    # fc_out into a lane-dense (128-multiple) padded vocab slab
    logits_ref[0] = (jnp.dot(y.astype(jnp.bfloat16), fcw_ref[...],
                             preferred_element_type=jnp.float32) + fcb_ref[...])


# ----------------------------- wrapper -----------------------------

def _whole_spec(arr):
    nd = arr.ndim
    return pl.BlockSpec(arr.shape, lambda b, _nd=nd: (0,) * _nd)


def pallas_seq2seq(x_src, x_trg, src_keep, trg_keep, enc_p, dec_p, cfg):
    B, Ls, H = x_src.shape
    Lt = x_trg.shape[1]
    nH = cfg["n_heads"]
    Vp = dec_p["fc_out_w"].shape[1]

    kernel = functools.partial(_seq2seq_kernel, n_layers=cfg["n_layers"],
                               n_heads=nH, eps=_LN_EPS)

    enc_w = (enc_p["wqkv"], enc_p["bqkv"], enc_p["wo"], enc_p["bo"],
             enc_p["w1"], enc_p["b1"], enc_p["w2"], enc_p["b2"], enc_p["ln"])
    dec_w = (dec_p["wqkv"], dec_p["bqkv"], dec_p["wo"], dec_p["bo"],
             dec_p["w1"], dec_p["b1"], dec_p["w2"], dec_p["b2"], dec_p["ln"],
             dec_p["fc_out_w"], dec_p["fc_out_b"])
    weight_specs = [_whole_spec(w) for w in enc_w + dec_w]

    logits, attn = pl.pallas_call(
        kernel,
        out_shape=(jax.ShapeDtypeStruct((B, Lt, Vp), jnp.float32),
                   jax.ShapeDtypeStruct((B, nH, Lt, Ls), jnp.float32)),
        grid=(B,),
        in_specs=[pl.BlockSpec((1, Ls, H), lambda b: (b, 0, 0)),
                  pl.BlockSpec((1, Lt, H), lambda b: (b, 0, 0)),
                  pl.BlockSpec((1, 1, Ls), lambda b: (b, 0, 0)),
                  pl.BlockSpec((1, 1, Lt), lambda b: (b, 0, 0))] + weight_specs,
        out_specs=(pl.BlockSpec((1, Lt, Vp), lambda b: (b, 0, 0)),
                   pl.BlockSpec((1, nH, Lt, Ls), lambda b: (b, 0, 0, 0))),
        compiler_params=pltpu.CompilerParams(
            dimension_semantics=("parallel",)),      # v7x: one batch per TensorCore
    )(x_src, x_trg, src_keep, trg_keep, *enc_w, *dec_w)
    return logits, attn


# ----------------------------- model glue -----------------------------

def seq2seq_forward(params, src, trg, cfg):
    B, Ls = src.shape
    _, Lt = trg.shape
    H = cfg["hid_dim"]

    # make_src_mask / make_trg_mask -> compact [B,1,L] keep masks; the causal
    # part of the target mask is rebuilt in-kernel with broadcasted_iota.
    src_keep = (src != cfg["src_pad_idx"]).astype(jnp.float32).reshape(B, 1, Ls)
    trg_keep = (trg != cfg["trg_pad_idx"]).astype(jnp.float32).reshape(B, 1, Lt)

    emb_scale = jnp.sqrt(jnp.float32(H))
    # TODO(synk): embedding-table gathers stay in plain JAX (no Pallas gather here).
    x_src = (params["enc"]["tok_emb"][src] * emb_scale
             + params["enc"]["pos_emb"][jnp.arange(Ls)][None])
    x_trg = (params["dec"]["tok_emb"][trg] * emb_scale
             + params["dec"]["pos_emb"][jnp.arange(Lt)][None])

    logits_p, attention = pallas_seq2seq(x_src, x_trg, src_keep, trg_keep,
                                         params["enc"], params["dec"], cfg)
    return logits_p[..., :cfg["output_dim"]], attention


# ----------------------------- param init -----------------------------

class _KeyGen:
    def __init__(self, key):
        self._key = key
        self._i = 0

    def __call__(self):
        self._i += 1
        return jax.random.fold_in(self._key, self._i)


def _dense(kg, fan_in, fan_out):
    bound = 1.0 / (fan_in ** 0.5)
    w = jax.random.uniform(kg(), (fan_in, fan_out), jnp.float32, -bound, bound)
    b = jax.random.uniform(kg(), (fan_out,), jnp.float32, -bound, bound)
    return w, b


def init_params(key, cfg):
    H, P, nL, nH = cfg["hid_dim"], cfg["pf_dim"], cfg["n_layers"], cfg["n_heads"]
    hd = H // nH
    V = cfg["output_dim"]
    Vp = ((V + 127) // 128) * 128
    bf = jnp.bfloat16
    kg = _KeyGen(key)

    def attn_block():
        """One MHA layer, re-packed per head for lane-aligned kernel access."""
        wq, bq = _dense(kg, H, H)
        wk, bk = _dense(kg, H, H)
        wv, bv = _dense(kg, H, H)
        wo, bo = _dense(kg, H, H)
        w_qkv = jnp.concatenate(
            [w.reshape(H, nH, hd).transpose(1, 0, 2) for w in (wq, wk, wv)],
            axis=0)                                              # [3*nH, H, hd]
        b_qkv = jnp.concatenate(
            [b.reshape(nH, 1, hd) for b in (bq, bk, bv)], axis=0)  # [3*nH, 1, hd]
        return w_qkv, b_qkv, wo.reshape(nH, hd, H), bo.reshape(1, H)

    def ln_pack(n):
        return jnp.stack([jnp.ones((n, H)), jnp.zeros((n, H))], axis=1)  # [n, 2, H]

    # ----- encoder -----
    ew, eb, ewo, ebo, ew1, eb1, ew2, eb2 = ([] for _ in range(8))
    for _ in range(nL):
        w3, b3, wo, bo = attn_block()
        ew.append(w3); eb.append(b3); ewo.append(wo); ebo.append(bo)
        w1, b1 = _dense(kg, H, P)
        w2, b2 = _dense(kg, P, H)
        ew1.append(w1); eb1.append(b1.reshape(1, P))
        ew2.append(w2); eb2.append(b2.reshape(1, H))
    enc = dict(
        tok_emb=jax.random.normal(kg(), (cfg["input_dim"], H), jnp.float32),
        pos_emb=jax.random.normal(kg(), (cfg["max_len"], H), jnp.float32),
        wqkv=jnp.concatenate(ew, 0).astype(bf),     # [nL*3*nH, H, hd] bf16
        bqkv=jnp.concatenate(eb, 0),                # [nL*3*nH, 1, hd] f32
        wo=jnp.concatenate(ewo, 0).astype(bf),      # [nL*nH, hd, H]
        bo=jnp.stack(ebo, 0),                       # [nL, 1, H]
        w1=jnp.stack(ew1, 0).astype(bf), b1=jnp.stack(eb1, 0),
        w2=jnp.stack(ew2, 0).astype(bf), b2=jnp.stack(eb2, 0),
        ln=ln_pack(2 * nL),                         # [2*nL, 2, H]
    )

    # ----- decoder -----
    dw, db, dwo, dbo, dw1, db1, dw2, db2 = ([] for _ in range(8))
    for _ in range(nL):
        for _which in range(2):                     # 0: self-attn, 1: cross-attn
            w3, b3, wo, bo = attn_block()
            dw.append(w3); db.append(b3); dwo.append(wo); dbo.append(bo)
        w1, b1 = _dense(kg, H, P)
        w2, b2 = _dense(kg, P, H)
        dw1.append(w1); db1.append(b1.reshape(1, P))
        dw2.append(w2); db2.append(b2.reshape(1, H))
    fw, fb = _dense(kg, H, V)
    dec = dict(
        tok_emb=jax.random.normal(kg(), (V, H), jnp.float32),
        pos_emb=jax.random.normal(kg(), (cfg["max_len"], H), jnp.float32),
        wqkv=jnp.concatenate(dw, 0).astype(bf),     # [nL*2*3*nH, H, hd]
        bqkv=jnp.concatenate(db, 0),                # [nL*2*3*nH, 1, hd]
        wo=jnp.concatenate(dwo, 0).astype(bf),      # [nL*2*nH, hd, H]
        bo=jnp.stack(dbo, 0),                       # [nL*2, 1, H]
        w1=jnp.stack(dw1, 0).astype(bf), b1=jnp.stack(db1, 0),
        w2=jnp.stack(dw2, 0).astype(bf), b2=jnp.stack(db2, 0),
        ln=ln_pack(3 * nL),                         # [3*nL, 2, H]
        # fc_out pre-padded once to a 128-multiple vocab width (lane-dense stores)
        fc_out_w=jnp.pad(fw, ((0, 0), (0, Vp - V))).astype(bf),   # [H, Vp]
        fc_out_b=jnp.pad(fb, (0, Vp - V)).reshape(1, Vp),         # [1, Vp]
    )
    return {"enc": enc, "dec": dec}


# ----------------------------- main -----------------------------

if __name__ == "__main__":
    cfg = dict(hid_dim=32, n_heads=4, pf_dim=64, n_layers=2,
               input_dim=50, output_dim=60, max_len=100,
               src_pad_idx=0, trg_pad_idx=0)

    key = jax.random.PRNGKey(0)
    pkey, skey, tkey = jax.random.split(key, 3)
    params = init_params(pkey, cfg)

    B, Ls, Lt = 2, 8, 8
    src = jax.random.randint(skey, (B, Ls), 1, cfg["input_dim"], dtype=jnp.int32)
    trg = jax.random.randint(tkey, (B, Lt), 1, cfg["output_dim"], dtype=jnp.int32)
    # introduce real padding so the masks matter
    src = src.at[1, -2:].set(cfg["src_pad_idx"])
    trg = trg.at[1, -3:].set(cfg["trg_pad_idx"])

    fwd = jax.jit(functools.partial(seq2seq_forward, cfg=cfg))
    output, attention = fwd(params, src, trg)
    output = jax.block_until_ready(output)
    attention = jax.block_until_ready(attention)

    assert output.shape == (B, Lt, cfg["output_dim"])
    assert attention.shape == (B, cfg["n_heads"], Lt, Ls)
    assert bool(jnp.all(jnp.isfinite(output)))
    assert bool(jnp.all(jnp.isfinite(attention)))
    # returned attention uses exact softmax -> rows sum to ~1
    assert bool(jnp.allclose(attention.sum(-1), 1.0, atol=1e-3))
    print("KERNEL_OK")
</pallas_src>

<mosaic_0001>
module attributes {stable_mosaic.version = 11 : i64} {
  func.func @_seq2seq_kernel(%arg0: i32, %arg1: memref<1x8x32xf32, #tpu.memory_space<vmem>>, %arg2: memref<1x8x32xf32, #tpu.memory_space<vmem>>, %arg3: memref<1x1x8xf32, #tpu.memory_space<vmem>>, %arg4: memref<1x1x8xf32, #tpu.memory_space<vmem>>, %arg5: memref<24x32x8xbf16, #tpu.memory_space<vmem>>, %arg6: memref<24x1x8xf32, #tpu.memory_space<vmem>>, %arg7: memref<8x8x32xbf16, #tpu.memory_space<vmem>>, %arg8: memref<2x1x32xf32, #tpu.memory_space<vmem>>, %arg9: memref<2x32x64xbf16, #tpu.memory_space<vmem>>, %arg10: memref<2x1x64xf32, #tpu.memory_space<vmem>>, %arg11: memref<2x64x32xbf16, #tpu.memory_space<vmem>>, %arg12: memref<2x1x32xf32, #tpu.memory_space<vmem>>, %arg13: memref<4x2x32xf32, #tpu.memory_space<vmem>>, %arg14: memref<48x32x8xbf16, #tpu.memory_space<vmem>>, %arg15: memref<48x1x8xf32, #tpu.memory_space<vmem>>, %arg16: memref<16x8x32xbf16, #tpu.memory_space<vmem>>, %arg17: memref<4x1x32xf32, #tpu.memory_space<vmem>>, %arg18: memref<2x32x64xbf16, #tpu.memory_space<vmem>>, %arg19: memref<2x1x64xf32, #tpu.memory_space<vmem>>, %arg20: memref<2x64x32xbf16, #tpu.memory_space<vmem>>, %arg21: memref<2x1x32xf32, #tpu.memory_space<vmem>>, %arg22: memref<6x2x32xf32, #tpu.memory_space<vmem>>, %arg23: memref<32x128xbf16, #tpu.memory_space<vmem>>, %arg24: memref<1x128xf32, #tpu.memory_space<vmem>>, %arg25: memref<1x8x128xf32, #tpu.memory_space<vmem>>, %arg26: memref<1x4x8x8xf32, #tpu.memory_space<vmem>>) attributes {dimension_semantics = [#tpu.dimension_semantics<parallel>], iteration_bounds = array<i64: 2>, scalar_prefetch = 0 : i64, scratch_operands = 0 : i64, tpu.core_type = #tpu.core_type<tc>, window_params = [{transform_indices = @transform_0, window_bounds = array<i64: 1, 8, 32>}, {transform_indices = @transform_1, window_bounds = array<i64: 1, 8, 32>}, {transform_indices = @transform_2, window_bounds = array<i64: 1, 1, 8>}, {transform_indices = @transform_3, window_bounds = array<i64: 1, 1, 8>}, {pipeline_mode = #tpu.pipeline_mode<synchronous>, transform_indices = @transform_4, window_bounds = array<i64: 24, 32, 8>}, {pipeline_mode = #tpu.pipeline_mode<synchronous>, transform_indices = @transform_5, window_bounds = array<i64: 24, 1, 8>}, {pipeline_mode = #tpu.pipeline_mode<synchronous>, transform_indices = @transform_6, window_bounds = array<i64: 8, 8, 32>}, {pipeline_mode = #tpu.pipeline_mode<synchronous>, transform_indices = @transform_7, window_bounds = array<i64: 2, 1, 32>}, {pipeline_mode = #tpu.pipeline_mode<synchronous>, transform_indices = @transform_8, window_bounds = array<i64: 2, 32, 64>}, {pipeline_mode = #tpu.pipeline_mode<synchronous>, transform_indices = @transform_9, window_bounds = array<i64: 2, 1, 64>}, {pipeline_mode = #tpu.pipeline_mode<synchronous>, transform_indices = @transform_10, window_bounds = array<i64: 2, 64, 32>}, {pipeline_mode = #tpu.pipeline_mode<synchronous>, transform_indices = @transform_11, window_bounds = array<i64: 2, 1, 32>}, {pipeline_mode = #tpu.pipeline_mode<synchronous>, transform_indices = @transform_12, window_bounds = array<i64: 4, 2, 32>}, {pipeline_mode = #tpu.pipeline_mode<synchronous>, transform_indices = @transform_13, window_bounds = array<i64: 48, 32, 8>}, {pipeline_mode = #tpu.pipeline_mode<synchronous>, transform_indices = @transform_14, window_bounds = array<i64: 48, 1, 8>}, {pipeline_mode = #tpu.pipeline_mode<synchronous>, transform_indices = @transform_15, window_bounds = array<i64: 16, 8, 32>}, {pipeline_mode = #tpu.pipeline_mode<synchronous>, transform_indices = @transform_16, window_bounds = array<i64: 4, 1, 32>}, {pipeline_mode = #tpu.pipeline_mode<synchronous>, transform_indices = @transform_17, window_bounds = array<i64: 2, 32, 64>}, {pipeline_mode = #tpu.pipeline_mode<synchronous>, transform_indices = @transform_18, window_bounds = array<i64: 2, 1, 64>}, {pipeline_mode = #tpu.pipeline_mode<synchronous>, transform_indices = @transform_19, window_bounds = array<i64: 2, 64, 32>}, {pipeline_mode = #tpu.pipeline_mode<synchronous>, transform_indices = @transform_20, window_bounds = array<i64: 2, 1, 32>}, {pipeline_mode = #tpu.pipeline_mode<synchronous>, transform_indices = @transform_21, window_bounds = array<i64: 6, 2, 32>}, {pipeline_mode = #tpu.pipeline_mode<synchronous>, transform_indices = @transform_22, window_bounds = array<i64: 32, 128>}, {pipeline_mode = #tpu.pipeline_mode<synchronous>, transform_indices = @transform_23, window_bounds = array<i64: 1, 128>}, {transform_indices = @transform_24, window_bounds = array<i64: 1, 8, 128>}, {transform_indices = @transform_25, window_bounds = array<i64: 1, 4, 8, 8>}]} {
    %c0 = arith.constant 0 : index
    %c0_0 = arith.constant 0 : index
    %c0_1 = arith.constant 0 : index
    %0 = vector.load %arg3[%c0, %c0_0, %c0_1] : memref<1x1x8xf32, #tpu.memory_space<vmem>>, vector<1x1x8xf32>
    %1 = vector.shape_cast %0 : vector<1x1x8xf32> to vector<1x8xf32>
    %cst = arith.constant 5.000000e-01 : f32
    %2 = vector.broadcast %cst : f32 to vector<1x8xf32>
    %3 = arith.cmpf ogt, %1, %2 : vector<1x8xf32>
    %c0_2 = arith.constant 0 : index
    %c0_3 = arith.constant 0 : index
    %c0_4 = arith.constant 0 : index
    %4 = vector.load %arg4[%c0_2, %c0_3, %c0_4] : memref<1x1x8xf32, #tpu.memory_space<vmem>>, vector<1x1x8xf32>
    %5 = vector.shape_cast %4 : vector<1x1x8xf32> to vector<1x8xf32>
    %cst_5 = arith.constant 5.000000e-01 : f32
    %6 = vector.broadcast %cst_5 : f32 to vector<1x8xf32>
    %7 = arith.cmpf ogt, %5, %6 : vector<1x8xf32>
    %c0_6 = arith.constant 0 : index
    %c0_7 = arith.constant 0 : index
    %c0_8 = arith.constant 0 : index
    %8 = vector.load %arg1[%c0_6, %c0_7, %c0_8] : memref<1x8x32xf32, #tpu.memory_space<vmem>>, vector<1x8x32xf32>
    %9 = vector.shape_cast %8 : vector<1x8x32xf32> to vector<8x32xf32>
    %c0_9 = arith.constant 0 : index
    %c0_10 = arith.constant 0 : index
    %c0_11 = arith.constant 0 : index
    %10 = vector.load %arg13[%c0_9, %c0_10, %c0_11] : memref<4x2x32xf32, #tpu.memory_space<vmem>>, vector<1x2x32xf32>
    %11 = vector.shape_cast %10 : vector<1x2x32xf32> to vector<2x32xf32>
    %c0_12 = arith.constant 0 : index
    %c0_13 = arith.constant 0 : index
    %c0_14 = arith.constant 0 : index
    %12 = vector.load %arg8[%c0_12, %c0_13, %c0_14] : memref<2x1x32xf32, #tpu.memory_space<vmem>>, vector<1x1x32xf32>
    %13 = vector.shape_cast %12 : vector<1x1x32xf32> to vector<1x32xf32>
    %14 = vector.extract_strided_slice %11 {offsets = [0, 0], sizes = [1, 32], strides = [1, 1]} : vector<2x32xf32> to vector<1x32xf32>
    %15 = vector.extract_strided_slice %11 {offsets = [1, 0], sizes = [1, 32], strides = [1, 1]} : vector<2x32xf32> to vector<1x32xf32>
    %16 = arith.truncf %9 : vector<8x32xf32> to vector<8x32xbf16>
    %17 = arith.truncf %9 : vector<8x32xf32> to vector<8x32xbf16>
    %cst_15 = arith.constant 0.000000e+00 : f32
    %18 = vector.broadcast %cst_15 : f32 to vector<8x32xf32>
    %c0_16 = arith.constant 0 : index
    %c0_17 = arith.constant 0 : index
    %c0_18 = arith.constant 0 : index
    %19 = vector.load %arg5[%c0_16, %c0_17, %c0_18] : memref<24x32x8xbf16, #tpu.memory_space<vmem>>, vector<1x32x8xbf16>
    %20 = vector.shape_cast %19 : vector<1x32x8xbf16> to vector<32x8xbf16>
    %cst_19 = arith.constant dense<0.000000e+00> : vector<8x8xf32>
    %21 = tpu.matmul %16, %20, %cst_19 {dimension_numbers = #tpu.dot_dimension_numbers<[1], [0], [0], [1], [0, 0, 1, 1], [], []>} : vector<8x32xbf16>, vector<32x8xbf16>, vector<8x8xf32> -> vector<8x8xf32>
    %c0_20 = arith.constant 0 : index
    %c0_21 = arith.constant 0 : index
    %c0_22 = arith.constant 0 : index
    %22 = vector.load %arg6[%c0_20, %c0_21, %c0_22] : memref<24x1x8xf32, #tpu.memory_space<vmem>>, vector<1x1x8xf32>
    %23 = vector.shape_cast %22 : vector<1x1x8xf32> to vector<1x8xf32>
    %24 = vector.broadcast %23 : vector<1x8xf32> to vector<8x8xf32>
    %25 = arith.addf %21, %24 : vector<8x8xf32>
    %c4 = arith.constant 4 : index
    %c0_23 = arith.constant 0 : index
    %c0_24 = arith.constant 0 : index
    %26 = vector.load %arg5[%c4, %c0_23, %c0_24] : memref<24x32x8xbf16, #tpu.memory_space<vmem>>, vector<1x32x8xbf16>
    %27 = vector.shape_cast %26 : vector<1x32x8xbf16> to vector<32x8xbf16>
    %cst_25 = arith.constant dense<0.000000e+00> : vector<8x8xf32>
    %28 = tpu.matmul %17, %27, %cst_25 {dimension_numbers = #tpu.dot_dimension_numbers<[1], [0], [0], [1], [0, 0, 1, 1], [], []>} : vector<8x32xbf16>, vector<32x8xbf16>, vector<8x8xf32> -> vector<8x8xf32>
    %c4_26 = arith.constant 4 : index
    %c0_27 = arith.constant 0 : index
    %c0_28 = arith.constant 0 : index
    %29 = vector.load %arg6[%c4_26, %c0_27, %c0_28] : memref<24x1x8xf32, #tpu.memory_space<vmem>>, vector<1x1x8xf32>
    %30 = vector.shape_cast %29 : vector<1x1x8xf32> to vector<1x8xf32>
    %31 = vector.broadcast %30 : vector<1x8xf32> to vector<8x8xf32>
    %32 = arith.addf %28, %31 : vector<8x8xf32>
    %c8 = arith.constant 8 : index
    %c0_29 = arith.constant 0 : index
    %c0_30 = arith.constant 0 : index
    %33 = vector.load %arg5[%c8, %c0_29, %c0_30] : memref<24x32x8xbf16, #tpu.memory_space<vmem>>, vector<1x32x8xbf16>
    %34 = vector.shape_cast %33 : vector<1x32x8xbf16> to vector<32x8xbf16>
    %cst_31 = arith.constant dense<0.000000e+00> : vector<8x8xf32>
    %35 = tpu.matmul %17, %34, %cst_31 {dimension_numbers = #tpu.dot_dimension_numbers<[1], [0], [0], [1], [0, 0, 1, 1], [], []>} : vector<8x32xbf16>, vector<32x8xbf16>, vector<8x8xf32> -> vector<8x8xf32>
    %c8_32 = arith.constant 8 : index
    %c0_33 = arith.constant 0 : index
    %c0_34 = arith.constant 0 : index
    %36 = vector.load %arg6[%c8_32, %c0_33, %c0_34] : memref<24x1x8xf32, #tpu.memory_space<vmem>>, vector<1x1x8xf32>
    %37 = vector.shape_cast %36 : vector<1x1x8xf32> to vector<1x8xf32>
    %38 = vector.broadcast %37 : vector<1x8xf32> to vector<8x8xf32>
    %39 = arith.addf %35, %38 : vector<8x8xf32>
    %40 = arith.truncf %25 : vector<8x8xf32> to vector<8x8xbf16>
    %41 = tpu.transpose %32, [1, 0] : vector<8x8xf32> -> vector<8x8xf32>
    %42 = arith.truncf %41 : vector<8x8xf32> to vector<8x8xbf16>
    %cst_35 = arith.constant dense<0.000000e+00> : vector<8x8xf32>
    %43 = tpu.matmul %40, %42, %cst_35 {dimension_numbers = #tpu.dot_dimension_numbers<[1], [0], [0], [1], [0, 0, 1, 1], [], []>} : vector<8x8xbf16>, vector<8x8xbf16>, vector<8x8xf32> -> vector<8x8xf32>
    %cst_36 = arith.constant 0.353553385 : f32
    %44 = vector.broadcast %cst_36 : f32 to vector<8x8xf32>
    %45 = arith.mulf %43, %44 : vector<8x8xf32>
    %cst_37 = arith.constant -1.000000e+10 : f32
    %46 = vector.shape_cast %3 : vector<1x8xi1> to vector<1x8xi1>
    %47 = vector.broadcast %46 : vector<1x8xi1> to vector<8x8xi1>
    %48 = vector.broadcast %cst_37 : f32 to vector<8x8xf32>
    %49 = arith.select %47, %45, %48 : vector<8x8xi1>, vector<8x8xf32>
    %cst_38 = arith.constant dense<0xFF800000> : vector<8xf32>
    %50 = vector.multi_reduction <maximumf>, %49, %cst_38 [1] : vector<8x8xf32> to vector<8xf32>
    %51 = vector.shape_cast %50 : vector<8xf32> to vector<8x1xf32>
    %52 = vector.broadcast %51 : vector<8x1xf32> to vector<8x8xf32>
    %53 = arith.subf %49, %52 : vector<8x8xf32>
    %54 = math.exp %53 : vector<8x8xf32>
    %cst_39 = arith.constant dense<0.000000e+00> : vector<8xf32>
    %55 = vector.multi_reduction <add>, %54, %cst_39 [1] : vector<8x8xf32> to vector<8xf32>
    %56 = vector.shape_cast %55 : vector<8xf32> to vector<8x1xf32>
    %57 = tpu.reciprocal %56 {approx = true} : vector<8x1xf32> -> vector<8x1xf32>
    %58 = vector.broadcast %57 : vector<8x1xf32> to vector<8x8xf32>
    %59 = arith.mulf %54, %58 : vector<8x8xf32>
    %60 = arith.truncf %59 : vector<8x8xf32> to vector<8x8xbf16>
    %61 = arith.truncf %39 : vector<8x8xf32> to vector<8x8xbf16>
    %cst_40 = arith.constant dense<0.000000e+00> : vector<8x8xf32>
    %62 = tpu.matmul %60, %61, %cst_40 {dimension_numbers = #tpu.dot_dimension_numbers<[1], [0], [0], [1], [0, 0, 1, 1], [], []>} : vector<8x8xbf16>, vector<8x8xbf16>, vector<8x8xf32> -> vector<8x8xf32>
    %63 = arith.truncf %62 : vector<8x8xf32> to vector<8x8xbf16>
    %c0_41 = arith.constant 0 : index
    %c0_42 = arith.constant 0 : index
    %c0_43 = arith.constant 0 : index
    %64 = vector.load %arg7[%c0_41, %c0_42, %c0_43] : memref<8x8x32xbf16, #tpu.memory_space<vmem>>, vector<1x8x32xbf16>
    %65 = vector.shape_cast %64 : vector<1x8x32xbf16> to vector<8x32xbf16>
    %cst_44 = arith.constant dense<0.000000e+00> : vector<8x32xf32>
    %66 = tpu.matmul %63, %65, %cst_44 {dimension_numbers = #tpu.dot_dimension_numbers<[1], [0], [0], [1], [0, 0, 1, 1], [], []>} : vector<8x8xbf16>, vector<8x32xbf16>, vector<8x32xf32> -> vector<8x32xf32>
    %67 = arith.addf %18, %66 : vector<8x32xf32>
    %c1 = arith.constant 1 : index
    %c0_45 = arith.constant 0 : index
    %c0_46 = arith.constant 0 : index
    %68 = vector.load %arg5[%c1, %c0_45, %c0_46] : memref<24x32x8xbf16, #tpu.memory_space<vmem>>, vector<1x32x8xbf16>
    %69 = vector.shape_cast %68 : vector<1x32x8xbf16> to vector<32x8xbf16>
    %cst_47 = arith.constant dense<0.000000e+00> : vector<8x8xf32>
    %70 = tpu.matmul %16, %69, %cst_47 {dimension_numbers = #tpu.dot_dimension_numbers<[1], [0], [0], [1], [0, 0, 1, 1], [], []>} : vector<8x32xbf16>, vector<32x8xbf16>, vector<8x8xf32> -> vector<8x8xf32>
    %c1_48 = arith.constant 1 : index
    %c0_49 = arith.constant 0 : index
    %c0_50 = arith.constant 0 : index
    %71 = vector.load %arg6[%c1_48, %c0_49, %c0_50] : memref<24x1x8xf32, #tpu.memory_space<vmem>>, vector<1x1x8xf32>
    %72 = vector.shape_cast %71 : vector<1x1x8xf32> to vector<1x8xf32>
    %73 = vector.broadcast %72 : vector<1x8xf32> to vector<8x8xf32>
    %74 = arith.addf %70, %73 : vector<8x8xf32>
    %c5 = arith.constant 5 : index
    %c0_51 = arith.constant 0 : index
    %c0_52 = arith.constant 0 : index
    %75 = vector.load %arg5[%c5, %c0_51, %c0_52] : memref<24x32x8xbf16, #tpu.memory_space<vmem>>, vector<1x32x8xbf16>
    %76 = vector.shape_cast %75 : vector<1x32x8xbf16> to vector<32x8xbf16>
    %cst_53 = arith.constant dense<0.000000e+00> : vector<8x8xf32>
    %77 = tpu.matmul %17, %76, %cst_53 {dimension_numbers = #tpu.dot_dimension_numbers<[1], [0], [0], [1], [0, 0, 1, 1], [], []>} : vector<8x32xbf16>, vector<32x8xbf16>, vector<8x8xf32> -> vector<8x8xf32>
    %c5_54 = arith.constant 5 : index
    %c0_55 = arith.constant 0 : index
    %c0_56 = arith.constant 0 : index
    %78 = vector.load %arg6[%c5_54, %c0_55, %c0_56] : memref<24x1x8xf32, #tpu.memory_space<vmem>>, vector<1x1x8xf32>
    %79 = vector.shape_cast %78 : vector<1x1x8xf32> to vector<1x8xf32>
    %80 = vector.broadcast %79 : vector<1x8xf32> to vector<8x8xf32>
    %81 = arith.addf %77, %80 : vector<8x8xf32>
    %c9 = arith.constant 9 : index
    %c0_57 = arith.constant 0 : index
    %c0_58 = arith.constant 0 : index
    %82 = vector.load %arg5[%c9, %c0_57, %c0_58] : memref<24x32x8xbf16, #tpu.memory_space<vmem>>, vector<1x32x8xbf16>
    %83 = vector.shape_cast %82 : vector<1x32x8xbf16> to vector<32x8xbf16>
    %cst_59 = arith.constant dense<0.000000e+00> : vector<8x8xf32>
    %84 = tpu.matmul %17, %83, %cst_59 {dimension_numbers = #tpu.dot_dimension_numbers<[1], [0], [0], [1], [0, 0, 1, 1], [], []>} : vector<8x32xbf16>, vector<32x8xbf16>, vector<8x8xf32> -> vector<8x8xf32>
    %c9_60 = arith.constant 9 : index
    %c0_61 = arith.constant 0 : index
    %c0_62 = arith.constant 0 : index
    %85 = vector.load %arg6[%c9_60, %c0_61, %c0_62] : memref<24x1x8xf32, #tpu.memory_space<vmem>>, vector<1x1x8xf32>
    %86 = vector.shape_cast %85 : vector<1x1x8xf32> to vector<1x8xf32>
    %87 = vector.broadcast %86 : vector<1x8xf32> to vector<8x8xf32>
    %88 = arith.addf %84, %87 : vector<8x8xf32>
    %89 = arith.truncf %74 : vector<8x8xf32> to vector<8x8xbf16>
    %90 = tpu.transpose %81, [1, 0] : vector<8x8xf32> -> vector<8x8xf32>
    %91 = arith.truncf %90 : vector<8x8xf32> to vector<8x8xbf16>
    %cst_63 = arith.constant dense<0.000000e+00> : vector<8x8xf32>
    %92 = tpu.matmul %89, %91, %cst_63 {dimension_numbers = #tpu.dot_dimension_numbers<[1], [0], [0], [1], [0, 0, 1, 1], [], []>} : vector<8x8xbf16>, vector<8x8xbf16>, vector<8x8xf32> -> vector<8x8xf32>
    %cst_64 = arith.constant 0.353553385 : f32
    %93 = vector.broadcast %cst_64 : f32 to vector<8x8xf32>
    %94 = arith.mulf %92, %93 : vector<8x8xf32>
    %cst_65 = arith.constant -1.000000e+10 : f32
    %95 = vector.shape_cast %3 : vector<1x8xi1> to vector<1x8xi1>
    %96 = vector.broadcast %95 : vector<1x8xi1> to vector<8x8xi1>
    %97 = vector.broadcast %cst_65 : f32 to vector<8x8xf32>
    %98 = arith.select %96, %94, %97 : vector<8x8xi1>, vector<8x8xf32>
    %cst_66 = arith.constant dense<0xFF800000> : vector<8xf32>
    %99 = vector.multi_reduction <maximumf>, %98, %cst_66 [1] : vector<8x8xf32> to vector<8xf32>
    %100 = vector.shape_cast %99 : vector<8xf32> to vector<8x1xf32>
    %101 = vector.broadcast %100 : vector<8x1xf32> to vector<8x8xf32>
    %102 = arith.subf %98, %101 : vector<8x8xf32>
    %103 = math.exp %102 : vector<8x8xf32>
    %cst_67 = arith.constant dense<0.000000e+00> : vector<8xf32>
    %104 = vector.multi_reduction <add>, %103, %cst_67 [1] : vector<8x8xf32> to vector<8xf32>
    %105 = vector.shape_cast %104 : vector<8xf32> to vector<8x1xf32>
    %106 = tpu.reciprocal %105 {approx = true} : vector<8x1xf32> -> vector<8x1xf32>
    %107 = vector.broadcast %106 : vector<8x1xf32> to vector<8x8xf32>
    %108 = arith.mulf %103, %107 : vector<8x8xf32>
    %109 = arith.truncf %108 : vector<8x8xf32> to vector<8x8xbf16>
    %110 = arith.truncf %88 : vector<8x8xf32> to vector<8x8xbf16>
    %cst_68 = arith.constant dense<0.000000e+00> : vector<8x8xf32>
    %111 = tpu.matmul %109, %110, %cst_68 {dimension_numbers = #tpu.dot_dimension_numbers<[1], [0], [0], [1], [0, 0, 1, 1], [], []>} : vector<8x8xbf16>, vector<8x8xbf16>, vector<8x8xf32> -> vector<8x8xf32>
    %112 = arith.truncf %111 : vector<8x8xf32> to vector<8x8xbf16>
    %c1_69 = arith.constant 1 : index
    %c0_70 = arith.constant 0 : index
    %c0_71 = arith.constant 0 : index
    %113 = vector.load %arg7[%c1_69, %c0_70, %c0_71] : memref<8x8x32xbf16, #tpu.memory_space<vmem>>, vector<1x8x32xbf16>
    %114 = vector.shape_cast %113 : vector<1x8x32xbf16> to vector<8x32xbf16>
    %cst_72 = arith.constant dense<0.000000e+00> : vector<8x32xf32>
    %115 = tpu.matmul %112, %114, %cst_72 {dimension_numbers = #tpu.dot_dimension_numbers<[1], [0], [0], [1], [0, 0, 1, 1], [], []>} : vector<8x8xbf16>, vector<8x32xbf16>, vector<8x32xf32> -> vector<8x32xf32>
    %116 = arith.addf %67, %115 : vector<8x32xf32>
    %c2 = arith.constant 2 : index
    %c0_73 = arith.constant 0 : index
    %c0_74 = arith.constant 0 : index
    %117 = vector.load %arg5[%c2, %c0_73, %c0_74] : memref<24x32x8xbf16, #tpu.memory_space<vmem>>, vector<1x32x8xbf16>
    %118 = vector.shape_cast %117 : vector<1x32x8xbf16> to vector<32x8xbf16>
    %cst_75 = arith.constant dense<0.000000e+00> : vector<8x8xf32>
    %119 = tpu.matmul %16, %118, %cst_75 {dimension_numbers = #tpu.dot_dimension_numbers<[1], [0], [0], [1], [0, 0, 1, 1], [], []>} : vector<8x32xbf16>, vector<32x8xbf16>, vector<8x8xf32> -> vector<8x8xf32>
    %c2_76 = arith.constant 2 : index
    %c0_77 = arith.constant 0 : index
    %c0_78 = arith.constant 0 : index
    %120 = vector.load %arg6[%c2_76, %c0_77, %c0_78] : memref<24x1x8xf32, #tpu.memory_space<vmem>>, vector<1x1x8xf32>
    %121 = vector.shape_cast %120 : vector<1x1x8xf32> to vector<1x8xf32>
    %122 = vector.broadcast %121 : vector<1x8xf32> to vector<8x8xf32>
    %123 = arith.addf %119, %122 : vector<8x8xf32>
    %c6 = arith.constant 6 : index
    %c0_79 = arith.constant 0 : index
    %c0_80 = arith.constant 0 : index
    %124 = vector.load %arg5[%c6, %c0_79, %c0_80] : memref<24x32x8xbf16, #tpu.memory_space<vmem>>, vector<1x32x8xbf16>
    %125 = vector.shape_cast %124 : vector<1x32x8xbf16> to vector<32x8xbf16>
    %cst_81 = arith.constant dense<0.000000e+00> : vector<8x8xf32>
    %126 = tpu.matmul %17, %125, %cst_81 {dimension_numbers = #tpu.dot_dimension_numbers<[1], [0], [0], [1], [0, 0, 1, 1], [], []>} : vector<8x32xbf16>, vector<32x8xbf16>, vector<8x8xf32> -> vector<8x8xf32>
    %c6_82 = arith.constant 6 : index
    %c0_83 = arith.constant 0 : index
    %c0_84 = arith.constant 0 : index
    %127 = vector.load %arg6[%c6_82, %c0_83, %c0_84] : memref<24x1x8xf32, #tpu.memory_space<vmem>>, vector<1x1x8xf32>
    %128 = vector.shape_cast %127 : vector<1x1x8xf32> to vector<1x8xf32>
    %129 = vector.broadcast %128 : vector<1x8xf32> to vector<8x8xf32>
    %130 = arith.addf %126, %129 : vector<8x8xf32>
    %c10 = arith.constant 10 : index
    %c0_85 = arith.constant 0 : index
    %c0_86 = arith.constant 0 : index
    %131 = vector.load %arg5[%c10, %c0_85, %c0_86] : memref<24x32x8xbf16, #tpu.memory_space<vmem>>, vector<1x32x8xbf16>
    %132 = vector.shape_cast %131 : vector<1x32x8xbf16> to vector<32x8xbf16>
    %cst_87 = arith.constant dense<0.000000e+00> : vector<8x8xf32>
    %133 = tpu.matmul %17, %132, %cst_87 {dimension_numbers = #tpu.dot_dimension_numbers<[1], [0], [0], [1], [0, 0, 1, 1], [], []>} : vector<8x32xbf16>, vector<32x8xbf16>, vector<8x8xf32> -> vector<8x8xf32>
    %c10_88 = arith.constant 10 : index
    %c0_89 = arith.constant 0 : index
    %c0_90 = arith.constant 0 : index
    %134 = vector.load %arg6[%c10_88, %c0_89, %c0_90] : memref<24x1x8xf32, #tpu.memory_space<vmem>>, vector<1x1x8xf32>
    %135 = vector.shape_cast %134 : vector<1x1x8xf32> to vector<1x8xf32>
    %136 = vector.broadcast %135 : vector<1x8xf32> to vector<8x8xf32>
    %137 = arith.addf %133, %136 : vector<8x8xf32>
    %138 = arith.truncf %123 : vector<8x8xf32> to vector<8x8xbf16>
    %139 = tpu.transpose %130, [1, 0] : vector<8x8xf32> -> vector<8x8xf32>
    %140 = arith.truncf %139 : vector<8x8xf32> to vector<8x8xbf16>
    %cst_91 = arith.constant dense<0.000000e+00> : vector<8x8xf32>
    %141 = tpu.matmul %138, %140, %cst_91 {dimension_numbers = #tpu.dot_dimension_numbers<[1], [0], [0], [1], [0, 0, 1, 1], [], []>} : vector<8x8xbf16>, vector<8x8xbf16>, vector<8x8xf32> -> vector<8x8xf32>
    %cst_92 = arith.constant 0.353553385 : f32
    %142 = vector.broadcast %cst_92 : f32 to vector<8x8xf32>
    %143 = arith.mulf %141, %142 : vector<8x8xf32>
    %cst_93 = arith.constant -1.000000e+10 : f32
    %144 = vector.shape_cast %3 : vector<1x8xi1> to vector<1x8xi1>
    %145 = vector.broadcast %144 : vector<1x8xi1> to vector<8x8xi1>
    %146 = vector.broadcast %cst_93 : f32 to vector<8x8xf32>
    %147 = arith.select %145, %143, %146 : vector<8x8xi1>, vector<8x8xf32>
    %cst_94 = arith.constant dense<0xFF800000> : vector<8xf32>
    %148 = vector.multi_reduction <maximumf>, %147, %cst_94 [1] : vector<8x8xf32> to vector<8xf32>
    %149 = vector.shape_cast %148 : vector<8xf32> to vector<8x1xf32>
    %150 = vector.broadcast %149 : vector<8x1xf32> to vector<8x8xf32>
    %151 = arith.subf %147, %150 : vector<8x8xf32>
    %152 = math.exp %151 : vector<8x8xf32>
    %cst_95 = arith.constant dense<0.000000e+00> : vector<8xf32>
    %153 = vector.multi_reduction <add>, %152, %cst_95 [1] : vector<8x8xf32> to vector<8xf32>
    %154 = vector.shape_cast %153 : vector<8xf32> to vector<8x1xf32>
    %155 = tpu.reciprocal %154 {approx = true} : vector<8x1xf32> -> vector<8x1xf32>
    %156 = vector.broadcast %155 : vector<8x1xf32> to vector<8x8xf32>
    %157 = arith.mulf %152, %156 : vector<8x8xf32>
    %158 = arith.truncf %157 : vector<8x8xf32> to vector<8x8xbf16>
    %159 = arith.truncf %137 : vector<8x8xf32> to vector<8x8xbf16>
    %cst_96 = arith.constant dense<0.000000e+00> : vector<8x8xf32>
    %160 = tpu.matmul %158, %159, %cst_96 {dimension_numbers = #tpu.dot_dimension_numbers<[1], [0], [0], [1], [0, 0, 1, 1], [], []>} : vector<8x8xbf16>, vector<8x8xbf16>, vector<8x8xf32> -> vector<8x8xf32>
    %161 = arith.truncf %160 : vector<8x8xf32> to vector<8x8xbf16>
    %c2_97 = arith.constant 2 : index
    %c0_98 = arith.constant 0 : index
    %c0_99 = arith.constant 0 : index
    %162 = vector.load %arg7[%c2_97, %c0_98, %c0_99] : memref<8x8x32xbf16, #tpu.memory_space<vmem>>, vector<1x8x32xbf16>
    %163 = vector.shape_cast %162 : vector<1x8x32xbf16> to vector<8x32xbf16>
    %cst_100 = arith.constant dense<0.000000e+00> : vector<8x32xf32>
    %164 = tpu.matmul %161, %163, %cst_100 {dimension_numbers = #tpu.dot_dimension_numbers<[1], [0], [0], [1], [0, 0, 1, 1], [], []>} : vector<8x8xbf16>, vector<8x32xbf16>, vector<8x32xf32> -> vector<8x32xf32>
    %165 = arith.addf %116, %164 : vector<8x32xf32>
    %c3 = arith.constant 3 : index
    %c0_101 = arith.constant 0 : index
    %c0_102 = arith.constant 0 : index
    %166 = vector.load %arg5[%c3, %c0_101, %c0_102] : memref<24x32x8xbf16, #tpu.memory_space<vmem>>, vector<1x32x8xbf16>
    %167 = vector.shape_cast %166 : vector<1x32x8xbf16> to vector<32x8xbf16>
    %cst_103 = arith.constant dense<0.000000e+00> : vector<8x8xf32>
    %168 = tpu.matmul %16, %167, %cst_103 {dimension_numbers = #tpu.dot_dimension_numbers<[1], [0], [0], [1], [0, 0, 1, 1], [], []>} : vector<8x32xbf16>, vector<32x8xbf16>, vector<8x8xf32> -> vector<8x8xf32>
    %c3_104 = arith.constant 3 : index
    %c0_105 = arith.constant 0 : index
    %c0_106 = arith.constant 0 : index
    %169 = vector.load %arg6[%c3_104, %c0_105, %c0_106] : memref<24x1x8xf32, #tpu.memory_space<vmem>>, vector<1x1x8xf32>
    %170 = vector.shape_cast %169 : vector<1x1x8xf32> to vector<1x8xf32>
    %171 = vector.broadcast %170 : vector<1x8xf32> to vector<8x8xf32>
    %172 = arith.addf %168, %171 : vector<8x8xf32>
    %c7 = arith.constant 7 : index
    %c0_107 = arith.constant 0 : index
    %c0_108 = arith.constant 0 : index
    %173 = vector.load %arg5[%c7, %c0_107, %c0_108] : memref<24x32x8xbf16, #tpu.memory_space<vmem>>, vector<1x32x8xbf16>
    %174 = vector.shape_cast %173 : vector<1x32x8xbf16> to vector<32x8xbf16>
    %cst_109 = arith.constant dense<0.000000e+00> : vector<8x8xf32>
    %175 = tpu.matmul %17, %174, %cst_109 {dimension_numbers = #tpu.dot_dimension_numbers<[1], [0], [0], [1], [0, 0, 1, 1], [], []>} : vector<8x32xbf16>, vector<32x8xbf16>, vector<8x8xf32> -> vector<8x8xf32>
    %c7_110 = arith.constant 7 : index
    %c0_111 = arith.constant 0 : index
    %c0_112 = arith.constant 0 : index
    %176 = vector.load %arg6[%c7_110, %c0_111, %c0_112] : memref<24x1x8xf32, #tpu.memory_space<vmem>>, vector<1x1x8xf32>
    %177 = vector.shape_cast %176 : vector<1x1x8xf32> to vector<1x8xf32>
    %178 = vector.broadcast %177 : vector<1x8xf32> to vector<8x8xf32>
    %179 = arith.addf %175, %178 : vector<8x8xf32>
    %c11 = arith.constant 11 : index
    %c0_113 = arith.constant 0 : index
    %c0_114 = arith.constant 0 : index
    %180 = vector.load %arg5[%c11, %c0_113, %c0_114] : memref<24x32x8xbf16, #tpu.memory_space<vmem>>, vector<1x32x8xbf16>
    %181 = vector.shape_cast %180 : vector<1x32x8xbf16> to vector<32x8xbf16>
    %cst_115 = arith.constant dense<0.000000e+00> : vector<8x8xf32>
    %182 = tpu.matmul %17, %181, %cst_115 {dimension_numbers = #tpu.dot_dimension_numbers<[1], [0], [0], [1], [0, 0, 1, 1], [], []>} : vector<8x32xbf16>, vector<32x8xbf16>, vector<8x8xf32> -> vector<8x8xf32>
    %c11_116 = arith.constant 11 : index
    %c0_117 = arith.constant 0 : index
    %c0_118 = arith.constant 0 : index
    %183 = vector.load %arg6[%c11_116, %c0_117, %c0_118] : memref<24x1x8xf32, #tpu.memory_space<vmem>>, vector<1x1x8xf32>
    %184 = vector.shape_cast %183 : vector<1x1x8xf32> to vector<1x8xf32>
    %185 = vector.broadcast %184 : vector<1x8xf32> to vector<8x8xf32>
    %186 = arith.addf %182, %185 : vector<8x8xf32>
    %187 = arith.truncf %172 : vector<8x8xf32> to vector<8x8xbf16>
    %188 = tpu.transpose %179, [1, 0] : vector<8x8xf32> -> vector<8x8xf32>
    %189 = arith.truncf %188 : vector<8x8xf32> to vector<8x8xbf16>
    %cst_119 = arith.constant dense<0.000000e+00> : vector<8x8xf32>
    %190 = tpu.matmul %187, %189, %cst_119 {dimension_numbers = #tpu.dot_dimension_numbers<[1], [0], [0], [1], [0, 0, 1, 1], [], []>} : vector<8x8xbf16>, vector<8x8xbf16>, vector<8x8xf32> -> vector<8x8xf32>
    %cst_120 = arith.constant 0.353553385 : f32
    %191 = vector.broadcast %cst_120 : f32 to vector<8x8xf32>
    %192 = arith.mulf %190, %191 : vector<8x8xf32>
    %cst_121 = arith.constant -1.000000e+10 : f32
    %193 = vector.shape_cast %3 : vector<1x8xi1> to vector<1x8xi1>
    %194 = vector.broadcast %193 : vector<1x8xi1> to vector<8x8xi1>
    %195 = vector.broadcast %cst_121 : f32 to vector<8x8xf32>
    %196 = arith.select %194, %192, %195 : vector<8x8xi1>, vector<8x8xf32>
    %cst_122 = arith.constant dense<0xFF800000> : vector<8xf32>
    %197 = vector.multi_reduction <maximumf>, %196, %cst_122 [1] : vector<8x8xf32> to vector<8xf32>
    %198 = vector.shape_cast %197 : vector<8xf32> to vector<8x1xf32>
    %199 = vector.broadcast %198 : vector<8x1xf32> to vector<8x8xf32>
    %200 = arith.subf %196, %199 : vector<8x8xf32>
    %201 = math.exp %200 : vector<8x8xf32>
    %cst_123 = arith.constant dense<0.000000e+00> : vector<8xf32>
    %202 = vector.multi_reduction <add>, %201, %cst_123 [1] : vector<8x8xf32> to vector<8xf32>
    %203 = vector.shape_cast %202 : vector<8xf32> to vector<8x1xf32>
    %204 = tpu.reciprocal %203 {approx = true} : vector<8x1xf32> -> vector<8x1xf32>
    %205 = vector.broadcast %204 : vector<8x1xf32> to vector<8x8xf32>
    %206 = arith.mulf %201, %205 : vector<8x8xf32>
    %207 = arith.truncf %206 : vector<8x8xf32> to vector<8x8xbf16>
    %208 = arith.truncf %186 : vector<8x8xf32> to vector<8x8xbf16>
    %cst_124 = arith.constant dense<0.000000e+00> : vector<8x8xf32>
    %209 = tpu.matmul %207, %208, %cst_124 {dimension_numbers = #tpu.dot_dimension_numbers<[1], [0], [0], [1], [0, 0, 1, 1], [], []>} : vector<8x8xbf16>, vector<8x8xbf16>, vector<8x8xf32> -> vector<8x8xf32>
    %210 = arith.truncf %209 : vector<8x8xf32> to vector<8x8xbf16>
    %c3_125 = arith.constant 3 : index
    %c0_126 = arith.constant 0 : index
    %c0_127 = arith.constant 0 : index
    %211 = vector.load %arg7[%c3_125, %c0_126, %c0_127] : memref<8x8x32xbf16, #tpu.memory_space<vmem>>, vector<1x8x32xbf16>
    %212 = vector.shape_cast %211 : vector<1x8x32xbf16> to vector<8x32xbf16>
    %cst_128 = arith.constant dense<0.000000e+00> : vector<8x32xf32>
    %213 = tpu.matmul %210, %212, %cst_128 {dimension_numbers = #tpu.dot_dimension_numbers<[1], [0], [0], [1], [0, 0, 1, 1], [], []>} : vector<8x8xbf16>, vector<8x32xbf16>, vector<8x32xf32> -> vector<8x32xf32>
    %214 = arith.addf %165, %213 : vector<8x32xf32>
    %215 = vector.broadcast %13 : vector<1x32xf32> to vector<8x32xf32>
    %216 = arith.addf %214, %215 : vector<8x32xf32>
    %217 = arith.addf %9, %216 : vector<8x32xf32>
    %cst_129 = arith.constant dense<0.000000e+00> : vector<8xf32>
    %218 = vector.multi_reduction <add>, %217, %cst_129 [1] : vector<8x32xf32> to vector<8xf32>
    %219 = vector.shape_cast %218 : vector<8xf32> to vector<8x1xf32>
    %cst_130 = arith.constant 3.200000e+01 : f32
    %220 = vector.broadcast %cst_130 : f32 to vector<8x1xf32>
    %221 = arith.divf %219, %220 : vector<8x1xf32>
    %222 = vector.broadcast %221 : vector<8x1xf32> to vector<8x32xf32>
    %223 = arith.subf %217, %222 : vector<8x32xf32>
    %224 = arith.mulf %223, %223 : vector<8x32xf32>
    %cst_131 = arith.constant dense<0.000000e+00> : vector<8xf32>
    %225 = vector.multi_reduction <add>, %224, %cst_131 [1] : vector<8x32xf32> to vector<8xf32>
    %226 = vector.shape_cast %225 : vector<8xf32> to vector<8x1xf32>
    %cst_132 = arith.constant 3.200000e+01 : f32
    %227 = vector.broadcast %cst_132 : f32 to vector<8x1xf32>
    %228 = arith.divf %226, %227 : vector<8x1xf32>
    %229 = vector.broadcast %221 : vector<8x1xf32> to vector<8x32xf32>
    %230 = arith.subf %217, %229 : vector<8x32xf32>
    %cst_133 = arith.constant 9.99999974E-6 : f32
    %231 = vector.broadcast %cst_133 : f32 to vector<8x1xf32>
    %232 = arith.addf %228, %231 : vector<8x1xf32>
    %233 = math.rsqrt %232 : vector<8x1xf32>
    %234 = vector.broadcast %233 : vector<8x1xf32> to vector<8x32xf32>
    %235 = arith.mulf %230, %234 : vector<8x32xf32>
    %236 = vector.broadcast %14 : vector<1x32xf32> to vector<8x32xf32>
    %237 = arith.mulf %235, %236 : vector<8x32xf32>
    %238 = vector.broadcast %15 : vector<1x32xf32> to vector<8x32xf32>
    %239 = arith.addf %237, %238 : vector<8x32xf32>
    %c1_134 = arith.constant 1 : index
    %c0_135 = arith.constant 0 : index
    %c0_136 = arith.constant 0 : index
    %240 = vector.load %arg13[%c1_134, %c0_135, %c0_136] : memref<4x2x32xf32, #tpu.memory_space<vmem>>, vector<1x2x32xf32>
    %241 = vector.shape_cast %240 : vector<1x2x32xf32> to vector<2x32xf32>
    %c0_137 = arith.constant 0 : index
    %c0_138 = arith.constant 0 : index
    %c0_139 = arith.constant 0 : index
    %242 = vector.load %arg9[%c0_137, %c0_138, %c0_139] : memref<2x32x64xbf16, #tpu.memory_space<vmem>>, vector<1x32x64xbf16>
    %243 = vector.shape_cast %242 : vector<1x32x64xbf16> to vector<32x64xbf16>
    %c0_140 = arith.constant 0 : index
    %c0_141 = arith.constant 0 : index
    %c0_142 = arith.constant 0 : index
    %244 = vector.load %arg10[%c0_140, %c0_141, %c0_142] : memref<2x1x64xf32, #tpu.memory_space<vmem>>, vector<1x1x64xf32>
    %245 = vector.shape_cast %244 : vector<1x1x64xf32> to vector<1x64xf32>
    %c0_143 = arith.constant 0 : index
    %c0_144 = arith.constant 0 : index
    %c0_145 = arith.constant 0 : index
    %246 = vector.load %arg11[%c0_143, %c0_144, %c0_145] : memref<2x64x32xbf16, #tpu.memory_space<vmem>>, vector<1x64x32xbf16>
    %247 = vector.shape_cast %246 : vector<1x64x32xbf16> to vector<64x32xbf16>
    %c0_146 = arith.constant 0 : index
    %c0_147 = arith.constant 0 : index
    %c0_148 = arith.constant 0 : index
    %248 = vector.load %arg12[%c0_146, %c0_147, %c0_148] : memref<2x1x32xf32, #tpu.memory_space<vmem>>, vector<1x1x32xf32>
    %249 = vector.shape_cast %248 : vector<1x1x32xf32> to vector<1x32xf32>
    %250 = vector.extract_strided_slice %241 {offsets = [0, 0], sizes = [1, 32], strides = [1, 1]} : vector<2x32xf32> to vector<1x32xf32>
    %251 = vector.extract_strided_slice %241 {offsets = [1, 0], sizes = [1, 32], strides = [1, 1]} : vector<2x32xf32> to vector<1x32xf32>
    %252 = arith.truncf %239 : vector<8x32xf32> to vector<8x32xbf16>
    %cst_149 = arith.constant dense<0.000000e+00> : vector<8x64xf32>
    %253 = tpu.matmul %252, %243, %cst_149 {dimension_numbers = #tpu.dot_dimension_numbers<[1], [0], [0], [1], [0, 0, 1, 1], [], []>} : vector<8x32xbf16>, vector<32x64xbf16>, vector<8x64xf32> -> vector<8x64xf32>
    %254 = vector.broadcast %245 : vector<1x64xf32> to vector<8x64xf32>
    %255 = arith.addf %253, %254 : vector<8x64xf32>
    %cst_150 = arith.constant 0.000000e+00 : f32
    %256 = vector.broadcast %cst_150 : f32 to vector<8x64xf32>
    %257 = arith.maximumf %255, %256 : vector<8x64xf32>
    %258 = arith.truncf %257 : vector<8x64xf32> to vector<8x64xbf16>
    %cst_151 = arith.constant dense<0.000000e+00> : vector<8x32xf32>
    %259 = tpu.matmul %258, %247, %cst_151 {dimension_numbers = #tpu.dot_dimension_numbers<[1], [0], [0], [1], [0, 0, 1, 1], [], []>} : vector<8x64xbf16>, vector<64x32xbf16>, vector<8x32xf32> -> vector<8x32xf32>
    %260 = vector.broadcast %249 : vector<1x32xf32> to vector<8x32xf32>
    %261 = arith.addf %259, %260 : vector<8x32xf32>
    %262 = arith.addf %239, %261 : vector<8x32xf32>
    %cst_152 = arith.constant dense<0.000000e+00> : vector<8xf32>
    %263 = vector.multi_reduction <add>, %262, %cst_152 [1] : vector<8x32xf32> to vector<8xf32>
    %264 = vector.shape_cast %263 : vector<8xf32> to vector<8x1xf32>
    %cst_153 = arith.constant 3.200000e+01 : f32
    %265 = vector.broadcast %cst_153 : f32 to vector<8x1xf32>
    %266 = arith.divf %264, %265 : vector<8x1xf32>
    %267 = vector.broadcast %266 : vector<8x1xf32> to vector<8x32xf32>
    %268 = arith.subf %262, %267 : vector<8x32xf32>
    %269 = arith.mulf %268, %268 : vector<8x32xf32>
    %cst_154 = arith.constant dense<0.000000e+00> : vector<8xf32>
    %270 = vector.multi_reduction <add>, %269, %cst_154 [1] : vector<8x32xf32> to vector<8xf32>
    %271 = vector.shape_cast %270 : vector<8xf32> to vector<8x1xf32>
    %cst_155 = arith.constant 3.200000e+01 : f32
    %272 = vector.broadcast %cst_155 : f32 to vector<8x1xf32>
    %273 = arith.divf %271, %272 : vector<8x1xf32>
    %274 = vector.broadcast %266 : vector<8x1xf32> to vector<8x32xf32>
    %275 = arith.subf %262, %274 : vector<8x32xf32>
    %cst_156 = arith.constant 9.99999974E-6 : f32
    %276 = vector.broadcast %cst_156 : f32 to vector<8x1xf32>
    %277 = arith.addf %273, %276 : vector<8x1xf32>
    %278 = math.rsqrt %277 : vector<8x1xf32>
    %279 = vector.broadcast %278 : vector<8x1xf32> to vector<8x32xf32>
    %280 = arith.mulf %275, %279 : vector<8x32xf32>
    %281 = vector.broadcast %250 : vector<1x32xf32> to vector<8x32xf32>
    %282 = arith.mulf %280, %281 : vector<8x32xf32>
    %283 = vector.broadcast %251 : vector<1x32xf32> to vector<8x32xf32>
    %284 = arith.addf %282, %283 : vector<8x32xf32>
    %c2_157 = arith.constant 2 : index
    %c0_158 = arith.constant 0 : index
    %c0_159 = arith.constant 0 : index
    %285 = vector.load %arg13[%c2_157, %c0_158, %c0_159] : memref<4x2x32xf32, #tpu.memory_space<vmem>>, vector<1x2x32xf32>
    %286 = vector.shape_cast %285 : vector<1x2x32xf32> to vector<2x32xf32>
    %c1_160 = arith.constant 1 : index
    %c0_161 = arith.constant 0 : index
    %c0_162 = arith.constant 0 : index
    %287 = vector.load %arg8[%c1_160, %c0_161, %c0_162] : memref<2x1x32xf32, #tpu.memory_space<vmem>>, vector<1x1x32xf32>
    %288 = vector.shape_cast %287 : vector<1x1x32xf32> to vector<1x32xf32>
    %289 = vector.extract_strided_slice %286 {offsets = [0, 0], sizes = [1, 32], strides = [1, 1]} : vector<2x32xf32> to vector<1x32xf32>
    %290 = vector.extract_strided_slice %286 {offsets = [1, 0], sizes = [1, 32], strides = [1, 1]} : vector<2x32xf32> to vector<1x32xf32>
    %291 = arith.truncf %284 : vector<8x32xf32> to vector<8x32xbf16>
    %292 = arith.truncf %284 : vector<8x32xf32> to vector<8x32xbf16>
    %cst_163 = arith.constant 0.000000e+00 : f32
    %293 = vector.broadcast %cst_163 : f32 to vector<8x32xf32>
    %c12 = arith.constant 12 : index
    %c0_164 = arith.constant 0 : index
    %c0_165 = arith.constant 0 : index
    %294 = vector.load %arg5[%c12, %c0_164, %c0_165] : memref<24x32x8xbf16, #tpu.memory_space<vmem>>, vector<1x32x8xbf16>
    %295 = vector.shape_cast %294 : vector<1x32x8xbf16> to vector<32x8xbf16>
    %cst_166 = arith.constant dense<0.000000e+00> : vector<8x8xf32>
    %296 = tpu.matmul %291, %295, %cst_166 {dimension_numbers = #tpu.dot_dimension_numbers<[1], [0], [0], [1], [0, 0, 1, 1], [], []>} : vector<8x32xbf16>, vector<32x8xbf16>, vector<8x8xf32> -> vector<8x8xf32>
    %c12_167 = arith.constant 12 : index
    %c0_168 = arith.constant 0 : index
    %c0_169 = arith.constant 0 : index
    %297 = vector.load %arg6[%c12_167, %c0_168, %c0_169] : memref<24x1x8xf32, #tpu.memory_space<vmem>>, vector<1x1x8xf32>
    %298 = vector.shape_cast %297 : vector<1x1x8xf32> to vector<1x8xf32>
    %299 = vector.broadcast %298 : vector<1x8xf32> to vector<8x8xf32>
    %300 = arith.addf %296, %299 : vector<8x8xf32>
    %c16 = arith.constant 16 : index
    %c0_170 = arith.constant 0 : index
    %c0_171 = arith.constant 0 : index
    %301 = vector.load %arg5[%c16, %c0_170, %c0_171] : memref<24x32x8xbf16, #tpu.memory_space<vmem>>, vector<1x32x8xbf16>
    %302 = vector.shape_cast %301 : vector<1x32x8xbf16> to vector<32x8xbf16>
    %cst_172 = arith.constant dense<0.000000e+00> : vector<8x8xf32>
    %303 = tpu.matmul %292, %302, %cst_172 {dimension_numbers = #tpu.dot_dimension_numbers<[1], [0], [0], [1], [0, 0, 1, 1], [], []>} : vector<8x32xbf16>, vector<32x8xbf16>, vector<8x8xf32> -> vector<8x8xf32>
    %c16_173 = arith.constant 16 : index
    %c0_174 = arith.constant 0 : index
    %c0_175 = arith.constant 0 : index
    %304 = vector.load %arg6[%c16_173, %c0_174, %c0_175] : memref<24x1x8xf32, #tpu.memory_space<vmem>>, vector<1x1x8xf32>
    %305 = vector.shape_cast %304 : vector<1x1x8xf32> to vector<1x8xf32>
    %306 = vector.broadcast %305 : vector<1x8xf32> to vector<8x8xf32>
    %307 = arith.addf %303, %306 : vector<8x8xf32>
    %c20 = arith.constant 20 : index
    %c0_176 = arith.constant 0 : index
    %c0_177 = arith.constant 0 : index
    %308 = vector.load %arg5[%c20, %c0_176, %c0_177] : memref<24x32x8xbf16, #tpu.memory_space<vmem>>, vector<1x32x8xbf16>
    %309 = vector.shape_cast %308 : vector<1x32x8xbf16> to vector<32x8xbf16>
    %cst_178 = arith.constant dense<0.000000e+00> : vector<8x8xf32>
    %310 = tpu.matmul %292, %309, %cst_178 {dimension_numbers = #tpu.dot_dimension_numbers<[1], [0], [0], [1], [0, 0, 1, 1], [], []>} : vector<8x32xbf16>, vector<32x8xbf16>, vector<8x8xf32> -> vector<8x8xf32>
    %c20_179 = arith.constant 20 : index
    %c0_180 = arith.constant 0 : index
    %c0_181 = arith.constant 0 : index
    %311 = vector.load %arg6[%c20_179, %c0_180, %c0_181] : memref<24x1x8xf32, #tpu.memory_space<vmem>>, vector<1x1x8xf32>
    %312 = vector.shape_cast %311 : vector<1x1x8xf32> to vector<1x8xf32>
    %313 = vector.broadcast %312 : vector<1x8xf32> to vector<8x8xf32>
    %314 = arith.addf %310, %313 : vector<8x8xf32>
    %315 = arith.truncf %300 : vector<8x8xf32> to vector<8x8xbf16>
    %316 = tpu.transpose %307, [1, 0] : vector<8x8xf32> -> vector<8x8xf32>
    %317 = arith.truncf %316 : vector<8x8xf32> to vector<8x8xbf16>
    %cst_182 = arith.constant dense<0.000000e+00> : vector<8x8xf32>
    %318 = tpu.matmul %315, %317, %cst_182 {dimension_numbers = #tpu.dot_dimension_numbers<[1], [0], [0], [1], [0, 0, 1, 1], [], []>} : vector<8x8xbf16>, vector<8x8xbf16>, vector<8x8xf32> -> vector<8x8xf32>
    %cst_183 = arith.constant 0.353553385 : f32
    %319 = vector.broadcast %cst_183 : f32 to vector<8x8xf32>
    %320 = arith.mulf %318, %319 : vector<8x8xf32>
    %cst_184 = arith.constant -1.000000e+10 : f32
    %321 = vector.shape_cast %3 : vector<1x8xi1> to vector<1x8xi1>
    %322 = vector.broadcast %321 : vector<1x8xi1> to vector<8x8xi1>
    %323 = vector.broadcast %cst_184 : f32 to vector<8x8xf32>
    %324 = arith.select %322, %320, %323 : vector<8x8xi1>, vector<8x8xf32>
    %cst_185 = arith.constant dense<0xFF800000> : vector<8xf32>
    %325 = vector.multi_reduction <maximumf>, %324, %cst_185 [1] : vector<8x8xf32> to vector<8xf32>
    %326 = vector.shape_cast %325 : vector<8xf32> to vector<8x1xf32>
    %327 = vector.broadcast %326 : vector<8x1xf32> to vector<8x8xf32>
    %328 = arith.subf %324, %327 : vector<8x8xf32>
    %329 = math.exp %328 : vector<8x8xf32>
    %cst_186 = arith.constant dense<0.000000e+00> : vector<8xf32>
    %330 = vector.multi_reduction <add>, %329, %cst_186 [1] : vector<8x8xf32> to vector<8xf32>
    %331 = vector.shape_cast %330 : vector<8xf32> to vector<8x1xf32>
    %332 = tpu.reciprocal %331 {approx = true} : vector<8x1xf32> -> vector<8x1xf32>
    %333 = vector.broadcast %332 : vector<8x1xf32> to vector<8x8xf32>
    %334 = arith.mulf %329, %333 : vector<8x8xf32>
    %335 = arith.truncf %334 : vector<8x8xf32> to vector<8x8xbf16>
    %336 = arith.truncf %314 : vector<8x8xf32> to vector<8x8xbf16>
    %cst_187 = arith.constant dense<0.000000e+00> : vector<8x8xf32>
    %337 = tpu.matmul %335, %336, %cst_187 {dimension_numbers = #tpu.dot_dimension_numbers<[1], [0], [0], [1], [0, 0, 1, 1], [], []>} : vector<8x8xbf16>, vector<8x8xbf16>, vector<8x8xf32> -> vector<8x8xf32>
    %338 = arith.truncf %337 : vector<8x8xf32> to vector<8x8xbf16>
    %c4_188 = arith.constant 4 : index
    %c0_189 = arith.constant 0 : index
    %c0_190 = arith.constant 0 : index
    %339 = vector.load %arg7[%c4_188, %c0_189, %c0_190] : memref<8x8x32xbf16, #tpu.memory_space<vmem>>, vector<1x8x32xbf16>
    %340 = vector.shape_cast %339 : vector<1x8x32xbf16> to vector<8x32xbf16>
    %cst_191 = arith.constant dense<0.000000e+00> : vector<8x32xf32>
    %341 = tpu.matmul %338, %340, %cst_191 {dimension_numbers = #tpu.dot_dimension_numbers<[1], [0], [0], [1], [0, 0, 1, 1], [], []>} : vector<8x8xbf16>, vector<8x32xbf16>, vector<8x32xf32> -> vector<8x32xf32>
    %342 = arith.addf %293, %341 : vector<8x32xf32>
    %c13 = arith.constant 13 : index
    %c0_192 = arith.constant 0 : index
    %c0_193 = arith.constant 0 : index
    %343 = vector.load %arg5[%c13, %c0_192, %c0_193] : memref<24x32x8xbf16, #tpu.memory_space<vmem>>, vector<1x32x8xbf16>
    %344 = vector.shape_cast %343 : vector<1x32x8xbf16> to vector<32x8xbf16>
    %cst_194 = arith.constant dense<0.000000e+00> : vector<8x8xf32>
    %345 = tpu.matmul %291, %344, %cst_194 {dimension_numbers = #tpu.dot_dimension_numbers<[1], [0], [0], [1], [0, 0, 1, 1], [], []>} : vector<8x32xbf16>, vector<32x8xbf16>, vector<8x8xf32> -> vector<8x8xf32>
    %c13_195 = arith.constant 13 : index
    %c0_196 = arith.constant 0 : index
    %c0_197 = arith.constant 0 : index
    %346 = vector.load %arg6[%c13_195, %c0_196, %c0_197] : memref<24x1x8xf32, #tpu.memory_space<vmem>>, vector<1x1x8xf32>
    %347 = vector.shape_cast %346 : vector<1x1x8xf32> to vector<1x8xf32>
    %348 = vector.broadcast %347 : vector<1x8xf32> to vector<8x8xf32>
    %349 = arith.addf %345, %348 : vector<8x8xf32>
    %c17 = arith.constant 17 : index
    %c0_198 = arith.constant 0 : index
    %c0_199 = arith.constant 0 : index
    %350 = vector.load %arg5[%c17, %c0_198, %c0_199] : memref<24x32x8xbf16, #tpu.memory_space<vmem>>, vector<1x32x8xbf16>
    %351 = vector.shape_cast %350 : vector<1x32x8xbf16> to vector<32x8xbf16>
    %cst_200 = arith.constant dense<0.000000e+00> : vector<8x8xf32>
    %352 = tpu.matmul %292, %351, %cst_200 {dimension_numbers = #tpu.dot_dimension_numbers<[1], [0], [0], [1], [0, 0, 1, 1], [], []>} : vector<8x32xbf16>, vector<32x8xbf16>, vector<8x8xf32> -> vector<8x8xf32>
    %c17_201 = arith.constant 17 : index
    %c0_202 = arith.constant 0 : index
    %c0_203 = arith.constant 0 : index
    %353 = vector.load %arg6[%c17_201, %c0_202, %c0_203] : memref<24x1x8xf32, #tpu.memory_space<vmem>>, vector<1x1x8xf32>
    %354 = vector.shape_cast %353 : vector<1x1x8xf32> to vector<1x8xf32>
    %355 = vector.broadcast %354 : vector<1x8xf32> to vector<8x8xf32>
    %356 = arith.addf %352, %355 : vector<8x8xf32>
    %c21 = arith.constant 21 : index
    %c0_204 = arith.constant 0 : index
    %c0_205 = arith.constant 0 : index
    %357 = vector.load %arg5[%c21, %c0_204, %c0_205] : memref<24x32x8xbf16, #tpu.memory_space<vmem>>, vector<1x32x8xbf16>
    %358 = vector.shape_cast %357 : vector<1x32x8xbf16> to vector<32x8xbf16>
    %cst_206 = arith.constant dense<0.000000e+00> : vector<8x8xf32>
    %359 = tpu.matmul %292, %358, %cst_206 {dimension_numbers = #tpu.dot_dimension_numbers<[1], [0], [0], [1], [0, 0, 1, 1], [], []>} : vector<8x32xbf16>, vector<32x8xbf16>, vector<8x8xf32> -> vector<8x8xf32>
    %c21_207 = arith.constant 21 : index
    %c0_208 = arith.constant 0 : index
    %c0_209 = arith.constant 0 : index
    %360 = vector.load %arg6[%c21_207, %c0_208, %c0_209] : memref<24x1x8xf32, #tpu.memory_space<vmem>>, vector<1x1x8xf32>
    %361 = vector.shape_cast %360 : vector<1x1x8xf32> to vector<1x8xf32>
    %362 = vector.broadcast %361 : vector<1x8xf32> to vector<8x8xf32>
    %363 = arith.addf %359, %362 : vector<8x8xf32>
    %364 = arith.truncf %349 : vector<8x8xf32> to vector<8x8xbf16>
    %365 = tpu.transpose %356, [1, 0] : vector<8x8xf32> -> vector<8x8xf32>
    %366 = arith.truncf %365 : vector<8x8xf32> to vector<8x8xbf16>
    %cst_210 = arith.constant dense<0.000000e+00> : vector<8x8xf32>
    %367 = tpu.matmul %364, %366, %cst_210 {dimension_numbers = #tpu.dot_dimension_numbers<[1], [0], [0], [1], [0, 0, 1, 1], [], []>} : vector<8x8xbf16>, vector<8x8xbf16>, vector<8x8xf32> -> vector<8x8xf32>
    %cst_211 = arith.constant 0.353553385 : f32
    %368 = vector.broadcast %cst_211 : f32 to vector<8x8xf32>
    %369 = arith.mulf %367, %368 : vector<8x8xf32>
    %cst_212 = arith.constant -1.000000e+10 : f32
    %370 = vector.shape_cast %3 : vector<1x8xi1> to vector<1x8xi1>
    %371 = vector.broadcast %370 : vector<1x8xi1> to vector<8x8xi1>
    %372 = vector.broadcast %cst_212 : f32 to vector<8x8xf32>
    %373 = arith.select %371, %369, %372 : vector<8x8xi1>, vector<8x8xf32>
    %cst_213 = arith.constant dense<0xFF800000> : vector<8xf32>
    %374 = vector.multi_reduction <maximumf>, %373, %cst_213 [1] : vector<8x8xf32> to vector<8xf32>
    %375 = vector.shape_cast %374 : vector<8xf32> to vector<8x1xf32>
    %376 = vector.broadcast %375 : vector<8x1xf32> to vector<8x8xf32>
    %377 = arith.subf %373, %376 : vector<8x8xf32>
    %378 = math.exp %377 : vector<8x8xf32>
    %cst_214 = arith.constant dense<0.000000e+00> : vector<8xf32>
    %379 = vector.multi_reduction <add>, %378, %cst_214 [1] : vector<8x8xf32> to vector<8xf32>
    %380 = vector.shape_cast %379 : vector<8xf32> to vector<8x1xf32>
    %381 = tpu.reciprocal %380 {approx = true} : vector<8x1xf32> -> vector<8x1xf32>
    %382 = vector.broadcast %381 : vector<8x1xf32> to vector<8x8xf32>
    %383 = arith.mulf %378, %382 : vector<8x8xf32>
    %384 = arith.truncf %383 : vector<8x8xf32> to vector<8x8xbf16>
    %385 = arith.truncf %363 : vector<8x8xf32> to vector<8x8xbf16>
    %cst_215 = arith.constant dense<0.000000e+00> : vector<8x8xf32>
    %386 = tpu.matmul %384, %385, %cst_215 {dimension_numbers = #tpu.dot_dimension_numbers<[1], [0], [0], [1], [0, 0, 1, 1], [], []>} : vector<8x8xbf16>, vector<8x8xbf16>, vector<8x8xf32> -> vector<8x8xf32>
    %387 = arith.truncf %386 : vector<8x8xf32> to vector<8x8xbf16>
    %c5_216 = arith.constant 5 : index
    %c0_217 = arith.constant 0 : index
    %c0_218 = arith.constant 0 : index
    %388 = vector.load %arg7[%c5_216, %c0_217, %c0_218] : memref<8x8x32xbf16, #tpu.memory_space<vmem>>, vector<1x8x32xbf16>
    %389 = vector.shape_cast %388 : vector<1x8x32xbf16> to vector<8x32xbf16>
    %cst_219 = arith.constant dense<0.000000e+00> : vector<8x32xf32>
    %390 = tpu.matmul %387, %389, %cst_219 {dimension_numbers = #tpu.dot_dimension_numbers<[1], [0], [0], [1], [0, 0, 1, 1], [], []>} : vector<8x8xbf16>, vector<8x32xbf16>, vector<8x32xf32> -> vector<8x32xf32>
    %391 = arith.addf %342, %390 : vector<8x32xf32>
    %c14 = arith.constant 14 : index
    %c0_220 = arith.constant 0 : index
    %c0_221 = arith.constant 0 : index
    %392 = vector.load %arg5[%c14, %c0_220, %c0_221] : memref<24x32x8xbf16, #tpu.memory_space<vmem>>, vector<1x32x8xbf16>
    %393 = vector.shape_cast %392 : vector<1x32x8xbf16> to vector<32x8xbf16>
    %cst_222 = arith.constant dense<0.000000e+00> : vector<8x8xf32>
    %394 = tpu.matmul %291, %393, %cst_222 {dimension_numbers = #tpu.dot_dimension_numbers<[1], [0], [0], [1], [0, 0, 1, 1], [], []>} : vector<8x32xbf16>, vector<32x8xbf16>, vector<8x8xf32> -> vector<8x8xf32>
    %c14_223 = arith.constant 14 : index
    %c0_224 = arith.constant 0 : index
    %c0_225 = arith.constant 0 : index
    %395 = vector.load %arg6[%c14_223, %c0_224, %c0_225] : memref<24x1x8xf32, #tpu.memory_space<vmem>>, vector<1x1x8xf32>
    %396 = vector.shape_cast %395 : vector<1x1x8xf32> to vector<1x8xf32>
    %397 = vector.broadcast %396 : vector<1x8xf32> to vector<8x8xf32>
    %398 = arith.addf %394, %397 : vector<8x8xf32>
    %c18 = arith.constant 18 : index
    %c0_226 = arith.constant 0 : index
    %c0_227 = arith.constant 0 : index
    %399 = vector.load %arg5[%c18, %c0_226, %c0_227] : memref<24x32x8xbf16, #tpu.memory_space<vmem>>, vector<1x32x8xbf16>
    %400 = vector.shape_cast %399 : vector<1x32x8xbf16> to vector<32x8xbf16>
    %cst_228 = arith.constant dense<0.000000e+00> : vector<8x8xf32>
    %401 = tpu.matmul %292, %400, %cst_228 {dimension_numbers = #tpu.dot_dimension_numbers<[1], [0], [0], [1], [0, 0, 1, 1], [], []>} : vector<8x32xbf16>, vector<32x8xbf16>, vector<8x8xf32> -> vector<8x8xf32>
    %c18_229 = arith.constant 18 : index
    %c0_230 = arith.constant 0 : index
    %c0_231 = arith.constant 0 : index
    %402 = vector.load %arg6[%c18_229, %c0_230, %c0_231] : memref<24x1x8xf32, #tpu.memory_space<vmem>>, vector<1x1x8xf32>
    %403 = vector.shape_cast %402 : vector<1x1x8xf32> to vector<1x8xf32>
    %404 = vector.broadcast %403 : vector<1x8xf32> to vector<8x8xf32>
    %405 = arith.addf %401, %404 : vector<8x8xf32>
    %c22 = arith.constant 22 : index
    %c0_232 = arith.constant 0 : index
    %c0_233 = arith.constant 0 : index
    %406 = vector.load %arg5[%c22, %c0_232, %c0_233] : memref<24x32x8xbf16, #tpu.memory_space<vmem>>, vector<1x32x8xbf16>
    %407 = vector.shape_cast %406 : vector<1x32x8xbf16> to vector<32x8xbf16>
    %cst_234 = arith.constant dense<0.000000e+00> : vector<8x8xf32>
    %408 = tpu.matmul %292, %407, %cst_234 {dimension_numbers = #tpu.dot_dimension_numbers<[1], [0], [0], [1], [0, 0, 1, 1], [], []>} : vector<8x32xbf16>, vector<32x8xbf16>, vector<8x8xf32> -> vector<8x8xf32>
    %c22_235 = arith.constant 22 : index
    %c0_236 = arith.constant 0 : index
    %c0_237 = arith.constant 0 : index
    %409 = vector.load %arg6[%c22_235, %c0_236, %c0_237] : memref<24x1x8xf32, #tpu.memory_space<vmem>>, vector<1x1x8xf32>
    %410 = vector.shape_cast %409 : vector<1x1x8xf32> to vector<1x8xf32>
    %411 = vector.broadcast %410 : vector<1x8xf32> to vector<8x8xf32>
    %412 = arith.addf %408, %411 : vector<8x8xf32>
    %413 = arith.truncf %398 : vector<8x8xf32> to vector<8x8xbf16>
    %414 = tpu.transpose %405, [1, 0] : vector<8x8xf32> -> vector<8x8xf32>
    %415 = arith.truncf %414 : vector<8x8xf32> to vector<8x8xbf16>
    %cst_238 = arith.constant dense<0.000000e+00> : vector<8x8xf32>
    %416 = tpu.matmul %413, %415, %cst_238 {dimension_numbers = #tpu.dot_dimension_numbers<[1], [0], [0], [1], [0, 0, 1, 1], [], []>} : vector<8x8xbf16>, vector<8x8xbf16>, vector<8x8xf32> -> vector<8x8xf32>
    %cst_239 = arith.constant 0.353553385 : f32
    %417 = vector.broadcast %cst_239 : f32 to vector<8x8xf32>
    %418 = arith.mulf %416, %417 : vector<8x8xf32>
    %cst_240 = arith.constant -1.000000e+10 : f32
    %419 = vector.shape_cast %3 : vector<1x8xi1> to vector<1x8xi1>
    %420 = vector.broadcast %419 : vector<1x8xi1> to vector<8x8xi1>
    %421 = vector.broadcast %cst_240 : f32 to vector<8x8xf32>
    %422 = arith.select %420, %418, %421 : vector<8x8xi1>, vector<8x8xf32>
    %cst_241 = arith.constant dense<0xFF800000> : vector<8xf32>
    %423 = vector.multi_reduction <maximumf>, %422, %cst_241 [1] : vector<8x8xf32> to vector<8xf32>
    %424 = vector.shape_cast %423 : vector<8xf32> to vector<8x1xf32>
    %425 = vector.broadcast %424 : vector<8x1xf32> to vector<8x8xf32>
    %426 = arith.subf %422, %425 : vector<8x8xf32>
    %427 = math.exp %426 : vector<8x8xf32>
    %cst_242 = arith.constant dense<0.000000e+00> : vector<8xf32>
    %428 = vector.multi_reduction <add>, %427, %cst_242 [1] : vector<8x8xf32> to vector<8xf32>
    %429 = vector.shape_cast %428 : vector<8xf32> to vector<8x1xf32>
    %430 = tpu.reciprocal %429 {approx = true} : vector<8x1xf32> -> vector<8x1xf32>
    %431 = vector.broadcast %430 : vector<8x1xf32> to vector<8x8xf32>
    %432 = arith.mulf %427, %431 : vector<8x8xf32>
    %433 = arith.truncf %432 : vector<8x8xf32> to vector<8x8xbf16>
    %434 = arith.truncf %412 : vector<8x8xf32> to vector<8x8xbf16>
    %cst_243 = arith.constant dense<0.000000e+00> : vector<8x8xf32>
    %435 = tpu.matmul %433, %434, %cst_243 {dimension_numbers = #tpu.dot_dimension_numbers<[1], [0], [0], [1], [0, 0, 1, 1], [], []>} : vector<8x8xbf16>, vector<8x8xbf16>, vector<8x8xf32> -> vector<8x8xf32>
    %436 = arith.truncf %435 : vector<8x8xf32> to vector<8x8xbf16>
    %c6_244 = arith.constant 6 : index
    %c0_245 = arith.constant 0 : index
    %c0_246 = arith.constant 0 : index
    %437 = vector.load %arg7[%c6_244, %c0_245, %c0_246] : memref<8x8x32xbf16, #tpu.memory_space<vmem>>, vector<1x8x32xbf16>
    %438 = vector.shape_cast %437 : vector<1x8x32xbf16> to vector<8x32xbf16>
    %cst_247 = arith.constant dense<0.000000e+00> : vector<8x32xf32>
    %439 = tpu.matmul %436, %438, %cst_247 {dimension_numbers = #tpu.dot_dimension_numbers<[1], [0], [0], [1], [0, 0, 1, 1], [], []>} : vector<8x8xbf16>, vector<8x32xbf16>, vector<8x32xf32> -> vector<8x32xf32>
    %440 = arith.addf %391, %439 : vector<8x32xf32>
    %c15 = arith.constant 15 : index
    %c0_248 = arith.constant 0 : index
    %c0_249 = arith.constant 0 : index
    %441 = vector.load %arg5[%c15, %c0_248, %c0_249] : memref<24x32x8xbf16, #tpu.memory_space<vmem>>, vector<1x32x8xbf16>
    %442 = vector.shape_cast %441 : vector<1x32x8xbf16> to vector<32x8xbf16>
    %cst_250 = arith.constant dense<0.000000e+00> : vector<8x8xf32>
    %443 = tpu.matmul %291, %442, %cst_250 {dimension_numbers = #tpu.dot_dimension_numbers<[1], [0], [0], [1], [0, 0, 1, 1], [], []>} : vector<8x32xbf16>, vector<32x8xbf16>, vector<8x8xf32> -> vector<8x8xf32>
    %c15_251 = arith.constant 15 : index
    %c0_252 = arith.constant 0 : index
    %c0_253 = arith.constant 0 : index
    %444 = vector.load %arg6[%c15_251, %c0_252, %c0_253] : memref<24x1x8xf32, #tpu.memory_space<vmem>>, vector<1x1x8xf32>
    %445 = vector.shape_cast %444 : vector<1x1x8xf32> to vector<1x8xf32>
    %446 = vector.broadcast %445 : vector<1x8xf32> to vector<8x8xf32>
    %447 = arith.addf %443, %446 : vector<8x8xf32>
    %c19 = arith.constant 19 : index
    %c0_254 = arith.constant 0 : index
    %c0_255 = arith.constant 0 : index
    %448 = vector.load %arg5[%c19, %c0_254, %c0_255] : memref<24x32x8xbf16, #tpu.memory_space<vmem>>, vector<1x32x8xbf16>
    %449 = vector.shape_cast %448 : vector<1x32x8xbf16> to vector<32x8xbf16>
    %cst_256 = arith.constant dense<0.000000e+00> : vector<8x8xf32>
    %450 = tpu.matmul %292, %449, %cst_256 {dimension_numbers = #tpu.dot_dimension_numbers<[1], [0], [0], [1], [0, 0, 1, 1], [], []>} : vector<8x32xbf16>, vector<32x8xbf16>, vector<8x8xf32> -> vector<8x8xf32>
    %c19_257 = arith.constant 19 : index
    %c0_258 = arith.constant 0 : index
    %c0_259 = arith.constant 0 : index
    %451 = vector.load %arg6[%c19_257, %c0_258, %c0_259] : memref<24x1x8xf32, #tpu.memory_space<vmem>>, vector<1x1x8xf32>
    %452 = vector.shape_cast %451 : vector<1x1x8xf32> to vector<1x8xf32>
    %453 = vector.broadcast %452 : vector<1x8xf32> to vector<8x8xf32>
    %454 = arith.addf %450, %453 : vector<8x8xf32>
    %c23 = arith.constant 23 : index
    %c0_260 = arith.constant 0 : index
    %c0_261 = arith.constant 0 : index
    %455 = vector.load %arg5[%c23, %c0_260, %c0_261] : memref<24x32x8xbf16, #tpu.memory_space<vmem>>, vector<1x32x8xbf16>
    %456 = vector.shape_cast %455 : vector<1x32x8xbf16> to vector<32x8xbf16>
    %cst_262 = arith.constant dense<0.000000e+00> : vector<8x8xf32>
    %457 = tpu.matmul %292, %456, %cst_262 {dimension_numbers = #tpu.dot_dimension_numbers<[1], [0], [0], [1], [0, 0, 1, 1], [], []>} : vector<8x32xbf16>, vector<32x8xbf16>, vector<8x8xf32> -> vector<8x8xf32>
    %c23_263 = arith.constant 23 : index
    %c0_264 = arith.constant 0 : index
    %c0_265 = arith.constant 0 : index
    %458 = vector.load %arg6[%c23_263, %c0_264, %c0_265] : memref<24x1x8xf32, #tpu.memory_space<vmem>>, vector<1x1x8xf32>
    %459 = vector.shape_cast %458 : vector<1x1x8xf32> to vector<1x8xf32>
    %460 = vector.broadcast %459 : vector<1x8xf32> to vector<8x8xf32>
    %461 = arith.addf %457, %460 : vector<8x8xf32>
    %462 = arith.truncf %447 : vector<8x8xf32> to vector<8x8xbf16>
    %463 = tpu.transpose %454, [1, 0] : vector<8x8xf32> -> vector<8x8xf32>
    %464 = arith.truncf %463 : vector<8x8xf32> to vector<8x8xbf16>
    %cst_266 = arith.constant dense<0.000000e+00> : vector<8x8xf32>
    %465 = tpu.matmul %462, %464, %cst_266 {dimension_numbers = #tpu.dot_dimension_numbers<[1], [0], [0], [1], [0, 0, 1, 1], [], []>} : vector<8x8xbf16>, vector<8x8xbf16>, vector<8x8xf32> -> vector<8x8xf32>
    %cst_267 = arith.constant 0.353553385 : f32
    %466 = vector.broadcast %cst_267 : f32 to vector<8x8xf32>
    %467 = arith.mulf %465, %466 : vector<8x8xf32>
    %cst_268 = arith.constant -1.000000e+10 : f32
    %468 = vector.shape_cast %3 : vector<1x8xi1> to vector<1x8xi1>
    %469 = vector.broadcast %468 : vector<1x8xi1> to vector<8x8xi1>
    %470 = vector.broadcast %cst_268 : f32 to vector<8x8xf32>
    %471 = arith.select %469, %467, %470 : vector<8x8xi1>, vector<8x8xf32>
    %cst_269 = arith.constant dense<0xFF800000> : vector<8xf32>
    %472 = vector.multi_reduction <maximumf>, %471, %cst_269 [1] : vector<8x8xf32> to vector<8xf32>
    %473 = vector.shape_cast %472 : vector<8xf32> to vector<8x1xf32>
    %474 = vector.broadcast %473 : vector<8x1xf32> to vector<8x8xf32>
    %475 = arith.subf %471, %474 : vector<8x8xf32>
    %476 = math.exp %475 : vector<8x8xf32>
    %cst_270 = arith.constant dense<0.000000e+00> : vector<8xf32>
    %477 = vector.multi_reduction <add>, %476, %cst_270 [1] : vector<8x8xf32> to vector<8xf32>
    %478 = vector.shape_cast %477 : vector<8xf32> to vector<8x1xf32>
    %479 = tpu.reciprocal %478 {approx = true} : vector<8x1xf32> -> vector<8x1xf32>
    %480 = vector.broadcast %479 : vector<8x1xf32> to vector<8x8xf32>
    %481 = arith.mulf %476, %480 : vector<8x8xf32>
    %482 = arith.truncf %481 : vector<8x8xf32> to vector<8x8xbf16>
    %483 = arith.truncf %461 : vector<8x8xf32> to vector<8x8xbf16>
    %cst_271 = arith.constant dense<0.000000e+00> : vector<8x8xf32>
    %484 = tpu.matmul %482, %483, %cst_271 {dimension_numbers = #tpu.dot_dimension_numbers<[1], [0], [0], [1], [0, 0, 1, 1], [], []>} : vector<8x8xbf16>, vector<8x8xbf16>, vector<8x8xf32> -> vector<8x8xf32>
    %485 = arith.truncf %484 : vector<8x8xf32> to vector<8x8xbf16>
    %c7_272 = arith.constant 7 : index
    %c0_273 = arith.constant 0 : index
    %c0_274 = arith.constant 0 : index
    %486 = vector.load %arg7[%c7_272, %c0_273, %c0_274] : memref<8x8x32xbf16, #tpu.memory_space<vmem>>, vector<1x8x32xbf16>
    %487 = vector.shape_cast %486 : vector<1x8x32xbf16> to vector<8x32xbf16>
    %cst_275 = arith.constant dense<0.000000e+00> : vector<8x32xf32>
    %488 = tpu.matmul %485, %487, %cst_275 {dimension_numbers = #tpu.dot_dimension_numbers<[1], [0], [0], [1], [0, 0, 1, 1], [], []>} : vector<8x8xbf16>, vector<8x32xbf16>, vector<8x32xf32> -> vector<8x32xf32>
    %489 = arith.addf %440, %488 : vector<8x32xf32>
    %490 = vector.broadcast %288 : vector<1x32xf32> to vector<8x32xf32>
    %491 = arith.addf %489, %490 : vector<8x32xf32>
    %492 = arith.addf %284, %491 : vector<8x32xf32>
    %cst_276 = arith.constant dense<0.000000e+00> : vector<8xf32>
    %493 = vector.multi_reduction <add>, %492, %cst_276 [1] : vector<8x32xf32> to vector<8xf32>
    %494 = vector.shape_cast %493 : vector<8xf32> to vector<8x1xf32>
    %cst_277 = arith.constant 3.200000e+01 : f32
    %495 = vector.broadcast %cst_277 : f32 to vector<8x1xf32>
    %496 = arith.divf %494, %495 : vector<8x1xf32>
    %497 = vector.broadcast %496 : vector<8x1xf32> to vector<8x32xf32>
    %498 = arith.subf %492, %497 : vector<8x32xf32>
    %499 = arith.mulf %498, %498 : vector<8x32xf32>
    %cst_278 = arith.constant dense<0.000000e+00> : vector<8xf32>
    %500 = vector.multi_reduction <add>, %499, %cst_278 [1] : vector<8x32xf32> to vector<8xf32>
    %501 = vector.shape_cast %500 : vector<8xf32> to vector<8x1xf32>
    %cst_279 = arith.constant 3.200000e+01 : f32
    %502 = vector.broadcast %cst_279 : f32 to vector<8x1xf32>
    %503 = arith.divf %501, %502 : vector<8x1xf32>
    %504 = vector.broadcast %496 : vector<8x1xf32> to vector<8x32xf32>
    %505 = arith.subf %492, %504 : vector<8x32xf32>
    %cst_280 = arith.constant 9.99999974E-6 : f32
    %506 = vector.broadcast %cst_280 : f32 to vector<8x1xf32>
    %507 = arith.addf %503, %506 : vector<8x1xf32>
    %508 = math.rsqrt %507 : vector<8x1xf32>
    %509 = vector.broadcast %508 : vector<8x1xf32> to vector<8x32xf32>
    %510 = arith.mulf %505, %509 : vector<8x32xf32>
    %511 = vector.broadcast %289 : vector<1x32xf32> to vector<8x32xf32>
    %512 = arith.mulf %510, %511 : vector<8x32xf32>
    %513 = vector.broadcast %290 : vector<1x32xf32> to vector<8x32xf32>
    %514 = arith.addf %512, %513 : vector<8x32xf32>
    %c3_281 = arith.constant 3 : index
    %c0_282 = arith.constant 0 : index
    %c0_283 = arith.constant 0 : index
    %515 = vector.load %arg13[%c3_281, %c0_282, %c0_283] : memref<4x2x32xf32, #tpu.memory_space<vmem>>, vector<1x2x32xf32>
    %516 = vector.shape_cast %515 : vector<1x2x32xf32> to vector<2x32xf32>
    %c1_284 = arith.constant 1 : index
    %c0_285 = arith.constant 0 : index
    %c0_286 = arith.constant 0 : index
    %517 = vector.load %arg9[%c1_284, %c0_285, %c0_286] : memref<2x32x64xbf16, #tpu.memory_space<vmem>>, vector<1x32x64xbf16>
    %518 = vector.shape_cast %517 : vector<1x32x64xbf16> to vector<32x64xbf16>
    %c1_287 = arith.constant 1 : index
    %c0_288 = arith.constant 0 : index
    %c0_289 = arith.constant 0 : index
    %519 = vector.load %arg10[%c1_287, %c0_288, %c0_289] : memref<2x1x64xf32, #tpu.memory_space<vmem>>, vector<1x1x64xf32>
    %520 = vector.shape_cast %519 : vector<1x1x64xf32> to vector<1x64xf32>
    %c1_290 = arith.constant 1 : index
    %c0_291 = arith.constant 0 : index
    %c0_292 = arith.constant 0 : index
    %521 = vector.load %arg11[%c1_290, %c0_291, %c0_292] : memref<2x64x32xbf16, #tpu.memory_space<vmem>>, vector<1x64x32xbf16>
    %522 = vector.shape_cast %521 : vector<1x64x32xbf16> to vector<64x32xbf16>
    %c1_293 = arith.constant 1 : index
    %c0_294 = arith.constant 0 : index
    %c0_295 = arith.constant 0 : index
    %523 = vector.load %arg12[%c1_293, %c0_294, %c0_295] : memref<2x1x32xf32, #tpu.memory_space<vmem>>, vector<1x1x32xf32>
    %524 = vector.shape_cast %523 : vector<1x1x32xf32> to vector<1x32xf32>
    %525 = vector.extract_strided_slice %516 {offsets = [0, 0], sizes = [1, 32], strides = [1, 1]} : vector<2x32xf32> to vector<1x32xf32>
    %526 = vector.extract_strided_slice %516 {offsets = [1, 0], sizes = [1, 32], strides = [1, 1]} : vector<2x32xf32> to vector<1x32xf32>
    %527 = arith.truncf %514 : vector<8x32xf32> to vector<8x32xbf16>
    %cst_296 = arith.constant dense<0.000000e+00> : vector<8x64xf32>
    %528 = tpu.matmul %527, %518, %cst_296 {dimension_numbers = #tpu.dot_dimension_numbers<[1], [0], [0], [1], [0, 0, 1, 1], [], []>} : vector<8x32xbf16>, vector<32x64xbf16>, vector<8x64xf32> -> vector<8x64xf32>
    %529 = vector.broadcast %520 : vector<1x64xf32> to vector<8x64xf32>
    %530 = arith.addf %528, %529 : vector<8x64xf32>
    %cst_297 = arith.constant 0.000000e+00 : f32
    %531 = vector.broadcast %cst_297 : f32 to vector<8x64xf32>
    %532 = arith.maximumf %530, %531 : vector<8x64xf32>
    %533 = arith.truncf %532 : vector<8x64xf32> to vector<8x64xbf16>
    %cst_298 = arith.constant dense<0.000000e+00> : vector<8x32xf32>
    %534 = tpu.matmul %533, %522, %cst_298 {dimension_numbers = #tpu.dot_dimension_numbers<[1], [0], [0], [1], [0, 0, 1, 1], [], []>} : vector<8x64xbf16>, vector<64x32xbf16>, vector<8x32xf32> -> vector<8x32xf32>
    %535 = vector.broadcast %524 : vector<1x32xf32> to vector<8x32xf32>
    %536 = arith.addf %534, %535 : vector<8x32xf32>
    %537 = arith.addf %514, %536 : vector<8x32xf32>
    %cst_299 = arith.constant dense<0.000000e+00> : vector<8xf32>
    %538 = vector.multi_reduction <add>, %537, %cst_299 [1] : vector<8x32xf32> to vector<8xf32>
    %539 = vector.shape_cast %538 : vector<8xf32> to vector<8x1xf32>
    %cst_300 = arith.constant 3.200000e+01 : f32
    %540 = vector.broadcast %cst_300 : f32 to vector<8x1xf32>
    %541 = arith.divf %539, %540 : vector<8x1xf32>
    %542 = vector.broadcast %541 : vector<8x1xf32> to vector<8x32xf32>
    %543 = arith.subf %537, %542 : vector<8x32xf32>
    %544 = arith.mulf %543, %543 : vector<8x32xf32>
    %cst_301 = arith.constant dense<0.000000e+00> : vector<8xf32>
    %545 = vector.multi_reduction <add>, %544, %cst_301 [1] : vector<8x32xf32> to vector<8xf32>
    %546 = vector.shape_cast %545 : vector<8xf32> to vector<8x1xf32>
    %cst_302 = arith.constant 3.200000e+01 : f32
    %547 = vector.broadcast %cst_302 : f32 to vector<8x1xf32>
    %548 = arith.divf %546, %547 : vector<8x1xf32>
    %549 = vector.broadcast %541 : vector<8x1xf32> to vector<8x32xf32>
    %550 = arith.subf %537, %549 : vector<8x32xf32>
    %cst_303 = arith.constant 9.99999974E-6 : f32
    %551 = vector.broadcast %cst_303 : f32 to vector<8x1xf32>
    %552 = arith.addf %548, %551 : vector<8x1xf32>
    %553 = math.rsqrt %552 : vector<8x1xf32>
    %554 = vector.broadcast %553 : vector<8x1xf32> to vector<8x32xf32>
    %555 = arith.mulf %550, %554 : vector<8x32xf32>
    %556 = vector.broadcast %525 : vector<1x32xf32> to vector<8x32xf32>
    %557 = arith.mulf %555, %556 : vector<8x32xf32>
    %558 = vector.broadcast %526 : vector<1x32xf32> to vector<8x32xf32>
    %559 = arith.addf %557, %558 : vector<8x32xf32>
    %c0_304 = arith.constant 0 : index
    %c0_305 = arith.constant 0 : index
    %c0_306 = arith.constant 0 : index
    %560 = vector.load %arg2[%c0_304, %c0_305, %c0_306] : memref<1x8x32xf32, #tpu.memory_space<vmem>>, vector<1x8x32xf32>
    %561 = vector.shape_cast %560 : vector<1x8x32xf32> to vector<8x32xf32>
    %c0_307 = arith.constant 0 : index
    %c0_308 = arith.constant 0 : index
    %c0_309 = arith.constant 0 : index
    %562 = vector.load %arg22[%c0_307, %c0_308, %c0_309] : memref<6x2x32xf32, #tpu.memory_space<vmem>>, vector<1x2x32xf32>
    %563 = vector.shape_cast %562 : vector<1x2x32xf32> to vector<2x32xf32>
    %c0_310 = arith.constant 0 : index
    %c0_311 = arith.constant 0 : index
    %c0_312 = arith.constant 0 : index
    %564 = vector.load %arg17[%c0_310, %c0_311, %c0_312] : memref<4x1x32xf32, #tpu.memory_space<vmem>>, vector<1x1x32xf32>
    %565 = vector.shape_cast %564 : vector<1x1x32xf32> to vector<1x32xf32>
    %566 = vector.extract_strided_slice %563 {offsets = [0, 0], sizes = [1, 32], strides = [1, 1]} : vector<2x32xf32> to vector<1x32xf32>
    %567 = vector.extract_strided_slice %563 {offsets = [1, 0], sizes = [1, 32], strides = [1, 1]} : vector<2x32xf32> to vector<1x32xf32>
    %568 = arith.truncf %561 : vector<8x32xf32> to vector<8x32xbf16>
    %569 = arith.truncf %561 : vector<8x32xf32> to vector<8x32xbf16>
    %570 = tpu.iota {dimensions = array<i32: 0>} : vector<8x8xi32>
    %571 = tpu.iota {dimensions = array<i32: 1>} : vector<8x8xi32>
    %572 = arith.cmpi sle, %571, %570 : vector<8x8xi32>
    %573 = vector.broadcast %7 : vector<1x8xi1> to vector<8x8xi1>
    %574 = arith.andi %573, %572 : vector<8x8xi1>
    %cst_313 = arith.constant 0.000000e+00 : f32
    %575 = vector.broadcast %cst_313 : f32 to vector<8x32xf32>
    %c0_314 = arith.constant 0 : index
    %c0_315 = arith.constant 0 : index
    %c0_316 = arith.constant 0 : index
    %576 = vector.load %arg14[%c0_314, %c0_315, %c0_316] : memref<48x32x8xbf16, #tpu.memory_space<vmem>>, vector<1x32x8xbf16>
    %577 = vector.shape_cast %576 : vector<1x32x8xbf16> to vector<32x8xbf16>
    %cst_317 = arith.constant dense<0.000000e+00> : vector<8x8xf32>
    %578 = tpu.matmul %568, %577, %cst_317 {dimension_numbers = #tpu.dot_dimension_numbers<[1], [0], [0], [1], [0, 0, 1, 1], [], []>} : vector<8x32xbf16>, vector<32x8xbf16>, vector<8x8xf32> -> vector<8x8xf32>
    %c0_318 = arith.constant 0 : index
    %c0_319 = arith.constant 0 : index
    %c0_320 = arith.constant 0 : index
    %579 = vector.load %arg15[%c0_318, %c0_319, %c0_320] : memref<48x1x8xf32, #tpu.memory_space<vmem>>, vector<1x1x8xf32>
    %580 = vector.shape_cast %579 : vector<1x1x8xf32> to vector<1x8xf32>
    %581 = vector.broadcast %580 : vector<1x8xf32> to vector<8x8xf32>
    %582 = arith.addf %578, %581 : vector<8x8xf32>
    %c4_321 = arith.constant 4 : index
    %c0_322 = arith.constant 0 : index
    %c0_323 = arith.constant 0 : index
    %583 = vector.load %arg14[%c4_321, %c0_322, %c0_323] : memref<48x32x8xbf16, #tpu.memory_space<vmem>>, vector<1x32x8xbf16>
    %584 = vector.shape_cast %583 : vector<1x32x8xbf16> to vector<32x8xbf16>
    %cst_324 = arith.constant dense<0.000000e+00> : vector<8x8xf32>
    %585 = tpu.matmul %569, %584, %cst_324 {dimension_numbers = #tpu.dot_dimension_numbers<[1], [0], [0], [1], [0, 0, 1, 1], [], []>} : vector<8x32xbf16>, vector<32x8xbf16>, vector<8x8xf32> -> vector<8x8xf32>
    %c4_325 = arith.constant 4 : index
    %c0_326 = arith.constant 0 : index
    %c0_327 = arith.constant 0 : index
    %586 = vector.load %arg15[%c4_325, %c0_326, %c0_327] : memref<48x1x8xf32, #tpu.memory_space<vmem>>, vector<1x1x8xf32>
    %587 = vector.shape_cast %586 : vector<1x1x8xf32> to vector<1x8xf32>
    %588 = vector.broadcast %587 : vector<1x8xf32> to vector<8x8xf32>
    %589 = arith.addf %585, %588 : vector<8x8xf32>
    %c8_328 = arith.constant 8 : index
    %c0_329 = arith.constant 0 : index
    %c0_330 = arith.constant 0 : index
    %590 = vector.load %arg14[%c8_328, %c0_329, %c0_330] : memref<48x32x8xbf16, #tpu.memory_space<vmem>>, vector<1x32x8xbf16>
    %591 = vector.shape_cast %590 : vector<1x32x8xbf16> to vector<32x8xbf16>
    %cst_331 = arith.constant dense<0.000000e+00> : vector<8x8xf32>
    %592 = tpu.matmul %569, %591, %cst_331 {dimension_numbers = #tpu.dot_dimension_numbers<[1], [0], [0], [1], [0, 0, 1, 1], [], []>} : vector<8x32xbf16>, vector<32x8xbf16>, vector<8x8xf32> -> vector<8x8xf32>
    %c8_332 = arith.constant 8 : index
    %c0_333 = arith.constant 0 : index
    %c0_334 = arith.constant 0 : index
    %593 = vector.load %arg15[%c8_332, %c0_333, %c0_334] : memref<48x1x8xf32, #tpu.memory_space<vmem>>, vector<1x1x8xf32>
    %594 = vector.shape_cast %593 : vector<1x1x8xf32> to vector<1x8xf32>
    %595 = vector.broadcast %594 : vector<1x8xf32> to vector<8x8xf32>
    %596 = arith.addf %592, %595 : vector<8x8xf32>
    %597 = arith.truncf %582 : vector<8x8xf32> to vector<8x8xbf16>
    %598 = tpu.transpose %589, [1, 0] : vector<8x8xf32> -> vector<8x8xf32>
    %599 = arith.truncf %598 : vector<8x8xf32> to vector<8x8xbf16>
    %cst_335 = arith.constant dense<0.000000e+00> : vector<8x8xf32>
    %600 = tpu.matmul %597, %599, %cst_335 {dimension_numbers = #tpu.dot_dimension_numbers<[1], [0], [0], [1], [0, 0, 1, 1], [], []>} : vector<8x8xbf16>, vector<8x8xbf16>, vector<8x8xf32> -> vector<8x8xf32>
    %cst_336 = arith.constant 0.353553385 : f32
    %601 = vector.broadcast %cst_336 : f32 to vector<8x8xf32>
    %602 = arith.mulf %600, %601 : vector<8x8xf32>
    %cst_337 = arith.constant -1.000000e+10 : f32
    %603 = vector.broadcast %cst_337 : f32 to vector<8x8xf32>
    %604 = arith.select %574, %602, %603 : vector<8x8xi1>, vector<8x8xf32>
    %cst_338 = arith.constant dense<0xFF800000> : vector<8xf32>
    %605 = vector.multi_reduction <maximumf>, %604, %cst_338 [1] : vector<8x8xf32> to vector<8xf32>
    %606 = vector.shape_cast %605 : vector<8xf32> to vector<8x1xf32>
    %607 = vector.broadcast %606 : vector<8x1xf32> to vector<8x8xf32>
    %608 = arith.subf %604, %607 : vector<8x8xf32>
    %609 = math.exp %608 : vector<8x8xf32>
    %cst_339 = arith.constant dense<0.000000e+00> : vector<8xf32>
    %610 = vector.multi_reduction <add>, %609, %cst_339 [1] : vector<8x8xf32> to vector<8xf32>
    %611 = vector.shape_cast %610 : vector<8xf32> to vector<8x1xf32>
    %612 = tpu.reciprocal %611 {approx = true} : vector<8x1xf32> -> vector<8x1xf32>
    %613 = vector.broadcast %612 : vector<8x1xf32> to vector<8x8xf32>
    %614 = arith.mulf %609, %613 : vector<8x8xf32>
    %615 = arith.truncf %614 : vector<8x8xf32> to vector<8x8xbf16>
    %616 = arith.truncf %596 : vector<8x8xf32> to vector<8x8xbf16>
    %cst_340 = arith.constant dense<0.000000e+00> : vector<8x8xf32>
    %617 = tpu.matmul %615, %616, %cst_340 {dimension_numbers = #tpu.dot_dimension_numbers<[1], [0], [0], [1], [0, 0, 1, 1], [], []>} : vector<8x8xbf16>, vector<8x8xbf16>, vector<8x8xf32> -> vector<8x8xf32>
    %618 = arith.truncf %617 : vector<8x8xf32> to vector<8x8xbf16>
    %c0_341 = arith.constant 0 : index
    %c0_342 = arith.constant 0 : index
    %c0_343 = arith.constant 0 : index
    %619 = vector.load %arg16[%c0_341, %c0_342, %c0_343] : memref<16x8x32xbf16, #tpu.memory_space<vmem>>, vector<1x8x32xbf16>
    %620 = vector.shape_cast %619 : vector<1x8x32xbf16> to vector<8x32xbf16>
    %cst_344 = arith.constant dense<0.000000e+00> : vector<8x32xf32>
    %621 = tpu.matmul %618, %620, %cst_344 {dimension_numbers = #tpu.dot_dimension_numbers<[1], [0], [0], [1], [0, 0, 1, 1], [], []>} : vector<8x8xbf16>, vector<8x32xbf16>, vector<8x32xf32> -> vector<8x32xf32>
    %622 = arith.addf %575, %621 : vector<8x32xf32>
    %c1_345 = arith.constant 1 : index
    %c0_346 = arith.constant 0 : index
    %c0_347 = arith.constant 0 : index
    %623 = vector.load %arg14[%c1_345, %c0_346, %c0_347] : memref<48x32x8xbf16, #tpu.memory_space<vmem>>, vector<1x32x8xbf16>
    %624 = vector.shape_cast %623 : vector<1x32x8xbf16> to vector<32x8xbf16>
    %cst_348 = arith.constant dense<0.000000e+00> : vector<8x8xf32>
    %625 = tpu.matmul %568, %624, %cst_348 {dimension_numbers = #tpu.dot_dimension_numbers<[1], [0], [0], [1], [0, 0, 1, 1], [], []>} : vector<8x32xbf16>, vector<32x8xbf16>, vector<8x8xf32> -> vector<8x8xf32>
    %c1_349 = arith.constant 1 : index
    %c0_350 = arith.constant 0 : index
    %c0_351 = arith.constant 0 : index
    %626 = vector.load %arg15[%c1_349, %c0_350, %c0_351] : memref<48x1x8xf32, #tpu.memory_space<vmem>>, vector<1x1x8xf32>
    %627 = vector.shape_cast %626 : vector<1x1x8xf32> to vector<1x8xf32>
    %628 = vector.broadcast %627 : vector<1x8xf32> to vector<8x8xf32>
    %629 = arith.addf %625, %628 : vector<8x8xf32>
    %c5_352 = arith.constant 5 : index
    %c0_353 = arith.constant 0 : index
    %c0_354 = arith.constant 0 : index
    %630 = vector.load %arg14[%c5_352, %c0_353, %c0_354] : memref<48x32x8xbf16, #tpu.memory_space<vmem>>, vector<1x32x8xbf16>
    %631 = vector.shape_cast %630 : vector<1x32x8xbf16> to vector<32x8xbf16>
    %cst_355 = arith.constant dense<0.000000e+00> : vector<8x8xf32>
    %632 = tpu.matmul %569, %631, %cst_355 {dimension_numbers = #tpu.dot_dimension_numbers<[1], [0], [0], [1], [0, 0, 1, 1], [], []>} : vector<8x32xbf16>, vector<32x8xbf16>, vector<8x8xf32> -> vector<8x8xf32>
    %c5_356 = arith.constant 5 : index
    %c0_357 = arith.constant 0 : index
    %c0_358 = arith.constant 0 : index
    %633 = vector.load %arg15[%c5_356, %c0_357, %c0_358] : memref<48x1x8xf32, #tpu.memory_space<vmem>>, vector<1x1x8xf32>
    %634 = vector.shape_cast %633 : vector<1x1x8xf32> to vector<1x8xf32>
    %635 = vector.broadcast %634 : vector<1x8xf32> to vector<8x8xf32>
    %636 = arith.addf %632, %635 : vector<8x8xf32>
    %c9_359 = arith.constant 9 : index
    %c0_360 = arith.constant 0 : index
    %c0_361 = arith.constant 0 : index
    %637 = vector.load %arg14[%c9_359, %c0_360, %c0_361] : memref<48x32x8xbf16, #tpu.memory_space<vmem>>, vector<1x32x8xbf16>
    %638 = vector.shape_cast %637 : vector<1x32x8xbf16> to vector<32x8xbf16>
    %cst_362 = arith.constant dense<0.000000e+00> : vector<8x8xf32>
    %639 = tpu.matmul %569, %638, %cst_362 {dimension_numbers = #tpu.dot_dimension_numbers<[1], [0], [0], [1], [0, 0, 1, 1], [], []>} : vector<8x32xbf16>, vector<32x8xbf16>, vector<8x8xf32> -> vector<8x8xf32>
    %c9_363 = arith.constant 9 : index
    %c0_364 = arith.constant 0 : index
    %c0_365 = arith.constant 0 : index
    %640 = vector.load %arg15[%c9_363, %c0_364, %c0_365] : memref<48x1x8xf32, #tpu.memory_space<vmem>>, vector<1x1x8xf32>
    %641 = vector.shape_cast %640 : vector<1x1x8xf32> to vector<1x8xf32>
    %642 = vector.broadcast %641 : vector<1x8xf32> to vector<8x8xf32>
    %643 = arith.addf %639, %642 : vector<8x8xf32>
    %644 = arith.truncf %629 : vector<8x8xf32> to vector<8x8xbf16>
    %645 = tpu.transpose %636, [1, 0] : vector<8x8xf32> -> vector<8x8xf32>
    %646 = arith.truncf %645 : vector<8x8xf32> to vector<8x8xbf16>
    %cst_366 = arith.constant dense<0.000000e+00> : vector<8x8xf32>
    %647 = tpu.matmul %644, %646, %cst_366 {dimension_numbers = #tpu.dot_dimension_numbers<[1], [0], [0], [1], [0, 0, 1, 1], [], []>} : vector<8x8xbf16>, vector<8x8xbf16>, vector<8x8xf32> -> vector<8x8xf32>
    %cst_367 = arith.constant 0.353553385 : f32
    %648 = vector.broadcast %cst_367 : f32 to vector<8x8xf32>
    %649 = arith.mulf %647, %648 : vector<8x8xf32>
    %cst_368 = arith.constant -1.000000e+10 : f32
    %650 = vector.broadcast %cst_368 : f32 to vector<8x8xf32>
    %651 = arith.select %574, %649, %650 : vector<8x8xi1>, vector<8x8xf32>
    %cst_369 = arith.constant dense<0xFF800000> : vector<8xf32>
    %652 = vector.multi_reduction <maximumf>, %651, %cst_369 [1] : vector<8x8xf32> to vector<8xf32>
    %653 = vector.shape_cast %652 : vector<8xf32> to vector<8x1xf32>
    %654 = vector.broadcast %653 : vector<8x1xf32> to vector<8x8xf32>
    %655 = arith.subf %651, %654 : vector<8x8xf32>
    %656 = math.exp %655 : vector<8x8xf32>
    %cst_370 = arith.constant dense<0.000000e+00> : vector<8xf32>
    %657 = vector.multi_reduction <add>, %656, %cst_370 [1] : vector<8x8xf32> to vector<8xf32>
    %658 = vector.shape_cast %657 : vector<8xf32> to vector<8x1xf32>
    %659 = tpu.reciprocal %658 {approx = true} : vector<8x1xf32> -> vector<8x1xf32>
    %660 = vector.broadcast %659 : vector<8x1xf32> to vector<8x8xf32>
    %661 = arith.mulf %656, %660 : vector<8x8xf32>
    %662 = arith.truncf %661 : vector<8x8xf32> to vector<8x8xbf16>
    %663 = arith.truncf %643 : vector<8x8xf32> to vector<8x8xbf16>
    %cst_371 = arith.constant dense<0.000000e+00> : vector<8x8xf32>
    %664 = tpu.matmul %662, %663, %cst_371 {dimension_numbers = #tpu.dot_dimension_numbers<[1], [0], [0], [1], [0, 0, 1, 1], [], []>} : vector<8x8xbf16>, vector<8x8xbf16>, vector<8x8xf32> -> vector<8x8xf32>
    %665 = arith.truncf %664 : vector<8x8xf32> to vector<8x8xbf16>
    %c1_372 = arith.constant 1 : index
    %c0_373 = arith.constant 0 : index
    %c0_374 = arith.constant 0 : index
    %666 = vector.load %arg16[%c1_372, %c0_373, %c0_374] : memref<16x8x32xbf16, #tpu.memory_space<vmem>>, vector<1x8x32xbf16>
    %667 = vector.shape_cast %666 : vector<1x8x32xbf16> to vector<8x32xbf16>
    %cst_375 = arith.constant dense<0.000000e+00> : vector<8x32xf32>
    %668 = tpu.matmul %665, %667, %cst_375 {dimension_numbers = #tpu.dot_dimension_numbers<[1], [0], [0], [1], [0, 0, 1, 1], [], []>} : vector<8x8xbf16>, vector<8x32xbf16>, vector<8x32xf32> -> vector<8x32xf32>
    %669 = arith.addf %622, %668 : vector<8x32xf32>
    %c2_376 = arith.constant 2 : index
    %c0_377 = arith.constant 0 : index
    %c0_378 = arith.constant 0 : index
    %670 = vector.load %arg14[%c2_376, %c0_377, %c0_378] : memref<48x32x8xbf16, #tpu.memory_space<vmem>>, vector<1x32x8xbf16>
    %671 = vector.shape_cast %670 : vector<1x32x8xbf16> to vector<32x8xbf16>
    %cst_379 = arith.constant dense<0.000000e+00> : vector<8x8xf32>
    %672 = tpu.matmul %568, %671, %cst_379 {dimension_numbers = #tpu.dot_dimension_numbers<[1], [0], [0], [1], [0, 0, 1, 1], [], []>} : vector<8x32xbf16>, vector<32x8xbf16>, vector<8x8xf32> -> vector<8x8xf32>
    %c2_380 = arith.constant 2 : index
    %c0_381 = arith.constant 0 : index
    %c0_382 = arith.constant 0 : index
    %673 = vector.load %arg15[%c2_380, %c0_381, %c0_382] : memref<48x1x8xf32, #tpu.memory_space<vmem>>, vector<1x1x8xf32>
    %674 = vector.shape_cast %673 : vector<1x1x8xf32> to vector<1x8xf32>
    %675 = vector.broadcast %674 : vector<1x8xf32> to vector<8x8xf32>
    %676 = arith.addf %672, %675 : vector<8x8xf32>
    %c6_383 = arith.constant 6 : index
    %c0_384 = arith.constant 0 : index
    %c0_385 = arith.constant 0 : index
    %677 = vector.load %arg14[%c6_383, %c0_384, %c0_385] : memref<48x32x8xbf16, #tpu.memory_space<vmem>>, vector<1x32x8xbf16>
    %678 = vector.shape_cast %677 : vector<1x32x8xbf16> to vector<32x8xbf16>
    %cst_386 = arith.constant dense<0.000000e+00> : vector<8x8xf32>
    %679 = tpu.matmul %569, %678, %cst_386 {dimension_numbers = #tpu.dot_dimension_numbers<[1], [0], [0], [1], [0, 0, 1, 1], [], []>} : vector<8x32xbf16>, vector<32x8xbf16>, vector<8x8xf32> -> vector<8x8xf32>
    %c6_387 = arith.constant 6 : index
    %c0_388 = arith.constant 0 : index
    %c0_389 = arith.constant 0 : index
    %680 = vector.load %arg15[%c6_387, %c0_388, %c0_389] : memref<48x1x8xf32, #tpu.memory_space<vmem>>, vector<1x1x8xf32>
    %681 = vector.shape_cast %680 : vector<1x1x8xf32> to vector<1x8xf32>
    %682 = vector.broadcast %681 : vector<1x8xf32> to vector<8x8xf32>
    %683 = arith.addf %679, %682 : vector<8x8xf32>
    %c10_390 = arith.constant 10 : index
    %c0_391 = arith.constant 0 : index
    %c0_392 = arith.constant 0 : index
    %684 = vector.load %arg14[%c10_390, %c0_391, %c0_392] : memref<48x32x8xbf16, #tpu.memory_space<vmem>>, vector<1x32x8xbf16>
    %685 = vector.shape_cast %684 : vector<1x32x8xbf16> to vector<32x8xbf16>
    %cst_393 = arith.constant dense<0.000000e+00> : vector<8x8xf32>
    %686 = tpu.matmul %569, %685, %cst_393 {dimension_numbers = #tpu.dot_dimension_numbers<[1], [0], [0], [1], [0, 0, 1, 1], [], []>} : vector<8x32xbf16>, vector<32x8xbf16>, vector<8x8xf32> -> vector<8x8xf32>
    %c10_394 = arith.constant 10 : index
    %c0_395 = arith.constant 0 : index
    %c0_396 = arith.constant 0 : index
    %687 = vector.load %arg15[%c10_394, %c0_395, %c0_396] : memref<48x1x8xf32, #tpu.memory_space<vmem>>, vector<1x1x8xf32>
    %688 = vector.shape_cast %687 : vector<1x1x8xf32> to vector<1x8xf32>
    %689 = vector.broadcast %688 : vector<1x8xf32> to vector<8x8xf32>
    %690 = arith.addf %686, %689 : vector<8x8xf32>
    %691 = arith.truncf %676 : vector<8x8xf32> to vector<8x8xbf16>
    %692 = tpu.transpose %683, [1, 0] : vector<8x8xf32> -> vector<8x8xf32>
    %693 = arith.truncf %692 : vector<8x8xf32> to vector<8x8xbf16>
    %cst_397 = arith.constant dense<0.000000e+00> : vector<8x8xf32>
    %694 = tpu.matmul %691, %693, %cst_397 {dimension_numbers = #tpu.dot_dimension_numbers<[1], [0], [0], [1], [0, 0, 1, 1], [], []>} : vector<8x8xbf16>, vector<8x8xbf16>, vector<8x8xf32> -> vector<8x8xf32>
    %cst_398 = arith.constant 0.353553385 : f32
    %695 = vector.broadcast %cst_398 : f32 to vector<8x8xf32>
    %696 = arith.mulf %694, %695 : vector<8x8xf32>
    %cst_399 = arith.constant -1.000000e+10 : f32
    %697 = vector.broadcast %cst_399 : f32 to vector<8x8xf32>
    %698 = arith.select %574, %696, %697 : vector<8x8xi1>, vector<8x8xf32>
    %cst_400 = arith.constant dense<0xFF800000> : vector<8xf32>
    %699 = vector.multi_reduction <maximumf>, %698, %cst_400 [1] : vector<8x8xf32> to vector<8xf32>
    %700 = vector.shape_cast %699 : vector<8xf32> to vector<8x1xf32>
    %701 = vector.broadcast %700 : vector<8x1xf32> to vector<8x8xf32>
    %702 = arith.subf %698, %701 : vector<8x8xf32>
    %703 = math.exp %702 : vector<8x8xf32>
    %cst_401 = arith.constant dense<0.000000e+00> : vector<8xf32>
    %704 = vector.multi_reduction <add>, %703, %cst_401 [1] : vector<8x8xf32> to vector<8xf32>
    %705 = vector.shape_cast %704 : vector<8xf32> to vector<8x1xf32>
    %706 = tpu.reciprocal %705 {approx = true} : vector<8x1xf32> -> vector<8x1xf32>
    %707 = vector.broadcast %706 : vector<8x1xf32> to vector<8x8xf32>
    %708 = arith.mulf %703, %707 : vector<8x8xf32>
    %709 = arith.truncf %708 : vector<8x8xf32> to vector<8x8xbf16>
    %710 = arith.truncf %690 : vector<8x8xf32> to vector<8x8xbf16>
    %cst_402 = arith.constant dense<0.000000e+00> : vector<8x8xf32>
    %711 = tpu.matmul %709, %710, %cst_402 {dimension_numbers = #tpu.dot_dimension_numbers<[1], [0], [0], [1], [0, 0, 1, 1], [], []>} : vector<8x8xbf16>, vector<8x8xbf16>, vector<8x8xf32> -> vector<8x8xf32>
    %712 = arith.truncf %711 : vector<8x8xf32> to vector<8x8xbf16>
    %c2_403 = arith.constant 2 : index
    %c0_404 = arith.constant 0 : index
    %c0_405 = arith.constant 0 : index
    %713 = vector.load %arg16[%c2_403, %c0_404, %c0_405] : memref<16x8x32xbf16, #tpu.memory_space<vmem>>, vector<1x8x32xbf16>
    %714 = vector.shape_cast %713 : vector<1x8x32xbf16> to vector<8x32xbf16>
    %cst_406 = arith.constant dense<0.000000e+00> : vector<8x32xf32>
    %715 = tpu.matmul %712, %714, %cst_406 {dimension_numbers = #tpu.dot_dimension_numbers<[1], [0], [0], [1], [0, 0, 1, 1], [], []>} : vector<8x8xbf16>, vector<8x32xbf16>, vector<8x32xf32> -> vector<8x32xf32>
    %716 = arith.addf %669, %715 : vector<8x32xf32>
    %c3_407 = arith.constant 3 : index
    %c0_408 = arith.constant 0 : index
    %c0_409 = arith.constant 0 : index
    %717 = vector.load %arg14[%c3_407, %c0_408, %c0_409] : memref<48x32x8xbf16, #tpu.memory_space<vmem>>, vector<1x32x8xbf16>
    %718 = vector.shape_cast %717 : vector<1x32x8xbf16> to vector<32x8xbf16>
    %cst_410 = arith.constant dense<0.000000e+00> : vector<8x8xf32>
    %719 = tpu.matmul %568, %718, %cst_410 {dimension_numbers = #tpu.dot_dimension_numbers<[1], [0], [0], [1], [0, 0, 1, 1], [], []>} : vector<8x32xbf16>, vector<32x8xbf16>, vector<8x8xf32> -> vector<8x8xf32>
    %c3_411 = arith.constant 3 : index
    %c0_412 = arith.constant 0 : index
    %c0_413 = arith.constant 0 : index
    %720 = vector.load %arg15[%c3_411, %c0_412, %c0_413] : memref<48x1x8xf32, #tpu.memory_space<vmem>>, vector<1x1x8xf32>
    %721 = vector.shape_cast %720 : vector<1x1x8xf32> to vector<1x8xf32>
    %722 = vector.broadcast %721 : vector<1x8xf32> to vector<8x8xf32>
    %723 = arith.addf %719, %722 : vector<8x8xf32>
    %c7_414 = arith.constant 7 : index
    %c0_415 = arith.constant 0 : index
    %c0_416 = arith.constant 0 : index
    %724 = vector.load %arg14[%c7_414, %c0_415, %c0_416] : memref<48x32x8xbf16, #tpu.memory_space<vmem>>, vector<1x32x8xbf16>
    %725 = vector.shape_cast %724 : vector<1x32x8xbf16> to vector<32x8xbf16>
    %cst_417 = arith.constant dense<0.000000e+00> : vector<8x8xf32>
    %726 = tpu.matmul %569, %725, %cst_417 {dimension_numbers = #tpu.dot_dimension_numbers<[1], [0], [0], [1], [0, 0, 1, 1], [], []>} : vector<8x32xbf16>, vector<32x8xbf16>, vector<8x8xf32> -> vector<8x8xf32>
    %c7_418 = arith.constant 7 : index
    %c0_419 = arith.constant 0 : index
    %c0_420 = arith.constant 0 : index
    %727 = vector.load %arg15[%c7_418, %c0_419, %c0_420] : memref<48x1x8xf32, #tpu.memory_space<vmem>>, vector<1x1x8xf32>
    %728 = vector.shape_cast %727 : vector<1x1x8xf32> to vector<1x8xf32>
    %729 = vector.broadcast %728 : vector<1x8xf32> to vector<8x8xf32>
    %730 = arith.addf %726, %729 : vector<8x8xf32>
    %c11_421 = arith.constant 11 : index
    %c0_422 = arith.constant 0 : index
    %c0_423 = arith.constant 0 : index
    %731 = vector.load %arg14[%c11_421, %c0_422, %c0_423] : memref<48x32x8xbf16, #tpu.memory_space<vmem>>, vector<1x32x8xbf16>
    %732 = vector.shape_cast %731 : vector<1x32x8xbf16> to vector<32x8xbf16>
    %cst_424 = arith.constant dense<0.000000e+00> : vector<8x8xf32>
    %733 = tpu.matmul %569, %732, %cst_424 {dimension_numbers = #tpu.dot_dimension_numbers<[1], [0], [0], [1], [0, 0, 1, 1], [], []>} : vector<8x32xbf16>, vector<32x8xbf16>, vector<8x8xf32> -> vector<8x8xf32>
    %c11_425 = arith.constant 11 : index
    %c0_426 = arith.constant 0 : index
    %c0_427 = arith.constant 0 : index
    %734 = vector.load %arg15[%c11_425, %c0_426, %c0_427] : memref<48x1x8xf32, #tpu.memory_space<vmem>>, vector<1x1x8xf32>
    %735 = vector.shape_cast %734 : vector<1x1x8xf32> to vector<1x8xf32>
    %736 = vector.broadcast %735 : vector<1x8xf32> to vector<8x8xf32>
    %737 = arith.addf %733, %736 : vector<8x8xf32>
    %738 = arith.truncf %723 : vector<8x8xf32> to vector<8x8xbf16>
    %739 = tpu.transpose %730, [1, 0] : vector<8x8xf32> -> vector<8x8xf32>
    %740 = arith.truncf %739 : vector<8x8xf32> to vector<8x8xbf16>
    %cst_428 = arith.constant dense<0.000000e+00> : vector<8x8xf32>
    %741 = tpu.matmul %738, %740, %cst_428 {dimension_numbers = #tpu.dot_dimension_numbers<[1], [0], [0], [1], [0, 0, 1, 1], [], []>} : vector<8x8xbf16>, vector<8x8xbf16>, vector<8x8xf32> -> vector<8x8xf32>
    %cst_429 = arith.constant 0.353553385 : f32
    %742 = vector.broadcast %cst_429 : f32 to vector<8x8xf32>
    %743 = arith.mulf %741, %742 : vector<8x8xf32>
    %cst_430 = arith.constant -1.000000e+10 : f32
    %744 = vector.broadcast %cst_430 : f32 to vector<8x8xf32>
    %745 = arith.select %574, %743, %744 : vector<8x8xi1>, vector<8x8xf32>
    %cst_431 = arith.constant dense<0xFF800000> : vector<8xf32>
    %746 = vector.multi_reduction <maximumf>, %745, %cst_431 [1] : vector<8x8xf32> to vector<8xf32>
    %747 = vector.shape_cast %746 : vector<8xf32> to vector<8x1xf32>
    %748 = vector.broadcast %747 : vector<8x1xf32> to vector<8x8xf32>
    %749 = arith.subf %745, %748 : vector<8x8xf32>
    %750 = math.exp %749 : vector<8x8xf32>
    %cst_432 = arith.constant dense<0.000000e+00> : vector<8xf32>
    %751 = vector.multi_reduction <add>, %750, %cst_432 [1] : vector<8x8xf32> to vector<8xf32>
    %752 = vector.shape_cast %751 : vector<8xf32> to vector<8x1xf32>
    %753 = tpu.reciprocal %752 {approx = true} : vector<8x1xf32> -> vector<8x1xf32>
    %754 = vector.broadcast %753 : vector<8x1xf32> to vector<8x8xf32>
    %755 = arith.mulf %750, %754 : vector<8x8xf32>
    %756 = arith.truncf %755 : vector<8x8xf32> to vector<8x8xbf16>
    %757 = arith.truncf %737 : vector<8x8xf32> to vector<8x8xbf16>
    %cst_433 = arith.constant dense<0.000000e+00> : vector<8x8xf32>
    %758 = tpu.matmul %756, %757, %cst_433 {dimension_numbers = #tpu.dot_dimension_numbers<[1], [0], [0], [1], [0, 0, 1, 1], [], []>} : vector<8x8xbf16>, vector<8x8xbf16>, vector<8x8xf32> -> vector<8x8xf32>
    %759 = arith.truncf %758 : vector<8x8xf32> to vector<8x8xbf16>
    %c3_434 = arith.constant 3 : index
    %c0_435 = arith.constant 0 : index
    %c0_436 = arith.constant 0 : index
    %760 = vector.load %arg16[%c3_434, %c0_435, %c0_436] : memref<16x8x32xbf16, #tpu.memory_space<vmem>>, vector<1x8x32xbf16>
    %761 = vector.shape_cast %760 : vector<1x8x32xbf16> to vector<8x32xbf16>
    %cst_437 = arith.constant dense<0.000000e+00> : vector<8x32xf32>
    %762 = tpu.matmul %759, %761, %cst_437 {dimension_numbers = #tpu.dot_dimension_numbers<[1], [0], [0], [1], [0, 0, 1, 1], [], []>} : vector<8x8xbf16>, vector<8x32xbf16>, vector<8x32xf32> -> vector<8x32xf32>
    %763 = arith.addf %716, %762 : vector<8x32xf32>
    %764 = vector.broadcast %565 : vector<1x32xf32> to vector<8x32xf32>
    %765 = arith.addf %763, %764 : vector<8x32xf32>
    %766 = arith.addf %561, %765 : vector<8x32xf32>
    %cst_438 = arith.constant dense<0.000000e+00> : vector<8xf32>
    %767 = vector.multi_reduction <add>, %766, %cst_438 [1] : vector<8x32xf32> to vector<8xf32>
    %768 = vector.shape_cast %767 : vector<8xf32> to vector<8x1xf32>
    %cst_439 = arith.constant 3.200000e+01 : f32
    %769 = vector.broadcast %cst_439 : f32 to vector<8x1xf32>
    %770 = arith.divf %768, %769 : vector<8x1xf32>
    %771 = vector.broadcast %770 : vector<8x1xf32> to vector<8x32xf32>
    %772 = arith.subf %766, %771 : vector<8x32xf32>
    %773 = arith.mulf %772, %772 : vector<8x32xf32>
    %cst_440 = arith.constant dense<0.000000e+00> : vector<8xf32>
    %774 = vector.multi_reduction <add>, %773, %cst_440 [1] : vector<8x32xf32> to vector<8xf32>
    %775 = vector.shape_cast %774 : vector<8xf32> to vector<8x1xf32>
    %cst_441 = arith.constant 3.200000e+01 : f32
    %776 = vector.broadcast %cst_441 : f32 to vector<8x1xf32>
    %777 = arith.divf %775, %776 : vector<8x1xf32>
    %778 = vector.broadcast %770 : vector<8x1xf32> to vector<8x32xf32>
    %779 = arith.subf %766, %778 : vector<8x32xf32>
    %cst_442 = arith.constant 9.99999974E-6 : f32
    %780 = vector.broadcast %cst_442 : f32 to vector<8x1xf32>
    %781 = arith.addf %777, %780 : vector<8x1xf32>
    %782 = math.rsqrt %781 : vector<8x1xf32>
    %783 = vector.broadcast %782 : vector<8x1xf32> to vector<8x32xf32>
    %784 = arith.mulf %779, %783 : vector<8x32xf32>
    %785 = vector.broadcast %566 : vector<1x32xf32> to vector<8x32xf32>
    %786 = arith.mulf %784, %785 : vector<8x32xf32>
    %787 = vector.broadcast %567 : vector<1x32xf32> to vector<8x32xf32>
    %788 = arith.addf %786, %787 : vector<8x32xf32>
    %c1_443 = arith.constant 1 : index
    %c0_444 = arith.constant 0 : index
    %c0_445 = arith.constant 0 : index
    %789 = vector.load %arg22[%c1_443, %c0_444, %c0_445] : memref<6x2x32xf32, #tpu.memory_space<vmem>>, vector<1x2x32xf32>
    %790 = vector.shape_cast %789 : vector<1x2x32xf32> to vector<2x32xf32>
    %c1_446 = arith.constant 1 : index
    %c0_447 = arith.constant 0 : index
    %c0_448 = arith.constant 0 : index
    %791 = vector.load %arg17[%c1_446, %c0_447, %c0_448] : memref<4x1x32xf32, #tpu.memory_space<vmem>>, vector<1x1x32xf32>
    %792 = vector.shape_cast %791 : vector<1x1x32xf32> to vector<1x32xf32>
    %793 = vector.extract_strided_slice %790 {offsets = [0, 0], sizes = [1, 32], strides = [1, 1]} : vector<2x32xf32> to vector<1x32xf32>
    %794 = vector.extract_strided_slice %790 {offsets = [1, 0], sizes = [1, 32], strides = [1, 1]} : vector<2x32xf32> to vector<1x32xf32>
    %795 = arith.truncf %788 : vector<8x32xf32> to vector<8x32xbf16>
    %796 = arith.truncf %559 : vector<8x32xf32> to vector<8x32xbf16>
    %cst_449 = arith.constant 0.000000e+00 : f32
    %797 = vector.broadcast %cst_449 : f32 to vector<8x32xf32>
    %c12_450 = arith.constant 12 : index
    %c0_451 = arith.constant 0 : index
    %c0_452 = arith.constant 0 : index
    %798 = vector.load %arg14[%c12_450, %c0_451, %c0_452] : memref<48x32x8xbf16, #tpu.memory_space<vmem>>, vector<1x32x8xbf16>
    %799 = vector.shape_cast %798 : vector<1x32x8xbf16> to vector<32x8xbf16>
    %cst_453 = arith.constant dense<0.000000e+00> : vector<8x8xf32>
    %800 = tpu.matmul %795, %799, %cst_453 {dimension_numbers = #tpu.dot_dimension_numbers<[1], [0], [0], [1], [0, 0, 1, 1], [], []>} : vector<8x32xbf16>, vector<32x8xbf16>, vector<8x8xf32> -> vector<8x8xf32>
    %c12_454 = arith.constant 12 : index
    %c0_455 = arith.constant 0 : index
    %c0_456 = arith.constant 0 : index
    %801 = vector.load %arg15[%c12_454, %c0_455, %c0_456] : memref<48x1x8xf32, #tpu.memory_space<vmem>>, vector<1x1x8xf32>
    %802 = vector.shape_cast %801 : vector<1x1x8xf32> to vector<1x8xf32>
    %803 = vector.broadcast %802 : vector<1x8xf32> to vector<8x8xf32>
    %804 = arith.addf %800, %803 : vector<8x8xf32>
    %c16_457 = arith.constant 16 : index
    %c0_458 = arith.constant 0 : index
    %c0_459 = arith.constant 0 : index
    %805 = vector.load %arg14[%c16_457, %c0_458, %c0_459] : memref<48x32x8xbf16, #tpu.memory_space<vmem>>, vector<1x32x8xbf16>
    %806 = vector.shape_cast %805 : vector<1x32x8xbf16> to vector<32x8xbf16>
    %cst_460 = arith.constant dense<0.000000e+00> : vector<8x8xf32>
    %807 = tpu.matmul %796, %806, %cst_460 {dimension_numbers = #tpu.dot_dimension_numbers<[1], [0], [0], [1], [0, 0, 1, 1], [], []>} : vector<8x32xbf16>, vector<32x8xbf16>, vector<8x8xf32> -> vector<8x8xf32>
    %c16_461 = arith.constant 16 : index
    %c0_462 = arith.constant 0 : index
    %c0_463 = arith.constant 0 : index
    %808 = vector.load %arg15[%c16_461, %c0_462, %c0_463] : memref<48x1x8xf32, #tpu.memory_space<vmem>>, vector<1x1x8xf32>
    %809 = vector.shape_cast %808 : vector<1x1x8xf32> to vector<1x8xf32>
    %810 = vector.broadcast %809 : vector<1x8xf32> to vector<8x8xf32>
    %811 = arith.addf %807, %810 : vector<8x8xf32>
    %c20_464 = arith.constant 20 : index
    %c0_465 = arith.constant 0 : index
    %c0_466 = arith.constant 0 : index
    %812 = vector.load %arg14[%c20_464, %c0_465, %c0_466] : memref<48x32x8xbf16, #tpu.memory_space<vmem>>, vector<1x32x8xbf16>
    %813 = vector.shape_cast %812 : vector<1x32x8xbf16> to vector<32x8xbf16>
    %cst_467 = arith.constant dense<0.000000e+00> : vector<8x8xf32>
    %814 = tpu.matmul %796, %813, %cst_467 {dimension_numbers = #tpu.dot_dimension_numbers<[1], [0], [0], [1], [0, 0, 1, 1], [], []>} : vector<8x32xbf16>, vector<32x8xbf16>, vector<8x8xf32> -> vector<8x8xf32>
    %c20_468 = arith.constant 20 : index
    %c0_469 = arith.constant 0 : index
    %c0_470 = arith.constant 0 : index
    %815 = vector.load %arg15[%c20_468, %c0_469, %c0_470] : memref<48x1x8xf32, #tpu.memory_space<vmem>>, vector<1x1x8xf32>
    %816 = vector.shape_cast %815 : vector<1x1x8xf32> to vector<1x8xf32>
    %817 = vector.broadcast %816 : vector<1x8xf32> to vector<8x8xf32>
    %818 = arith.addf %814, %817 : vector<8x8xf32>
    %819 = arith.truncf %804 : vector<8x8xf32> to vector<8x8xbf16>
    %820 = tpu.transpose %811, [1, 0] : vector<8x8xf32> -> vector<8x8xf32>
    %821 = arith.truncf %820 : vector<8x8xf32> to vector<8x8xbf16>
    %cst_471 = arith.constant dense<0.000000e+00> : vector<8x8xf32>
    %822 = tpu.matmul %819, %821, %cst_471 {dimension_numbers = #tpu.dot_dimension_numbers<[1], [0], [0], [1], [0, 0, 1, 1], [], []>} : vector<8x8xbf16>, vector<8x8xbf16>, vector<8x8xf32> -> vector<8x8xf32>
    %cst_472 = arith.constant 0.353553385 : f32
    %823 = vector.broadcast %cst_472 : f32 to vector<8x8xf32>
    %824 = arith.mulf %822, %823 : vector<8x8xf32>
    %cst_473 = arith.constant -1.000000e+10 : f32
    %825 = vector.shape_cast %3 : vector<1x8xi1> to vector<1x8xi1>
    %826 = vector.broadcast %825 : vector<1x8xi1> to vector<8x8xi1>
    %827 = vector.broadcast %cst_473 : f32 to vector<8x8xf32>
    %828 = arith.select %826, %824, %827 : vector<8x8xi1>, vector<8x8xf32>
    %cst_474 = arith.constant dense<0xFF800000> : vector<8xf32>
    %829 = vector.multi_reduction <maximumf>, %828, %cst_474 [1] : vector<8x8xf32> to vector<8xf32>
    %830 = vector.shape_cast %829 : vector<8xf32> to vector<8x1xf32>
    %831 = vector.broadcast %830 : vector<8x1xf32> to vector<8x8xf32>
    %832 = arith.subf %828, %831 : vector<8x8xf32>
    %833 = math.exp %832 : vector<8x8xf32>
    %cst_475 = arith.constant dense<0.000000e+00> : vector<8xf32>
    %834 = vector.multi_reduction <add>, %833, %cst_475 [1] : vector<8x8xf32> to vector<8xf32>
    %835 = vector.shape_cast %834 : vector<8xf32> to vector<8x1xf32>
    %836 = tpu.reciprocal %835 {approx = true} : vector<8x1xf32> -> vector<8x1xf32>
    %837 = vector.broadcast %836 : vector<8x1xf32> to vector<8x8xf32>
    %838 = arith.mulf %833, %837 : vector<8x8xf32>
    %839 = arith.truncf %838 : vector<8x8xf32> to vector<8x8xbf16>
    %840 = arith.truncf %818 : vector<8x8xf32> to vector<8x8xbf16>
    %cst_476 = arith.constant dense<0.000000e+00> : vector<8x8xf32>
    %841 = tpu.matmul %839, %840, %cst_476 {dimension_numbers = #tpu.dot_dimension_numbers<[1], [0], [0], [1], [0, 0, 1, 1], [], []>} : vector<8x8xbf16>, vector<8x8xbf16>, vector<8x8xf32> -> vector<8x8xf32>
    %842 = arith.truncf %841 : vector<8x8xf32> to vector<8x8xbf16>
    %c4_477 = arith.constant 4 : index
    %c0_478 = arith.constant 0 : index
    %c0_479 = arith.constant 0 : index
    %843 = vector.load %arg16[%c4_477, %c0_478, %c0_479] : memref<16x8x32xbf16, #tpu.memory_space<vmem>>, vector<1x8x32xbf16>
    %844 = vector.shape_cast %843 : vector<1x8x32xbf16> to vector<8x32xbf16>
    %cst_480 = arith.constant dense<0.000000e+00> : vector<8x32xf32>
    %845 = tpu.matmul %842, %844, %cst_480 {dimension_numbers = #tpu.dot_dimension_numbers<[1], [0], [0], [1], [0, 0, 1, 1], [], []>} : vector<8x8xbf16>, vector<8x32xbf16>, vector<8x32xf32> -> vector<8x32xf32>
    %846 = arith.addf %797, %845 : vector<8x32xf32>
    %c13_481 = arith.constant 13 : index
    %c0_482 = arith.constant 0 : index
    %c0_483 = arith.constant 0 : index
    %847 = vector.load %arg14[%c13_481, %c0_482, %c0_483] : memref<48x32x8xbf16, #tpu.memory_space<vmem>>, vector<1x32x8xbf16>
    %848 = vector.shape_cast %847 : vector<1x32x8xbf16> to vector<32x8xbf16>
    %cst_484 = arith.constant dense<0.000000e+00> : vector<8x8xf32>
    %849 = tpu.matmul %795, %848, %cst_484 {dimension_numbers = #tpu.dot_dimension_numbers<[1], [0], [0], [1], [0, 0, 1, 1], [], []>} : vector<8x32xbf16>, vector<32x8xbf16>, vector<8x8xf32> -> vector<8x8xf32>
    %c13_485 = arith.constant 13 : index
    %c0_486 = arith.constant 0 : index
    %c0_487 = arith.constant 0 : index
    %850 = vector.load %arg15[%c13_485, %c0_486, %c0_487] : memref<48x1x8xf32, #tpu.memory_space<vmem>>, vector<1x1x8xf32>
    %851 = vector.shape_cast %850 : vector<1x1x8xf32> to vector<1x8xf32>
    %852 = vector.broadcast %851 : vector<1x8xf32> to vector<8x8xf32>
    %853 = arith.addf %849, %852 : vector<8x8xf32>
    %c17_488 = arith.constant 17 : index
    %c0_489 = arith.constant 0 : index
    %c0_490 = arith.constant 0 : index
    %854 = vector.load %arg14[%c17_488, %c0_489, %c0_490] : memref<48x32x8xbf16, #tpu.memory_space<vmem>>, vector<1x32x8xbf16>
    %855 = vector.shape_cast %854 : vector<1x32x8xbf16> to vector<32x8xbf16>
    %cst_491 = arith.constant dense<0.000000e+00> : vector<8x8xf32>
    %856 = tpu.matmul %796, %855, %cst_491 {dimension_numbers = #tpu.dot_dimension_numbers<[1], [0], [0], [1], [0, 0, 1, 1], [], []>} : vector<8x32xbf16>, vector<32x8xbf16>, vector<8x8xf32> -> vector<8x8xf32>
    %c17_492 = arith.constant 17 : index
    %c0_493 = arith.constant 0 : index
    %c0_494 = arith.constant 0 : index
    %857 = vector.load %arg15[%c17_492, %c0_493, %c0_494] : memref<48x1x8xf32, #tpu.memory_space<vmem>>, vector<1x1x8xf32>
    %858 = vector.shape_cast %857 : vector<1x1x8xf32> to vector<1x8xf32>
    %859 = vector.broadcast %858 : vector<1x8xf32> to vector<8x8xf32>
    %860 = arith.addf %856, %859 : vector<8x8xf32>
    %c21_495 = arith.constant 21 : index
    %c0_496 = arith.constant 0 : index
    %c0_497 = arith.constant 0 : index
    %861 = vector.load %arg14[%c21_495, %c0_496, %c0_497] : memref<48x32x8xbf16, #tpu.memory_space<vmem>>, vector<1x32x8xbf16>
    %862 = vector.shape_cast %861 : vector<1x32x8xbf16> to vector<32x8xbf16>
    %cst_498 = arith.constant dense<0.000000e+00> : vector<8x8xf32>
    %863 = tpu.matmul %796, %862, %cst_498 {dimension_numbers = #tpu.dot_dimension_numbers<[1], [0], [0], [1], [0, 0, 1, 1], [], []>} : vector<8x32xbf16>, vector<32x8xbf16>, vector<8x8xf32> -> vector<8x8xf32>
    %c21_499 = arith.constant 21 : index
    %c0_500 = arith.constant 0 : index
    %c0_501 = arith.constant 0 : index
    %864 = vector.load %arg15[%c21_499, %c0_500, %c0_501] : memref<48x1x8xf32, #tpu.memory_space<vmem>>, vector<1x1x8xf32>
    %865 = vector.shape_cast %864 : vector<1x1x8xf32> to vector<1x8xf32>
    %866 = vector.broadcast %865 : vector<1x8xf32> to vector<8x8xf32>
    %867 = arith.addf %863, %866 : vector<8x8xf32>
    %868 = arith.truncf %853 : vector<8x8xf32> to vector<8x8xbf16>
    %869 = tpu.transpose %860, [1, 0] : vector<8x8xf32> -> vector<8x8xf32>
    %870 = arith.truncf %869 : vector<8x8xf32> to vector<8x8xbf16>
    %cst_502 = arith.constant dense<0.000000e+00> : vector<8x8xf32>
    %871 = tpu.matmul %868, %870, %cst_502 {dimension_numbers = #tpu.dot_dimension_numbers<[1], [0], [0], [1], [0, 0, 1, 1], [], []>} : vector<8x8xbf16>, vector<8x8xbf16>, vector<8x8xf32> -> vector<8x8xf32>
    %cst_503 = arith.constant 0.353553385 : f32
    %872 = vector.broadcast %cst_503 : f32 to vector<8x8xf32>
    %873 = arith.mulf %871, %872 : vector<8x8xf32>
    %cst_504 = arith.constant -1.000000e+10 : f32
    %874 = vector.shape_cast %3 : vector<1x8xi1> to vector<1x8xi1>
    %875 = vector.broadcast %874 : vector<1x8xi1> to vector<8x8xi1>
    %876 = vector.broadcast %cst_504 : f32 to vector<8x8xf32>
    %877 = arith.select %875, %873, %876 : vector<8x8xi1>, vector<8x8xf32>
    %cst_505 = arith.constant dense<0xFF800000> : vector<8xf32>
    %878 = vector.multi_reduction <maximumf>, %877, %cst_505 [1] : vector<8x8xf32> to vector<8xf32>
    %879 = vector.shape_cast %878 : vector<8xf32> to vector<8x1xf32>
    %880 = vector.broadcast %879 : vector<8x1xf32> to vector<8x8xf32>
    %881 = arith.subf %877, %880 : vector<8x8xf32>
    %882 = math.exp %881 : vector<8x8xf32>
    %cst_506 = arith.constant dense<0.000000e+00> : vector<8xf32>
    %883 = vector.multi_reduction <add>, %882, %cst_506 [1] : vector<8x8xf32> to vector<8xf32>
    %884 = vector.shape_cast %883 : vector<8xf32> to vector<8x1xf32>
    %885 = tpu.reciprocal %884 {approx = true} : vector<8x1xf32> -> vector<8x1xf32>
    %886 = vector.broadcast %885 : vector<8x1xf32> to vector<8x8xf32>
    %887 = arith.mulf %882, %886 : vector<8x8xf32>
    %888 = arith.truncf %887 : vector<8x8xf32> to vector<8x8xbf16>
    %889 = arith.truncf %867 : vector<8x8xf32> to vector<8x8xbf16>
    %cst_507 = arith.constant dense<0.000000e+00> : vector<8x8xf32>
    %890 = tpu.matmul %888, %889, %cst_507 {dimension_numbers = #tpu.dot_dimension_numbers<[1], [0], [0], [1], [0, 0, 1, 1], [], []>} : vector<8x8xbf16>, vector<8x8xbf16>, vector<8x8xf32> -> vector<8x8xf32>
    %891 = arith.truncf %890 : vector<8x8xf32> to vector<8x8xbf16>
    %c5_508 = arith.constant 5 : index
    %c0_509 = arith.constant 0 : index
    %c0_510 = arith.constant 0 : index
    %892 = vector.load %arg16[%c5_508, %c0_509, %c0_510] : memref<16x8x32xbf16, #tpu.memory_space<vmem>>, vector<1x8x32xbf16>
    %893 = vector.shape_cast %892 : vector<1x8x32xbf16> to vector<8x32xbf16>
    %cst_511 = arith.constant dense<0.000000e+00> : vector<8x32xf32>
    %894 = tpu.matmul %891, %893, %cst_511 {dimension_numbers = #tpu.dot_dimension_numbers<[1], [0], [0], [1], [0, 0, 1, 1], [], []>} : vector<8x8xbf16>, vector<8x32xbf16>, vector<8x32xf32> -> vector<8x32xf32>
    %895 = arith.addf %846, %894 : vector<8x32xf32>
    %c14_512 = arith.constant 14 : index
    %c0_513 = arith.constant 0 : index
    %c0_514 = arith.constant 0 : index
    %896 = vector.load %arg14[%c14_512, %c0_513, %c0_514] : memref<48x32x8xbf16, #tpu.memory_space<vmem>>, vector<1x32x8xbf16>
    %897 = vector.shape_cast %896 : vector<1x32x8xbf16> to vector<32x8xbf16>
    %cst_515 = arith.constant dense<0.000000e+00> : vector<8x8xf32>
    %898 = tpu.matmul %795, %897, %cst_515 {dimension_numbers = #tpu.dot_dimension_numbers<[1], [0], [0], [1], [0, 0, 1, 1], [], []>} : vector<8x32xbf16>, vector<32x8xbf16>, vector<8x8xf32> -> vector<8x8xf32>
    %c14_516 = arith.constant 14 : index
    %c0_517 = arith.constant 0 : index
    %c0_518 = arith.constant 0 : index
    %899 = vector.load %arg15[%c14_516, %c0_517, %c0_518] : memref<48x1x8xf32, #tpu.memory_space<vmem>>, vector<1x1x8xf32>
    %900 = vector.shape_cast %899 : vector<1x1x8xf32> to vector<1x8xf32>
    %901 = vector.broadcast %900 : vector<1x8xf32> to vector<8x8xf32>
    %902 = arith.addf %898, %901 : vector<8x8xf32>
    %c18_519 = arith.constant 18 : index
    %c0_520 = arith.constant 0 : index
    %c0_521 = arith.constant 0 : index
    %903 = vector.load %arg14[%c18_519, %c0_520, %c0_521] : memref<48x32x8xbf16, #tpu.memory_space<vmem>>, vector<1x32x8xbf16>
    %904 = vector.shape_cast %903 : vector<1x32x8xbf16> to vector<32x8xbf16>
    %cst_522 = arith.constant dense<0.000000e+00> : vector<8x8xf32>
    %905 = tpu.matmul %796, %904, %cst_522 {dimension_numbers = #tpu.dot_dimension_numbers<[1], [0], [0], [1], [0, 0, 1, 1], [], []>} : vector<8x32xbf16>, vector<32x8xbf16>, vector<8x8xf32> -> vector<8x8xf32>
    %c18_523 = arith.constant 18 : index
    %c0_524 = arith.constant 0 : index
    %c0_525 = arith.constant 0 : index
    %906 = vector.load %arg15[%c18_523, %c0_524, %c0_525] : memref<48x1x8xf32, #tpu.memory_space<vmem>>, vector<1x1x8xf32>
    %907 = vector.shape_cast %906 : vector<1x1x8xf32> to vector<1x8xf32>
    %908 = vector.broadcast %907 : vector<1x8xf32> to vector<8x8xf32>
    %909 = arith.addf %905, %908 : vector<8x8xf32>
    %c22_526 = arith.constant 22 : index
    %c0_527 = arith.constant 0 : index
    %c0_528 = arith.constant 0 : index
    %910 = vector.load %arg14[%c22_526, %c0_527, %c0_528] : memref<48x32x8xbf16, #tpu.memory_space<vmem>>, vector<1x32x8xbf16>
    %911 = vector.shape_cast %910 : vector<1x32x8xbf16> to vector<32x8xbf16>
    %cst_529 = arith.constant dense<0.000000e+00> : vector<8x8xf32>
    %912 = tpu.matmul %796, %911, %cst_529 {dimension_numbers = #tpu.dot_dimension_numbers<[1], [0], [0], [1], [0, 0, 1, 1], [], []>} : vector<8x32xbf16>, vector<32x8xbf16>, vector<8x8xf32> -> vector<8x8xf32>
    %c22_530 = arith.constant 22 : index
    %c0_531 = arith.constant 0 : index
    %c0_532 = arith.constant 0 : index
    %913 = vector.load %arg15[%c22_530, %c0_531, %c0_532] : memref<48x1x8xf32, #tpu.memory_space<vmem>>, vector<1x1x8xf32>
    %914 = vector.shape_cast %913 : vector<1x1x8xf32> to vector<1x8xf32>
    %915 = vector.broadcast %914 : vector<1x8xf32> to vector<8x8xf32>
    %916 = arith.addf %912, %915 : vector<8x8xf32>
    %917 = arith.truncf %902 : vector<8x8xf32> to vector<8x8xbf16>
    %918 = tpu.transpose %909, [1, 0] : vector<8x8xf32> -> vector<8x8xf32>
    %919 = arith.truncf %918 : vector<8x8xf32> to vector<8x8xbf16>
    %cst_533 = arith.constant dense<0.000000e+00> : vector<8x8xf32>
    %920 = tpu.matmul %917, %919, %cst_533 {dimension_numbers = #tpu.dot_dimension_numbers<[1], [0], [0], [1], [0, 0, 1, 1], [], []>} : vector<8x8xbf16>, vector<8x8xbf16>, vector<8x8xf32> -> vector<8x8xf32>
    %cst_534 = arith.constant 0.353553385 : f32
    %921 = vector.broadcast %cst_534 : f32 to vector<8x8xf32>
    %922 = arith.mulf %920, %921 : vector<8x8xf32>
    %cst_535 = arith.constant -1.000000e+10 : f32
    %923 = vector.shape_cast %3 : vector<1x8xi1> to vector<1x8xi1>
    %924 = vector.broadcast %923 : vector<1x8xi1> to vector<8x8xi1>
    %925 = vector.broadcast %cst_535 : f32 to vector<8x8xf32>
    %926 = arith.select %924, %922, %925 : vector<8x8xi1>, vector<8x8xf32>
    %cst_536 = arith.constant dense<0xFF800000> : vector<8xf32>
    %927 = vector.multi_reduction <maximumf>, %926, %cst_536 [1] : vector<8x8xf32> to vector<8xf32>
    %928 = vector.shape_cast %927 : vector<8xf32> to vector<8x1xf32>
    %929 = vector.broadcast %928 : vector<8x1xf32> to vector<8x8xf32>
    %930 = arith.subf %926, %929 : vector<8x8xf32>
    %931 = math.exp %930 : vector<8x8xf32>
    %cst_537 = arith.constant dense<0.000000e+00> : vector<8xf32>
    %932 = vector.multi_reduction <add>, %931, %cst_537 [1] : vector<8x8xf32> to vector<8xf32>
    %933 = vector.shape_cast %932 : vector<8xf32> to vector<8x1xf32>
    %934 = tpu.reciprocal %933 {approx = true} : vector<8x1xf32> -> vector<8x1xf32>
    %935 = vector.broadcast %934 : vector<8x1xf32> to vector<8x8xf32>
    %936 = arith.mulf %931, %935 : vector<8x8xf32>
    %937 = arith.truncf %936 : vector<8x8xf32> to vector<8x8xbf16>
    %938 = arith.truncf %916 : vector<8x8xf32> to vector<8x8xbf16>
    %cst_538 = arith.constant dense<0.000000e+00> : vector<8x8xf32>
    %939 = tpu.matmul %937, %938, %cst_538 {dimension_numbers = #tpu.dot_dimension_numbers<[1], [0], [0], [1], [0, 0, 1, 1], [], []>} : vector<8x8xbf16>, vector<8x8xbf16>, vector<8x8xf32> -> vector<8x8xf32>
    %940 = arith.truncf %939 : vector<8x8xf32> to vector<8x8xbf16>
    %c6_539 = arith.constant 6 : index
    %c0_540 = arith.constant 0 : index
    %c0_541 = arith.constant 0 : index
    %941 = vector.load %arg16[%c6_539, %c0_540, %c0_541] : memref<16x8x32xbf16, #tpu.memory_space<vmem>>, vector<1x8x32xbf16>
    %942 = vector.shape_cast %941 : vector<1x8x32xbf16> to vector<8x32xbf16>
    %cst_542 = arith.constant dense<0.000000e+00> : vector<8x32xf32>
    %943 = tpu.matmul %940, %942, %cst_542 {dimension_numbers = #tpu.dot_dimension_numbers<[1], [0], [0], [1], [0, 0, 1, 1], [], []>} : vector<8x8xbf16>, vector<8x32xbf16>, vector<8x32xf32> -> vector<8x32xf32>
    %944 = arith.addf %895, %943 : vector<8x32xf32>
    %c15_543 = arith.constant 15 : index
    %c0_544 = arith.constant 0 : index
    %c0_545 = arith.constant 0 : index
    %945 = vector.load %arg14[%c15_543, %c0_544, %c0_545] : memref<48x32x8xbf16, #tpu.memory_space<vmem>>, vector<1x32x8xbf16>
    %946 = vector.shape_cast %945 : vector<1x32x8xbf16> to vector<32x8xbf16>
    %cst_546 = arith.constant dense<0.000000e+00> : vector<8x8xf32>
    %947 = tpu.matmul %795, %946, %cst_546 {dimension_numbers = #tpu.dot_dimension_numbers<[1], [0], [0], [1], [0, 0, 1, 1], [], []>} : vector<8x32xbf16>, vector<32x8xbf16>, vector<8x8xf32> -> vector<8x8xf32>
    %c15_547 = arith.constant 15 : index
    %c0_548 = arith.constant 0 : index
    %c0_549 = arith.constant 0 : index
    %948 = vector.load %arg15[%c15_547, %c0_548, %c0_549] : memref<48x1x8xf32, #tpu.memory_space<vmem>>, vector<1x1x8xf32>
    %949 = vector.shape_cast %948 : vector<1x1x8xf32> to vector<1x8xf32>
    %950 = vector.broadcast %949 : vector<1x8xf32> to vector<8x8xf32>
    %951 = arith.addf %947, %950 : vector<8x8xf32>
    %c19_550 = arith.constant 19 : index
    %c0_551 = arith.constant 0 : index
    %c0_552 = arith.constant 0 : index
    %952 = vector.load %arg14[%c19_550, %c0_551, %c0_552] : memref<48x32x8xbf16, #tpu.memory_space<vmem>>, vector<1x32x8xbf16>
    %953 = vector.shape_cast %952 : vector<1x32x8xbf16> to vector<32x8xbf16>
    %cst_553 = arith.constant dense<0.000000e+00> : vector<8x8xf32>
    %954 = tpu.matmul %796, %953, %cst_553 {dimension_numbers = #tpu.dot_dimension_numbers<[1], [0], [0], [1], [0, 0, 1, 1], [], []>} : vector<8x32xbf16>, vector<32x8xbf16>, vector<8x8xf32> -> vector<8x8xf32>
    %c19_554 = arith.constant 19 : index
    %c0_555 = arith.constant 0 : index
    %c0_556 = arith.constant 0 : index
    %955 = vector.load %arg15[%c19_554, %c0_555, %c0_556] : memref<48x1x8xf32, #tpu.memory_space<vmem>>, vector<1x1x8xf32>
    %956 = vector.shape_cast %955 : vector<1x1x8xf32> to vector<1x8xf32>
    %957 = vector.broadcast %956 : vector<1x8xf32> to vector<8x8xf32>
    %958 = arith.addf %954, %957 : vector<8x8xf32>
    %c23_557 = arith.constant 23 : index
    %c0_558 = arith.constant 0 : index
    %c0_559 = arith.constant 0 : index
    %959 = vector.load %arg14[%c23_557, %c0_558, %c0_559] : memref<48x32x8xbf16, #tpu.memory_space<vmem>>, vector<1x32x8xbf16>
    %960 = vector.shape_cast %959 : vector<1x32x8xbf16> to vector<32x8xbf16>
    %cst_560 = arith.constant dense<0.000000e+00> : vector<8x8xf32>
    %961 = tpu.matmul %796, %960, %cst_560 {dimension_numbers = #tpu.dot_dimension_numbers<[1], [0], [0], [1], [0, 0, 1, 1], [], []>} : vector<8x32xbf16>, vector<32x8xbf16>, vector<8x8xf32> -> vector<8x8xf32>
    %c23_561 = arith.constant 23 : index
    %c0_562 = arith.constant 0 : index
    %c0_563 = arith.constant 0 : index
    %962 = vector.load %arg15[%c23_561, %c0_562, %c0_563] : memref<48x1x8xf32, #tpu.memory_space<vmem>>, vector<1x1x8xf32>
    %963 = vector.shape_cast %962 : vector<1x1x8xf32> to vector<1x8xf32>
    %964 = vector.broadcast %963 : vector<1x8xf32> to vector<8x8xf32>
    %965 = arith.addf %961, %964 : vector<8x8xf32>
    %966 = arith.truncf %951 : vector<8x8xf32> to vector<8x8xbf16>
    %967 = tpu.transpose %958, [1, 0] : vector<8x8xf32> -> vector<8x8xf32>
    %968 = arith.truncf %967 : vector<8x8xf32> to vector<8x8xbf16>
    %cst_564 = arith.constant dense<0.000000e+00> : vector<8x8xf32>
    %969 = tpu.matmul %966, %968, %cst_564 {dimension_numbers = #tpu.dot_dimension_numbers<[1], [0], [0], [1], [0, 0, 1, 1], [], []>} : vector<8x8xbf16>, vector<8x8xbf16>, vector<8x8xf32> -> vector<8x8xf32>
    %cst_565 = arith.constant 0.353553385 : f32
    %970 = vector.broadcast %cst_565 : f32 to vector<8x8xf32>
    %971 = arith.mulf %969, %970 : vector<8x8xf32>
    %cst_566 = arith.constant -1.000000e+10 : f32
    %972 = vector.shape_cast %3 : vector<1x8xi1> to vector<1x8xi1>
    %973 = vector.broadcast %972 : vector<1x8xi1> to vector<8x8xi1>
    %974 = vector.broadcast %cst_566 : f32 to vector<8x8xf32>
    %975 = arith.select %973, %971, %974 : vector<8x8xi1>, vector<8x8xf32>
    %cst_567 = arith.constant dense<0xFF800000> : vector<8xf32>
    %976 = vector.multi_reduction <maximumf>, %975, %cst_567 [1] : vector<8x8xf32> to vector<8xf32>
    %977 = vector.shape_cast %976 : vector<8xf32> to vector<8x1xf32>
    %978 = vector.broadcast %977 : vector<8x1xf32> to vector<8x8xf32>
    %979 = arith.subf %975, %978 : vector<8x8xf32>
    %980 = math.exp %979 : vector<8x8xf32>
    %cst_568 = arith.constant dense<0.000000e+00> : vector<8xf32>
    %981 = vector.multi_reduction <add>, %980, %cst_568 [1] : vector<8x8xf32> to vector<8xf32>
    %982 = vector.shape_cast %981 : vector<8xf32> to vector<8x1xf32>
    %983 = tpu.reciprocal %982 {approx = true} : vector<8x1xf32> -> vector<8x1xf32>
    %984 = vector.broadcast %983 : vector<8x1xf32> to vector<8x8xf32>
    %985 = arith.mulf %980, %984 : vector<8x8xf32>
    %986 = arith.truncf %985 : vector<8x8xf32> to vector<8x8xbf16>
    %987 = arith.truncf %965 : vector<8x8xf32> to vector<8x8xbf16>
    %cst_569 = arith.constant dense<0.000000e+00> : vector<8x8xf32>
    %988 = tpu.matmul %986, %987, %cst_569 {dimension_numbers = #tpu.dot_dimension_numbers<[1], [0], [0], [1], [0, 0, 1, 1], [], []>} : vector<8x8xbf16>, vector<8x8xbf16>, vector<8x8xf32> -> vector<8x8xf32>
    %989 = arith.truncf %988 : vector<8x8xf32> to vector<8x8xbf16>
    %c7_570 = arith.constant 7 : index
    %c0_571 = arith.constant 0 : index
    %c0_572 = arith.constant 0 : index
    %990 = vector.load %arg16[%c7_570, %c0_571, %c0_572] : memref<16x8x32xbf16, #tpu.memory_space<vmem>>, vector<1x8x32xbf16>
    %991 = vector.shape_cast %990 : vector<1x8x32xbf16> to vector<8x32xbf16>
    %cst_573 = arith.constant dense<0.000000e+00> : vector<8x32xf32>
    %992 = tpu.matmul %989, %991, %cst_573 {dimension_numbers = #tpu.dot_dimension_numbers<[1], [0], [0], [1], [0, 0, 1, 1], [], []>} : vector<8x8xbf16>, vector<8x32xbf16>, vector<8x32xf32> -> vector<8x32xf32>
    %993 = arith.addf %944, %992 : vector<8x32xf32>
    %994 = vector.broadcast %792 : vector<1x32xf32> to vector<8x32xf32>
    %995 = arith.addf %993, %994 : vector<8x32xf32>
    %996 = arith.addf %788, %995 : vector<8x32xf32>
    %cst_574 = arith.constant dense<0.000000e+00> : vector<8xf32>
    %997 = vector.multi_reduction <add>, %996, %cst_574 [1] : vector<8x32xf32> to vector<8xf32>
    %998 = vector.shape_cast %997 : vector<8xf32> to vector<8x1xf32>
    %cst_575 = arith.constant 3.200000e+01 : f32
    %999 = vector.broadcast %cst_575 : f32 to vector<8x1xf32>
    %1000 = arith.divf %998, %999 : vector<8x1xf32>
    %1001 = vector.broadcast %1000 : vector<8x1xf32> to vector<8x32xf32>
    %1002 = arith.subf %996, %1001 : vector<8x32xf32>
    %1003 = arith.mulf %1002, %1002 : vector<8x32xf32>
    %cst_576 = arith.constant dense<0.000000e+00> : vector<8xf32>
    %1004 = vector.multi_reduction <add>, %1003, %cst_576 [1] : vector<8x32xf32> to vector<8xf32>
    %1005 = vector.shape_cast %1004 : vector<8xf32> to vector<8x1xf32>
    %cst_577 = arith.constant 3.200000e+01 : f32
    %1006 = vector.broadcast %cst_577 : f32 to vector<8x1xf32>
    %1007 = arith.divf %1005, %1006 : vector<8x1xf32>
    %1008 = vector.broadcast %1000 : vector<8x1xf32> to vector<8x32xf32>
    %1009 = arith.subf %996, %1008 : vector<8x32xf32>
    %cst_578 = arith.constant 9.99999974E-6 : f32
    %1010 = vector.broadcast %cst_578 : f32 to vector<8x1xf32>
    %1011 = arith.addf %1007, %1010 : vector<8x1xf32>
    %1012 = math.rsqrt %1011 : vector<8x1xf32>
    %1013 = vector.broadcast %1012 : vector<8x1xf32> to vector<8x32xf32>
    %1014 = arith.mulf %1009, %1013 : vector<8x32xf32>
    %1015 = vector.broadcast %793 : vector<1x32xf32> to vector<8x32xf32>
    %1016 = arith.mulf %1014, %1015 : vector<8x32xf32>
    %1017 = vector.broadcast %794 : vector<1x32xf32> to vector<8x32xf32>
    %1018 = arith.addf %1016, %1017 : vector<8x32xf32>
    %c2_579 = arith.constant 2 : index
    %c0_580 = arith.constant 0 : index
    %c0_581 = arith.constant 0 : index
    %1019 = vector.load %arg22[%c2_579, %c0_580, %c0_581] : memref<6x2x32xf32, #tpu.memory_space<vmem>>, vector<1x2x32xf32>
    %1020 = vector.shape_cast %1019 : vector<1x2x32xf32> to vector<2x32xf32>
    %c0_582 = arith.constant 0 : index
    %c0_583 = arith.constant 0 : index
    %c0_584 = arith.constant 0 : index
    %1021 = vector.load %arg18[%c0_582, %c0_583, %c0_584] : memref<2x32x64xbf16, #tpu.memory_space<vmem>>, vector<1x32x64xbf16>
    %1022 = vector.shape_cast %1021 : vector<1x32x64xbf16> to vector<32x64xbf16>
    %c0_585 = arith.constant 0 : index
    %c0_586 = arith.constant 0 : index
    %c0_587 = arith.constant 0 : index
    %1023 = vector.load %arg19[%c0_585, %c0_586, %c0_587] : memref<2x1x64xf32, #tpu.memory_space<vmem>>, vector<1x1x64xf32>
    %1024 = vector.shape_cast %1023 : vector<1x1x64xf32> to vector<1x64xf32>
    %c0_588 = arith.constant 0 : index
    %c0_589 = arith.constant 0 : index
    %c0_590 = arith.constant 0 : index
    %1025 = vector.load %arg20[%c0_588, %c0_589, %c0_590] : memref<2x64x32xbf16, #tpu.memory_space<vmem>>, vector<1x64x32xbf16>
    %1026 = vector.shape_cast %1025 : vector<1x64x32xbf16> to vector<64x32xbf16>
    %c0_591 = arith.constant 0 : index
    %c0_592 = arith.constant 0 : index
    %c0_593 = arith.constant 0 : index
    %1027 = vector.load %arg21[%c0_591, %c0_592, %c0_593] : memref<2x1x32xf32, #tpu.memory_space<vmem>>, vector<1x1x32xf32>
    %1028 = vector.shape_cast %1027 : vector<1x1x32xf32> to vector<1x32xf32>
    %1029 = vector.extract_strided_slice %1020 {offsets = [0, 0], sizes = [1, 32], strides = [1, 1]} : vector<2x32xf32> to vector<1x32xf32>
    %1030 = vector.extract_strided_slice %1020 {offsets = [1, 0], sizes = [1, 32], strides = [1, 1]} : vector<2x32xf32> to vector<1x32xf32>
    %1031 = arith.truncf %1018 : vector<8x32xf32> to vector<8x32xbf16>
    %cst_594 = arith.constant dense<0.000000e+00> : vector<8x64xf32>
    %1032 = tpu.matmul %1031, %1022, %cst_594 {dimension_numbers = #tpu.dot_dimension_numbers<[1], [0], [0], [1], [0, 0, 1, 1], [], []>} : vector<8x32xbf16>, vector<32x64xbf16>, vector<8x64xf32> -> vector<8x64xf32>
    %1033 = vector.broadcast %1024 : vector<1x64xf32> to vector<8x64xf32>
    %1034 = arith.addf %1032, %1033 : vector<8x64xf32>
    %cst_595 = arith.constant 0.000000e+00 : f32
    %1035 = vector.broadcast %cst_595 : f32 to vector<8x64xf32>
    %1036 = arith.maximumf %1034, %1035 : vector<8x64xf32>
    %1037 = arith.truncf %1036 : vector<8x64xf32> to vector<8x64xbf16>
    %cst_596 = arith.constant dense<0.000000e+00> : vector<8x32xf32>
    %1038 = tpu.matmul %1037, %1026, %cst_596 {dimension_numbers = #tpu.dot_dimension_numbers<[1], [0], [0], [1], [0, 0, 1, 1], [], []>} : vector<8x64xbf16>, vector<64x32xbf16>, vector<8x32xf32> -> vector<8x32xf32>
    %1039 = vector.broadcast %1028 : vector<1x32xf32> to vector<8x32xf32>
    %1040 = arith.addf %1038, %1039 : vector<8x32xf32>
    %1041 = arith.addf %1018, %1040 : vector<8x32xf32>
    %cst_597 = arith.constant dense<0.000000e+00> : vector<8xf32>
    %1042 = vector.multi_reduction <add>, %1041, %cst_597 [1] : vector<8x32xf32> to vector<8xf32>
    %1043 = vector.shape_cast %1042 : vector<8xf32> to vector<8x1xf32>
    %cst_598 = arith.constant 3.200000e+01 : f32
    %1044 = vector.broadcast %cst_598 : f32 to vector<8x1xf32>
    %1045 = arith.divf %1043, %1044 : vector<8x1xf32>
    %1046 = vector.broadcast %1045 : vector<8x1xf32> to vector<8x32xf32>
    %1047 = arith.subf %1041, %1046 : vector<8x32xf32>
    %1048 = arith.mulf %1047, %1047 : vector<8x32xf32>
    %cst_599 = arith.constant dense<0.000000e+00> : vector<8xf32>
    %1049 = vector.multi_reduction <add>, %1048, %cst_599 [1] : vector<8x32xf32> to vector<8xf32>
    %1050 = vector.shape_cast %1049 : vector<8xf32> to vector<8x1xf32>
    %cst_600 = arith.constant 3.200000e+01 : f32
    %1051 = vector.broadcast %cst_600 : f32 to vector<8x1xf32>
    %1052 = arith.divf %1050, %1051 : vector<8x1xf32>
    %1053 = vector.broadcast %1045 : vector<8x1xf32> to vector<8x32xf32>
    %1054 = arith.subf %1041, %1053 : vector<8x32xf32>
    %cst_601 = arith.constant 9.99999974E-6 : f32
    %1055 = vector.broadcast %cst_601 : f32 to vector<8x1xf32>
    %1056 = arith.addf %1052, %1055 : vector<8x1xf32>
    %1057 = math.rsqrt %1056 : vector<8x1xf32>
    %1058 = vector.broadcast %1057 : vector<8x1xf32> to vector<8x32xf32>
    %1059 = arith.mulf %1054, %1058 : vector<8x32xf32>
    %1060 = vector.broadcast %1029 : vector<1x32xf32> to vector<8x32xf32>
    %1061 = arith.mulf %1059, %1060 : vector<8x32xf32>
    %1062 = vector.broadcast %1030 : vector<1x32xf32> to vector<8x32xf32>
    %1063 = arith.addf %1061, %1062 : vector<8x32xf32>
    %c3_602 = arith.constant 3 : index
    %c0_603 = arith.constant 0 : index
    %c0_604 = arith.constant 0 : index
    %1064 = vector.load %arg22[%c3_602, %c0_603, %c0_604] : memref<6x2x32xf32, #tpu.memory_space<vmem>>, vector<1x2x32xf32>
    %1065 = vector.shape_cast %1064 : vector<1x2x32xf32> to vector<2x32xf32>
    %c2_605 = arith.constant 2 : index
    %c0_606 = arith.constant 0 : index
    %c0_607 = arith.constant 0 : index
    %1066 = vector.load %arg17[%c2_605, %c0_606, %c0_607] : memref<4x1x32xf32, #tpu.memory_space<vmem>>, vector<1x1x32xf32>
    %1067 = vector.shape_cast %1066 : vector<1x1x32xf32> to vector<1x32xf32>
    %1068 = vector.extract_strided_slice %1065 {offsets = [0, 0], sizes = [1, 32], strides = [1, 1]} : vector<2x32xf32> to vector<1x32xf32>
    %1069 = vector.extract_strided_slice %1065 {offsets = [1, 0], sizes = [1, 32], strides = [1, 1]} : vector<2x32xf32> to vector<1x32xf32>
    %1070 = arith.truncf %1063 : vector<8x32xf32> to vector<8x32xbf16>
    %1071 = arith.truncf %1063 : vector<8x32xf32> to vector<8x32xbf16>
    %1072 = tpu.iota {dimensions = array<i32: 0>} : vector<8x8xi32>
    %1073 = tpu.iota {dimensions = array<i32: 1>} : vector<8x8xi32>
    %1074 = arith.cmpi sle, %1073, %1072 : vector<8x8xi32>
    %1075 = vector.broadcast %7 : vector<1x8xi1> to vector<8x8xi1>
    %1076 = arith.andi %1075, %1074 : vector<8x8xi1>
    %cst_608 = arith.constant 0.000000e+00 : f32
    %1077 = vector.broadcast %cst_608 : f32 to vector<8x32xf32>
    %c24 = arith.constant 24 : index
    %c0_609 = arith.constant 0 : index
    %c0_610 = arith.constant 0 : index
    %1078 = vector.load %arg14[%c24, %c0_609, %c0_610] : memref<48x32x8xbf16, #tpu.memory_space<vmem>>, vector<1x32x8xbf16>
    %1079 = vector.shape_cast %1078 : vector<1x32x8xbf16> to vector<32x8xbf16>
    %cst_611 = arith.constant dense<0.000000e+00> : vector<8x8xf32>
    %1080 = tpu.matmul %1070, %1079, %cst_611 {dimension_numbers = #tpu.dot_dimension_numbers<[1], [0], [0], [1], [0, 0, 1, 1], [], []>} : vector<8x32xbf16>, vector<32x8xbf16>, vector<8x8xf32> -> vector<8x8xf32>
    %c24_612 = arith.constant 24 : index
    %c0_613 = arith.constant 0 : index
    %c0_614 = arith.constant 0 : index
    %1081 = vector.load %arg15[%c24_612, %c0_613, %c0_614] : memref<48x1x8xf32, #tpu.memory_space<vmem>>, vector<1x1x8xf32>
    %1082 = vector.shape_cast %1081 : vector<1x1x8xf32> to vector<1x8xf32>
    %1083 = vector.broadcast %1082 : vector<1x8xf32> to vector<8x8xf32>
    %1084 = arith.addf %1080, %1083 : vector<8x8xf32>
    %c28 = arith.constant 28 : index
    %c0_615 = arith.constant 0 : index
    %c0_616 = arith.constant 0 : index
    %1085 = vector.load %arg14[%c28, %c0_615, %c0_616] : memref<48x32x8xbf16, #tpu.memory_space<vmem>>, vector<1x32x8xbf16>
    %1086 = vector.shape_cast %1085 : vector<1x32x8xbf16> to vector<32x8xbf16>
    %cst_617 = arith.constant dense<0.000000e+00> : vector<8x8xf32>
    %1087 = tpu.matmul %1071, %1086, %cst_617 {dimension_numbers = #tpu.dot_dimension_numbers<[1], [0], [0], [1], [0, 0, 1, 1], [], []>} : vector<8x32xbf16>, vector<32x8xbf16>, vector<8x8xf32> -> vector<8x8xf32>
    %c28_618 = arith.constant 28 : index
    %c0_619 = arith.constant 0 : index
    %c0_620 = arith.constant 0 : index
    %1088 = vector.load %arg15[%c28_618, %c0_619, %c0_620] : memref<48x1x8xf32, #tpu.memory_space<vmem>>, vector<1x1x8xf32>
    %1089 = vector.shape_cast %1088 : vector<1x1x8xf32> to vector<1x8xf32>
    %1090 = vector.broadcast %1089 : vector<1x8xf32> to vector<8x8xf32>
    %1091 = arith.addf %1087, %1090 : vector<8x8xf32>
    %c32 = arith.constant 32 : index
    %c0_621 = arith.constant 0 : index
    %c0_622 = arith.constant 0 : index
    %1092 = vector.load %arg14[%c32, %c0_621, %c0_622] : memref<48x32x8xbf16, #tpu.memory_space<vmem>>, vector<1x32x8xbf16>
    %1093 = vector.shape_cast %1092 : vector<1x32x8xbf16> to vector<32x8xbf16>
    %cst_623 = arith.constant dense<0.000000e+00> : vector<8x8xf32>
    %1094 = tpu.matmul %1071, %1093, %cst_623 {dimension_numbers = #tpu.dot_dimension_numbers<[1], [0], [0], [1], [0, 0, 1, 1], [], []>} : vector<8x32xbf16>, vector<32x8xbf16>, vector<8x8xf32> -> vector<8x8xf32>
    %c32_624 = arith.constant 32 : index
    %c0_625 = arith.constant 0 : index
    %c0_626 = arith.constant 0 : index
    %1095 = vector.load %arg15[%c32_624, %c0_625, %c0_626] : memref<48x1x8xf32, #tpu.memory_space<vmem>>, vector<1x1x8xf32>
    %1096 = vector.shape_cast %1095 : vector<1x1x8xf32> to vector<1x8xf32>
    %1097 = vector.broadcast %1096 : vector<1x8xf32> to vector<8x8xf32>
    %1098 = arith.addf %1094, %1097 : vector<8x8xf32>
    %1099 = arith.truncf %1084 : vector<8x8xf32> to vector<8x8xbf16>
    %1100 = tpu.transpose %1091, [1, 0] : vector<8x8xf32> -> vector<8x8xf32>
    %1101 = arith.truncf %1100 : vector<8x8xf32> to vector<8x8xbf16>
    %cst_627 = arith.constant dense<0.000000e+00> : vector<8x8xf32>
    %1102 = tpu.matmul %1099, %1101, %cst_627 {dimension_numbers = #tpu.dot_dimension_numbers<[1], [0], [0], [1], [0, 0, 1, 1], [], []>} : vector<8x8xbf16>, vector<8x8xbf16>, vector<8x8xf32> -> vector<8x8xf32>
    %cst_628 = arith.constant 0.353553385 : f32
    %1103 = vector.broadcast %cst_628 : f32 to vector<8x8xf32>
    %1104 = arith.mulf %1102, %1103 : vector<8x8xf32>
    %cst_629 = arith.constant -1.000000e+10 : f32
    %1105 = vector.broadcast %cst_629 : f32 to vector<8x8xf32>
    %1106 = arith.select %1076, %1104, %1105 : vector<8x8xi1>, vector<8x8xf32>
    %cst_630 = arith.constant dense<0xFF800000> : vector<8xf32>
    %1107 = vector.multi_reduction <maximumf>, %1106, %cst_630 [1] : vector<8x8xf32> to vector<8xf32>
    %1108 = vector.shape_cast %1107 : vector<8xf32> to vector<8x1xf32>
    %1109 = vector.broadcast %1108 : vector<8x1xf32> to vector<8x8xf32>
    %1110 = arith.subf %1106, %1109 : vector<8x8xf32>
    %1111 = math.exp %1110 : vector<8x8xf32>
    %cst_631 = arith.constant dense<0.000000e+00> : vector<8xf32>
    %1112 = vector.multi_reduction <add>, %1111, %cst_631 [1] : vector<8x8xf32> to vector<8xf32>
    %1113 = vector.shape_cast %1112 : vector<8xf32> to vector<8x1xf32>
    %1114 = tpu.reciprocal %1113 {approx = true} : vector<8x1xf32> -> vector<8x1xf32>
    %1115 = vector.broadcast %1114 : vector<8x1xf32> to vector<8x8xf32>
    %1116 = arith.mulf %1111, %1115 : vector<8x8xf32>
    %1117 = arith.truncf %1116 : vector<8x8xf32> to vector<8x8xbf16>
    %1118 = arith.truncf %1098 : vector<8x8xf32> to vector<8x8xbf16>
    %cst_632 = arith.constant dense<0.000000e+00> : vector<8x8xf32>
    %1119 = tpu.matmul %1117, %1118, %cst_632 {dimension_numbers = #tpu.dot_dimension_numbers<[1], [0], [0], [1], [0, 0, 1, 1], [], []>} : vector<8x8xbf16>, vector<8x8xbf16>, vector<8x8xf32> -> vector<8x8xf32>
    %1120 = arith.truncf %1119 : vector<8x8xf32> to vector<8x8xbf16>
    %c8_633 = arith.constant 8 : index
    %c0_634 = arith.constant 0 : index
    %c0_635 = arith.constant 0 : index
    %1121 = vector.load %arg16[%c8_633, %c0_634, %c0_635] : memref<16x8x32xbf16, #tpu.memory_space<vmem>>, vector<1x8x32xbf16>
    %1122 = vector.shape_cast %1121 : vector<1x8x32xbf16> to vector<8x32xbf16>
    %cst_636 = arith.constant dense<0.000000e+00> : vector<8x32xf32>
    %1123 = tpu.matmul %1120, %1122, %cst_636 {dimension_numbers = #tpu.dot_dimension_numbers<[1], [0], [0], [1], [0, 0, 1, 1], [], []>} : vector<8x8xbf16>, vector<8x32xbf16>, vector<8x32xf32> -> vector<8x32xf32>
    %1124 = arith.addf %1077, %1123 : vector<8x32xf32>
    %c25 = arith.constant 25 : index
    %c0_637 = arith.constant 0 : index
    %c0_638 = arith.constant 0 : index
    %1125 = vector.load %arg14[%c25, %c0_637, %c0_638] : memref<48x32x8xbf16, #tpu.memory_space<vmem>>, vector<1x32x8xbf16>
    %1126 = vector.shape_cast %1125 : vector<1x32x8xbf16> to vector<32x8xbf16>
    %cst_639 = arith.constant dense<0.000000e+00> : vector<8x8xf32>
    %1127 = tpu.matmul %1070, %1126, %cst_639 {dimension_numbers = #tpu.dot_dimension_numbers<[1], [0], [0], [1], [0, 0, 1, 1], [], []>} : vector<8x32xbf16>, vector<32x8xbf16>, vector<8x8xf32> -> vector<8x8xf32>
    %c25_640 = arith.constant 25 : index
    %c0_641 = arith.constant 0 : index
    %c0_642 = arith.constant 0 : index
    %1128 = vector.load %arg15[%c25_640, %c0_641, %c0_642] : memref<48x1x8xf32, #tpu.memory_space<vmem>>, vector<1x1x8xf32>
    %1129 = vector.shape_cast %1128 : vector<1x1x8xf32> to vector<1x8xf32>
    %1130 = vector.broadcast %1129 : vector<1x8xf32> to vector<8x8xf32>
    %1131 = arith.addf %1127, %1130 : vector<8x8xf32>
    %c29 = arith.constant 29 : index
    %c0_643 = arith.constant 0 : index
    %c0_644 = arith.constant 0 : index
    %1132 = vector.load %arg14[%c29, %c0_643, %c0_644] : memref<48x32x8xbf16, #tpu.memory_space<vmem>>, vector<1x32x8xbf16>
    %1133 = vector.shape_cast %1132 : vector<1x32x8xbf16> to vector<32x8xbf16>
    %cst_645 = arith.constant dense<0.000000e+00> : vector<8x8xf32>
    %1134 = tpu.matmul %1071, %1133, %cst_645 {dimension_numbers = #tpu.dot_dimension_numbers<[1], [0], [0], [1], [0, 0, 1, 1], [], []>} : vector<8x32xbf16>, vector<32x8xbf16>, vector<8x8xf32> -> vector<8x8xf32>
    %c29_646 = arith.constant 29 : index
    %c0_647 = arith.constant 0 : index
    %c0_648 = arith.constant 0 : index
    %1135 = vector.load %arg15[%c29_646, %c0_647, %c0_648] : memref<48x1x8xf32, #tpu.memory_space<vmem>>, vector<1x1x8xf32>
    %1136 = vector.shape_cast %1135 : vector<1x1x8xf32> to vector<1x8xf32>
    %1137 = vector.broadcast %1136 : vector<1x8xf32> to vector<8x8xf32>
    %1138 = arith.addf %1134, %1137 : vector<8x8xf32>
    %c33 = arith.constant 33 : index
    %c0_649 = arith.constant 0 : index
    %c0_650 = arith.constant 0 : index
    %1139 = vector.load %arg14[%c33, %c0_649, %c0_650] : memref<48x32x8xbf16, #tpu.memory_space<vmem>>, vector<1x32x8xbf16>
    %1140 = vector.shape_cast %1139 : vector<1x32x8xbf16> to vector<32x8xbf16>
    %cst_651 = arith.constant dense<0.000000e+00> : vector<8x8xf32>
    %1141 = tpu.matmul %1071, %1140, %cst_651 {dimension_numbers = #tpu.dot_dimension_numbers<[1], [0], [0], [1], [0, 0, 1, 1], [], []>} : vector<8x32xbf16>, vector<32x8xbf16>, vector<8x8xf32> -> vector<8x8xf32>
    %c33_652 = arith.constant 33 : index
    %c0_653 = arith.constant 0 : index
    %c0_654 = arith.constant 0 : index
    %1142 = vector.load %arg15[%c33_652, %c0_653, %c0_654] : memref<48x1x8xf32, #tpu.memory_space<vmem>>, vector<1x1x8xf32>
    %1143 = vector.shape_cast %1142 : vector<1x1x8xf32> to vector<1x8xf32>
    %1144 = vector.broadcast %1143 : vector<1x8xf32> to vector<8x8xf32>
    %1145 = arith.addf %1141, %1144 : vector<8x8xf32>
    %1146 = arith.truncf %1131 : vector<8x8xf32> to vector<8x8xbf16>
    %1147 = tpu.transpose %1138, [1, 0] : vector<8x8xf32> -> vector<8x8xf32>
    %1148 = arith.truncf %1147 : vector<8x8xf32> to vector<8x8xbf16>
    %cst_655 = arith.constant dense<0.000000e+00> : vector<8x8xf32>
    %1149 = tpu.matmul %1146, %1148, %cst_655 {dimension_numbers = #tpu.dot_dimension_numbers<[1], [0], [0], [1], [0, 0, 1, 1], [], []>} : vector<8x8xbf16>, vector<8x8xbf16>, vector<8x8xf32> -> vector<8x8xf32>
    %cst_656 = arith.constant 0.353553385 : f32
    %1150 = vector.broadcast %cst_656 : f32 to vector<8x8xf32>
    %1151 = arith.mulf %1149, %1150 : vector<8x8xf32>
    %cst_657 = arith.constant -1.000000e+10 : f32
    %1152 = vector.broadcast %cst_657 : f32 to vector<8x8xf32>
    %1153 = arith.select %1076, %1151, %1152 : vector<8x8xi1>, vector<8x8xf32>
    %cst_658 = arith.constant dense<0xFF800000> : vector<8xf32>
    %1154 = vector.multi_reduction <maximumf>, %1153, %cst_658 [1] : vector<8x8xf32> to vector<8xf32>
    %1155 = vector.shape_cast %1154 : vector<8xf32> to vector<8x1xf32>
    %1156 = vector.broadcast %1155 : vector<8x1xf32> to vector<8x8xf32>
    %1157 = arith.subf %1153, %1156 : vector<8x8xf32>
    %1158 = math.exp %1157 : vector<8x8xf32>
    %cst_659 = arith.constant dense<0.000000e+00> : vector<8xf32>
    %1159 = vector.multi_reduction <add>, %1158, %cst_659 [1] : vector<8x8xf32> to vector<8xf32>
    %1160 = vector.shape_cast %1159 : vector<8xf32> to vector<8x1xf32>
    %1161 = tpu.reciprocal %1160 {approx = true} : vector<8x1xf32> -> vector<8x1xf32>
    %1162 = vector.broadcast %1161 : vector<8x1xf32> to vector<8x8xf32>
    %1163 = arith.mulf %1158, %1162 : vector<8x8xf32>
    %1164 = arith.truncf %1163 : vector<8x8xf32> to vector<8x8xbf16>
    %1165 = arith.truncf %1145 : vector<8x8xf32> to vector<8x8xbf16>
    %cst_660 = arith.constant dense<0.000000e+00> : vector<8x8xf32>
    %1166 = tpu.matmul %1164, %1165, %cst_660 {dimension_numbers = #tpu.dot_dimension_numbers<[1], [0], [0], [1], [0, 0, 1, 1], [], []>} : vector<8x8xbf16>, vector<8x8xbf16>, vector<8x8xf32> -> vector<8x8xf32>
    %1167 = arith.truncf %1166 : vector<8x8xf32> to vector<8x8xbf16>
    %c9_661 = arith.constant 9 : index
    %c0_662 = arith.constant 0 : index
    %c0_663 = arith.constant 0 : index
    %1168 = vector.load %arg16[%c9_661, %c0_662, %c0_663] : memref<16x8x32xbf16, #tpu.memory_space<vmem>>, vector<1x8x32xbf16>
    %1169 = vector.shape_cast %1168 : vector<1x8x32xbf16> to vector<8x32xbf16>
    %cst_664 = arith.constant dense<0.000000e+00> : vector<8x32xf32>
    %1170 = tpu.matmul %1167, %1169, %cst_664 {dimension_numbers = #tpu.dot_dimension_numbers<[1], [0], [0], [1], [0, 0, 1, 1], [], []>} : vector<8x8xbf16>, vector<8x32xbf16>, vector<8x32xf32> -> vector<8x32xf32>
    %1171 = arith.addf %1124, %1170 : vector<8x32xf32>
    %c26 = arith.constant 26 : index
    %c0_665 = arith.constant 0 : index
    %c0_666 = arith.constant 0 : index
    %1172 = vector.load %arg14[%c26, %c0_665, %c0_666] : memref<48x32x8xbf16, #tpu.memory_space<vmem>>, vector<1x32x8xbf16>
    %1173 = vector.shape_cast %1172 : vector<1x32x8xbf16> to vector<32x8xbf16>
    %cst_667 = arith.constant dense<0.000000e+00> : vector<8x8xf32>
    %1174 = tpu.matmul %1070, %1173, %cst_667 {dimension_numbers = #tpu.dot_dimension_numbers<[1], [0], [0], [1], [0, 0, 1, 1], [], []>} : vector<8x32xbf16>, vector<32x8xbf16>, vector<8x8xf32> -> vector<8x8xf32>
    %c26_668 = arith.constant 26 : index
    %c0_669 = arith.constant 0 : index
    %c0_670 = arith.constant 0 : index
    %1175 = vector.load %arg15[%c26_668, %c0_669, %c0_670] : memref<48x1x8xf32, #tpu.memory_space<vmem>>, vector<1x1x8xf32>
    %1176 = vector.shape_cast %1175 : vector<1x1x8xf32> to vector<1x8xf32>
    %1177 = vector.broadcast %1176 : vector<1x8xf32> to vector<8x8xf32>
    %1178 = arith.addf %1174, %1177 : vector<8x8xf32>
    %c30 = arith.constant 30 : index
    %c0_671 = arith.constant 0 : index
    %c0_672 = arith.constant 0 : index
    %1179 = vector.load %arg14[%c30, %c0_671, %c0_672] : memref<48x32x8xbf16, #tpu.memory_space<vmem>>, vector<1x32x8xbf16>
    %1180 = vector.shape_cast %1179 : vector<1x32x8xbf16> to vector<32x8xbf16>
    %cst_673 = arith.constant dense<0.000000e+00> : vector<8x8xf32>
    %1181 = tpu.matmul %1071, %1180, %cst_673 {dimension_numbers = #tpu.dot_dimension_numbers<[1], [0], [0], [1], [0, 0, 1, 1], [], []>} : vector<8x32xbf16>, vector<32x8xbf16>, vector<8x8xf32> -> vector<8x8xf32>
    %c30_674 = arith.constant 30 : index
    %c0_675 = arith.constant 0 : index
    %c0_676 = arith.constant 0 : index
    %1182 = vector.load %arg15[%c30_674, %c0_675, %c0_676] : memref<48x1x8xf32, #tpu.memory_space<vmem>>, vector<1x1x8xf32>
    %1183 = vector.shape_cast %1182 : vector<1x1x8xf32> to vector<1x8xf32>
    %1184 = vector.broadcast %1183 : vector<1x8xf32> to vector<8x8xf32>
    %1185 = arith.addf %1181, %1184 : vector<8x8xf32>
    %c34 = arith.constant 34 : index
    %c0_677 = arith.constant 0 : index
    %c0_678 = arith.constant 0 : index
    %1186 = vector.load %arg14[%c34, %c0_677, %c0_678] : memref<48x32x8xbf16, #tpu.memory_space<vmem>>, vector<1x32x8xbf16>
    %1187 = vector.shape_cast %1186 : vector<1x32x8xbf16> to vector<32x8xbf16>
    %cst_679 = arith.constant dense<0.000000e+00> : vector<8x8xf32>
    %1188 = tpu.matmul %1071, %1187, %cst_679 {dimension_numbers = #tpu.dot_dimension_numbers<[1], [0], [0], [1], [0, 0, 1, 1], [], []>} : vector<8x32xbf16>, vector<32x8xbf16>, vector<8x8xf32> -> vector<8x8xf32>
    %c34_680 = arith.constant 34 : index
    %c0_681 = arith.constant 0 : index
    %c0_682 = arith.constant 0 : index
    %1189 = vector.load %arg15[%c34_680, %c0_681, %c0_682] : memref<48x1x8xf32, #tpu.memory_space<vmem>>, vector<1x1x8xf32>
    %1190 = vector.shape_cast %1189 : vector<1x1x8xf32> to vector<1x8xf32>
    %1191 = vector.broadcast %1190 : vector<1x8xf32> to vector<8x8xf32>
    %1192 = arith.addf %1188, %1191 : vector<8x8xf32>
    %1193 = arith.truncf %1178 : vector<8x8xf32> to vector<8x8xbf16>
    %1194 = tpu.transpose %1185, [1, 0] : vector<8x8xf32> -> vector<8x8xf32>
    %1195 = arith.truncf %1194 : vector<8x8xf32> to vector<8x8xbf16>
    %cst_683 = arith.constant dense<0.000000e+00> : vector<8x8xf32>
    %1196 = tpu.matmul %1193, %1195, %cst_683 {dimension_numbers = #tpu.dot_dimension_numbers<[1], [0], [0], [1], [0, 0, 1, 1], [], []>} : vector<8x8xbf16>, vector<8x8xbf16>, vector<8x8xf32> -> vector<8x8xf32>
    %cst_684 = arith.constant 0.353553385 : f32
    %1197 = vector.broadcast %cst_684 : f32 to vector<8x8xf32>
    %1198 = arith.mulf %1196, %1197 : vector<8x8xf32>
    %cst_685 = arith.constant -1.000000e+10 : f32
    %1199 = vector.broadcast %cst_685 : f32 to vector<8x8xf32>
    %1200 = arith.select %1076, %1198, %1199 : vector<8x8xi1>, vector<8x8xf32>
    %cst_686 = arith.constant dense<0xFF800000> : vector<8xf32>
    %1201 = vector.multi_reduction <maximumf>, %1200, %cst_686 [1] : vector<8x8xf32> to vector<8xf32>
    %1202 = vector.shape_cast %1201 : vector<8xf32> to vector<8x1xf32>
    %1203 = vector.broadcast %1202 : vector<8x1xf32> to vector<8x8xf32>
    %1204 = arith.subf %1200, %1203 : vector<8x8xf32>
    %1205 = math.exp %1204 : vector<8x8xf32>
    %cst_687 = arith.constant dense<0.000000e+00> : vector<8xf32>
    %1206 = vector.multi_reduction <add>, %1205, %cst_687 [1] : vector<8x8xf32> to vector<8xf32>
    %1207 = vector.shape_cast %1206 : vector<8xf32> to vector<8x1xf32>
    %1208 = tpu.reciprocal %1207 {approx = true} : vector<8x1xf32> -> vector<8x1xf32>
    %1209 = vector.broadcast %1208 : vector<8x1xf32> to vector<8x8xf32>
    %1210 = arith.mulf %1205, %1209 : vector<8x8xf32>
    %1211 = arith.truncf %1210 : vector<8x8xf32> to vector<8x8xbf16>
    %1212 = arith.truncf %1192 : vector<8x8xf32> to vector<8x8xbf16>
    %cst_688 = arith.constant dense<0.000000e+00> : vector<8x8xf32>
    %1213 = tpu.matmul %1211, %1212, %cst_688 {dimension_numbers = #tpu.dot_dimension_numbers<[1], [0], [0], [1], [0, 0, 1, 1], [], []>} : vector<8x8xbf16>, vector<8x8xbf16>, vector<8x8xf32> -> vector<8x8xf32>
    %1214 = arith.truncf %1213 : vector<8x8xf32> to vector<8x8xbf16>
    %c10_689 = arith.constant 10 : index
    %c0_690 = arith.constant 0 : index
    %c0_691 = arith.constant 0 : index
    %1215 = vector.load %arg16[%c10_689, %c0_690, %c0_691] : memref<16x8x32xbf16, #tpu.memory_space<vmem>>, vector<1x8x32xbf16>
    %1216 = vector.shape_cast %1215 : vector<1x8x32xbf16> to vector<8x32xbf16>
    %cst_692 = arith.constant dense<0.000000e+00> : vector<8x32xf32>
    %1217 = tpu.matmul %1214, %1216, %cst_692 {dimension_numbers = #tpu.dot_dimension_numbers<[1], [0], [0], [1], [0, 0, 1, 1], [], []>} : vector<8x8xbf16>, vector<8x32xbf16>, vector<8x32xf32> -> vector<8x32xf32>
    %1218 = arith.addf %1171, %1217 : vector<8x32xf32>
    %c27 = arith.constant 27 : index
    %c0_693 = arith.constant 0 : index
    %c0_694 = arith.constant 0 : index
    %1219 = vector.load %arg14[%c27, %c0_693, %c0_694] : memref<48x32x8xbf16, #tpu.memory_space<vmem>>, vector<1x32x8xbf16>
    %1220 = vector.shape_cast %1219 : vector<1x32x8xbf16> to vector<32x8xbf16>
    %cst_695 = arith.constant dense<0.000000e+00> : vector<8x8xf32>
    %1221 = tpu.matmul %1070, %1220, %cst_695 {dimension_numbers = #tpu.dot_dimension_numbers<[1], [0], [0], [1], [0, 0, 1, 1], [], []>} : vector<8x32xbf16>, vector<32x8xbf16>, vector<8x8xf32> -> vector<8x8xf32>
    %c27_696 = arith.constant 27 : index
    %c0_697 = arith.constant 0 : index
    %c0_698 = arith.constant 0 : index
    %1222 = vector.load %arg15[%c27_696, %c0_697, %c0_698] : memref<48x1x8xf32, #tpu.memory_space<vmem>>, vector<1x1x8xf32>
    %1223 = vector.shape_cast %1222 : vector<1x1x8xf32> to vector<1x8xf32>
    %1224 = vector.broadcast %1223 : vector<1x8xf32> to vector<8x8xf32>
    %1225 = arith.addf %1221, %1224 : vector<8x8xf32>
    %c31 = arith.constant 31 : index
    %c0_699 = arith.constant 0 : index
    %c0_700 = arith.constant 0 : index
    %1226 = vector.load %arg14[%c31, %c0_699, %c0_700] : memref<48x32x8xbf16, #tpu.memory_space<vmem>>, vector<1x32x8xbf16>
    %1227 = vector.shape_cast %1226 : vector<1x32x8xbf16> to vector<32x8xbf16>
    %cst_701 = arith.constant dense<0.000000e+00> : vector<8x8xf32>
    %1228 = tpu.matmul %1071, %1227, %cst_701 {dimension_numbers = #tpu.dot_dimension_numbers<[1], [0], [0], [1], [0, 0, 1, 1], [], []>} : vector<8x32xbf16>, vector<32x8xbf16>, vector<8x8xf32> -> vector<8x8xf32>
    %c31_702 = arith.constant 31 : index
    %c0_703 = arith.constant 0 : index
    %c0_704 = arith.constant 0 : index
    %1229 = vector.load %arg15[%c31_702, %c0_703, %c0_704] : memref<48x1x8xf32, #tpu.memory_space<vmem>>, vector<1x1x8xf32>
    %1230 = vector.shape_cast %1229 : vector<1x1x8xf32> to vector<1x8xf32>
    %1231 = vector.broadcast %1230 : vector<1x8xf32> to vector<8x8xf32>
    %1232 = arith.addf %1228, %1231 : vector<8x8xf32>
    %c35 = arith.constant 35 : index
    %c0_705 = arith.constant 0 : index
    %c0_706 = arith.constant 0 : index
    %1233 = vector.load %arg14[%c35, %c0_705, %c0_706] : memref<48x32x8xbf16, #tpu.memory_space<vmem>>, vector<1x32x8xbf16>
    %1234 = vector.shape_cast %1233 : vector<1x32x8xbf16> to vector<32x8xbf16>
    %cst_707 = arith.constant dense<0.000000e+00> : vector<8x8xf32>
    %1235 = tpu.matmul %1071, %1234, %cst_707 {dimension_numbers = #tpu.dot_dimension_numbers<[1], [0], [0], [1], [0, 0, 1, 1], [], []>} : vector<8x32xbf16>, vector<32x8xbf16>, vector<8x8xf32> -> vector<8x8xf32>
    %c35_708 = arith.constant 35 : index
    %c0_709 = arith.constant 0 : index
    %c0_710 = arith.constant 0 : index
    %1236 = vector.load %arg15[%c35_708, %c0_709, %c0_710] : memref<48x1x8xf32, #tpu.memory_space<vmem>>, vector<1x1x8xf32>
    %1237 = vector.shape_cast %1236 : vector<1x1x8xf32> to vector<1x8xf32>
    %1238 = vector.broadcast %1237 : vector<1x8xf32> to vector<8x8xf32>
    %1239 = arith.addf %1235, %1238 : vector<8x8xf32>
    %1240 = arith.truncf %1225 : vector<8x8xf32> to vector<8x8xbf16>
    %1241 = tpu.transpose %1232, [1, 0] : vector<8x8xf32> -> vector<8x8xf32>
    %1242 = arith.truncf %1241 : vector<8x8xf32> to vector<8x8xbf16>
    %cst_711 = arith.constant dense<0.000000e+00> : vector<8x8xf32>
    %1243 = tpu.matmul %1240, %1242, %cst_711 {dimension_numbers = #tpu.dot_dimension_numbers<[1], [0], [0], [1], [0, 0, 1, 1], [], []>} : vector<8x8xbf16>, vector<8x8xbf16>, vector<8x8xf32> -> vector<8x8xf32>
    %cst_712 = arith.constant 0.353553385 : f32
    %1244 = vector.broadcast %cst_712 : f32 to vector<8x8xf32>
    %1245 = arith.mulf %1243, %1244 : vector<8x8xf32>
    %cst_713 = arith.constant -1.000000e+10 : f32
    %1246 = vector.broadcast %cst_713 : f32 to vector<8x8xf32>
    %1247 = arith.select %1076, %1245, %1246 : vector<8x8xi1>, vector<8x8xf32>
    %cst_714 = arith.constant dense<0xFF800000> : vector<8xf32>
    %1248 = vector.multi_reduction <maximumf>, %1247, %cst_714 [1] : vector<8x8xf32> to vector<8xf32>
    %1249 = vector.shape_cast %1248 : vector<8xf32> to vector<8x1xf32>
    %1250 = vector.broadcast %1249 : vector<8x1xf32> to vector<8x8xf32>
    %1251 = arith.subf %1247, %1250 : vector<8x8xf32>
    %1252 = math.exp %1251 : vector<8x8xf32>
    %cst_715 = arith.constant dense<0.000000e+00> : vector<8xf32>
    %1253 = vector.multi_reduction <add>, %1252, %cst_715 [1] : vector<8x8xf32> to vector<8xf32>
    %1254 = vector.shape_cast %1253 : vector<8xf32> to vector<8x1xf32>
    %1255 = tpu.reciprocal %1254 {approx = true} : vector<8x1xf32> -> vector<8x1xf32>
    %1256 = vector.broadcast %1255 : vector<8x1xf32> to vector<8x8xf32>
    %1257 = arith.mulf %1252, %1256 : vector<8x8xf32>
    %1258 = arith.truncf %1257 : vector<8x8xf32> to vector<8x8xbf16>
    %1259 = arith.truncf %1239 : vector<8x8xf32> to vector<8x8xbf16>
    %cst_716 = arith.constant dense<0.000000e+00> : vector<8x8xf32>
    %1260 = tpu.matmul %1258, %1259, %cst_716 {dimension_numbers = #tpu.dot_dimension_numbers<[1], [0], [0], [1], [0, 0, 1, 1], [], []>} : vector<8x8xbf16>, vector<8x8xbf16>, vector<8x8xf32> -> vector<8x8xf32>
    %1261 = arith.truncf %1260 : vector<8x8xf32> to vector<8x8xbf16>
    %c11_717 = arith.constant 11 : index
    %c0_718 = arith.constant 0 : index
    %c0_719 = arith.constant 0 : index
    %1262 = vector.load %arg16[%c11_717, %c0_718, %c0_719] : memref<16x8x32xbf16, #tpu.memory_space<vmem>>, vector<1x8x32xbf16>
    %1263 = vector.shape_cast %1262 : vector<1x8x32xbf16> to vector<8x32xbf16>
    %cst_720 = arith.constant dense<0.000000e+00> : vector<8x32xf32>
    %1264 = tpu.matmul %1261, %1263, %cst_720 {dimension_numbers = #tpu.dot_dimension_numbers<[1], [0], [0], [1], [0, 0, 1, 1], [], []>} : vector<8x8xbf16>, vector<8x32xbf16>, vector<8x32xf32> -> vector<8x32xf32>
    %1265 = arith.addf %1218, %1264 : vector<8x32xf32>
    %1266 = vector.broadcast %1067 : vector<1x32xf32> to vector<8x32xf32>
    %1267 = arith.addf %1265, %1266 : vector<8x32xf32>
    %1268 = arith.addf %1063, %1267 : vector<8x32xf32>
    %cst_721 = arith.constant dense<0.000000e+00> : vector<8xf32>
    %1269 = vector.multi_reduction <add>, %1268, %cst_721 [1] : vector<8x32xf32> to vector<8xf32>
    %1270 = vector.shape_cast %1269 : vector<8xf32> to vector<8x1xf32>
    %cst_722 = arith.constant 3.200000e+01 : f32
    %1271 = vector.broadcast %cst_722 : f32 to vector<8x1xf32>
    %1272 = arith.divf %1270, %1271 : vector<8x1xf32>
    %1273 = vector.broadcast %1272 : vector<8x1xf32> to vector<8x32xf32>
    %1274 = arith.subf %1268, %1273 : vector<8x32xf32>
    %1275 = arith.mulf %1274, %1274 : vector<8x32xf32>
    %cst_723 = arith.constant dense<0.000000e+00> : vector<8xf32>
    %1276 = vector.multi_reduction <add>, %1275, %cst_723 [1] : vector<8x32xf32> to vector<8xf32>
    %1277 = vector.shape_cast %1276 : vector<8xf32> to vector<8x1xf32>
    %cst_724 = arith.constant 3.200000e+01 : f32
    %1278 = vector.broadcast %cst_724 : f32 to vector<8x1xf32>
    %1279 = arith.divf %1277, %1278 : vector<8x1xf32>
    %1280 = vector.broadcast %1272 : vector<8x1xf32> to vector<8x32xf32>
    %1281 = arith.subf %1268, %1280 : vector<8x32xf32>
    %cst_725 = arith.constant 9.99999974E-6 : f32
    %1282 = vector.broadcast %cst_725 : f32 to vector<8x1xf32>
    %1283 = arith.addf %1279, %1282 : vector<8x1xf32>
    %1284 = math.rsqrt %1283 : vector<8x1xf32>
    %1285 = vector.broadcast %1284 : vector<8x1xf32> to vector<8x32xf32>
    %1286 = arith.mulf %1281, %1285 : vector<8x32xf32>
    %1287 = vector.broadcast %1068 : vector<1x32xf32> to vector<8x32xf32>
    %1288 = arith.mulf %1286, %1287 : vector<8x32xf32>
    %1289 = vector.broadcast %1069 : vector<1x32xf32> to vector<8x32xf32>
    %1290 = arith.addf %1288, %1289 : vector<8x32xf32>
    %c4_726 = arith.constant 4 : index
    %c0_727 = arith.constant 0 : index
    %c0_728 = arith.constant 0 : index
    %1291 = vector.load %arg22[%c4_726, %c0_727, %c0_728] : memref<6x2x32xf32, #tpu.memory_space<vmem>>, vector<1x2x32xf32>
    %1292 = vector.shape_cast %1291 : vector<1x2x32xf32> to vector<2x32xf32>
    %c3_729 = arith.constant 3 : index
    %c0_730 = arith.constant 0 : index
    %c0_731 = arith.constant 0 : index
    %1293 = vector.load %arg17[%c3_729, %c0_730, %c0_731] : memref<4x1x32xf32, #tpu.memory_space<vmem>>, vector<1x1x32xf32>
    %1294 = vector.shape_cast %1293 : vector<1x1x32xf32> to vector<1x32xf32>
    %1295 = vector.extract_strided_slice %1292 {offsets = [0, 0], sizes = [1, 32], strides = [1, 1]} : vector<2x32xf32> to vector<1x32xf32>
    %1296 = vector.extract_strided_slice %1292 {offsets = [1, 0], sizes = [1, 32], strides = [1, 1]} : vector<2x32xf32> to vector<1x32xf32>
    %1297 = arith.truncf %1290 : vector<8x32xf32> to vector<8x32xbf16>
    %1298 = arith.truncf %559 : vector<8x32xf32> to vector<8x32xbf16>
    %cst_732 = arith.constant 0.000000e+00 : f32
    %1299 = vector.broadcast %cst_732 : f32 to vector<8x32xf32>
    %c36 = arith.constant 36 : index
    %c0_733 = arith.constant 0 : index
    %c0_734 = arith.constant 0 : index
    %1300 = vector.load %arg14[%c36, %c0_733, %c0_734] : memref<48x32x8xbf16, #tpu.memory_space<vmem>>, vector<1x32x8xbf16>
    %1301 = vector.shape_cast %1300 : vector<1x32x8xbf16> to vector<32x8xbf16>
    %cst_735 = arith.constant dense<0.000000e+00> : vector<8x8xf32>
    %1302 = tpu.matmul %1297, %1301, %cst_735 {dimension_numbers = #tpu.dot_dimension_numbers<[1], [0], [0], [1], [0, 0, 1, 1], [], []>} : vector<8x32xbf16>, vector<32x8xbf16>, vector<8x8xf32> -> vector<8x8xf32>
    %c36_736 = arith.constant 36 : index
    %c0_737 = arith.constant 0 : index
    %c0_738 = arith.constant 0 : index
    %1303 = vector.load %arg15[%c36_736, %c0_737, %c0_738] : memref<48x1x8xf32, #tpu.memory_space<vmem>>, vector<1x1x8xf32>
    %1304 = vector.shape_cast %1303 : vector<1x1x8xf32> to vector<1x8xf32>
    %1305 = vector.broadcast %1304 : vector<1x8xf32> to vector<8x8xf32>
    %1306 = arith.addf %1302, %1305 : vector<8x8xf32>
    %c40 = arith.constant 40 : index
    %c0_739 = arith.constant 0 : index
    %c0_740 = arith.constant 0 : index
    %1307 = vector.load %arg14[%c40, %c0_739, %c0_740] : memref<48x32x8xbf16, #tpu.memory_space<vmem>>, vector<1x32x8xbf16>
    %1308 = vector.shape_cast %1307 : vector<1x32x8xbf16> to vector<32x8xbf16>
    %cst_741 = arith.constant dense<0.000000e+00> : vector<8x8xf32>
    %1309 = tpu.matmul %1298, %1308, %cst_741 {dimension_numbers = #tpu.dot_dimension_numbers<[1], [0], [0], [1], [0, 0, 1, 1], [], []>} : vector<8x32xbf16>, vector<32x8xbf16>, vector<8x8xf32> -> vector<8x8xf32>
    %c40_742 = arith.constant 40 : index
    %c0_743 = arith.constant 0 : index
    %c0_744 = arith.constant 0 : index
    %1310 = vector.load %arg15[%c40_742, %c0_743, %c0_744] : memref<48x1x8xf32, #tpu.memory_space<vmem>>, vector<1x1x8xf32>
    %1311 = vector.shape_cast %1310 : vector<1x1x8xf32> to vector<1x8xf32>
    %1312 = vector.broadcast %1311 : vector<1x8xf32> to vector<8x8xf32>
    %1313 = arith.addf %1309, %1312 : vector<8x8xf32>
    %c44 = arith.constant 44 : index
    %c0_745 = arith.constant 0 : index
    %c0_746 = arith.constant 0 : index
    %1314 = vector.load %arg14[%c44, %c0_745, %c0_746] : memref<48x32x8xbf16, #tpu.memory_space<vmem>>, vector<1x32x8xbf16>
    %1315 = vector.shape_cast %1314 : vector<1x32x8xbf16> to vector<32x8xbf16>
    %cst_747 = arith.constant dense<0.000000e+00> : vector<8x8xf32>
    %1316 = tpu.matmul %1298, %1315, %cst_747 {dimension_numbers = #tpu.dot_dimension_numbers<[1], [0], [0], [1], [0, 0, 1, 1], [], []>} : vector<8x32xbf16>, vector<32x8xbf16>, vector<8x8xf32> -> vector<8x8xf32>
    %c44_748 = arith.constant 44 : index
    %c0_749 = arith.constant 0 : index
    %c0_750 = arith.constant 0 : index
    %1317 = vector.load %arg15[%c44_748, %c0_749, %c0_750] : memref<48x1x8xf32, #tpu.memory_space<vmem>>, vector<1x1x8xf32>
    %1318 = vector.shape_cast %1317 : vector<1x1x8xf32> to vector<1x8xf32>
    %1319 = vector.broadcast %1318 : vector<1x8xf32> to vector<8x8xf32>
    %1320 = arith.addf %1316, %1319 : vector<8x8xf32>
    %1321 = arith.truncf %1306 : vector<8x8xf32> to vector<8x8xbf16>
    %1322 = tpu.transpose %1313, [1, 0] : vector<8x8xf32> -> vector<8x8xf32>
    %1323 = arith.truncf %1322 : vector<8x8xf32> to vector<8x8xbf16>
    %cst_751 = arith.constant dense<0.000000e+00> : vector<8x8xf32>
    %1324 = tpu.matmul %1321, %1323, %cst_751 {dimension_numbers = #tpu.dot_dimension_numbers<[1], [0], [0], [1], [0, 0, 1, 1], [], []>} : vector<8x8xbf16>, vector<8x8xbf16>, vector<8x8xf32> -> vector<8x8xf32>
    %cst_752 = arith.constant 0.353553385 : f32
    %1325 = vector.broadcast %cst_752 : f32 to vector<8x8xf32>
    %1326 = arith.mulf %1324, %1325 : vector<8x8xf32>
    %cst_753 = arith.constant -1.000000e+10 : f32
    %1327 = vector.shape_cast %3 : vector<1x8xi1> to vector<1x8xi1>
    %1328 = vector.broadcast %1327 : vector<1x8xi1> to vector<8x8xi1>
    %1329 = vector.broadcast %cst_753 : f32 to vector<8x8xf32>
    %1330 = arith.select %1328, %1326, %1329 : vector<8x8xi1>, vector<8x8xf32>
    %cst_754 = arith.constant dense<0xFF800000> : vector<8xf32>
    %1331 = vector.multi_reduction <maximumf>, %1330, %cst_754 [1] : vector<8x8xf32> to vector<8xf32>
    %1332 = vector.shape_cast %1331 : vector<8xf32> to vector<8x1xf32>
    %1333 = vector.broadcast %1332 : vector<8x1xf32> to vector<8x8xf32>
    %1334 = arith.subf %1330, %1333 : vector<8x8xf32>
    %1335 = math.exp %1334 : vector<8x8xf32>
    %cst_755 = arith.constant dense<0.000000e+00> : vector<8xf32>
    %1336 = vector.multi_reduction <add>, %1335, %cst_755 [1] : vector<8x8xf32> to vector<8xf32>
    %1337 = vector.shape_cast %1336 : vector<8xf32> to vector<8x1xf32>
    %1338 = vector.broadcast %1337 : vector<8x1xf32> to vector<8x8xf32>
    %1339 = arith.divf %1335, %1338 : vector<8x8xf32>
    %1340 = arith.truncf %1339 : vector<8x8xf32> to vector<8x8xbf16>
    %1341 = arith.truncf %1320 : vector<8x8xf32> to vector<8x8xbf16>
    %cst_756 = arith.constant dense<0.000000e+00> : vector<8x8xf32>
    %1342 = tpu.matmul %1340, %1341, %cst_756 {dimension_numbers = #tpu.dot_dimension_numbers<[1], [0], [0], [1], [0, 0, 1, 1], [], []>} : vector<8x8xbf16>, vector<8x8xbf16>, vector<8x8xf32> -> vector<8x8xf32>
    %1343 = arith.truncf %1342 : vector<8x8xf32> to vector<8x8xbf16>
    %c12_757 = arith.constant 12 : index
    %c0_758 = arith.constant 0 : index
    %c0_759 = arith.constant 0 : index
    %1344 = vector.load %arg16[%c12_757, %c0_758, %c0_759] : memref<16x8x32xbf16, #tpu.memory_space<vmem>>, vector<1x8x32xbf16>
    %1345 = vector.shape_cast %1344 : vector<1x8x32xbf16> to vector<8x32xbf16>
    %cst_760 = arith.constant dense<0.000000e+00> : vector<8x32xf32>
    %1346 = tpu.matmul %1343, %1345, %cst_760 {dimension_numbers = #tpu.dot_dimension_numbers<[1], [0], [0], [1], [0, 0, 1, 1], [], []>} : vector<8x8xbf16>, vector<8x32xbf16>, vector<8x32xf32> -> vector<8x32xf32>
    %1347 = arith.addf %1299, %1346 : vector<8x32xf32>
    %c37 = arith.constant 37 : index
    %c0_761 = arith.constant 0 : index
    %c0_762 = arith.constant 0 : index
    %1348 = vector.load %arg14[%c37, %c0_761, %c0_762] : memref<48x32x8xbf16, #tpu.memory_space<vmem>>, vector<1x32x8xbf16>
    %1349 = vector.shape_cast %1348 : vector<1x32x8xbf16> to vector<32x8xbf16>
    %cst_763 = arith.constant dense<0.000000e+00> : vector<8x8xf32>
    %1350 = tpu.matmul %1297, %1349, %cst_763 {dimension_numbers = #tpu.dot_dimension_numbers<[1], [0], [0], [1], [0, 0, 1, 1], [], []>} : vector<8x32xbf16>, vector<32x8xbf16>, vector<8x8xf32> -> vector<8x8xf32>
    %c37_764 = arith.constant 37 : index
    %c0_765 = arith.constant 0 : index
    %c0_766 = arith.constant 0 : index
    %1351 = vector.load %arg15[%c37_764, %c0_765, %c0_766] : memref<48x1x8xf32, #tpu.memory_space<vmem>>, vector<1x1x8xf32>
    %1352 = vector.shape_cast %1351 : vector<1x1x8xf32> to vector<1x8xf32>
    %1353 = vector.broadcast %1352 : vector<1x8xf32> to vector<8x8xf32>
    %1354 = arith.addf %1350, %1353 : vector<8x8xf32>
    %c41 = arith.constant 41 : index
    %c0_767 = arith.constant 0 : index
    %c0_768 = arith.constant 0 : index
    %1355 = vector.load %arg14[%c41, %c0_767, %c0_768] : memref<48x32x8xbf16, #tpu.memory_space<vmem>>, vector<1x32x8xbf16>
    %1356 = vector.shape_cast %1355 : vector<1x32x8xbf16> to vector<32x8xbf16>
    %cst_769 = arith.constant dense<0.000000e+00> : vector<8x8xf32>
    %1357 = tpu.matmul %1298, %1356, %cst_769 {dimension_numbers = #tpu.dot_dimension_numbers<[1], [0], [0], [1], [0, 0, 1, 1], [], []>} : vector<8x32xbf16>, vector<32x8xbf16>, vector<8x8xf32> -> vector<8x8xf32>
    %c41_770 = arith.constant 41 : index
    %c0_771 = arith.constant 0 : index
    %c0_772 = arith.constant 0 : index
    %1358 = vector.load %arg15[%c41_770, %c0_771, %c0_772] : memref<48x1x8xf32, #tpu.memory_space<vmem>>, vector<1x1x8xf32>
    %1359 = vector.shape_cast %1358 : vector<1x1x8xf32> to vector<1x8xf32>
    %1360 = vector.broadcast %1359 : vector<1x8xf32> to vector<8x8xf32>
    %1361 = arith.addf %1357, %1360 : vector<8x8xf32>
    %c45 = arith.constant 45 : index
    %c0_773 = arith.constant 0 : index
    %c0_774 = arith.constant 0 : index
    %1362 = vector.load %arg14[%c45, %c0_773, %c0_774] : memref<48x32x8xbf16, #tpu.memory_space<vmem>>, vector<1x32x8xbf16>
    %1363 = vector.shape_cast %1362 : vector<1x32x8xbf16> to vector<32x8xbf16>
    %cst_775 = arith.constant dense<0.000000e+00> : vector<8x8xf32>
    %1364 = tpu.matmul %1298, %1363, %cst_775 {dimension_numbers = #tpu.dot_dimension_numbers<[1], [0], [0], [1], [0, 0, 1, 1], [], []>} : vector<8x32xbf16>, vector<32x8xbf16>, vector<8x8xf32> -> vector<8x8xf32>
    %c45_776 = arith.constant 45 : index
    %c0_777 = arith.constant 0 : index
    %c0_778 = arith.constant 0 : index
    %1365 = vector.load %arg15[%c45_776, %c0_777, %c0_778] : memref<48x1x8xf32, #tpu.memory_space<vmem>>, vector<1x1x8xf32>
    %1366 = vector.shape_cast %1365 : vector<1x1x8xf32> to vector<1x8xf32>
    %1367 = vector.broadcast %1366 : vector<1x8xf32> to vector<8x8xf32>
    %1368 = arith.addf %1364, %1367 : vector<8x8xf32>
    %1369 = arith.truncf %1354 : vector<8x8xf32> to vector<8x8xbf16>
    %1370 = tpu.transpose %1361, [1, 0] : vector<8x8xf32> -> vector<8x8xf32>
    %1371 = arith.truncf %1370 : vector<8x8xf32> to vector<8x8xbf16>
    %cst_779 = arith.constant dense<0.000000e+00> : vector<8x8xf32>
    %1372 = tpu.matmul %1369, %1371, %cst_779 {dimension_numbers = #tpu.dot_dimension_numbers<[1], [0], [0], [1], [0, 0, 1, 1], [], []>} : vector<8x8xbf16>, vector<8x8xbf16>, vector<8x8xf32> -> vector<8x8xf32>
    %cst_780 = arith.constant 0.353553385 : f32
    %1373 = vector.broadcast %cst_780 : f32 to vector<8x8xf32>
    %1374 = arith.mulf %1372, %1373 : vector<8x8xf32>
    %cst_781 = arith.constant -1.000000e+10 : f32
    %1375 = vector.shape_cast %3 : vector<1x8xi1> to vector<1x8xi1>
    %1376 = vector.broadcast %1375 : vector<1x8xi1> to vector<8x8xi1>
    %1377 = vector.broadcast %cst_781 : f32 to vector<8x8xf32>
    %1378 = arith.select %1376, %1374, %1377 : vector<8x8xi1>, vector<8x8xf32>
    %cst_782 = arith.constant dense<0xFF800000> : vector<8xf32>
    %1379 = vector.multi_reduction <maximumf>, %1378, %cst_782 [1] : vector<8x8xf32> to vector<8xf32>
    %1380 = vector.shape_cast %1379 : vector<8xf32> to vector<8x1xf32>
    %1381 = vector.broadcast %1380 : vector<8x1xf32> to vector<8x8xf32>
    %1382 = arith.subf %1378, %1381 : vector<8x8xf32>
    %1383 = math.exp %1382 : vector<8x8xf32>
    %cst_783 = arith.constant dense<0.000000e+00> : vector<8xf32>
    %1384 = vector.multi_reduction <add>, %1383, %cst_783 [1] : vector<8x8xf32> to vector<8xf32>
    %1385 = vector.shape_cast %1384 : vector<8xf32> to vector<8x1xf32>
    %1386 = vector.broadcast %1385 : vector<8x1xf32> to vector<8x8xf32>
    %1387 = arith.divf %1383, %1386 : vector<8x8xf32>
    %1388 = arith.truncf %1387 : vector<8x8xf32> to vector<8x8xbf16>
    %1389 = arith.truncf %1368 : vector<8x8xf32> to vector<8x8xbf16>
    %cst_784 = arith.constant dense<0.000000e+00> : vector<8x8xf32>
    %1390 = tpu.matmul %1388, %1389, %cst_784 {dimension_numbers = #tpu.dot_dimension_numbers<[1], [0], [0], [1], [0, 0, 1, 1], [], []>} : vector<8x8xbf16>, vector<8x8xbf16>, vector<8x8xf32> -> vector<8x8xf32>
    %1391 = arith.truncf %1390 : vector<8x8xf32> to vector<8x8xbf16>
    %c13_785 = arith.constant 13 : index
    %c0_786 = arith.constant 0 : index
    %c0_787 = arith.constant 0 : index
    %1392 = vector.load %arg16[%c13_785, %c0_786, %c0_787] : memref<16x8x32xbf16, #tpu.memory_space<vmem>>, vector<1x8x32xbf16>
    %1393 = vector.shape_cast %1392 : vector<1x8x32xbf16> to vector<8x32xbf16>
    %cst_788 = arith.constant dense<0.000000e+00> : vector<8x32xf32>
    %1394 = tpu.matmul %1391, %1393, %cst_788 {dimension_numbers = #tpu.dot_dimension_numbers<[1], [0], [0], [1], [0, 0, 1, 1], [], []>} : vector<8x8xbf16>, vector<8x32xbf16>, vector<8x32xf32> -> vector<8x32xf32>
    %1395 = arith.addf %1347, %1394 : vector<8x32xf32>
    %c38 = arith.constant 38 : index
    %c0_789 = arith.constant 0 : index
    %c0_790 = arith.constant 0 : index
    %1396 = vector.load %arg14[%c38, %c0_789, %c0_790] : memref<48x32x8xbf16, #tpu.memory_space<vmem>>, vector<1x32x8xbf16>
    %1397 = vector.shape_cast %1396 : vector<1x32x8xbf16> to vector<32x8xbf16>
    %cst_791 = arith.constant dense<0.000000e+00> : vector<8x8xf32>
    %1398 = tpu.matmul %1297, %1397, %cst_791 {dimension_numbers = #tpu.dot_dimension_numbers<[1], [0], [0], [1], [0, 0, 1, 1], [], []>} : vector<8x32xbf16>, vector<32x8xbf16>, vector<8x8xf32> -> vector<8x8xf32>
    %c38_792 = arith.constant 38 : index
    %c0_793 = arith.constant 0 : index
    %c0_794 = arith.constant 0 : index
    %1399 = vector.load %arg15[%c38_792, %c0_793, %c0_794] : memref<48x1x8xf32, #tpu.memory_space<vmem>>, vector<1x1x8xf32>
    %1400 = vector.shape_cast %1399 : vector<1x1x8xf32> to vector<1x8xf32>
    %1401 = vector.broadcast %1400 : vector<1x8xf32> to vector<8x8xf32>
    %1402 = arith.addf %1398, %1401 : vector<8x8xf32>
    %c42 = arith.constant 42 : index
    %c0_795 = arith.constant 0 : index
    %c0_796 = arith.constant 0 : index
    %1403 = vector.load %arg14[%c42, %c0_795, %c0_796] : memref<48x32x8xbf16, #tpu.memory_space<vmem>>, vector<1x32x8xbf16>
    %1404 = vector.shape_cast %1403 : vector<1x32x8xbf16> to vector<32x8xbf16>
    %cst_797 = arith.constant dense<0.000000e+00> : vector<8x8xf32>
    %1405 = tpu.matmul %1298, %1404, %cst_797 {dimension_numbers = #tpu.dot_dimension_numbers<[1], [0], [0], [1], [0, 0, 1, 1], [], []>} : vector<8x32xbf16>, vector<32x8xbf16>, vector<8x8xf32> -> vector<8x8xf32>
    %c42_798 = arith.constant 42 : index
    %c0_799 = arith.constant 0 : index
    %c0_800 = arith.constant 0 : index
    %1406 = vector.load %arg15[%c42_798, %c0_799, %c0_800] : memref<48x1x8xf32, #tpu.memory_space<vmem>>, vector<1x1x8xf32>
    %1407 = vector.shape_cast %1406 : vector<1x1x8xf32> to vector<1x8xf32>
    %1408 = vector.broadcast %1407 : vector<1x8xf32> to vector<8x8xf32>
    %1409 = arith.addf %1405, %1408 : vector<8x8xf32>
    %c46 = arith.constant 46 : index
    %c0_801 = arith.constant 0 : index
    %c0_802 = arith.constant 0 : index
    %1410 = vector.load %arg14[%c46, %c0_801, %c0_802] : memref<48x32x8xbf16, #tpu.memory_space<vmem>>, vector<1x32x8xbf16>
    %1411 = vector.shape_cast %1410 : vector<1x32x8xbf16> to vector<32x8xbf16>
    %cst_803 = arith.constant dense<0.000000e+00> : vector<8x8xf32>
    %1412 = tpu.matmul %1298, %1411, %cst_803 {dimension_numbers = #tpu.dot_dimension_numbers<[1], [0], [0], [1], [0, 0, 1, 1], [], []>} : vector<8x32xbf16>, vector<32x8xbf16>, vector<8x8xf32> -> vector<8x8xf32>
    %c46_804 = arith.constant 46 : index
    %c0_805 = arith.constant 0 : index
    %c0_806 = arith.constant 0 : index
    %1413 = vector.load %arg15[%c46_804, %c0_805, %c0_806] : memref<48x1x8xf32, #tpu.memory_space<vmem>>, vector<1x1x8xf32>
    %1414 = vector.shape_cast %1413 : vector<1x1x8xf32> to vector<1x8xf32>
    %1415 = vector.broadcast %1414 : vector<1x8xf32> to vector<8x8xf32>
    %1416 = arith.addf %1412, %1415 : vector<8x8xf32>
    %1417 = arith.truncf %1402 : vector<8x8xf32> to vector<8x8xbf16>
    %1418 = tpu.transpose %1409, [1, 0] : vector<8x8xf32> -> vector<8x8xf32>
    %1419 = arith.truncf %1418 : vector<8x8xf32> to vector<8x8xbf16>
    %cst_807 = arith.constant dense<0.000000e+00> : vector<8x8xf32>
    %1420 = tpu.matmul %1417, %1419, %cst_807 {dimension_numbers = #tpu.dot_dimension_numbers<[1], [0], [0], [1], [0, 0, 1, 1], [], []>} : vector<8x8xbf16>, vector<8x8xbf16>, vector<8x8xf32> -> vector<8x8xf32>
    %cst_808 = arith.constant 0.353553385 : f32
    %1421 = vector.broadcast %cst_808 : f32 to vector<8x8xf32>
    %1422 = arith.mulf %1420, %1421 : vector<8x8xf32>
    %cst_809 = arith.constant -1.000000e+10 : f32
    %1423 = vector.shape_cast %3 : vector<1x8xi1> to vector<1x8xi1>
    %1424 = vector.broadcast %1423 : vector<1x8xi1> to vector<8x8xi1>
    %1425 = vector.broadcast %cst_809 : f32 to vector<8x8xf32>
    %1426 = arith.select %1424, %1422, %1425 : vector<8x8xi1>, vector<8x8xf32>
    %cst_810 = arith.constant dense<0xFF800000> : vector<8xf32>
    %1427 = vector.multi_reduction <maximumf>, %1426, %cst_810 [1] : vector<8x8xf32> to vector<8xf32>
    %1428 = vector.shape_cast %1427 : vector<8xf32> to vector<8x1xf32>
    %1429 = vector.broadcast %1428 : vector<8x1xf32> to vector<8x8xf32>
    %1430 = arith.subf %1426, %1429 : vector<8x8xf32>
    %1431 = math.exp %1430 : vector<8x8xf32>
    %cst_811 = arith.constant dense<0.000000e+00> : vector<8xf32>
    %1432 = vector.multi_reduction <add>, %1431, %cst_811 [1] : vector<8x8xf32> to vector<8xf32>
    %1433 = vector.shape_cast %1432 : vector<8xf32> to vector<8x1xf32>
    %1434 = vector.broadcast %1433 : vector<8x1xf32> to vector<8x8xf32>
    %1435 = arith.divf %1431, %1434 : vector<8x8xf32>
    %1436 = arith.truncf %1435 : vector<8x8xf32> to vector<8x8xbf16>
    %1437 = arith.truncf %1416 : vector<8x8xf32> to vector<8x8xbf16>
    %cst_812 = arith.constant dense<0.000000e+00> : vector<8x8xf32>
    %1438 = tpu.matmul %1436, %1437, %cst_812 {dimension_numbers = #tpu.dot_dimension_numbers<[1], [0], [0], [1], [0, 0, 1, 1], [], []>} : vector<8x8xbf16>, vector<8x8xbf16>, vector<8x8xf32> -> vector<8x8xf32>
    %1439 = arith.truncf %1438 : vector<8x8xf32> to vector<8x8xbf16>
    %c14_813 = arith.constant 14 : index
    %c0_814 = arith.constant 0 : index
    %c0_815 = arith.constant 0 : index
    %1440 = vector.load %arg16[%c14_813, %c0_814, %c0_815] : memref<16x8x32xbf16, #tpu.memory_space<vmem>>, vector<1x8x32xbf16>
    %1441 = vector.shape_cast %1440 : vector<1x8x32xbf16> to vector<8x32xbf16>
    %cst_816 = arith.constant dense<0.000000e+00> : vector<8x32xf32>
    %1442 = tpu.matmul %1439, %1441, %cst_816 {dimension_numbers = #tpu.dot_dimension_numbers<[1], [0], [0], [1], [0, 0, 1, 1], [], []>} : vector<8x8xbf16>, vector<8x32xbf16>, vector<8x32xf32> -> vector<8x32xf32>
    %1443 = arith.addf %1395, %1442 : vector<8x32xf32>
    %c39 = arith.constant 39 : index
    %c0_817 = arith.constant 0 : index
    %c0_818 = arith.constant 0 : index
    %1444 = vector.load %arg14[%c39, %c0_817, %c0_818] : memref<48x32x8xbf16, #tpu.memory_space<vmem>>, vector<1x32x8xbf16>
    %1445 = vector.shape_cast %1444 : vector<1x32x8xbf16> to vector<32x8xbf16>
    %cst_819 = arith.constant dense<0.000000e+00> : vector<8x8xf32>
    %1446 = tpu.matmul %1297, %1445, %cst_819 {dimension_numbers = #tpu.dot_dimension_numbers<[1], [0], [0], [1], [0, 0, 1, 1], [], []>} : vector<8x32xbf16>, vector<32x8xbf16>, vector<8x8xf32> -> vector<8x8xf32>
    %c39_820 = arith.constant 39 : index
    %c0_821 = arith.constant 0 : index
    %c0_822 = arith.constant 0 : index
    %1447 = vector.load %arg15[%c39_820, %c0_821, %c0_822] : memref<48x1x8xf32, #tpu.memory_space<vmem>>, vector<1x1x8xf32>
    %1448 = vector.shape_cast %1447 : vector<1x1x8xf32> to vector<1x8xf32>
    %1449 = vector.broadcast %1448 : vector<1x8xf32> to vector<8x8xf32>
    %1450 = arith.addf %1446, %1449 : vector<8x8xf32>
    %c43 = arith.constant 43 : index
    %c0_823 = arith.constant 0 : index
    %c0_824 = arith.constant 0 : index
    %1451 = vector.load %arg14[%c43, %c0_823, %c0_824] : memref<48x32x8xbf16, #tpu.memory_space<vmem>>, vector<1x32x8xbf16>
    %1452 = vector.shape_cast %1451 : vector<1x32x8xbf16> to vector<32x8xbf16>
    %cst_825 = arith.constant dense<0.000000e+00> : vector<8x8xf32>
    %1453 = tpu.matmul %1298, %1452, %cst_825 {dimension_numbers = #tpu.dot_dimension_numbers<[1], [0], [0], [1], [0, 0, 1, 1], [], []>} : vector<8x32xbf16>, vector<32x8xbf16>, vector<8x8xf32> -> vector<8x8xf32>
    %c43_826 = arith.constant 43 : index
    %c0_827 = arith.constant 0 : index
    %c0_828 = arith.constant 0 : index
    %1454 = vector.load %arg15[%c43_826, %c0_827, %c0_828] : memref<48x1x8xf32, #tpu.memory_space<vmem>>, vector<1x1x8xf32>
    %1455 = vector.shape_cast %1454 : vector<1x1x8xf32> to vector<1x8xf32>
    %1456 = vector.broadcast %1455 : vector<1x8xf32> to vector<8x8xf32>
    %1457 = arith.addf %1453, %1456 : vector<8x8xf32>
    %c47 = arith.constant 47 : index
    %c0_829 = arith.constant 0 : index
    %c0_830 = arith.constant 0 : index
    %1458 = vector.load %arg14[%c47, %c0_829, %c0_830] : memref<48x32x8xbf16, #tpu.memory_space<vmem>>, vector<1x32x8xbf16>
    %1459 = vector.shape_cast %1458 : vector<1x32x8xbf16> to vector<32x8xbf16>
    %cst_831 = arith.constant dense<0.000000e+00> : vector<8x8xf32>
    %1460 = tpu.matmul %1298, %1459, %cst_831 {dimension_numbers = #tpu.dot_dimension_numbers<[1], [0], [0], [1], [0, 0, 1, 1], [], []>} : vector<8x32xbf16>, vector<32x8xbf16>, vector<8x8xf32> -> vector<8x8xf32>
    %c47_832 = arith.constant 47 : index
    %c0_833 = arith.constant 0 : index
    %c0_834 = arith.constant 0 : index
    %1461 = vector.load %arg15[%c47_832, %c0_833, %c0_834] : memref<48x1x8xf32, #tpu.memory_space<vmem>>, vector<1x1x8xf32>
    %1462 = vector.shape_cast %1461 : vector<1x1x8xf32> to vector<1x8xf32>
    %1463 = vector.broadcast %1462 : vector<1x8xf32> to vector<8x8xf32>
    %1464 = arith.addf %1460, %1463 : vector<8x8xf32>
    %1465 = arith.truncf %1450 : vector<8x8xf32> to vector<8x8xbf16>
    %1466 = tpu.transpose %1457, [1, 0] : vector<8x8xf32> -> vector<8x8xf32>
    %1467 = arith.truncf %1466 : vector<8x8xf32> to vector<8x8xbf16>
    %cst_835 = arith.constant dense<0.000000e+00> : vector<8x8xf32>
    %1468 = tpu.matmul %1465, %1467, %cst_835 {dimension_numbers = #tpu.dot_dimension_numbers<[1], [0], [0], [1], [0, 0, 1, 1], [], []>} : vector<8x8xbf16>, vector<8x8xbf16>, vector<8x8xf32> -> vector<8x8xf32>
    %cst_836 = arith.constant 0.353553385 : f32
    %1469 = vector.broadcast %cst_836 : f32 to vector<8x8xf32>
    %1470 = arith.mulf %1468, %1469 : vector<8x8xf32>
    %cst_837 = arith.constant -1.000000e+10 : f32
    %1471 = vector.shape_cast %3 : vector<1x8xi1> to vector<1x8xi1>
    %1472 = vector.broadcast %1471 : vector<1x8xi1> to vector<8x8xi1>
    %1473 = vector.broadcast %cst_837 : f32 to vector<8x8xf32>
    %1474 = arith.select %1472, %1470, %1473 : vector<8x8xi1>, vector<8x8xf32>
    %cst_838 = arith.constant dense<0xFF800000> : vector<8xf32>
    %1475 = vector.multi_reduction <maximumf>, %1474, %cst_838 [1] : vector<8x8xf32> to vector<8xf32>
    %1476 = vector.shape_cast %1475 : vector<8xf32> to vector<8x1xf32>
    %1477 = vector.broadcast %1476 : vector<8x1xf32> to vector<8x8xf32>
    %1478 = arith.subf %1474, %1477 : vector<8x8xf32>
    %1479 = math.exp %1478 : vector<8x8xf32>
    %cst_839 = arith.constant dense<0.000000e+00> : vector<8xf32>
    %1480 = vector.multi_reduction <add>, %1479, %cst_839 [1] : vector<8x8xf32> to vector<8xf32>
    %1481 = vector.shape_cast %1480 : vector<8xf32> to vector<8x1xf32>
    %1482 = vector.broadcast %1481 : vector<8x1xf32> to vector<8x8xf32>
    %1483 = arith.divf %1479, %1482 : vector<8x8xf32>
    %1484 = arith.truncf %1483 : vector<8x8xf32> to vector<8x8xbf16>
    %1485 = arith.truncf %1464 : vector<8x8xf32> to vector<8x8xbf16>
    %cst_840 = arith.constant dense<0.000000e+00> : vector<8x8xf32>
    %1486 = tpu.matmul %1484, %1485, %cst_840 {dimension_numbers = #tpu.dot_dimension_numbers<[1], [0], [0], [1], [0, 0, 1, 1], [], []>} : vector<8x8xbf16>, vector<8x8xbf16>, vector<8x8xf32> -> vector<8x8xf32>
    %1487 = arith.truncf %1486 : vector<8x8xf32> to vector<8x8xbf16>
    %c15_841 = arith.constant 15 : index
    %c0_842 = arith.constant 0 : index
    %c0_843 = arith.constant 0 : index
    %1488 = vector.load %arg16[%c15_841, %c0_842, %c0_843] : memref<16x8x32xbf16, #tpu.memory_space<vmem>>, vector<1x8x32xbf16>
    %1489 = vector.shape_cast %1488 : vector<1x8x32xbf16> to vector<8x32xbf16>
    %cst_844 = arith.constant dense<0.000000e+00> : vector<8x32xf32>
    %1490 = tpu.matmul %1487, %1489, %cst_844 {dimension_numbers = #tpu.dot_dimension_numbers<[1], [0], [0], [1], [0, 0, 1, 1], [], []>} : vector<8x8xbf16>, vector<8x32xbf16>, vector<8x32xf32> -> vector<8x32xf32>
    %1491 = arith.addf %1443, %1490 : vector<8x32xf32>
    %1492 = vector.shape_cast %1339 : vector<8x8xf32> to vector<1x8x8xf32>
    %1493 = vector.shape_cast %1387 : vector<8x8xf32> to vector<1x8x8xf32>
    %1494 = vector.shape_cast %1435 : vector<8x8xf32> to vector<1x8x8xf32>
    %1495 = vector.shape_cast %1483 : vector<8x8xf32> to vector<1x8x8xf32>
    %1496 = tpu.concatenate %1492, %1493, %1494, %1495 in 0 : vector<1x8x8xf32>, vector<1x8x8xf32>, vector<1x8x8xf32>, vector<1x8x8xf32> -> vector<4x8x8xf32>
    %c0_845 = arith.constant 0 : index
    %c0_846 = arith.constant 0 : index
    %c0_847 = arith.constant 0 : index
    %c0_848 = arith.constant 0 : index
    %1497 = vector.load %arg26[%c0_845, %c0_846, %c0_847, %c0_848] : memref<1x4x8x8xf32, #tpu.memory_space<vmem>>, vector<1x4x8x8xf32>
    %1498 = vector.shape_cast %1497 : vector<1x4x8x8xf32> to vector<4x8x8xf32>
    %1499 = vector.shape_cast %1496 : vector<4x8x8xf32> to vector<1x4x8x8xf32>
    tpu.vector_store %arg26[%c0_845, %c0_846, %c0_847, %c0_848], %1499 {strides = array<i32>} : memref<1x4x8x8xf32, #tpu.memory_space<vmem>>, vector<1x4x8x8xf32>,
    %1500 = vector.broadcast %1294 : vector<1x32xf32> to vector<8x32xf32>
    %1501 = arith.addf %1491, %1500 : vector<8x32xf32>
    %1502 = arith.addf %1290, %1501 : vector<8x32xf32>
    %cst_849 = arith.constant dense<0.000000e+00> : vector<8xf32>
    %1503 = vector.multi_reduction <add>, %1502, %cst_849 [1] : vector<8x32xf32> to vector<8xf32>
    %1504 = vector.shape_cast %1503 : vector<8xf32> to vector<8x1xf32>
    %cst_850 = arith.constant 3.200000e+01 : f32
    %1505 = vector.broadcast %cst_850 : f32 to vector<8x1xf32>
    %1506 = arith.divf %1504, %1505 : vector<8x1xf32>
    %1507 = vector.broadcast %1506 : vector<8x1xf32> to vector<8x32xf32>
    %1508 = arith.subf %1502, %1507 : vector<8x32xf32>
    %1509 = arith.mulf %1508, %1508 : vector<8x32xf32>
    %cst_851 = arith.constant dense<0.000000e+00> : vector<8xf32>
    %1510 = vector.multi_reduction <add>, %1509, %cst_851 [1] : vector<8x32xf32> to vector<8xf32>
    %1511 = vector.shape_cast %1510 : vector<8xf32> to vector<8x1xf32>
    %cst_852 = arith.constant 3.200000e+01 : f32
    %1512 = vector.broadcast %cst_852 : f32 to vector<8x1xf32>
    %1513 = arith.divf %1511, %1512 : vector<8x1xf32>
    %1514 = vector.broadcast %1506 : vector<8x1xf32> to vector<8x32xf32>
    %1515 = arith.subf %1502, %1514 : vector<8x32xf32>
    %cst_853 = arith.constant 9.99999974E-6 : f32
    %1516 = vector.broadcast %cst_853 : f32 to vector<8x1xf32>
    %1517 = arith.addf %1513, %1516 : vector<8x1xf32>
    %1518 = math.rsqrt %1517 : vector<8x1xf32>
    %1519 = vector.broadcast %1518 : vector<8x1xf32> to vector<8x32xf32>
    %1520 = arith.mulf %1515, %1519 : vector<8x32xf32>
    %1521 = vector.broadcast %1295 : vector<1x32xf32> to vector<8x32xf32>
    %1522 = arith.mulf %1520, %1521 : vector<8x32xf32>
    %1523 = vector.broadcast %1296 : vector<1x32xf32> to vector<8x32xf32>
    %1524 = arith.addf %1522, %1523 : vector<8x32xf32>
    %c5_854 = arith.constant 5 : index
    %c0_855 = arith.constant 0 : index
    %c0_856 = arith.constant 0 : index
    %1525 = vector.load %arg22[%c5_854, %c0_855, %c0_856] : memref<6x2x32xf32, #tpu.memory_space<vmem>>, vector<1x2x32xf32>
    %1526 = vector.shape_cast %1525 : vector<1x2x32xf32> to vector<2x32xf32>
    %c1_857 = arith.constant 1 : index
    %c0_858 = arith.constant 0 : index
    %c0_859 = arith.constant 0 : index
    %1527 = vector.load %arg18[%c1_857, %c0_858, %c0_859] : memref<2x32x64xbf16, #tpu.memory_space<vmem>>, vector<1x32x64xbf16>
    %1528 = vector.shape_cast %1527 : vector<1x32x64xbf16> to vector<32x64xbf16>
    %c1_860 = arith.constant 1 : index
    %c0_861 = arith.constant 0 : index
    %c0_862 = arith.constant 0 : index
    %1529 = vector.load %arg19[%c1_860, %c0_861, %c0_862] : memref<2x1x64xf32, #tpu.memory_space<vmem>>, vector<1x1x64xf32>
    %1530 = vector.shape_cast %1529 : vector<1x1x64xf32> to vector<1x64xf32>
    %c1_863 = arith.constant 1 : index
    %c0_864 = arith.constant 0 : index
    %c0_865 = arith.constant 0 : index
    %1531 = vector.load %arg20[%c1_863, %c0_864, %c0_865] : memref<2x64x32xbf16, #tpu.memory_space<vmem>>, vector<1x64x32xbf16>
    %1532 = vector.shape_cast %1531 : vector<1x64x32xbf16> to vector<64x32xbf16>
    %c1_866 = arith.constant 1 : index
    %c0_867 = arith.constant 0 : index
    %c0_868 = arith.constant 0 : index
    %1533 = vector.load %arg21[%c1_866, %c0_867, %c0_868] : memref<2x1x32xf32, #tpu.memory_space<vmem>>, vector<1x1x32xf32>
    %1534 = vector.shape_cast %1533 : vector<1x1x32xf32> to vector<1x32xf32>
    %1535 = vector.extract_strided_slice %1526 {offsets = [0, 0], sizes = [1, 32], strides = [1, 1]} : vector<2x32xf32> to vector<1x32xf32>
    %1536 = vector.extract_strided_slice %1526 {offsets = [1, 0], sizes = [1, 32], strides = [1, 1]} : vector<2x32xf32> to vector<1x32xf32>
    %1537 = arith.truncf %1524 : vector<8x32xf32> to vector<8x32xbf16>
    %cst_869 = arith.constant dense<0.000000e+00> : vector<8x64xf32>
    %1538 = tpu.matmul %1537, %1528, %cst_869 {dimension_numbers = #tpu.dot_dimension_numbers<[1], [0], [0], [1], [0, 0, 1, 1], [], []>} : vector<8x32xbf16>, vector<32x64xbf16>, vector<8x64xf32> -> vector<8x64xf32>
    %1539 = vector.broadcast %1530 : vector<1x64xf32> to vector<8x64xf32>
    %1540 = arith.addf %1538, %1539 : vector<8x64xf32>
    %cst_870 = arith.constant 0.000000e+00 : f32
    %1541 = vector.broadcast %cst_870 : f32 to vector<8x64xf32>
    %1542 = arith.maximumf %1540, %1541 : vector<8x64xf32>
    %1543 = arith.truncf %1542 : vector<8x64xf32> to vector<8x64xbf16>
    %cst_871 = arith.constant dense<0.000000e+00> : vector<8x32xf32>
    %1544 = tpu.matmul %1543, %1532, %cst_871 {dimension_numbers = #tpu.dot_dimension_numbers<[1], [0], [0], [1], [0, 0, 1, 1], [], []>} : vector<8x64xbf16>, vector<64x32xbf16>, vector<8x32xf32> -> vector<8x32xf32>
    %1545 = vector.broadcast %1534 : vector<1x32xf32> to vector<8x32xf32>
    %1546 = arith.addf %1544, %1545 : vector<8x32xf32>
    %1547 = arith.addf %1524, %1546 : vector<8x32xf32>
    %cst_872 = arith.constant dense<0.000000e+00> : vector<8xf32>
    %1548 = vector.multi_reduction <add>, %1547, %cst_872 [1] : vector<8x32xf32> to vector<8xf32>
    %1549 = vector.shape_cast %1548 : vector<8xf32> to vector<8x1xf32>
    %cst_873 = arith.constant 3.200000e+01 : f32
    %1550 = vector.broadcast %cst_873 : f32 to vector<8x1xf32>
    %1551 = arith.divf %1549, %1550 : vector<8x1xf32>
    %1552 = vector.broadcast %1551 : vector<8x1xf32> to vector<8x32xf32>
    %1553 = arith.subf %1547, %1552 : vector<8x32xf32>
    %1554 = arith.mulf %1553, %1553 : vector<8x32xf32>
    %cst_874 = arith.constant dense<0.000000e+00> : vector<8xf32>
    %1555 = vector.multi_reduction <add>, %1554, %cst_874 [1] : vector<8x32xf32> to vector<8xf32>
    %1556 = vector.shape_cast %1555 : vector<8xf32> to vector<8x1xf32>
    %cst_875 = arith.constant 3.200000e+01 : f32
    %1557 = vector.broadcast %cst_875 : f32 to vector<8x1xf32>
    %1558 = arith.divf %1556, %1557 : vector<8x1xf32>
    %1559 = vector.broadcast %1551 : vector<8x1xf32> to vector<8x32xf32>
    %1560 = arith.subf %1547, %1559 : vector<8x32xf32>
    %cst_876 = arith.constant 9.99999974E-6 : f32
    %1561 = vector.broadcast %cst_876 : f32 to vector<8x1xf32>
    %1562 = arith.addf %1558, %1561 : vector<8x1xf32>
    %1563 = math.rsqrt %1562 : vector<8x1xf32>
    %1564 = vector.broadcast %1563 : vector<8x1xf32> to vector<8x32xf32>
    %1565 = arith.mulf %1560, %1564 : vector<8x32xf32>
    %1566 = vector.broadcast %1535 : vector<1x32xf32> to vector<8x32xf32>
    %1567 = arith.mulf %1565, %1566 : vector<8x32xf32>
    %1568 = vector.broadcast %1536 : vector<1x32xf32> to vector<8x32xf32>
    %1569 = arith.addf %1567, %1568 : vector<8x32xf32>
    %1570 = arith.truncf %1569 : vector<8x32xf32> to vector<8x32xbf16>
    %c0_877 = arith.constant 0 : index
    %c0_878 = arith.constant 0 : index
    %1571 = vector.load %arg23[%c0_877, %c0_878] : memref<32x128xbf16, #tpu.memory_space<vmem>>, vector<32x128xbf16>
    %cst_879 = arith.constant dense<0.000000e+00> : vector<8x128xf32>
    %1572 = tpu.matmul %1570, %1571, %cst_879 {dimension_numbers = #tpu.dot_dimension_numbers<[1], [0], [0], [1], [0, 0, 1, 1], [], []>} : vector<8x32xbf16>, vector<32x128xbf16>, vector<8x128xf32> -> vector<8x128xf32>
    %c0_880 = arith.constant 0 : index
    %c0_881 = arith.constant 0 : index
    %1573 = vector.load %arg24[%c0_880, %c0_881] : memref<1x128xf32, #tpu.memory_space<vmem>>, vector<1x128xf32>
    %1574 = vector.broadcast %1573 : vector<1x128xf32> to vector<8x128xf32>
    %1575 = arith.addf %1572, %1574 : vector<8x128xf32>
    %c0_882 = arith.constant 0 : index
    %c0_883 = arith.constant 0 : index
    %c0_884 = arith.constant 0 : index
    %1576 = vector.load %arg25[%c0_882, %c0_883, %c0_884] : memref<1x8x128xf32, #tpu.memory_space<vmem>>, vector<1x8x128xf32>
    %1577 = vector.shape_cast %1576 : vector<1x8x128xf32> to vector<8x128xf32>
    %1578 = vector.shape_cast %1575 : vector<8x128xf32> to vector<1x8x128xf32>
    tpu.vector_store %arg25[%c0_882, %c0_883, %c0_884], %1578 {strides = array<i32>} : memref<1x8x128xf32, #tpu.memory_space<vmem>>, vector<1x8x128xf32>,
    return
  }
  func.func @transform_0(%arg0: i32) -> (i32, i32, i32) {
    %c0_i32 = arith.constant 0 : i32
    %c0_i32_0 = arith.constant 0 : i32
    %c0_i32_1 = arith.constant 0 : i32
    return %arg0, %c0_i32, %c0_i32_0 : i32, i32, i32
  }
  func.func @transform_1(%arg0: i32) -> (i32, i32, i32) {
    %c0_i32 = arith.constant 0 : i32
    %c0_i32_0 = arith.constant 0 : i32
    %c0_i32_1 = arith.constant 0 : i32
    return %arg0, %c0_i32, %c0_i32_0 : i32, i32, i32
  }
  func.func @transform_2(%arg0: i32) -> (i32, i32, i32) {
    %c0_i32 = arith.constant 0 : i32
    %c0_i32_0 = arith.constant 0 : i32
    %c0_i32_1 = arith.constant 0 : i32
    return %arg0, %c0_i32, %c0_i32_0 : i32, i32, i32
  }
  func.func @transform_3(%arg0: i32) -> (i32, i32, i32) {
    %c0_i32 = arith.constant 0 : i32
    %c0_i32_0 = arith.constant 0 : i32
    %c0_i32_1 = arith.constant 0 : i32
    return %arg0, %c0_i32, %c0_i32_0 : i32, i32, i32
  }
  func.func @transform_4(%arg0: i32) -> (i32, i32, i32) {
    %c0_i32 = arith.constant 0 : i32
    %c0_i32_0 = arith.constant 0 : i32
    %c0_i32_1 = arith.constant 0 : i32
    %c0_i32_2 = arith.constant 0 : i32
    return %c0_i32, %c0_i32_0, %c0_i32_1 : i32, i32, i32
  }
  func.func @transform_5(%arg0: i32) -> (i32, i32, i32) {
    %c0_i32 = arith.constant 0 : i32
    %c0_i32_0 = arith.constant 0 : i32
    %c0_i32_1 = arith.constant 0 : i32
    %c0_i32_2 = arith.constant 0 : i32
    return %c0_i32, %c0_i32_0, %c0_i32_1 : i32, i32, i32
  }
  func.func @transform_6(%arg0: i32) -> (i32, i32, i32) {
    %c0_i32 = arith.constant 0 : i32
    %c0_i32_0 = arith.constant 0 : i32
    %c0_i32_1 = arith.constant 0 : i32
    %c0_i32_2 = arith.constant 0 : i32
    return %c0_i32, %c0_i32_0, %c0_i32_1 : i32, i32, i32
  }
  func.func @transform_7(%arg0: i32) -> (i32, i32, i32) {
    %c0_i32 = arith.constant 0 : i32
    %c0_i32_0 = arith.constant 0 : i32
    %c0_i32_1 = arith.constant 0 : i32
    %c0_i32_2 = arith.constant 0 : i32
    return %c0_i32, %c0_i32_0, %c0_i32_1 : i32, i32, i32
  }
  func.func @transform_8(%arg0: i32) -> (i32, i32, i32) {
    %c0_i32 = arith.constant 0 : i32
    %c0_i32_0 = arith.constant 0 : i32
    %c0_i32_1 = arith.constant 0 : i32
    %c0_i32_2 = arith.constant 0 : i32
    return %c0_i32, %c0_i32_0, %c0_i32_1 : i32, i32, i32
  }
  func.func @transform_9(%arg0: i32) -> (i32, i32, i32) {
    %c0_i32 = arith.constant 0 : i32
    %c0_i32_0 = arith.constant 0 : i32
    %c0_i32_1 = arith.constant 0 : i32
    %c0_i32_2 = arith.constant 0 : i32
    return %c0_i32, %c0_i32_0, %c0_i32_1 : i32, i32, i32
  }
  func.func @transform_10(%arg0: i32) -> (i32, i32, i32) {
    %c0_i32 = arith.constant 0 : i32
    %c0_i32_0 = arith.constant 0 : i32
    %c0_i32_1 = arith.constant 0 : i32
    %c0_i32_2 = arith.constant 0 : i32
    return %c0_i32, %c0_i32_0, %c0_i32_1 : i32, i32, i32
  }
  func.func @transform_11(%arg0: i32) -> (i32, i32, i32) {
    %c0_i32 = arith.constant 0 : i32
    %c0_i32_0 = arith.constant 0 : i32
    %c0_i32_1 = arith.constant 0 : i32
    %c0_i32_2 = arith.constant 0 : i32
    return %c0_i32, %c0_i32_0, %c0_i32_1 : i32, i32, i32
  }
  func.func @transform_12(%arg0: i32) -> (i32, i32, i32) {
    %c0_i32 = arith.constant 0 : i32
    %c0_i32_0 = arith.constant 0 : i32
    %c0_i32_1 = arith.constant 0 : i32
    %c0_i32_2 = arith.constant 0 : i32
    return %c0_i32, %c0_i32_0, %c0_i32_1 : i32, i32, i32
  }
  func.func @transform_13(%arg0: i32) -> (i32, i32, i32) {
    %c0_i32 = arith.constant 0 : i32
    %c0_i32_0 = arith.constant 0 : i32
    %c0_i32_1 = arith.constant 0 : i32
    %c0_i32_2 = arith.constant 0 : i32
    return %c0_i32, %c0_i32_0, %c0_i32_1 : i32, i32, i32
  }
  func.func @transform_14(%arg0: i32) -> (i32, i32, i32) {
    %c0_i32 = arith.constant 0 : i32
    %c0_i32_0 = arith.constant 0 : i32
    %c0_i32_1 = arith.constant 0 : i32
    %c0_i32_2 = arith.constant 0 : i32
    return %c0_i32, %c0_i32_0, %c0_i32_1 : i32, i32, i32
  }
  func.func @transform_15(%arg0: i32) -> (i32, i32, i32) {
    %c0_i32 = arith.constant 0 : i32
    %c0_i32_0 = arith.constant 0 : i32
    %c0_i32_1 = arith.constant 0 : i32
    %c0_i32_2 = arith.constant 0 : i32
    return %c0_i32, %c0_i32_0, %c0_i32_1 : i32, i32, i32
  }
  func.func @transform_16(%arg0: i32) -> (i32, i32, i32) {
    %c0_i32 = arith.constant 0 : i32
    %c0_i32_0 = arith.constant 0 : i32
    %c0_i32_1 = arith.constant 0 : i32
    %c0_i32_2 = arith.constant 0 : i32
    return %c0_i32, %c0_i32_0, %c0_i32_1 : i32, i32, i32
  }
  func.func @transform_17(%arg0: i32) -> (i32, i32, i32) {
    %c0_i32 = arith.constant 0 : i32
    %c0_i32_0 = arith.constant 0 : i32
    %c0_i32_1 = arith.constant 0 : i32
    %c0_i32_2 = arith.constant 0 : i32
    return %c0_i32, %c0_i32_0, %c0_i32_1 : i32, i32, i32
  }
  func.func @transform_18(%arg0: i32) -> (i32, i32, i32) {
    %c0_i32 = arith.constant 0 : i32
    %c0_i32_0 = arith.constant 0 : i32
    %c0_i32_1 = arith.constant 0 : i32
    %c0_i32_2 = arith.constant 0 : i32
    return %c0_i32, %c0_i32_0, %c0_i32_1 : i32, i32, i32
  }
  func.func @transform_19(%arg0: i32) -> (i32, i32, i32) {
    %c0_i32 = arith.constant 0 : i32
    %c0_i32_0 = arith.constant 0 : i32
    %c0_i32_1 = arith.constant 0 : i32
    %c0_i32_2 = arith.constant 0 : i32
    return %c0_i32, %c0_i32_0, %c0_i32_1 : i32, i32, i32
  }
  func.func @transform_20(%arg0: i32) -> (i32, i32, i32) {
    %c0_i32 = arith.constant 0 : i32
    %c0_i32_0 = arith.constant 0 : i32
    %c0_i32_1 = arith.constant 0 : i32
    %c0_i32_2 = arith.constant 0 : i32
    return %c0_i32, %c0_i32_0, %c0_i32_1 : i32, i32, i32
  }
  func.func @transform_21(%arg0: i32) -> (i32, i32, i32) {
    %c0_i32 = arith.constant 0 : i32
    %c0_i32_0 = arith.constant 0 : i32
    %c0_i32_1 = arith.constant 0 : i32
    %c0_i32_2 = arith.constant 0 : i32
    return %c0_i32, %c0_i32_0, %c0_i32_1 : i32, i32, i32
  }
  func.func @transform_22(%arg0: i32) -> (i32, i32) {
    %c0_i32 = arith.constant 0 : i32
    %c0_i32_0 = arith.constant 0 : i32
    %c0_i32_1 = arith.constant 0 : i32
    return %c0_i32, %c0_i32_0 : i32, i32
  }
  func.func @transform_23(%arg0: i32) -> (i32, i32) {
    %c0_i32 = arith.constant 0 : i32
    %c0_i32_0 = arith.constant 0 : i32
    %c0_i32_1 = arith.constant 0 : i32
    return %c0_i32, %c0_i32_0 : i32, i32
  }
  func.func @transform_24(%arg0: i32) -> (i32, i32, i32) {
    %c0_i32 = arith.constant 0 : i32
    %c0_i32_0 = arith.constant 0 : i32
    %c0_i32_1 = arith.constant 0 : i32
    return %arg0, %c0_i32, %c0_i32_0 : i32, i32, i32
  }
  func.func @transform_25(%arg0: i32) -> (i32, i32, i32, i32) {
    %c0_i32 = arith.constant 0 : i32
    %c0_i32_0 = arith.constant 0 : i32
    %c0_i32_1 = arith.constant 0 : i32
    %c0_i32_2 = arith.constant 0 : i32
    return %arg0, %c0_i32, %c0_i32_0, %c0_i32_1 : i32, i32, i32, i32
  }
}

</mosaic_0001>

<bundles_post_ra>
// kernel: seq2seq_forward.1
= control target key start
LH: loop header
LB: loop body
LE: loop exit
PB: predicated region body
PF: predicated region fallthrough
CT: control target
= control target key end

     0   :  { %s16301_s0 = inlined_call_operand.vmem [shape: f32[2,8,32], index: 0, kind: input, shape index: {}]   ;;  %s16302_s1 = inlined_call_operand.vmem [shape: f32[2,8,32], index: 1, kind: input, shape index: {}]   ;;  %s16303_s2 = inlined_call_operand.vmem [shape: f32[2,1,8], index: 2, kind: input, shape index: {}]   ;;  %s16304_s3 = inlined_call_operand.vmem [shape: f32[2,1,8], index: 3, kind: input, shape index: {}]   ;;  %s16305_s4 = inlined_call_operand.vmem [shape: bf16[24,32,8], index: 4, kind: input, shape index: {}]   ;;  %s16306_s5 = inlined_call_operand.vmem [shape: f32[24,1,8], index: 5, kind: input, shape index: {}]   ;;  %s16307_s6 = inlined_call_operand.vmem [shape: bf16[8,8,32], index: 6, kind: input, shape index: {}]   ;;  %s16308_s7 = inlined_call_operand.vmem [shape: f32[2,1,32], index: 7, kind: input, shape index: {}]   ;;  %s16309_s8 = inlined_call_operand.vmem [shape: bf16[2,32,64], index: 8, kind: input, shape index: {}]   ;;  %s16310_s9 = inlined_call_operand.vmem [shape: f32[2,1,64], index: 9, kind: input, shape index: {}]   ;;  %s16311_s10 = inlined_call_operand.vmem [shape: bf16[2,64,32], index: 10, kind: input, shape index: {}]   ;;  %s16312_s11 = inlined_call_operand.vmem [shape: f32[2,1,32], index: 11, kind: input, shape index: {}]   ;;  %s16313_s12 = inlined_call_operand.vmem [shape: f32[4,2,32], index: 12, kind: input, shape index: {}]   ;;  %s16314_s13 = inlined_call_operand.vmem [shape: bf16[48,32,8], index: 13, kind: input, shape index: {}]   ;;  %s16315_s14 = inlined_call_operand.vmem [shape: f32[48,1,8], index: 14, kind: input, shape index: {}]   ;;  %s16316_s15 = inlined_call_operand.vmem [shape: bf16[16,8,32], index: 15, kind: input, shape index: {}]   ;;  %s16317_s16 = inlined_call_operand.vmem [shape: f32[4,1,32], index: 16, kind: input, shape index: {}]   ;;  %s16318_s17 = inlined_call_operand.vmem [shape: bf16[2,32,64], index: 17, kind: input, shape index: {}]   ;;  %s16319_s18 = inlined_call_operand.vmem [shape: f32[2,1,64], index: 18, kind: input, shape index: {}]   ;;  %s16320_s19 = inlined_call_operand.vmem [shape: bf16[2,64,32], index: 19, kind: input, shape index: {}]   ;;  %s16321_s20 = inlined_call_operand.vmem [shape: f32[2,1,32], index: 20, kind: input, shape index: {}]   ;;  %s16322_s21 = inlined_call_operand.vmem [shape: f32[6,2,32], index: 21, kind: input, shape index: {}]   ;;  %s16323_s22 = inlined_call_operand.vmem [shape: bf16[32,128], index: 22, kind: input, shape index: {}]   ;;  %s16324_s23 = inlined_call_operand.vmem [shape: f32[1,128], index: 23, kind: input, shape index: {}]   ;;  %s16325_s24 = inlined_call_operand.hbm [shape: f32[2,8,128], index: 24, kind: output, shape index: {0}]   ;;  %s16326_s25 = inlined_call_operand.hbm [shape: f32[2,4,8,8], index: 25, kind: output, shape index: {1}]  }
   0x1   :  { %16346 = sst [smem:[#allocation14_spill]] %s16301_s0 }
   0x2   :  { %16347 = sst [smem:[#allocation15_spill]] %s16302_s1 }
   0x3   :  { %16348 = sst [smem:[#allocation16_spill]] %s16303_s2 }
   0x4   :  { %16349 = sst [smem:[#allocation17_spill]] %s16304_s3 }
   0x5   :  { %16350 = sst [smem:[#allocation18_spill]] %s16305_s4 }
   0x6   :  { %16351 = sst [smem:[#allocation19_spill]] %s16306_s5 }
   0x7   :  { %16352 = sst [smem:[#allocation20_spill]] %s16307_s6 }
   0x8   :  { %16353 = sst [smem:[#allocation21_spill]] %s16308_s7 }
   0x9   :  { %16354 = sst [smem:[#allocation22_spill]] %s16309_s8 }
   0xa   :  { %16355 = sst [smem:[#allocation23_spill]] %s16310_s9 }
   0xb   :  { %16356 = sst [smem:[#allocation24_spill]] %s16311_s10 }
   0xc   :  { %16357 = sst [smem:[#allocation25_spill]] %s16312_s11 }
   0xd   :  { %16358 = sst [smem:[#allocation26_spill]] %s16313_s12 }
   0xe   :  { %16359 = sst [smem:[#allocation27_spill]] %s16314_s13 }
   0xf   :  { %16360 = sst [smem:[#allocation28_spill]] %s16315_s14 }
  0x10   :  { %16361 = sst [smem:[#allocation29_spill]] %s16324_s23 }
  0x11   :  { %16362 = sst [smem:[#allocation30_spill]] %s16325_s24 }
  0x12   :  { %16363 = sst [smem:[#allocation31_spill]] %s16326_s25 }
  0x13   :  { %31 = vsyncpa [#allocation3], 0 }
  0x14   :  { %33 = vsyncpa [#allocation3 + $0x1], 0 }
  0x15   :  { %34 = vsyncpa [#allocation5], 0 }
  0x16   :  { %36 = vsyncpa [#allocation5 + $0x1], 0  ;;  %s14168_s29 = smov 0   ;;  %s14170_s2 = smov 0  }
  0x17   :  { %s14172_s6 = smov 0   ;;  %s14174_s30 = smov 0  }
  0x18 LB: > { %16364 = sst [smem:[#allocation8_spill]] %s14017_s29  ;;  %s14189_s7 = sadd.s32 4294967295, %s14029_s30   ;;  %s14029_s30 = sphi %s14174_s30, %s16401_s30   ;;  %s14025_s6 = sphi %s14172_s6, %s16403_s6   ;;  %s14021_s2 = sphi %s14170_s2, %s16405_s2   ;;  %s14017_s29 = sphi %s14168_s29, %s16404_s29  }
  0x19   : > { %16365 = sst [smem:[#allocation9_spill]] %s14025_s6  ;;  %s11270_s3 = sadd.s32 4294967294, %s14029_s30  }
  0x1a   : > { %16366 = sst [smem:[#allocation10_spill]] %s14029_s30  ;;  %s14193_s26 = sadd.s32 1, %s14029_s30  }
  0x1b   : > { %16367 = sst [smem:[#allocation11_spill]] %s14193_s26  ;;  %s573_s1 = sadd.s32 1, %s14025_s6 }
  0x1c   : > { %s570_s8 = ssub.s32 %s14029_s30, %s14193_s26  ;;  %p583_p0 = scmp.ne.s32.totalorder %s14025_s6, %s14021_s2 }
  0x1d   : > { %p571_p1 = scmp.eq.s32.totalorder %s570_s8, 0  ;;  %p584_p2 = scmp.eq.s32.totalorder %s14189_s7, 1 }
  0x1e   : > { %p589_p3 = scmp.ne.s32.totalorder %s14021_s2, %s14017_s29  ;;  %p590_p4 = scmp.eq.s32.totalorder %s11270_s3, 1 }
  0x1f   : > { %s14204_s27 = scalar_select %p571_p1, %s14025_s6, %s573_s1  }
  0x20   : > { %p14206_p5 = por %p584_p2, %p583_p0  ;;  %p14210_p6 = por %p590_p4, %p589_p3 }
  0x21   : > { %16368 = sst [smem:[#allocation12_spill]] %s14204_s27  ;;  %p11273_p7 = scmp.ge.s32.totalorder %s14029_s30, 1 }
  0x22   : > { %s16370_s28 = scalar_select %p14210_p6, 1, 0 }
  0x23   : > { %p720_p8 = scmp.lt.s32.totalorder %s14029_s30, 3 }
  0x24   : > { %16371 = sst [smem:[#allocation13_spill]] %s16370_s28 }
  0x25   : > { %p721_p9 = pnand %p11273_p7, %p720_p8 }
  0x26   : > { %s16372_s0 = sld [smem:[#allocation18_spill]] (!%p721_p9)  ;;  %v14031_v1 = vmov (!%p721_p9), 0.0   ;;  %vm14032_vm0 = vmmov (!%p721_p9), 0   ;;  %p802_p10 = scmp.lt.s32.totalorder (!%p721_p9), %s14189_s7, 1  ;;  %vm848_vm1 = vcmask (!%p721_p9), 261120   ;;  %vm1060_vm2 = vcmask (!%p721_p9), 1043456  }
  0x27   : > { %724 = sbr.rel (%p721_p9) target bundleno = 29810 (0x7472), region = 116  ;;  %12511 = vmatprep.subr.bf16.mxu1 (!%p721_p9), %v14031_v1  ;;  %12503 = vmatprep.subr.bf16.mxu0 (!%p721_p9), %v14031_v1  ;;  %s16373_s9 = sld [smem:[#allocation14_spill]] (!%p721_p9)  ;;  %vm1056_vm3 = vcmask (!%p721_p9), 64512   ;;  %v1106_v25 = vlaneseq (!%p721_p9)  ;;  %v14033_v29 = vmov (!%p721_p9), 0   ;;  %vm2518_vm6 = vcmask (!%p721_p9), 523264  }
  0x28   : > { %12515 = vmatprep.mubr.msk.bf16.mxu1 (!%p721_p9), %vm14032_vm0, %v14031_v1  ;;  %12507 = vmatprep.mubr.msk.bf16.mxu0 (!%p721_p9), %vm14032_vm0, %v14031_v1  ;;  %s16374_s1 = sld [smem:[#allocation19_spill]] (!%p721_p9)  ;;  %s16375_s6 = sld [smem:[#allocation16_spill]] (!%p721_p9)  ;;  %v12068_v33 = vld [vmem:[%s16316_s15 + $0x3c] sm:$0xf] (!%p721_p9) }
  0x29   : > { %v14289_v27 = vshrl.u32 (!%p721_p9), %v1106_v25, 7  ;;  %s16382_s10 = sld [smem:[#allocation24_spill]] (!%p721_p9)  ;;  %s16383_s12 = sld [smem:[#allocation26_spill]] (!%p721_p9) }
  0x2a   : > { %s16386_s11 = sld [smem:[#allocation25_spill]] (!%p721_p9)  ;;  %s16387_s13 = sld [smem:[#allocation27_spill]] (!%p721_p9) }
  0x2b   : > { %v14292_v28 = vsub.s32 (!%p721_p9), 0, %v14289_v27  ;;  %s16390_s14 = sld [smem:[#allocation28_spill]] (!%p721_p9)  ;;  %s15959_s23 = sand.u32 (!%p721_p9), 1, %s14021_s2  }
  0x2c   : > { %v13648_v0 = vld [vmem:[%s16372_s0 + $0x40] sm:$0xff] (!%p721_p9)   ;;  %v13649_v2 = vld [vmem:[%s16372_s0 + $0x48] sm:$0xff] (!%p721_p9)   ;;  %v13656_v53 = vld [vmem:[%s16372_s0 + $0x10] sm:$0xff] (!%p721_p9)   ;;  %s11275_s24 = sshll.u32 (!%p721_p9), %s15959_s23, 5  ;;  %s16394_s29 = sld [smem:[#allocation31_spill]] (!%p721_p9) }
  0x2d   : > { %12512 = vmatpush3.bf16.msra.mxu1 (!%p721_p9), %v13648_v0  ;;  %v13650_v3 = vld [vmem:[%s16372_s0] sm:$0xff] (!%p721_p9)   ;;  %v13651_v4 = vld [vmem:[%s16372_s0 + $0x8] sm:$0xff] (!%p721_p9)   ;;  %v13657_v54 = vld [vmem:[%s16372_s0 + $0x18] sm:$0xff] (!%p721_p9)  }
  0x2e   : > { %12513 = vmatprep.subr.bf16.mxu1 %v14031_v1  ;;  %s14234_s5 = scalar_select %p802_p10, %s14189_s7, 1  ;;  %12504 = vmatpush3.bf16.msra.mxu0 %v13650_v3  ;;  %v11287_v7 = vld [vmem:[%s16374_s1 + $0x4] ss:$0 sm:$0xff]  ;;  %v11278_v17 = vld [vmem:[%s16374_s1] ss:$0 sm:$0xff]  ;;  %v13653_v24 = vld [vmem:[%s16372_s0 + $0x88] sm:$0xff]  }
  0x2f   : > { %12505 = vmatprep.subr.bf16.mxu0 %v14031_v1  ;;  %v13652_v23 = vld [vmem:[%s16372_s0 + $0x80] sm:$0xff]   ;;  %v11296_v48 = vld [vmem:[%s16374_s1 + $0x8] ss:$0 sm:$0xff]  ;;  %v13654_v58 = vld [vmem:[%s16372_s0 + $0x50] sm:$0xff]  }
  0x30   : > { %s16336_s3 = sshll.u32 %s14234_s5, 3  ;;  %s812_s27 = scalar_lea.vmem %s16375_s6, %s14234_s5  ;;  %v13655_v60 = vld [vmem:[%s16372_s0 + $0x58] sm:$0xff]  }
  0x31   : > { %12514 = vmatpush3.bf16.msra.mxu1 %v13649_v2  ;;  %s14246_s26 = scalar_lea.vmem %s16373_s9, %s16336_s3  ;;  %v817_v26 = vld [vmem:[%s812_s27] sm:$0x1]  ;;  %s16378_s6 = sld [smem:[#allocation20_spill]] }
  0x32   : > { %12527 = vmatprep.subr.bf16.mxu1 %v14031_v1  ;;  %v821_v5 = vld [vmem:[%s14246_s26] sm:$0xff]  ;;  %12506 = vmatpush3.bf16.msra.mxu0 %v13651_v4  ;;  %vm818_vm4 = vcmp.gt.f32.partialorder %v817_v26, 0.5  ;;  %s16380_s9 = sld [smem:[#allocation21_spill]]  ;;  %s16381_s3 = sld [smem:[#allocation22_spill]] }
  0x33   : > { %v14250_v6 = vpack.c.bf16 %v821_v5, %v821_v5  ;;  %12519 = vmatprep.subr.bf16.mxu0 %v14031_v1  ;;  %v1105_v30 = vsel %vm818_vm4, 1, %v14033_v29  ;;  %s16388_s30 = sshll.u32 %s14234_s5, 3  ;;  %s16395_s25 = smov %s16394_s29 }
  0x34   : > { %v1109_v31 = vrot.slane %v1105_v30, %v14292_v28 }
  0x35   : > { %12516 = vmatmul.mubr.msk.bf16.vlgmr.msra.gmra.mrb[0].mxu1 %vm848_vm1, %v14250_v6  ;;  %12508 = vmatmul.mubr.msk.bf16.vlgmr.msra.gmra.mrb[0].mxu0 %vm848_vm1, %v14250_v6 }
  0x36   : > { %12529 = vmatprep.mubr.msk.bf16.mxu1 %vm14032_vm0, %v14031_v1  ;;  %12523 = vmatprep.mubr.msk.bf16.mxu0 %vm14032_vm0, %v14031_v1  ;;  %vm14296_vm5 = vcmp.eq.s32.totalorder %v1109_v31, 1 }
  0x37   : > { %12520 = vmatpush3.bf16.msra.mxu0 %v13652_v23  ;;  %s16379_s27 = smov %s16378_s6 }
  0x38   : > { %12521 = vmatprep.subr.bf16.mxu0 %v14031_v1 }
  0x3b   : > { %12522 = vmatpush3.bf16.msra.mxu0 %v13653_v24 }
  0x3c   : > { %12533 = vmatprep.subr.bf16.mxu0 %v14031_v1 }
  0x3e   : > { %12524 = vmatmul.mubr.msk.bf16.vlgmr.msra.gmra.mrb[4].mxu0 %vm848_vm1, %v14250_v6 }
  0x3f   : > { %12535 = vmatprep.mubr.msk.bf16.mxu0 %vm14032_vm0, %v14031_v1 }
 0x108   : > { %v951_v8 = vpop.f32.mrb[0].mxu1  ;;  %v886_v11 = vpop.f32.mrb[0].mxu0 }
 0x109   : > { %v12517_v9 = vpop.f32.mrb[1].mxu1  ;;  %v952_v10 = vadd.f32 %v11287_v7, %v951_v8  ;;  %v12509_v13 = vpop.f32.mrb[1].mxu0  ;;  %v887_v18 = vadd.f32 %v11278_v17, %v886_v11  ;;  %v11316_v7 = vld [vmem:[%s16374_s1 + $0x5] ss:$0 sm:$0xff] }
 0x10a   : > { %v954_v12 = vpop.f32.mrb[2].mxu1  ;;  %v889_v15 = vpop.f32.mrb[2].mxu0  ;;  %v11307_v13 = vld [vmem:[%s16374_s1 + $0x1] ss:$0 sm:$0xff] }
 0x10b   : > { %1023 = vxpose.xlu0.b32.start.end [1/1] (short) (narrow) %v952_v10, 8  ;;  %v12518_v14 = vpop.f32.mrb[3].mxu1  ;;  %v12510_v16 = vpop.f32.mrb[3].mxu0  ;;  %v1022_v21 = vpack.c.bf16 %v887_v18, %v887_v18 }
 0x111   : > { %v1016_v45 = vpop.f32.mrb[4].mxu0 }
 0x112   : > { %v12525_v46 = vpop.f32.mrb[5].mxu0  ;;  %v1017_v50 = vadd.f32 %v11296_v48, %v1016_v45  ;;  %v1172_v48 = vld [vmem:[%s16378_s6] sm:$0xf]  ;;  %s16384_s6 = sld [smem:[#allocation23_spill]] }
 0x113   : > { %v1019_v47 = vpop.f32.mrb[6].mxu0 }
 0x114   : > { %v12526_v49 = vpop.f32.mrb[7].mxu0  ;;  %v1124_v51 = vpack.c.bf16 %v1017_v50, %v1017_v50 }
 0x116   : > { %v1129_v52 = vsel %vm1060_vm2, %v1124_v51, 0  ;;  %v1562_v51 = vsel %vm1060_vm2, %v1172_v48, 0 }
 0x117   : > { %12534 = vmatpush3.bf16.msra.mxu0 %v1129_v52  ;;  %v13660_v52 = vld [vmem:[%s16372_s0 + $0x60] sm:$0xff]  }
 0x118   : > { %12547 = vmatprep.subr.bf16.mxu0 %v14031_v1  ;;  %s16385_s28 = smov %s16384_s6 }
 0x18b   : > { %v1039_v19 = vpop.trf.xlu0 }
 0x18c   : > { %v1055_v20 = vpack.c.bf16 %v1039_v19, %v1039_v19  ;;  %v13658_v19 = vld [vmem:[%s16372_s0 + $0x90] sm:$0xff]  }
 0x18e   : > { %v1062_v22 = vsel %vm1060_vm2, %v1055_v20, 0  ;;  %v13659_v20 = vld [vmem:[%s16372_s0 + $0x98] sm:$0xff]  }
 0x18f   : > { %12528 = vmatpush3.bf16.msra.mxu1 %v1062_v22 }
 0x190   : > { %12539 = vmatprep.subr.bf16.mxu1 %v14031_v1 }
 0x192   : > { %12530 = vmatmul.mubr.msk.bf16.vlgmr.msra.gmra.mrb[4].mxu1 %vm1056_vm3, %v1022_v21 }
 0x193   : > { %12543 = vmatprep.mubr.msk.bf16.mxu1 %vm14032_vm0, %v14031_v1  ;;  %12540 = vmatpush3.bf16.msra.mxu1 %v13656_v53 }
 0x194   : > { %12541 = vmatprep.subr.bf16.mxu1 %v14031_v1 }
 0x197   : > { %12542 = vmatpush3.bf16.msra.mxu1 %v13657_v54  ;;  %v13661_v54 = vld [vmem:[%s16372_s0 + $0x68] sm:$0xff]  }
 0x198   : > { %12555 = vmatprep.subr.bf16.mxu1 %v14031_v1 }
 0x19a   : > { %12544 = vmatmul.mubr.msk.bf16.vlgmr.msra.gmra.mrb[8].mxu1 %vm848_vm1, %v14250_v6 }
 0x19b   : > { %12559 = vmatprep.mubr.msk.bf16.mxu1 %vm14032_vm0, %v14031_v1  ;;  %12556 = vmatpush3.bf16.msra.mxu1 %v13658_v19 }
 0x19c   : > { %12557 = vmatprep.subr.bf16.mxu1 %v14031_v1 }
 0x19f   : > { %12558 = vmatpush3.bf16.msra.mxu1 %v13659_v20  ;;  %v11339_v20 = vld [vmem:[%s16374_s1 + $0x2] ss:$0 sm:$0xff] }
 0x1a0   : > { %12569 = vmatprep.subr.bf16.mxu1 %v14031_v1 }
 0x1a2   : > { %12560 = vmatmul.mubr.msk.bf16.vlgmr.msra.gmra.mrb[12].mxu1 %vm848_vm1, %v14250_v6 }
 0x1a3   : > { %12571 = vmatprep.mubr.msk.bf16.mxu1 %vm14032_vm0, %v14031_v1 }
 0x265   : > { %v1098_v32 = vpop.f32.mrb[4].mxu1 }
 0x266   : > { %v12531_v34 = vpop.f32.mrb[5].mxu1  ;;  %v1104_v35 = vmul.f32 0.35355338, %v1098_v32 }
 0x267   : > { %v1101_v36 = vpop.f32.mrb[6].mxu1 }
 0x268   : > { %v12532_v37 = vpop.f32.mrb[7].mxu1  ;;  %v1111_v38 = vsel %vm14296_vm5, %v1104_v35, -1e+10 }
 0x269   : > { %v1112_v39 = vsel %vm1056_vm3, %v1111_v38, -inf }
 0x26a   : > { %1113 = vmax.xlane.f32.xlu0 %v1112_v39 }
 0x26d   : > { %v1232_v61 = vpop.f32.mrb[8].mxu1 }
 0x26e   : > { %v12545_v62 = vpop.f32.mrb[9].mxu1  ;;  %v1233_v14 = vadd.f32 %v11307_v13, %v1232_v61 }
 0x26f   : > { %v1235_v63 = vpop.f32.mrb[10].mxu1 }
 0x270   : > { %v12546_v0 = vpop.f32.mrb[11].mxu1  ;;  %v1368_v17 = vpack.c.bf16 %v1233_v14, %v1233_v14  ;;  %v13663_v63 = vld [vmem:[%s16372_s0 + $0x28] sm:$0xff]  }
 0x2f7   : > { %v1114_v40 = vpop.xlane.xlu0 %1113 }
 0x2f8   : > { %v1115_v41 = vsub.f32 %v1111_v38, %v1114_v40  ;;  %v1362_v38 = vpop.f32.mrb[12].mxu1 }
 0x2f9   : > { %v12561_v39 = vpop.f32.mrb[13].mxu1 }
 0x2fa   : > { %v1116_v42 = vmul.f32 1.442695, %v1115_v41  ;;  %v1365_v40 = vpop.f32.mrb[14].mxu1  ;;  %v11325_v41 = vld [vmem:[%s16374_s1 + $0x9] ss:$0 sm:$0xff] }
 0x2fc   : > { %13818 = vpow2.f32 %v1116_v42  ;;  %v12562_v42 = vpop.f32.mrb[15].mxu1 }
 0x306   : > { %v13819_v43 = vpop.eup %13818 }
 0x307   : > { %v1118_v44 = vsel %vm1056_vm3, %v13819_v43, 0.0 }
 0x308   : > { %1119 = vadd.xlane.f32.xlu1 %v1118_v44 }
 0x395   : > { %v1120_v55 = vpop.xlane.xlu1 %1119 }
 0x396   : > { %13820 = vrcp.f32 %v1120_v55  ;;  %v11331_v55 = vld [vmem:[%s16379_s27 + $0x4] sm:$0xf] }
 0x3a0   : > { %v13821_v56 = vpop.eup %13820 }
 0x3a1   : > { %v1122_v57 = vmul.f32 %v13821_v56, %v13819_v43  ;;  %v1363_v43 = vadd.f32 %v11325_v41, %v1362_v38  ;;  %v1516_v56 = vsel %vm1060_vm2, %v11331_v55, 0 }
 0x3a3   : > { %v1123_v59 = vpack.c.bf16 %v1122_v57, %v1122_v57  ;;  %v1462_v44 = vpack.c.bf16 %v1363_v43, %v1363_v43 }
 0x3a5   : > { %12536 = vmatmul.mubr.msk.bf16.vlgmr.msra.gmra.mrb[8].mxu0 %vm1056_vm3, %v1123_v59  ;;  %v1467_v45 = vsel %vm1060_vm2, %v1462_v44, 0 }
 0x3a6   : > { %12548 = vmatpush3.bf16.msra.mxu0 %v13654_v58  ;;  %12551 = vmatprep.mubr.msk.bf16.mxu0 %vm14032_vm0, %v14031_v1  ;;  %v13662_v58 = vld [vmem:[%s16372_s0 + $0x20] sm:$0xff]  }
 0x3a7   : > { %12549 = vmatprep.subr.bf16.mxu0 %v14031_v1  ;;  %12570 = vmatpush3.bf16.msra.mxu1 %v1467_v45 }
 0x3a8   : > { %12581 = vmatprep.subr.bf16.mxu1 %v14031_v1 }
 0x3aa   : > { %12550 = vmatpush3.bf16.msra.mxu0 %v13655_v60 }
 0x3ab   : > { %12563 = vmatprep.subr.bf16.mxu0 %v14031_v1 }
 0x3ad   : > { %12552 = vmatmul.mubr.msk.bf16.vlgmr.msra.gmra.mrb[12].mxu0 %vm848_vm1, %v14250_v6 }
 0x3ae   : > { %12565 = vmatprep.mubr.msk.bf16.mxu0 %vm14032_vm0, %v14031_v1 }
 0x478   : > { %v14336_v2 = vpop.f32.mrb[8].mxu0 }
 0x479   : > { %v12537_v3 = vpop.f32.mrb[9].mxu0  ;;  %v1171_v53 = vpack.c.bf16 %v14336_v2, %v14336_v2 }
 0x47a   : > { %v1168_v4 = vpop.f32.mrb[10].mxu0 }
 0x47b   : > { %v12538_v5 = vpop.f32.mrb[11].mxu0 }
 0x47c   : > { %v11348_v5 = vld [vmem:[%s16374_s1 + $0x6] ss:$0 sm:$0xff] }
 0x480   : > { %v1297_v8 = vpop.f32.mrb[12].mxu0 }
 0x481   : > { %v12553_v9 = vpop.f32.mrb[13].mxu0  ;;  %v1298_v10 = vadd.f32 %v11316_v7, %v1297_v8 }
 0x482   : > { %v1300_v11 = vpop.f32.mrb[14].mxu0 }
 0x483   : > { %1369 = vxpose.xlu1.b32.start.end [1/1] (short) (narrow) %v1298_v10, 8  ;;  %v12554_v12 = vpop.f32.mrb[15].mxu0 }
 0x503   : > { %v1385_v15 = vpop.trf.xlu1 }
 0x504   : > { %v1401_v16 = vpack.c.bf16 %v1385_v15, %v1385_v15 }
 0x506   : > { %v1406_v18 = vsel %vm1060_vm2, %v1401_v16, 0 }
 0x507   : > { %12564 = vmatpush3.bf16.msra.mxu0 %v1406_v18 }
 0x508   : > { %12575 = vmatprep.subr.bf16.mxu0 %v14031_v1 }
 0x50a   : > { %12566 = vmatmul.mubr.msk.bf16.vlgmr.msra.gmra.mrb[16].mxu0 %vm1056_vm3, %v1368_v17 }
 0x50b   : > { %12577 = vmatprep.mubr.msk.bf16.mxu0 %vm14032_vm0, %v14031_v1  ;;  %12576 = vmatpush3.bf16.msra.mxu0 %v1516_v56 }
 0x50c   : > { %12587 = vmatprep.subr.bf16.mxu0 %v14031_v1 }
 0x5dd   : > { %v1442_v21 = vpop.f32.mrb[16].mxu0 }
 0x5de   : > { %v12567_v22 = vpop.f32.mrb[17].mxu0  ;;  %v1448_v23 = vmul.f32 0.35355338, %v1442_v21 }
 0x5df   : > { %v1445_v24 = vpop.f32.mrb[18].mxu0 }
 0x5e0   : > { %v12568_v26 = vpop.f32.mrb[19].mxu0  ;;  %v1449_v30 = vsel %vm14296_vm5, %v1448_v23, -1e+10 }
 0x5e1   : > { %v1450_v31 = vsel %vm1056_vm3, %v1449_v30, -inf }
 0x5e2   : > { %1451 = vmax.xlane.f32.xlu0 %v1450_v31  ;;  %v13664_v31 = vld [vmem:[%s16372_s0 + $0xa0] sm:$0xff]  }
 0x66f   : > { %v1452_v32 = vpop.xlane.xlu0 %1451 }
 0x670   : > { %v1453_v34 = vsub.f32 %v1449_v30, %v1452_v32  ;;  %v13665_v32 = vld [vmem:[%s16372_s0 + $0xa8] sm:$0xff]  }
 0x672   : > { %v1454_v35 = vmul.f32 1.442695, %v1453_v34 }
 0x674   : > { %13822 = vpow2.f32 %v1454_v35 }
 0x67e   : > { %v13823_v36 = vpop.eup %13822 }
 0x67f   : > { %v1456_v37 = vsel %vm1056_vm3, %v13823_v36, 0.0 }
 0x680   : > { %1457 = vadd.xlane.f32.xlu0 %v1456_v37 }
 0x70d   : > { %v1458_v46 = vpop.xlane.xlu0 %1457 }
 0x70e   : > { %13824 = vrcp.f32 %v1458_v46 }
 0x718   : > { %v13825_v47 = vpop.eup %13824 }
 0x719   : > { %v1460_v49 = vmul.f32 %v13825_v47, %v13823_v36 }
 0x71b   : > { %v1461_v50 = vpack.c.bf16 %v1460_v49, %v1460_v49  ;;  %v11357_v49 = vld [vmem:[%s16374_s1 + $0xa] ss:$0 sm:$0xff] }
 0x71d   : > { %12572 = vmatmul.mubr.msk.bf16.vlgmr.msra.gmra.mrb[16].mxu1 %vm1056_vm3, %v1461_v50 }
 0x71e   : > { %12582 = vmatpush3.bf16.msra.mxu1 %v1562_v51  ;;  %12583 = vmatprep.mubr.msk.bf16.mxu1 %vm14032_vm0, %v14031_v1 }
 0x71f   : > { %12595 = vmatprep.subr.bf16.mxu1 %v14031_v1 }
 0x725   : > { %12584 = vmatmul.mubr.msk.bf16.vlgmr.msra.gmra.mrb[20].mxu1 %vm1056_vm3, %v1171_v53 }
 0x726   : > { %12596 = vmatpush3.bf16.msra.mxu1 %v13660_v52  ;;  %12599 = vmatprep.mubr.msk.bf16.mxu1 %vm14032_vm0, %v14031_v1 }
 0x727   : > { %12597 = vmatprep.subr.bf16.mxu1 %v14031_v1 }
 0x72a   : > { %12598 = vmatpush3.bf16.msra.mxu1 %v13661_v54 }
 0x72b   : > { %12611 = vmatprep.subr.bf16.mxu1 %v14031_v1 }
 0x72d   : > { %12600 = vmatmul.mubr.msk.bf16.vlgmr.msra.gmra.mrb[24].mxu1 %vm848_vm1, %v14250_v6 }
 0x72e   : > { %12613 = vmatprep.mubr.msk.bf16.mxu1 %vm14032_vm0, %v14031_v1 }
 0x7f0   : > { %v1503_v57 = vpop.f32.mrb[16].mxu1 }
 0x7f1   : > { %v1509_v59 = vpack.c.bf16 %v1503_v57, %v1503_v57  ;;  %v12573_v60 = vpop.f32.mrb[17].mxu1 }
 0x7f2   : > { %v1506_v61 = vpop.f32.mrb[18].mxu1  ;;  %v13668_v60 = vld [vmem:[%s16372_s0 + $0x30] sm:$0xff]  }
 0x7f3   : > { %v12574_v62 = vpop.f32.mrb[19].mxu1  ;;  %12578 = vmatmul.mubr.msk.bf16.vlgmr.msra.gmra.mrb[20].mxu0 %vm1056_vm3, %v1509_v59  ;;  %v13669_v61 = vld [vmem:[%s16372_s0 + $0x38] sm:$0xff]  }
 0x7f4   : > { %12588 = vmatpush3.bf16.msra.mxu0 %v13662_v58  ;;  %12591 = vmatprep.mubr.msk.bf16.mxu0 %vm14032_vm0, %v14031_v1  ;;  %v11363_v58 = vld [vmem:[%s16379_s27 + $0x8] sm:$0xf] }
 0x7f5   : > { %12589 = vmatprep.subr.bf16.mxu0 %v14031_v1  ;;  %v1947_v59 = vsel %vm1060_vm2, %v11363_v58, 0  ;;  %v11394_v58 = vld [vmem:[%s16379_s27 + $0xc] sm:$0xf] }
 0x7f8   : > { %v1598_v0 = vpop.f32.mrb[20].mxu1  ;;  %12590 = vmatpush3.bf16.msra.mxu0 %v13663_v63  ;;  %v13666_v63 = vld [vmem:[%s16372_s0 + $0x70] sm:$0xff]  }
 0x7f9   : > { %v12585_v2 = vpop.f32.mrb[21].mxu1  ;;  %12603 = vmatprep.subr.bf16.mxu0 %v14031_v1 }
 0x7fa   : > { %v1601_v3 = vpop.f32.mrb[22].mxu1 }
 0x7fb   : > { %v12586_v4 = vpop.f32.mrb[23].mxu1  ;;  %12592 = vmatmul.mubr.msk.bf16.vlgmr.msra.gmra.mrb[24].mxu0 %vm848_vm1, %v14250_v6 }
 0x7fc   : > { %12607 = vmatprep.mubr.msk.bf16.mxu0 %vm14032_vm0, %v14031_v1  ;;  %12604 = vmatpush3.bf16.msra.mxu0 %v13664_v31 }
 0x7fd   : > { %12605 = vmatprep.subr.bf16.mxu0 %v14031_v1 }
 0x800   : > { %v1728_v7 = vpop.f32.mrb[24].mxu1  ;;  %12606 = vmatpush3.bf16.msra.mxu0 %v13665_v32  ;;  %v13670_v32 = vld [vmem:[%s16372_s0 + $0xb0] sm:$0xff]  }
 0x801   : > { %v12601_v8 = vpop.f32.mrb[25].mxu1  ;;  %v1729_v9 = vadd.f32 %v11348_v5, %v1728_v7  ;;  %12617 = vmatprep.subr.bf16.mxu0 %v14031_v1  ;;  %v13667_v5 = vld [vmem:[%s16372_s0 + $0x78] sm:$0xff]  }
 0x802   : > { %v1731_v10 = vpop.f32.mrb[26].mxu1 }
 0x803   : > { %v12602_v11 = vpop.f32.mrb[27].mxu1  ;;  %1800 = vxpose.xlu1.b32.start.end [1/1] (short) (narrow) %v1729_v9, 8  ;;  %12608 = vmatmul.mubr.msk.bf16.vlgmr.msra.gmra.mrb[28].mxu0 %vm848_vm1, %v14250_v6 }
 0x804   : > { %12619 = vmatprep.mubr.msk.bf16.mxu0 %vm14032_vm0, %v14031_v1 }
 0x883   : > { %v1816_v12 = vpop.trf.xlu1 }
 0x884   : > { %v1832_v13 = vpack.c.bf16 %v1816_v12, %v1816_v12 }
 0x886   : > { %v1837_v14 = vsel %vm1060_vm2, %v1832_v13, 0 }
 0x887   : > { %12612 = vmatpush3.bf16.msra.mxu1 %v1837_v14 }
 0x888   : > { %12623 = vmatprep.subr.bf16.mxu1 %v14031_v1 }
 0x8c6   : > { %v1552_v15 = vpop.f32.mrb[20].mxu0 }
 0x8c7   : > { %v14420_v16 = vadd.f32 %v1598_v0, %v1552_v15  ;;  %v12579_v17 = vpop.f32.mrb[21].mxu0 }
 0x8c8   : > { %v1555_v18 = vpop.f32.mrb[22].mxu0  ;;  %v11379_v17 = vld [vmem:[%s16374_s1 + $0x7] ss:$0 sm:$0xff] }
 0x8c9   : > { %v12580_v19 = vpop.f32.mrb[23].mxu0 }
 0x8ce   : > { %v1663_v21 = vpop.f32.mrb[24].mxu0 }
 0x8cf   : > { %v1664_v22 = vadd.f32 %v11339_v20, %v1663_v21  ;;  %v12593_v23 = vpop.f32.mrb[25].mxu0 }
 0x8d0   : > { %v1666_v24 = vpop.f32.mrb[26].mxu0  ;;  %v11370_v23 = vld [vmem:[%s16374_s1 + $0x3] ss:$0 sm:$0xff] }
 0x8d1   : > { %v1799_v26 = vpack.c.bf16 %v1664_v22, %v1664_v22  ;;  %v12594_v30 = vpop.f32.mrb[27].mxu0 }
 0x8d3   : > { %12614 = vmatmul.mubr.msk.bf16.vlgmr.msra.gmra.mrb[28].mxu1 %vm1056_vm3, %v1799_v26 }
 0x8d4   : > { %12625 = vmatprep.mubr.msk.bf16.mxu1 %vm14032_vm0, %v14031_v1  ;;  %12624 = vmatpush3.bf16.msra.mxu1 %v1947_v59  ;;  %v2333_v59 = vsel %vm1060_vm2, %v11394_v58, 0 }
 0x8d5   : > { %12637 = vmatprep.subr.bf16.mxu1 %v14031_v1 }
 0x8d6   : > { %v1793_v46 = vpop.f32.mrb[28].mxu0 }
 0x8d7   : > { %v12609_v47 = vpop.f32.mrb[29].mxu0  ;;  %v1794_v51 = vadd.f32 %v11357_v49, %v1793_v46  ;;  %v11388_v49 = vld [vmem:[%s16374_s1 + $0xb] ss:$0 sm:$0xff] }
 0x8d8   : > { %v1796_v48 = vpop.f32.mrb[30].mxu0 }
 0x8d9   : > { %v12610_v50 = vpop.f32.mrb[31].mxu0  ;;  %v1893_v52 = vpack.c.bf16 %v1794_v51, %v1794_v51 }
 0x8db   : > { %v1898_v53 = vsel %vm1060_vm2, %v1893_v52, 0 }
 0x8dc   : > { %12618 = vmatpush3.bf16.msra.mxu0 %v1898_v53 }
 0x8dd   : > { %12629 = vmatprep.subr.bf16.mxu0 %v14031_v1 }
 0x9a6   : > { %v1873_v34 = vpop.f32.mrb[28].mxu1 }
 0x9a7   : > { %v12615_v35 = vpop.f32.mrb[29].mxu1  ;;  %v1879_v36 = vmul.f32 0.35355338, %v1873_v34  ;;  %v13671_v34 = vld [vmem:[%s16372_s0 + $0xb8] sm:$0xff]  }
 0x9a8   : > { %v1876_v37 = vpop.f32.mrb[30].mxu1 }
 0x9a9   : > { %v12616_v38 = vpop.f32.mrb[31].mxu1  ;;  %v1880_v39 = vsel %vm14296_vm5, %v1879_v36, -1e+10 }
 0x9aa   : > { %v1881_v40 = vsel %vm1056_vm3, %v1880_v39, -inf }
 0x9ab   : > { %1882 = vmax.xlane.f32.xlu0 %v1881_v40 }
 0xa38   : > { %v1883_v41 = vpop.xlane.xlu0 %1882 }
 0xa39   : > { %v1884_v42 = vsub.f32 %v1880_v39, %v1883_v41 }
 0xa3b   : > { %v1885_v43 = vmul.f32 1.442695, %v1884_v42 }
 0xa3d   : > { %13826 = vpow2.f32 %v1885_v43 }
 0xa47   : > { %v13827_v44 = vpop.eup %13826 }
 0xa48   : > { %v1887_v45 = vsel %vm1056_vm3, %v13827_v44, 0.0 }
 0xa49   : > { %1888 = vadd.xlane.f32.xlu1 %v1887_v45 }
 0xad6   : > { %v1889_v54 = vpop.xlane.xlu1 %1888 }
 0xad7   : > { %13828 = vrcp.f32 %v1889_v54 }
 0xae1   : > { %v13829_v55 = vpop.eup %13828 }
 0xae2   : > { %v1891_v56 = vmul.f32 %v13829_v55, %v13827_v44 }
 0xae4   : > { %v1892_v57 = vpack.c.bf16 %v1891_v56, %v1891_v56 }
 0xae6   : > { %12620 = vmatmul.mubr.msk.bf16.vlgmr.msra.gmra.mrb[32].mxu0 %vm1056_vm3, %v1892_v57 }
 0xae7   : > { %12633 = vmatprep.mubr.msk.bf16.mxu0 %vm14032_vm0, %v14031_v1  ;;  %12630 = vmatpush3.bf16.msra.mxu0 %v13668_v60 }
 0xae8   : > { %12631 = vmatprep.subr.bf16.mxu0 %v14031_v1 }
 0xaeb   : > { %12632 = vmatpush3.bf16.msra.mxu0 %v13669_v61 }
 0xaec   : > { %12645 = vmatprep.subr.bf16.mxu0 %v14031_v1 }
 0xaee   : > { %12634 = vmatmul.mubr.msk.bf16.vlgmr.msra.gmra.mrb[36].mxu0 %vm848_vm1, %v14250_v6 }
 0xaef   : > { %12649 = vmatprep.mubr.msk.bf16.mxu0 %vm14032_vm0, %v14031_v1  ;;  %12646 = vmatpush3.bf16.msra.mxu0 %v13670_v32 }
 0xaf0   : > { %12647 = vmatprep.subr.bf16.mxu0 %v14031_v1 }
 0xaf3   : > { %12648 = vmatpush3.bf16.msra.mxu0 %v13671_v34 }
 0xaf4   : > { %12659 = vmatprep.subr.bf16.mxu0 %v14031_v1 }
 0xaf6   : > { %12650 = vmatmul.mubr.msk.bf16.vlgmr.msra.gmra.mrb[40].mxu0 %vm848_vm1, %v14250_v6 }
 0xaf7   : > { %12661 = vmatprep.mubr.msk.bf16.mxu0 %vm14032_vm0, %v14031_v1 }
 0xbb9   : > { %v1934_v62 = vpop.f32.mrb[32].mxu0 }
 0xbba   : > { %v1940_v0 = vpack.c.bf16 %v1934_v62, %v1934_v62  ;;  %v12621_v2 = vpop.f32.mrb[33].mxu0 }
 0xbbb   : > { %v1937_v3 = vpop.f32.mrb[34].mxu0 }
 0xbbc   : > { %v12622_v4 = vpop.f32.mrb[35].mxu0  ;;  %12626 = vmatmul.mubr.msk.bf16.vlgmr.msra.gmra.mrb[32].mxu1 %vm1056_vm3, %v1940_v0  ;;  %v11396_v3 = vld [vmem:[%s16380_s9] ss:$0 sm:$0xff] }
 0xbbd   : > { %12638 = vmatpush3.bf16.msra.mxu1 %v13666_v63  ;;  %12641 = vmatprep.mubr.msk.bf16.mxu1 %vm14032_vm0, %v14031_v1 }
 0xbbe   : > { %12639 = vmatprep.subr.bf16.mxu1 %v14031_v1 }
 0xbc1   : > { %12640 = vmatpush3.bf16.msra.mxu1 %v13667_v5  ;;  %v2049_v7 = vpop.f32.mrb[36].mxu0 }
 0xbc2   : > { %12653 = vmatprep.subr.bf16.mxu1 %v14031_v1  ;;  %v12635_v8 = vpop.f32.mrb[37].mxu0  ;;  %v2050_v24 = vadd.f32 %v11370_v23, %v2049_v7 }
 0xbc3   : > { %v2052_v9 = vpop.f32.mrb[38].mxu0 }
 0xbc4   : > { %12642 = vmatmul.mubr.msk.bf16.vlgmr.msra.gmra.mrb[36].mxu1 %vm848_vm1, %v14250_v6  ;;  %v12636_v10 = vpop.f32.mrb[39].mxu0  ;;  %v2185_v30 = vpack.c.bf16 %v2050_v24, %v2050_v24 }
 0xbc5   : > { %12655 = vmatprep.mubr.msk.bf16.mxu1 %vm14032_vm0, %v14031_v1  ;;  %v13934_v10 = vld [vmem:[%s14246_s26] sm:$0xff]  ;;  %s16389_s26 = sld [smem:[#allocation15_spill]] }
 0xbc9   : > { %v2179_v46 = vpop.f32.mrb[40].mxu0 }
 0xbca   : > { %v12651_v47 = vpop.f32.mrb[41].mxu0  ;;  %v2180_v51 = vadd.f32 %v11388_v49, %v2179_v46 }
 0xbcb   : > { %v2182_v48 = vpop.f32.mrb[42].mxu0  ;;  %s809_s8 = scalar_lea.vmem %s16389_s26, %s16388_s30 }
 0xbcc   : > { %v12652_v50 = vpop.f32.mrb[43].mxu0  ;;  %v2279_v52 = vpack.c.bf16 %v2180_v51, %v2180_v51  ;;  %v11402_v48 = vld [vmem:[%s16386_s11] ss:$0 sm:$0xff] }
 0xbce   : > { %v2284_v53 = vsel %vm1060_vm2, %v2279_v52, 0 }
 0xbcf   : > { %12660 = vmatpush3.bf16.msra.mxu0 %v2284_v53 }
 0xbd0   : > { %12671 = vmatprep.subr.bf16.mxu0 %v14031_v1 }
 0xc8f   : > { %v1983_v11 = vpop.f32.mrb[32].mxu1 }
 0xc90   : > { %v14485_v12 = vadd.f32 %v1983_v11, %v14420_v16  ;;  %v12627_v13 = vpop.f32.mrb[33].mxu1 }
 0xc91   : > { %v1986_v14 = vpop.f32.mrb[34].mxu1 }
 0xc92   : > { %v12628_v15 = vpop.f32.mrb[35].mxu1 }
 0xc97   : > { %v2114_v18 = vpop.f32.mrb[36].mxu1 }
 0xc98   : > { %v2115_v19 = vadd.f32 %v11379_v17, %v2114_v18  ;;  %v12643_v20 = vpop.f32.mrb[37].mxu1 }
 0xc99   : > { %v2117_v21 = vpop.f32.mrb[38].mxu1  ;;  %v13673_v20 = vld [vmem:[%s16381_s3 + $0x8] sm:$0xff]  }
 0xc9a   : > { %2186 = vxpose.xlu0.b32.start.end [1/1] (short) (narrow) %v2115_v19, 8  ;;  %v12644_v22 = vpop.f32.mrb[39].mxu1  ;;  %v13674_v21 = vld [vmem:[%s16382_s10] sm:$0xff]  }
 0xc9b   : > { %v13675_v22 = vld [vmem:[%s16382_s10 + $0x8] sm:$0xff]  }
 0xd1a   : > { %v2202_v16 = vpop.trf.xlu0 }
 0xd1b   : > { %v2218_v26 = vpack.c.bf16 %v2202_v16, %v2202_v16 }
 0xd1d   : > { %v2223_v31 = vsel %vm1060_vm2, %v2218_v26, 0  ;;  %v822_v26 = vld [vmem:[%s16383_s12] sm:$0x3] }
 0xd1e   : > { %12654 = vmatpush3.bf16.msra.mxu1 %v2223_v31  ;;  %v2401_v31 = vrot.slane %v822_v26, %v14292_v28 }
 0xd1f   : > { %12665 = vmatprep.subr.bf16.mxu1 %v14031_v1 }
 0xd21   : > { %12656 = vmatmul.mubr.msk.bf16.vlgmr.msra.gmra.mrb[40].mxu1 %vm1056_vm3, %v2185_v30  ;;  %v14557_v30 = vsub.s32 1, %v14289_v27 }
 0xd22   : > { %12667 = vmatprep.mubr.msk.bf16.mxu1 %vm14032_vm0, %v14031_v1  ;;  %12666 = vmatpush3.bf16.msra.mxu1 %v2333_v59 }
 0xd23   : > { %12679 = vmatprep.subr.bf16.mxu1 %v14031_v1 }
 0xdf4   : > { %v2259_v35 = vpop.f32.mrb[40].mxu1 }
 0xdf5   : > { %v12657_v36 = vpop.f32.mrb[41].mxu1  ;;  %v2265_v37 = vmul.f32 0.35355338, %v2259_v35  ;;  %v2406_v35 = vrot.slane %v822_v26, %v14557_v30 }
 0xdf6   : > { %v2262_v38 = vpop.f32.mrb[42].mxu1 }
 0xdf7   : > { %v12658_v39 = vpop.f32.mrb[43].mxu1  ;;  %v2266_v40 = vsel %vm14296_vm5, %v2265_v37, -1e+10 }
 0xdf8   : > { %v2267_v41 = vsel %vm1056_vm3, %v2266_v40, -inf  ;;  %v13676_v39 = vld [vmem:[%s16382_s10 + $0x10] sm:$0xff]  }
 0xdf9   : > { %2268 = vmax.xlane.f32.xlu1 %v2267_v41  ;;  %v11398_v41 = vld [vmem:[%s16384_s6] ss:$0 sm:$0xff] }
 0xe86   : > { %v2269_v42 = vpop.xlane.xlu1 %2268 }
 0xe87   : > { %v2270_v43 = vsub.f32 %v2266_v40, %v2269_v42  ;;  %v13677_v40 = vld [vmem:[%s16382_s10 + $0x18] sm:$0xff]  }
 0xe89   : > { %v2271_v44 = vmul.f32 1.442695, %v2270_v43 }
 0xe8b   : > { %13830 = vpow2.f32 %v2271_v44 }
 0xe95   : > { %v13831_v45 = vpop.eup %13830 }
 0xe96   : > { %v2273_v6 = vsel %vm1056_vm3, %v13831_v45, 0.0 }
 0xe97   : > { %2274 = vadd.xlane.f32.xlu1 %v2273_v6 }
 0xf24   : > { %v2275_v54 = vpop.xlane.xlu1 %2274 }
 0xf25   : > { %13832 = vrcp.f32 %v2275_v54 }
 0xf2f   : > { %v13833_v55 = vpop.eup %13832 }
 0xf30   : > { %v2277_v56 = vmul.f32 %v13833_v55, %v13831_v45 }
 0xf32   : > { %v2278_v57 = vpack.c.bf16 %v2277_v56, %v2277_v56 }
 0xf34   : > { %12662 = vmatmul.mubr.msk.bf16.vlgmr.msra.gmra.mrb[44].mxu0 %vm1056_vm3, %v2278_v57 }
 0xf35   : > { %12675 = vmatprep.mubr.msk.bf16.mxu0 %vm14032_vm0, %v14031_v1 }
0x1007   : > { %v2320_v60 = vpop.f32.mrb[44].mxu0 }
0x1008   : > { %v2326_v61 = vpack.c.bf16 %v2320_v60, %v2320_v60  ;;  %v12663_v62 = vpop.f32.mrb[45].mxu0 }
0x1009   : > { %v2323_v63 = vpop.f32.mrb[46].mxu0  ;;  %v13679_v62 = vld [vmem:[%s16372_s0 + $0x140] sm:$0xff]  }
0x100a   : > { %v12664_v0 = vpop.f32.mrb[47].mxu0  ;;  %12668 = vmatmul.mubr.msk.bf16.vlgmr.msra.gmra.mrb[44].mxu1 %vm1056_vm3, %v2326_v61  ;;  %v13678_v61 = vld [vmem:[%s16372_s0 + $0xc0] sm:$0xff]   ;;  %v13680_v63 = vld [vmem:[%s16372_s0 + $0xc8] sm:$0xff]  }
0x100b   : > { %12687 = vmatprep.mubr.msk.bf16.mxu1 %vm14032_vm0, %v14031_v1  ;;  %12680 = vmatpush3.bf16.msra.mxu1 %v13674_v21  ;;  %v13681_v0 = vld [vmem:[%s16372_s0 + $0x148] sm:$0xff]  }
0x100c   : > { %12681 = vmatprep.subr.bf16.mxu1 %v14031_v1 }
0x100f   : > { %12682 = vmatpush3.bf16.msra.mxu1 %v13675_v22 }
0x1010   : > { %12683 = vmatprep.subr.bf16.mxu1 %v14031_v1 }
0x1013   : > { %12684 = vmatpush3.bf16.msra.mxu1 %v13676_v39 }
0x1014   : > { %12685 = vmatprep.subr.bf16.mxu1 %v14031_v1 }
0x1017   : > { %12686 = vmatpush3.bf16.msra.mxu1 %v13677_v40  ;;  %v11415_v40 = vld [vmem:[%s16374_s1 + $0xc] ss:$0 sm:$0xff] }
0x1018   : > { %12707 = vmatprep.subr.bf16.mxu1 %v14031_v1 }
0x10dd   : > { %v2369_v2 = vpop.f32.mrb[44].mxu1 }
0x10de   : > { %v2375_v4 = vadd.f32 %v2369_v2, %v14485_v12  ;;  %v12669_v5 = vpop.f32.mrb[45].mxu1  ;;  %v13672_v12 = vld [vmem:[%s16381_s3] sm:$0xff]  }
0x10df   : > { %v2372_v7 = vpop.f32.mrb[46].mxu1  ;;  %12672 = vmatpush3.bf16.msra.mxu0 %v13672_v12  ;;  %v11397_v5 = vld [vmem:[%s16383_s12 + $0x2] sm:$0x3] }
0x10e0   : > { %v12670_v8 = vpop.f32.mrb[47].mxu1  ;;  %v2382_v9 = vadd.f32 %v11396_v3, %v2375_v4  ;;  %12673 = vmatprep.subr.bf16.mxu0 %v14031_v1  ;;  %v2579_v7 = vrot.slane %v11397_v5, %v14292_v28 }
0x10e2   : > { %v2383_v11 = vadd.f32 %v13934_v10, %v2382_v9  ;;  %v2584_v9 = vrot.slane %v11397_v5, %v14557_v30 }
0x10e3   : > { %12674 = vmatpush3.bf16.msra.mxu0 %v13673_v20 }
0x10e4   : > { %v2384_v13 = vsel %vm848_vm1, %v2383_v11, 0.0  ;;  %12691 = vmatprep.subr.bf16.mxu0 %v14031_v1 }
0x10e5   : > { %2385 = vadd.xlane.f32.xlu0 %v2384_v13 }
0x1172   : > { %v2386_v14 = vpop.xlane.xlu0 %2385 }
0x1173   : > { %v2388_v15 = vmul.f32 0.03125, %v2386_v14  ;;  %v13682_v14 = vld [vmem:[%s16372_s0 + $0x100] sm:$0xff]  }
0x1175   : > { %v2389_v17 = vsub.f32 %v2383_v11, %v2388_v15 }
0x1177   : > { %v2390_v18 = vmul.f32 %v2389_v17, %v2389_v17 }
0x1179   : > { %v2391_v19 = vsel %vm848_vm1, %v2390_v18, 0.0  ;;  %v11433_v18 = vld [vmem:[%s16374_s1 + $0x14] ss:$0 sm:$0xff] }
0x117a   : > { %2392 = vadd.xlane.f32.xlu1 %v2391_v19 }
0x1207   : > { %v2393_v23 = vpop.xlane.xlu1 %2392 }
0x1208   : > { %v2394_v24 = vmul.f32 0.03125, %v2393_v23 }
0x120a   : > { %v2395_v16 = vadd.f32 1e-05, %v2394_v24 }
0x120c   : > { %13834 = vrsqrt.f32 %v2395_v16 }
0x1216   : > { %v13835_v32 = vpop.eup %13834 }
0x1217   : > { %v2397_v34 = vmul.f32 %v13835_v32, %v2389_v17  ;;  %v13683_v17 = vld [vmem:[%s16372_s0 + $0x108] sm:$0xff]  }
0x1219   : > { %v2402_v36 = vmul.f32 %v2401_v31, %v2397_v34  ;;  %v11424_v34 = vld [vmem:[%s16374_s1 + $0x10] ss:$0 sm:$0xff] }
0x121b   : > { %v2407_v37 = vadd.f32 %v2406_v35, %v2402_v36 }
0x121d   : > { %v2424_v38 = vpack.c.bf16 %v2407_v37, %v2407_v37 }
0x121f   : > { %12676 = vmatmul.mubr.msk.bf16.vlgmr.msra.gmra.mrb[48].mxu0 %vm848_vm1, %v2424_v38 }
0x1220   : > { %12695 = vmatprep.mubr.msk.bf16.mxu0 %vm14032_vm0, %v14031_v1  ;;  %12692 = vmatpush3.bf16.msra.mxu0 %v13678_v61 }
0x1221   : > { %12693 = vmatprep.subr.bf16.mxu0 %v14031_v1 }
0x1224   : > { %12694 = vmatpush3.bf16.msra.mxu0 %v13680_v63 }
0x1225   : > { %12699 = vmatprep.subr.bf16.mxu0 %v14031_v1 }
0x12f2   : > { %v2480_v42 = vpop.f32.mrb[48].mxu0 }
0x12f3   : > { %v2481_v43 = vadd.f32 %v11398_v41, %v2480_v42  ;;  %v12677_v44 = vpop.f32.mrb[49].mxu0 }
0x12f4   : > { %v2483_v45 = vpop.f32.mrb[50].mxu0 }
0x12f5   : > { %v2486_v6 = vmax.f32 %v2481_v43, 0.0  ;;  %v12678_v46 = vpop.f32.mrb[51].mxu0  ;;  %v13684_v45 = vld [vmem:[%s16372_s0 + $0xd0] sm:$0xff]  }
0x12f6   : > { %v13685_v46 = vld [vmem:[%s16372_s0 + $0xd8] sm:$0xff]  }
0x12f7   : > { %v2487_v47 = vpack.c.bf16 %v2486_v6, %v2486_v6 }
0x12f9   : > { %12688 = vmatmul.mubr.msk.bf16.vlgmr.msra.gmra.mrb[48].mxu1 %vm2518_vm6, %v2487_v47  ;;  %v13686_v47 = vld [vmem:[%s16372_s0 + $0x150] sm:$0xff]  }
0x12fa   : > { %12711 = vmatprep.mubr.msk.bf16.mxu1 %vm14032_vm0, %v14031_v1  ;;  %12708 = vmatpush3.bf16.msra.mxu1 %v13679_v62 }
0x12fb   : > { %12709 = vmatprep.subr.bf16.mxu1 %v14031_v1 }
0x12fe   : > { %12710 = vmatpush3.bf16.msra.mxu1 %v13681_v0 }
0x12ff   : > { %12721 = vmatprep.subr.bf16.mxu1 %v14031_v1 }
0x13cc   : > { %v2556_v49 = vpop.f32.mrb[48].mxu1 }
0x13cd   : > { %v2557_v50 = vadd.f32 %v11402_v48, %v2556_v49  ;;  %v12689_v51 = vpop.f32.mrb[49].mxu1  ;;  %v13687_v48 = vld [vmem:[%s16372_s0 + $0x158] sm:$0xff]  }
0x13ce   : > { %v2559_v52 = vpop.f32.mrb[50].mxu1 }
0x13cf   : > { %v12690_v53 = vpop.f32.mrb[51].mxu1  ;;  %v2562_v54 = vadd.f32 %v2557_v50, %v2407_v37 }
0x13d1   : > { %v2563_v55 = vsel %vm848_vm1, %v2562_v54, 0.0 }
0x13d2   : > { %2564 = vadd.xlane.f32.xlu1 %v2563_v55 }
0x145f   : > { %v2565_v56 = vpop.xlane.xlu1 %2564 }
0x1460   : > { %v2566_v57 = vmul.f32 0.03125, %v2565_v56 }
0x1462   : > { %v2567_v58 = vsub.f32 %v2562_v54, %v2566_v57 }
0x1464   : > { %v2568_v59 = vmul.f32 %v2567_v58, %v2567_v58 }
0x1466   : > { %v2569_v60 = vsel %vm848_vm1, %v2568_v59, 0.0 }
0x1467   : > { %2570 = vadd.xlane.f32.xlu1 %v2569_v60  ;;  %v11463_v60 = vld [vmem:[%s16374_s1 + $0x15] ss:$0 sm:$0xff] }
0x14f4   : > { %v2571_v2 = vpop.xlane.xlu1 %2570 }
0x14f5   : > { %v2572_v3 = vmul.f32 0.03125, %v2571_v2 }
0x14f7   : > { %v2573_v4 = vadd.f32 1e-05, %v2572_v3 }
0x14f9   : > { %13836 = vrsqrt.f32 %v2573_v4 }
0x1503   : > { %v13837_v8 = vpop.eup %13836 }
0x1504   : > { %v2575_v10 = vmul.f32 %v13837_v8, %v2567_v58 }
0x1506   : > { %v2580_v11 = vmul.f32 %v2579_v7, %v2575_v10 }
0x1508   : > { %v14604_v13 = vadd.f32 %v2584_v9, %v2580_v11 }
0x150a   : > { %v14611_v15 = vpack.c.bf16 %v14604_v13, %v14604_v13 }
0x150c   : > { %12696 = vmatmul.mubr.msk.bf16.vlgmr.msra.gmra.mrb[52].mxu0 %vm848_vm1, %v14611_v15  ;;  %12712 = vmatmul.mubr.msk.bf16.vlgmr.msra.gmra.mrb[52].mxu1 %vm848_vm1, %v14611_v15 }
0x150d   : > { %12700 = vmatpush3.bf16.msra.mxu0 %v13682_v14  ;;  %12703 = vmatprep.mubr.msk.bf16.mxu0 %vm14032_vm0, %v14031_v1 }
0x150e   : > { %12701 = vmatprep.subr.bf16.mxu0 %v14031_v1  ;;  %12723 = vmatprep.mubr.msk.bf16.mxu1 %vm14032_vm0, %v14031_v1 }
0x1511   : > { %12702 = vmatpush3.bf16.msra.mxu0 %v13683_v17 }
0x1512   : > { %12715 = vmatprep.subr.bf16.mxu0 %v14031_v1 }
0x1514   : > { %12704 = vmatmul.mubr.msk.bf16.vlgmr.msra.gmra.mrb[56].mxu0 %vm848_vm1, %v14611_v15 }
0x1515   : > { %12717 = vmatprep.mubr.msk.bf16.mxu0 %vm14032_vm0, %v14031_v1 }
0x15df   : > { %v2653_v19 = vpop.f32.mrb[52].mxu0  ;;  %v2783_v12 = vpop.f32.mrb[52].mxu1 }
0x15e0   : > { %v2784_v20 = vadd.f32 %v11433_v18, %v2783_v12  ;;  %v12697_v21 = vpop.f32.mrb[53].mxu0  ;;  %v12713_v22 = vpop.f32.mrb[53].mxu1  ;;  %v2654_v42 = vadd.f32 %v11415_v40, %v2653_v19  ;;  %v13688_v18 = vld [vmem:[%s16372_s0 + $0x110] sm:$0xff]   ;;  %v13689_v12 = vld [vmem:[%s16372_s0 + $0x118] sm:$0xff]  }
0x15e1   : > { %v2656_v23 = vpop.f32.mrb[54].mxu0  ;;  %v2786_v24 = vpop.f32.mrb[54].mxu1 }
0x15e2   : > { %v2883_v16 = vpack.c.bf16 %v2784_v20, %v2784_v20  ;;  %v12698_v26 = vpop.f32.mrb[55].mxu0  ;;  %v12714_v31 = vpop.f32.mrb[55].mxu1  ;;  %v2789_v6 = vpack.c.bf16 %v2654_v42, %v2654_v42  ;;  %v11454_v24 = vld [vmem:[%s16374_s1 + $0x11] ss:$0 sm:$0xff] }
0x15e4   : > { %v2888_v32 = vsel %vm1060_vm2, %v2883_v16, 0 }
0x15e5   : > { %12722 = vmatpush3.bf16.msra.mxu1 %v2888_v32 }
0x15e6   : > { %12735 = vmatprep.subr.bf16.mxu1 %v14031_v1 }
0x15e7   : > { %v2718_v35 = vpop.f32.mrb[56].mxu0 }
0x15e8   : > { %v2719_v36 = vadd.f32 %v11424_v34, %v2718_v35  ;;  %v12705_v37 = vpop.f32.mrb[57].mxu0  ;;  %v11445_v35 = vld [vmem:[%s16374_s1 + $0xd] ss:$0 sm:$0xff] }
0x15e9   : > { %v2721_v38 = vpop.f32.mrb[58].mxu0 }
0x15ea   : > { %2790 = vxpose.xlu1.b32.start.end [1/1] (short) (narrow) %v2719_v36, 8  ;;  %v12706_v39 = vpop.f32.mrb[59].mxu0 }
0x166a   : > { %v2806_v41 = vpop.trf.xlu1 }
0x166b   : > { %v2822_v43 = vpack.c.bf16 %v2806_v41, %v2806_v41 }
0x166d   : > { %v2827_v44 = vsel %vm1060_vm2, %v2822_v43, 0 }
0x166e   : > { %12716 = vmatpush3.bf16.msra.mxu0 %v2827_v44 }
0x166f   : > { %12727 = vmatprep.subr.bf16.mxu0 %v14031_v1 }
0x1671   : > { %12718 = vmatmul.mubr.msk.bf16.vlgmr.msra.gmra.mrb[60].mxu0 %vm1056_vm3, %v2789_v6 }
0x1672   : > { %12728 = vmatpush3.bf16.msra.mxu0 %v13684_v45  ;;  %12731 = vmatprep.mubr.msk.bf16.mxu0 %vm14032_vm0, %v14031_v1 }
0x1673   : > { %12729 = vmatprep.subr.bf16.mxu0 %v14031_v1 }
0x1676   : > { %12730 = vmatpush3.bf16.msra.mxu0 %v13685_v46 }
0x1677   : > { %12743 = vmatprep.subr.bf16.mxu0 %v14031_v1 }
0x1679   : > { %12732 = vmatmul.mubr.msk.bf16.vlgmr.msra.gmra.mrb[64].mxu0 %vm848_vm1, %v14611_v15 }
0x167a   : > { %12744 = vmatpush3.bf16.msra.mxu0 %v13686_v47  ;;  %12747 = vmatprep.mubr.msk.bf16.mxu0 %vm14032_vm0, %v14031_v1 }
0x167b   : > { %12745 = vmatprep.subr.bf16.mxu0 %v14031_v1 }
0x167e   : > { %12746 = vmatpush3.bf16.msra.mxu0 %v13687_v48 }
0x167f   : > { %12757 = vmatprep.subr.bf16.mxu0 %v14031_v1 }
0x1681   : > { %12748 = vmatmul.mubr.msk.bf16.vlgmr.msra.gmra.mrb[68].mxu0 %vm848_vm1, %v14611_v15 }
0x1682   : > { %12759 = vmatprep.mubr.msk.bf16.mxu0 %vm14032_vm0, %v14031_v1 }
0x1744   : > { %v2863_v49 = vpop.f32.mrb[60].mxu0 }
0x1745   : > { %v2869_v50 = vmul.f32 0.35355338, %v2863_v49  ;;  %v12719_v51 = vpop.f32.mrb[61].mxu0 }
0x1746   : > { %v2866_v52 = vpop.f32.mrb[62].mxu0 }
0x1747   : > { %v12720_v53 = vpop.f32.mrb[63].mxu0  ;;  %v2870_v54 = vsel %vm14296_vm5, %v2869_v50, -1e+10 }
0x1748   : > { %v2871_v55 = vsel %vm1056_vm3, %v2870_v54, -inf }
0x1749   : > { %2872 = vmax.xlane.f32.xlu0 %v2871_v55 }
0x174c   : > { %v2992_v56 = vpop.f32.mrb[64].mxu0 }
0x174d   : > { %v12733_v57 = vpop.f32.mrb[65].mxu0  ;;  %v2993_v37 = vadd.f32 %v11445_v35, %v2992_v56 }
0x174e   : > { %v2995_v58 = vpop.f32.mrb[66].mxu0 }
0x174f   : > { %v12734_v59 = vpop.f32.mrb[67].mxu0  ;;  %v3128_v40 = vpack.c.bf16 %v2993_v37, %v2993_v37  ;;  %v13690_v58 = vld [vmem:[%s16372_s0 + $0x120] sm:$0xff]  }
0x1754   : > { %v3122_v61 = vpop.f32.mrb[68].mxu0 }
0x1755   : > { %v3123_v62 = vadd.f32 %v11463_v60, %v3122_v61  ;;  %v12749_v63 = vpop.f32.mrb[69].mxu0  ;;  %v13691_v60 = vld [vmem:[%s16372_s0 + $0x128] sm:$0xff]   ;;  %v11469_v61 = vld [vmem:[%s16379_s27 + $0x14] sm:$0xf] }
0x1756   : > { %v3125_v0 = vpop.f32.mrb[70].mxu0 }
0x1757   : > { %v3222_v2 = vpack.c.bf16 %v3123_v62, %v3123_v62  ;;  %v12750_v3 = vpop.f32.mrb[71].mxu0  ;;  %v3276_v62 = vsel %vm1060_vm2, %v11469_v61, 0  ;;  %v13692_v0 = vld [vmem:[%s16372_s0 + $0xe0] sm:$0xff]  }
0x1759   : > { %v3227_v4 = vsel %vm1060_vm2, %v3222_v2, 0 }
0x175a   : > { %12758 = vmatpush3.bf16.msra.mxu0 %v3227_v4 }
0x175b   : > { %12769 = vmatprep.subr.bf16.mxu0 %v14031_v1 }
0x17d6   : > { %v2873_v5 = vpop.xlane.xlu0 %2872 }
0x17d7   : > { %v2874_v7 = vsub.f32 %v2870_v54, %v2873_v5  ;;  %v11439_v54 = vld [vmem:[%s16379_s27 + $0x10] sm:$0xf] }
0x17d8   : > { %v3322_v57 = vsel %vm1060_vm2, %v11439_v54, 0 }
0x17d9   : > { %v2875_v8 = vmul.f32 1.442695, %v2874_v7  ;;  %v13693_v7 = vld [vmem:[%s16372_s0 + $0xe8] sm:$0xff]  }
0x17db   : > { %13838 = vpow2.f32 %v2875_v8 }
0x17e5   : > { %v13839_v9 = vpop.eup %13838 }
0x17e6   : > { %v2877_v10 = vsel %vm1056_vm3, %v13839_v9, 0.0 }
0x17e7   : > { %2878 = vadd.xlane.f32.xlu0 %v2877_v10 }
0x1874   : > { %v2879_v11 = vpop.xlane.xlu0 %2878 }
0x1875   : > { %13840 = vrcp.f32 %v2879_v11 }
0x187f   : > { %v13841_v14 = vpop.eup %13840 }
0x1880   : > { %v2881_v17 = vmul.f32 %v13841_v14, %v13839_v9  ;;  %v13694_v9 = vld [vmem:[%s16372_s0 + $0x160] sm:$0xff]  }
0x1882   : > { %v2882_v19 = vpack.c.bf16 %v2881_v17, %v2881_v17  ;;  %v13695_v17 = vld [vmem:[%s16372_s0 + $0x168] sm:$0xff]  }
0x1884   : > { %12724 = vmatmul.mubr.msk.bf16.vlgmr.msra.gmra.mrb[56].mxu1 %vm1056_vm3, %v2882_v19 }
0x1885   : > { %12736 = vmatpush3.bf16.msra.mxu1 %v13688_v18  ;;  %12739 = vmatprep.mubr.msk.bf16.mxu1 %vm14032_vm0, %v14031_v1  ;;  %v11486_v18 = vld [vmem:[%s16374_s1 + $0x12] ss:$0 sm:$0xff] }
0x1886   : > { %12737 = vmatprep.subr.bf16.mxu1 %v14031_v1 }
0x1889   : > { %12738 = vmatpush3.bf16.msra.mxu1 %v13689_v12 }
0x188a   : > { %12751 = vmatprep.subr.bf16.mxu1 %v14031_v1 }
0x188c   : > { %12740 = vmatmul.mubr.msk.bf16.vlgmr.msra.gmra.mrb[60].mxu1 %vm848_vm1, %v14611_v15 }
0x188d   : > { %12753 = vmatprep.mubr.msk.bf16.mxu1 %vm14032_vm0, %v14031_v1 }
0x1957   : > { %v2924_v20 = vpop.f32.mrb[56].mxu1 }
0x1958   : > { %v12725_v21 = vpop.f32.mrb[57].mxu1  ;;  %v2930_v59 = vpack.c.bf16 %v2924_v20, %v2924_v20 }
0x1959   : > { %v2927_v22 = vpop.f32.mrb[58].mxu1 }
0x195a   : > { %v12726_v23 = vpop.f32.mrb[59].mxu1 }
0x195f   : > { %v3057_v16 = vpop.f32.mrb[60].mxu1 }
0x1960   : > { %v3058_v26 = vadd.f32 %v11454_v24, %v3057_v16  ;;  %v12741_v31 = vpop.f32.mrb[61].mxu1 }
0x1961   : > { %v3060_v32 = vpop.f32.mrb[62].mxu1 }
0x1962   : > { %3129 = vxpose.xlu0.b32.start.end [1/1] (short) (narrow) %v3058_v26, 8  ;;  %v12742_v34 = vpop.f32.mrb[63].mxu1 }
0x19e2   : > { %v3145_v36 = vpop.trf.xlu0 }
0x19e3   : > { %v3161_v38 = vpack.c.bf16 %v3145_v36, %v3145_v36  ;;  %v11477_v36 = vld [vmem:[%s16374_s1 + $0xe] ss:$0 sm:$0xff] }
0x19e5   : > { %v3166_v39 = vsel %vm1060_vm2, %v3161_v38, 0 }
0x19e6   : > { %12752 = vmatpush3.bf16.msra.mxu1 %v3166_v39 }
0x19e7   : > { %12763 = vmatprep.subr.bf16.mxu1 %v14031_v1 }
0x19e9   : > { %12754 = vmatmul.mubr.msk.bf16.vlgmr.msra.gmra.mrb[64].mxu1 %vm1056_vm3, %v3128_v40 }
0x19ea   : > { %12765 = vmatprep.mubr.msk.bf16.mxu1 %vm14032_vm0, %v14031_v1  ;;  %12764 = vmatpush3.bf16.msra.mxu1 %v3276_v62 }
0x19eb   : > { %12775 = vmatprep.subr.bf16.mxu1 %v14031_v1 }
0x1abc   : > { %v3202_v41 = vpop.f32.mrb[64].mxu1 }
0x1abd   : > { %v3208_v42 = vmul.f32 0.35355338, %v3202_v41  ;;  %v12755_v43 = vpop.f32.mrb[65].mxu1 }
0x1abe   : > { %v3205_v44 = vpop.f32.mrb[66].mxu1  ;;  %v11495_v43 = vld [vmem:[%s16374_s1 + $0x16] ss:$0 sm:$0xff] }
0x1abf   : > { %v12756_v45 = vpop.f32.mrb[67].mxu1  ;;  %v3209_v6 = vsel %vm14296_vm5, %v3208_v42, -1e+10 }
0x1ac0   : > { %v3210_v46 = vsel %vm1056_vm3, %v3209_v6, -inf }
0x1ac1   : > { %3211 = vmax.xlane.f32.xlu1 %v3210_v46 }
0x1b4e   : > { %v3212_v47 = vpop.xlane.xlu1 %3211 }
0x1b4f   : > { %v3213_v48 = vsub.f32 %v3209_v6, %v3212_v47 }
0x1b51   : > { %v3214_v49 = vmul.f32 1.442695, %v3213_v48 }
0x1b53   : > { %13842 = vpow2.f32 %v3214_v49 }
0x1b5d   : > { %v13843_v50 = vpop.eup %13842 }
0x1b5e   : > { %v3216_v51 = vsel %vm1056_vm3, %v13843_v50, 0.0 }
0x1b5f   : > { %3217 = vadd.xlane.f32.xlu0 %v3216_v51 }
0x1bec   : > { %v3218_v52 = vpop.xlane.xlu0 %3217 }
0x1bed   : > { %13844 = vrcp.f32 %v3218_v52 }
0x1bf7   : > { %v13845_v53 = vpop.eup %13844 }
0x1bf8   : > { %v3220_v55 = vmul.f32 %v13845_v53, %v13843_v50 }
0x1bfa   : > { %v3221_v56 = vpack.c.bf16 %v3220_v55, %v3220_v55 }
0x1bfc   : > { %12760 = vmatmul.mubr.msk.bf16.vlgmr.msra.gmra.mrb[72].mxu0 %vm1056_vm3, %v3221_v56 }
0x1bfd   : > { %12770 = vmatpush3.bf16.msra.mxu0 %v3322_v57  ;;  %12771 = vmatprep.mubr.msk.bf16.mxu0 %vm14032_vm0, %v14031_v1 }
0x1bfe   : > { %12783 = vmatprep.subr.bf16.mxu0 %v14031_v1 }
0x1c04   : > { %12772 = vmatmul.mubr.msk.bf16.vlgmr.msra.gmra.mrb[76].mxu0 %vm1056_vm3, %v2930_v59 }
0x1c05   : > { %12784 = vmatpush3.bf16.msra.mxu0 %v13690_v58  ;;  %12787 = vmatprep.mubr.msk.bf16.mxu0 %vm14032_vm0, %v14031_v1 }
0x1c06   : > { %12785 = vmatprep.subr.bf16.mxu0 %v14031_v1 }
0x1c09   : > { %12786 = vmatpush3.bf16.msra.mxu0 %v13691_v60 }
0x1c0a   : > { %12799 = vmatprep.subr.bf16.mxu0 %v14031_v1 }
0x1c0c   : > { %12788 = vmatmul.mubr.msk.bf16.vlgmr.msra.gmra.mrb[80].mxu0 %vm848_vm1, %v14611_v15 }
0x1c0d   : > { %12801 = vmatprep.mubr.msk.bf16.mxu0 %vm14032_vm0, %v14031_v1 }
0x1ccf   : > { %v3263_v63 = vpop.f32.mrb[72].mxu0 }
0x1cd0   : > { %v3269_v2 = vpack.c.bf16 %v3263_v63, %v3263_v63  ;;  %v12761_v3 = vpop.f32.mrb[73].mxu0 }
0x1cd1   : > { %v3266_v4 = vpop.f32.mrb[74].mxu0 }
0x1cd2   : > { %v12762_v5 = vpop.f32.mrb[75].mxu0  ;;  %12766 = vmatmul.mubr.msk.bf16.vlgmr.msra.gmra.mrb[68].mxu1 %vm1056_vm3, %v3269_v2  ;;  %v13696_v2 = vld [vmem:[%s16372_s0 + $0xf0] sm:$0xff]   ;;  %v13697_v4 = vld [vmem:[%s16372_s0 + $0xf8] sm:$0xff]  }
0x1cd3   : > { %12776 = vmatpush3.bf16.msra.mxu1 %v13692_v0  ;;  %12779 = vmatprep.mubr.msk.bf16.mxu1 %vm14032_vm0, %v14031_v1  ;;  %v13698_v5 = vld [vmem:[%s16372_s0 + $0x170] sm:$0xff]  }
0x1cd4   : > { %12777 = vmatprep.subr.bf16.mxu1 %v14031_v1 }
0x1cd7   : > { %v3358_v8 = vpop.f32.mrb[76].mxu0  ;;  %12778 = vmatpush3.bf16.msra.mxu1 %v13693_v7  ;;  %v13699_v7 = vld [vmem:[%s16372_s0 + $0x178] sm:$0xff]  }
0x1cd8   : > { %v12773_v10 = vpop.f32.mrb[77].mxu0  ;;  %12791 = vmatprep.subr.bf16.mxu1 %v14031_v1 }
0x1cd9   : > { %v3361_v11 = vpop.f32.mrb[78].mxu0 }
0x1cda   : > { %v12774_v14 = vpop.f32.mrb[79].mxu0  ;;  %12780 = vmatmul.mubr.msk.bf16.vlgmr.msra.gmra.mrb[72].mxu1 %vm848_vm1, %v14611_v15  ;;  %v13700_v11 = vld [vmem:[%s16372_s0 + $0x130] sm:$0xff]  }
0x1cdb   : > { %12792 = vmatpush3.bf16.msra.mxu1 %v13694_v9  ;;  %12795 = vmatprep.mubr.msk.bf16.mxu1 %vm14032_vm0, %v14031_v1 }
0x1cdc   : > { %12793 = vmatprep.subr.bf16.mxu1 %v14031_v1 }
0x1cdf   : > { %v3488_v19 = vpop.f32.mrb[80].mxu0  ;;  %12794 = vmatpush3.bf16.msra.mxu1 %v13695_v17 }
0x1ce0   : > { %v3489_v12 = vadd.f32 %v11486_v18, %v3488_v19  ;;  %v12789_v20 = vpop.f32.mrb[81].mxu0  ;;  %12805 = vmatprep.subr.bf16.mxu1 %v14031_v1 }
0x1ce1   : > { %v3491_v21 = vpop.f32.mrb[82].mxu0 }
0x1ce2   : > { %12796 = vmatmul.mubr.msk.bf16.vlgmr.msra.gmra.mrb[76].mxu1 %vm848_vm1, %v14611_v15  ;;  %3560 = vxpose.xlu1.b32.start.end [1/1] (short) (narrow) %v3489_v12, 8  ;;  %v12790_v22 = vpop.f32.mrb[83].mxu0  ;;  %v13701_v12 = vld [vmem:[%s16372_s0 + $0x138] sm:$0xff]   ;;  %s16391_s0 = sld [smem:[#allocation17_spill]] }
0x1ce3   : > { %12807 = vmatprep.mubr.msk.bf16.mxu1 %vm14032_vm0, %v14031_v1 }
0x1ce8   : > { %s815_s30 = scalar_lea.vmem %s16391_s0, %s14234_s5  ;;  %s15965_s5 = scalar_lea.vmem [#allocation4], %s11275_s24 }
0x1ce9   : > { %s11146_s6 = sshll.u32 %s15965_s5, 4  ;;  %s12107_s24 = sshll.u32 %s14189_s7, 9  ;;  %s16218_s6 = int_to_ptr.vmem [resolvable:$true] %s11146_s6 }
0x1cea   : > { %s16224_s26 = scalar_lea.hbm %s16394_s29, %s12107_s24 }
0x1d62   : > { %v3576_v23 = vpop.trf.xlu1 }
0x1d63   : > { %v3592_v24 = vpack.c.bf16 %v3576_v23, %v3576_v23 }
0x1d65   : > { %v3597_v16 = vsel %vm1060_vm2, %v3592_v24, 0  ;;  %v11526_v24 = vld [vmem:[%s16374_s1 + $0x17] ss:$0 sm:$0xff] }
0x1d66   : > { %12800 = vmatpush3.bf16.msra.mxu0 %v3597_v16 }
0x1d67   : > { %12811 = vmatprep.subr.bf16.mxu0 %v14031_v1 }
0x1da5   : > { %v3312_v26 = vpop.f32.mrb[68].mxu1 }
0x1da6   : > { %v14769_v31 = vadd.f32 %v3358_v8, %v3312_v26  ;;  %v12767_v32 = vpop.f32.mrb[69].mxu1  ;;  %v11501_v8 = vld [vmem:[%s16379_s27 + $0x18] sm:$0xf] }
0x1da7   : > { %v3315_v34 = vpop.f32.mrb[70].mxu1  ;;  %v3707_v9 = vsel %vm1060_vm2, %v11501_v8, 0 }
0x1da8   : > { %v12768_v35 = vpop.f32.mrb[71].mxu1 }
0x1dad   : > { %v3423_v37 = vpop.f32.mrb[72].mxu1 }
0x1dae   : > { %v3424_v38 = vadd.f32 %v11477_v36, %v3423_v37  ;;  %v12781_v39 = vpop.f32.mrb[73].mxu1 }
0x1daf   : > { %v3426_v40 = vpop.f32.mrb[74].mxu1 }
0x1db0   : > { %v3559_v41 = vpack.c.bf16 %v3424_v38, %v3424_v38  ;;  %v12782_v42 = vpop.f32.mrb[75].mxu1 }
0x1db1   : > { %v11517_v42 = vld [vmem:[%s16374_s1 + $0x13] ss:$0 sm:$0xff] }
0x1db2   : > { %12802 = vmatmul.mubr.msk.bf16.vlgmr.msra.gmra.mrb[84].mxu0 %vm1056_vm3, %v3559_v41 }
0x1db3   : > { %12813 = vmatprep.mubr.msk.bf16.mxu0 %vm14032_vm0, %v14031_v1  ;;  %12812 = vmatpush3.bf16.msra.mxu0 %v3707_v9 }
0x1db4   : > { %12825 = vmatprep.subr.bf16.mxu0 %v14031_v1 }
0x1db5   : > { %v3553_v44 = vpop.f32.mrb[76].mxu1 }
0x1db6   : > { %v3554_v45 = vadd.f32 %v11495_v43, %v3553_v44  ;;  %v12797_v6 = vpop.f32.mrb[77].mxu1 }
0x1db7   : > { %v3556_v46 = vpop.f32.mrb[78].mxu1 }
0x1db8   : > { %v3653_v47 = vpack.c.bf16 %v3554_v45, %v3554_v45  ;;  %v12798_v48 = vpop.f32.mrb[79].mxu1 }
0x1dba   : > { %v3658_v49 = vsel %vm1060_vm2, %v3653_v47, 0  ;;  %v11508_v47 = vld [vmem:[%s16374_s1 + $0xf] ss:$0 sm:$0xff]  ;;  %s13935_s1 = scalar_lea.vmem %s16218_s6, 512 }
0x1dbb   : > { %12806 = vmatpush3.bf16.msra.mxu1 %v3658_v49  ;;  %p13936_p11 = scmp.ne.s32.totalorder %s16218_s6, %s13935_s1 }
0x1dbc   : > { %12817 = vmatprep.subr.bf16.mxu1 %v14031_v1 }
0x1dbd   : > { %p13937_p12 = pnand %p13936_p11, %p14206_p5 }
0x1dbf   : > { %p13938_p13 = pneg %p13937_p12 }
0x1e85   : > { %v3633_v50 = vpop.f32.mrb[84].mxu0 }
0x1e86   : > { %v3639_v51 = vmul.f32 0.35355338, %v3633_v50  ;;  %v12803_v52 = vpop.f32.mrb[85].mxu0 }
0x1e87   : > { %v3636_v53 = vpop.f32.mrb[86].mxu0 }
0x1e88   : > { %v12804_v54 = vpop.f32.mrb[87].mxu0  ;;  %v3640_v55 = vsel %vm14296_vm5, %v3639_v51, -1e+10 }
0x1e89   : > { %v3641_v56 = vsel %vm1056_vm3, %v3640_v55, -inf }
0x1e8a   : > { %3642 = vmax.xlane.f32.xlu0 %v3641_v56 }
0x1f17   : > { %v3643_v57 = vpop.xlane.xlu0 %3642 }
0x1f18   : > { %v3644_v58 = vsub.f32 %v3640_v55, %v3643_v57 }
0x1f1a   : > { %v3645_v59 = vmul.f32 1.442695, %v3644_v58 }
0x1f1c   : > { %13846 = vpow2.f32 %v3645_v59 }
0x1f26   : > { %v13847_v60 = vpop.eup %13846 }
0x1f27   : > { %v3647_v61 = vsel %vm1056_vm3, %v13847_v60, 0.0 }
0x1f28   : > { %3648 = vadd.xlane.f32.xlu0 %v3647_v61 }
0x1fb5   : > { %v3649_v62 = vpop.xlane.xlu0 %3648 }
0x1fb6   : > { %13848 = vrcp.f32 %v3649_v62 }
0x1fc0   : > { %v13849_v63 = vpop.eup %13848 }
0x1fc1   : > { %v3651_v0 = vmul.f32 %v13849_v63, %v13847_v60 }
0x1fc3   : > { %v3652_v3 = vpack.c.bf16 %v3651_v0, %v3651_v0 }
0x1fc5   : > { %12808 = vmatmul.mubr.msk.bf16.vlgmr.msra.gmra.mrb[80].mxu1 %vm1056_vm3, %v3652_v3 }
0x1fc6   : > { %12818 = vmatpush3.bf16.msra.mxu1 %v13696_v2  ;;  %12821 = vmatprep.mubr.msk.bf16.mxu1 %vm14032_vm0, %v14031_v1 }
0x1fc7   : > { %12819 = vmatprep.subr.bf16.mxu1 %v14031_v1 }
0x1fca   : > { %12820 = vmatpush3.bf16.msra.mxu1 %v13697_v4 }
0x1fcb   : > { %12833 = vmatprep.subr.bf16.mxu1 %v14031_v1 }
0x1fcd   : > { %12822 = vmatmul.mubr.msk.bf16.vlgmr.msra.gmra.mrb[84].mxu1 %vm848_vm1, %v14611_v15 }
0x1fce   : > { %12834 = vmatpush3.bf16.msra.mxu1 %v13698_v5  ;;  %12837 = vmatprep.mubr.msk.bf16.mxu1 %vm14032_vm0, %v14031_v1  ;;  %v11532_v5 = vld [vmem:[%s16379_s27 + $0x1c] sm:$0xf] }
0x1fcf   : > { %12835 = vmatprep.subr.bf16.mxu1 %v14031_v1 }
0x1fd2   : > { %12836 = vmatpush3.bf16.msra.mxu1 %v13699_v7  ;;  %v4093_v7 = vsel %vm1060_vm2, %v11532_v5, 0 }
0x1fd3   : > { %12847 = vmatprep.subr.bf16.mxu1 %v14031_v1 }
0x1fd5   : > { %12838 = vmatmul.mubr.msk.bf16.vlgmr.msra.gmra.mrb[88].mxu1 %vm848_vm1, %v14611_v15 }
0x1fd6   : > { %12849 = vmatprep.mubr.msk.bf16.mxu1 %vm14032_vm0, %v14031_v1 }
0x2098   : > { %v3694_v10 = vpop.f32.mrb[80].mxu1 }
0x2099   : > { %v3700_v14 = vpack.c.bf16 %v3694_v10, %v3694_v10  ;;  %v12809_v17 = vpop.f32.mrb[81].mxu1 }
0x209a   : > { %v3697_v18 = vpop.f32.mrb[82].mxu1  ;;  %v11534_v17 = vld [vmem:[%s16380_s9 + $0x1] ss:$0 sm:$0xff] }
0x209b   : > { %v12810_v19 = vpop.f32.mrb[83].mxu1  ;;  %12814 = vmatmul.mubr.msk.bf16.vlgmr.msra.gmra.mrb[88].mxu0 %vm1056_vm3, %v3700_v14 }
0x209c   : > { %12826 = vmatpush3.bf16.msra.mxu0 %v13700_v11  ;;  %12829 = vmatprep.mubr.msk.bf16.mxu0 %vm14032_vm0, %v14031_v1 }
0x209d   : > { %12827 = vmatprep.subr.bf16.mxu0 %v14031_v1 }
0x20a0   : > { %v3809_v20 = vpop.f32.mrb[84].mxu1  ;;  %12828 = vmatpush3.bf16.msra.mxu0 %v13701_v12 }
0x20a1   : > { %v12823_v21 = vpop.f32.mrb[85].mxu1  ;;  %12841 = vmatprep.subr.bf16.mxu0 %v14031_v1  ;;  %v3810_v49 = vadd.f32 %v11508_v47, %v3809_v20  ;;  %v13704_v47 = vld [vmem:[%s16387_s13] sm:$0xff]  }
0x20a2   : > { %v3812_v22 = vpop.f32.mrb[86].mxu1 }
0x20a3   : > { %v12824_v23 = vpop.f32.mrb[87].mxu1  ;;  %12830 = vmatmul.mubr.msk.bf16.vlgmr.msra.gmra.mrb[92].mxu0 %vm848_vm1, %v14611_v15  ;;  %v3945_v51 = vpack.c.bf16 %v3810_v49, %v3810_v49  ;;  %v13705_v49 = vld [vmem:[%s16387_s13 + $0x8] sm:$0xff]  }
0x20a4   : > { %12843 = vmatprep.mubr.msk.bf16.mxu0 %vm14032_vm0, %v14031_v1 }
0x20a8   : > { %v3939_v16 = vpop.f32.mrb[88].mxu1 }
0x20a9   : > { %v3940_v26 = vadd.f32 %v11526_v24, %v3939_v16  ;;  %v12839_v32 = vpop.f32.mrb[89].mxu1 }
0x20aa   : > { %v3942_v34 = vpop.f32.mrb[90].mxu1 }
0x20ab   : > { %v4039_v35 = vpack.c.bf16 %v3940_v26, %v3940_v26  ;;  %v12840_v36 = vpop.f32.mrb[91].mxu1 }
0x20ac   : > { %v13702_v36 = vld [vmem:[%s16381_s3 + $0x10] sm:$0xff]  }
0x20ad   : > { %v4044_v37 = vsel %vm1060_vm2, %v4039_v35, 0 }
0x20ae   : > { %12848 = vmatpush3.bf16.msra.mxu1 %v4044_v37  ;;  %v13708_v37 = vld [vmem:[%s16382_s10 + $0x20] sm:$0xff]  }
0x20af   : > { %12859 = vmatprep.subr.bf16.mxu1 %v14031_v1 }
0x216e   : > { %v3743_v38 = vpop.f32.mrb[88].mxu0 }
0x216f   : > { %v3749_v15 = vadd.f32 %v3743_v38, %v14769_v31  ;;  %v12815_v39 = vpop.f32.mrb[89].mxu0  ;;  %v13709_v38 = vld [vmem:[%s16382_s10 + $0x28] sm:$0xff]  }
0x2170   : > { %v3746_v40 = vpop.f32.mrb[90].mxu0 }
0x2171   : > { %v12816_v41 = vpop.f32.mrb[91].mxu0 }
0x2172   : > { %v11408_v41 = vld [vmem:[%s16383_s12 + $0x4] sm:$0x3] }
0x2176   : > { %v3874_v43 = vpop.f32.mrb[92].mxu0 }
0x2177   : > { %v3875_v44 = vadd.f32 %v11517_v42, %v3874_v43  ;;  %v12831_v45 = vpop.f32.mrb[93].mxu0  ;;  %v4160_v42 = vrot.slane %v11408_v41, %v14292_v28 }
0x2178   : > { %v3877_v6 = vpop.f32.mrb[94].mxu0  ;;  %v4165_v45 = vrot.slane %v11408_v41, %v14557_v30 }
0x2179   : > { %3946 = vxpose.xlu0.b32.start.end [1/1] (short) (narrow) %v3875_v44, 8  ;;  %v12832_v46 = vpop.f32.mrb[95].mxu0 }
0x21f9   : > { %v3962_v48 = vpop.trf.xlu0 }
0x21fa   : > { %v3978_v31 = vpack.c.bf16 %v3962_v48, %v3962_v48 }
0x21fc   : > { %v3983_v50 = vsel %vm1060_vm2, %v3978_v31, 0  ;;  %v14910_v31 = vld [vmem:[%s809_s8] sm:$0xff]  ;;  %s11120_s8 = scalar_lea.sflag [#allocation5], %s15959_s23 }
0x21fd   : > { %12842 = vmatpush3.bf16.msra.mxu0 %v3983_v50  ;;  %v14915_v50 = vpack.c.bf16 %v14910_v31, %v14910_v31 }
0x21fe   : > { %12853 = vmatprep.subr.bf16.mxu0 %v14031_v1 }
0x2200   : > { %12844 = vmatmul.mubr.msk.bf16.vlgmr.msra.gmra.mrb[96].mxu0 %vm1056_vm3, %v3945_v51  ;;  %v13706_v51 = vld [vmem:[%s16387_s13 + $0x40] sm:$0xff]  }
0x2201   : > { %12855 = vmatprep.mubr.msk.bf16.mxu0 %vm14032_vm0, %v14031_v1  ;;  %12854 = vmatpush3.bf16.msra.mxu0 %v4093_v7 }
0x2202   : > { %12867 = vmatprep.subr.bf16.mxu0 %v14031_v1 }
0x22d3   : > { %v4019_v52 = vpop.f32.mrb[96].mxu0 }
0x22d4   : > { %v4025_v53 = vmul.f32 0.35355338, %v4019_v52  ;;  %v12845_v54 = vpop.f32.mrb[97].mxu0  ;;  %v13707_v52 = vld [vmem:[%s16387_s13 + $0x48] sm:$0xff]  }
0x22d5   : > { %v4022_v55 = vpop.f32.mrb[98].mxu0  ;;  %v13711_v54 = vld [vmem:[%s16382_s10 + $0x38] sm:$0xff]  }
0x22d6   : > { %v12846_v56 = vpop.f32.mrb[99].mxu0  ;;  %v4026_v57 = vsel %vm14296_vm5, %v4025_v53, -1e+10  ;;  %v13710_v53 = vld [vmem:[%s16382_s10 + $0x30] sm:$0xff]   ;;  %v11550_v55 = vld [vmem:[%s16385_s28 + $0x1] ss:$0 sm:$0xff] }
0x22d7   : > { %v4027_v58 = vsel %vm1056_vm3, %v4026_v57, -inf }
0x22d8   : > { %4028 = vmax.xlane.f32.xlu1 %v4027_v58 }
0x2365   : > { %v4029_v59 = vpop.xlane.xlu1 %4028 }
0x2366   : > { %v4030_v60 = vsub.f32 %v4026_v57, %v4029_v59 }
0x2368   : > { %v4031_v61 = vmul.f32 1.442695, %v4030_v60 }
0x236a   : > { %13850 = vpow2.f32 %v4031_v61 }
0x2374   : > { %v13851_v62 = vpop.eup %13850 }
0x2375   : > { %v4033_v63 = vsel %vm1056_vm3, %v13851_v62, 0.0 }
0x2376   : > { %4034 = vadd.xlane.f32.xlu1 %v4033_v63 }
0x2403   : > { %v4035_v0 = vpop.xlane.xlu1 %4034 }
0x2404   : > { %13852 = vrcp.f32 %v4035_v0 }
0x240e   : > { %v13853_v2 = vpop.eup %13852 }
0x240f   : > { %v4037_v3 = vmul.f32 %v13853_v2, %v13851_v62 }
0x2411   : > { %v4038_v4 = vpack.c.bf16 %v4037_v3, %v4037_v3 }
0x2413   : > { %12850 = vmatmul.mubr.msk.bf16.vlgmr.msra.gmra.mrb[92].mxu1 %vm1056_vm3, %v4038_v4  ;;  %v11569_v4 = vld [vmem:[%s16390_s14 + $0x4] ss:$0 sm:$0xff] }
0x2414   : > { %12863 = vmatprep.mubr.msk.bf16.mxu1 %vm14032_vm0, %v14031_v1  ;;  %12860 = vmatpush3.bf16.msra.mxu1 %v13702_v36 }
0x2415   : > { %12861 = vmatprep.subr.bf16.mxu1 %v14031_v1 }
0x24e6   : > { %v4080_v8 = vpop.f32.mrb[92].mxu1 }
0x24e7   : > { %v4086_v9 = vpack.c.bf16 %v4080_v8, %v4080_v8  ;;  %v12851_v10 = vpop.f32.mrb[93].mxu1 }
0x24e8   : > { %v4083_v11 = vpop.f32.mrb[94].mxu1 }
0x24e9   : > { %v12852_v14 = vpop.f32.mrb[95].mxu1  ;;  %12856 = vmatmul.mubr.msk.bf16.vlgmr.msra.gmra.mrb[100].mxu0 %vm1056_vm3, %v4086_v9  ;;  %v11560_v11 = vld [vmem:[%s16390_s14] ss:$0 sm:$0xff] }
0x24ea   : > { %12875 = vmatprep.mubr.msk.bf16.mxu0 %vm14032_vm0, %v14031_v1  ;;  %12868 = vmatpush3.bf16.msra.mxu0 %v13708_v37 }
0x24eb   : > { %12869 = vmatprep.subr.bf16.mxu0 %v14031_v1 }
0x24ee   : > { %12870 = vmatpush3.bf16.msra.mxu0 %v13709_v38 }
0x24ef   : > { %12871 = vmatprep.subr.bf16.mxu0 %v14031_v1 }
0x24f2   : > { %12872 = vmatpush3.bf16.msra.mxu0 %v13710_v53  ;;  %v13716_v53 = vld [vmem:[%s16387_s13 + $0x10] sm:$0xff]  }
0x24f3   : > { %12873 = vmatprep.subr.bf16.mxu0 %v14031_v1 }
0x24f6   : > { %12874 = vmatpush3.bf16.msra.mxu0 %v13711_v54  ;;  %v13717_v54 = vld [vmem:[%s16387_s13 + $0x18] sm:$0xff]  }
0x24f7   : > { %12895 = vmatprep.subr.bf16.mxu0 %v14031_v1 }
0x25bc   : > { %v4129_v18 = vpop.f32.mrb[100].mxu0 }
0x25bd   : > { %v4135_v19 = vadd.f32 %v4129_v18, %v3749_v15  ;;  %v12857_v12 = vpop.f32.mrb[101].mxu0 }
0x25be   : > { %v4132_v20 = vpop.f32.mrb[102].mxu0 }
0x25bf   : > { %v4142_v21 = vadd.f32 %v11534_v17, %v4135_v19  ;;  %v12858_v22 = vpop.f32.mrb[103].mxu0 }
0x25c1   : > { %v4143_v23 = vadd.f32 %v4142_v21, %v14604_v13  ;;  %v13703_v13 = vld [vmem:[%s16381_s3 + $0x18] sm:$0xff]   ;;  %s14034_s3 = smov [#allocation4]  }
0x25c2   : > { %12862 = vmatpush3.bf16.msra.mxu1 %v13703_v13  ;;  %v11941_v13 = vld [vmem:[%s16316_s15 + $0x2c] sm:$0xf]  ;;  %s13939_s9 = sshll.u32 %s14034_s3, 4  ;;  %s13940_s9 = int_to_ptr.vmem [resolvable:$false] %s13939_s9 }
0x25c3   : > { %v4144_v24 = vsel %vm848_vm1, %v4143_v23, 0.0  ;;  %12879 = vmatprep.subr.bf16.mxu1 %v14031_v1  ;;  %p13942_p0 = scmp.lt.s32.totalorder %s16218_s6, %s13940_s9 }
0x25c4   : > { %4145 = vadd.xlane.f32.xlu0 %v4144_v24  ;;  %v13712_v24 = vld [vmem:[%s16387_s13 + $0x80] sm:$0xff]  }
0x2651   : > { %v4146_v16 = vpop.xlane.xlu0 %4145 }
0x2652   : > { %v4147_v26 = vmul.f32 0.03125, %v4146_v16  ;;  %v13713_v16 = vld [vmem:[%s16387_s13 + $0x88] sm:$0xff]  }
0x2654   : > { %v4148_v32 = vsub.f32 %v4143_v23, %v4147_v26  ;;  %v819_v26 = vld [vmem:[%s815_s30] sm:$0x1] }
0x2655   : > { %vm820_vm7 = vcmp.gt.f32.partialorder %v819_v26, 0.5 }
0x2656   : > { %v4149_v34 = vmul.f32 %v4148_v32, %v4148_v32 }
0x2658   : > { %v4150_v35 = vsel %vm848_vm1, %v4149_v34, 0.0  ;;  %v4355_v34 = vand.u32 127, %v1106_v25 }
0x2659   : > { %4151 = vadd.xlane.f32.xlu1 %v4150_v35 }
0x265a   : > { %vm4356_vm8 = vcmp.le.s32.totalorder %v4355_v34, %v14289_v27 }
0x26e6   : > { %v4152_v15 = vpop.xlane.xlu1 %4151 }
0x26e7   : > { %v4153_v39 = vmul.f32 0.03125, %v4152_v15 }
0x26e9   : > { %v4154_v40 = vadd.f32 1e-05, %v4153_v39 }
0x26eb   : > { %13854 = vrsqrt.f32 %v4154_v40 }
0x26f5   : > { %v13855_v43 = vpop.eup %13854 }
0x26f6   : > { %v4156_v44 = vmul.f32 %v13855_v43, %v4148_v32  ;;  %v4357_v32 = vsel %vm820_vm7, 1, %v14033_v29 }
0x26f7   : > { %v4361_v35 = vrot.slane %v4357_v32, %v14292_v28 }
0x26f8   : > { %v4161_v6 = vmul.f32 %v4160_v42, %v4156_v44 }
0x26f9   : > { %vm4362_vm9 = vcmp.eq.s32.totalorder %v4361_v35, 1 }
0x26fa   : > { %v14892_v46 = vadd.f32 %v4165_v45, %v4161_v6  ;;  %vm14981_vm10 = vmand %vm4362_vm9, %vm4356_vm8 }
0x26fc   : > { %v4187_v48 = vpack.c.bf16 %v14892_v46, %v14892_v46 }
0x26fe   : > { %12864 = vmatmul.mubr.msk.bf16.vlgmr.msra.gmra.mrb[96].mxu1 %vm848_vm1, %v4187_v48 }
0x26ff   : > { %12880 = vmatpush3.bf16.msra.mxu1 %v13704_v47  ;;  %12883 = vmatprep.mubr.msk.bf16.mxu1 %vm14032_vm0, %v14031_v1  ;;  %v11578_v47 = vld [vmem:[%s16390_s14 + $0x8] ss:$0 sm:$0xff] }
0x2700   : > { %12881 = vmatprep.subr.bf16.mxu1 %v14031_v1 }
0x2703   : > { %12882 = vmatpush3.bf16.msra.mxu1 %v13705_v49 }
0x2704   : > { %12887 = vmatprep.subr.bf16.mxu1 %v14031_v1 }
0x2706   : > { %12884 = vmatmul.mubr.msk.bf16.vlgmr.msra.gmra.mrb[100].mxu1 %vm848_vm1, %v14915_v50 }
0x2707   : > { %12888 = vmatpush3.bf16.msra.mxu1 %v13706_v51  ;;  %12891 = vmatprep.mubr.msk.bf16.mxu1 %vm14032_vm0, %v14031_v1 }
0x2708   : > { %12889 = vmatprep.subr.bf16.mxu1 %v14031_v1 }
0x270b   : > { %12890 = vmatpush3.bf16.msra.mxu1 %v13707_v52 }
0x270c   : > { %12903 = vmatprep.subr.bf16.mxu1 %v14031_v1 }
0x270e   : > { %12892 = vmatmul.mubr.msk.bf16.vlgmr.msra.gmra.mrb[104].mxu1 %vm848_vm1, %v14915_v50 }
0x270f   : > { %12905 = vmatprep.mubr.msk.bf16.mxu1 %vm14032_vm0, %v14031_v1 }
0x27d1   : > { %v4243_v56 = vpop.f32.mrb[96].mxu1 }
0x27d2   : > { %v4244_v57 = vadd.f32 %v11550_v55, %v4243_v56  ;;  %v12865_v58 = vpop.f32.mrb[97].mxu1 }
0x27d3   : > { %v4246_v59 = vpop.f32.mrb[98].mxu1  ;;  %v13714_v58 = vld [vmem:[%s16387_s13 + $0x50] sm:$0xff]  }
0x27d4   : > { %v4249_v60 = vmax.f32 %v4244_v57, 0.0  ;;  %v12866_v61 = vpop.f32.mrb[99].mxu1 }
0x27d6   : > { %v4250_v62 = vpack.c.bf16 %v4249_v60, %v4249_v60  ;;  %v13715_v60 = vld [vmem:[%s16387_s13 + $0x58] sm:$0xff]  }
0x27d8   : > { %12876 = vmatmul.mubr.msk.bf16.vlgmr.msra.gmra.mrb[104].mxu0 %vm2518_vm6, %v4250_v62 }
0x27d9   : > { %v4424_v63 = vpop.f32.mrb[100].mxu1  ;;  %12899 = vmatprep.mubr.msk.bf16.mxu0 %vm14032_vm0, %v14031_v1  ;;  %12896 = vmatpush3.bf16.msra.mxu0 %v13712_v24  ;;  %v13719_v24 = vld [vmem:[%s16387_s13 + $0x98] sm:$0xff]  }
0x27da   : > { %v12885_v0 = vpop.f32.mrb[101].mxu1  ;;  %v4425_v17 = vadd.f32 %v11560_v11, %v4424_v63  ;;  %12897 = vmatprep.subr.bf16.mxu0 %v14031_v1 }
0x27db   : > { %v4427_v2 = vpop.f32.mrb[102].mxu1 }
0x27dc   : > { %v12886_v3 = vpop.f32.mrb[103].mxu1  ;;  %v4560_v12 = vpack.c.bf16 %v4425_v17, %v4425_v17  ;;  %v11589_v17 = vld [vmem:[%s16390_s14 + $0x1] ss:$0 sm:$0xff] }
0x27dd   : > { %12898 = vmatpush3.bf16.msra.mxu0 %v13713_v16 }
0x27de   : > { %12909 = vmatprep.subr.bf16.mxu0 %v14031_v1 }
0x27e0   : > { %12900 = vmatmul.mubr.msk.bf16.vlgmr.msra.gmra.mrb[108].mxu0 %vm848_vm1, %v14915_v50 }
0x27e1   : > { %v4489_v5 = vpop.f32.mrb[104].mxu1  ;;  %12911 = vmatprep.mubr.msk.bf16.mxu0 %vm14032_vm0, %v14031_v1 }
0x27e2   : > { %v4490_v7 = vadd.f32 %v11569_v4, %v4489_v5  ;;  %v12893_v8 = vpop.f32.mrb[105].mxu1 }
0x27e3   : > { %v4492_v9 = vpop.f32.mrb[106].mxu1 }
0x27e4   : > { %4561 = vxpose.xlu1.b32.start.end [1/1] (short) (narrow) %v4490_v7, 8  ;;  %v12894_v10 = vpop.f32.mrb[107].mxu1  ;;  %v11598_v7 = vld [vmem:[%s16390_s14 + $0x5] ss:$0 sm:$0xff] }
0x2864   : > { %v4577_v14 = vpop.trf.xlu1 }
0x2865   : > { %v4593_v18 = vpack.c.bf16 %v4577_v14, %v4577_v14 }
0x2867   : > { %v4598_v19 = vsel %vm1060_vm2, %v4593_v18, 0 }
0x2868   : > { %12904 = vmatpush3.bf16.msra.mxu1 %v4598_v19 }
0x2869   : > { %12915 = vmatprep.subr.bf16.mxu1 %v14031_v1 }
0x286b   : > { %12906 = vmatmul.mubr.msk.bf16.vlgmr.msra.gmra.mrb[108].mxu1 %vm1056_vm3, %v4560_v12 }
0x286c   : > { %12919 = vmatprep.mubr.msk.bf16.mxu1 %vm14032_vm0, %v14031_v1  ;;  %12916 = vmatpush3.bf16.msra.mxu1 %v13716_v53 }
0x286d   : > { %12917 = vmatprep.subr.bf16.mxu1 %v14031_v1 }
0x2870   : > { %12918 = vmatpush3.bf16.msra.mxu1 %v13717_v54  ;;  %v13720_v54 = vld [vmem:[%s16387_s13 + $0x60] sm:$0xff]  }
0x2871   : > { %12931 = vmatprep.subr.bf16.mxu1 %v14031_v1 }
0x2873   : > { %12920 = vmatmul.mubr.msk.bf16.vlgmr.msra.gmra.mrb[112].mxu1 %vm848_vm1, %v14915_v50 }
0x2874   : > { %12935 = vmatprep.mubr.msk.bf16.mxu1 %vm14032_vm0, %v14031_v1 }
0x28ab   : > { %v14959_v20 = vpop.f32.mrb[104].mxu0 }
0x28ac   : > { %v12877_v21 = vpop.f32.mrb[105].mxu0 }
0x28ad   : > { %v4321_v22 = vpop.f32.mrb[106].mxu0 }
0x28ae   : > { %v12878_v23 = vpop.f32.mrb[107].mxu0 }
0x28af   : > { %v13718_v23 = vld [vmem:[%s16387_s13 + $0x90] sm:$0xff]  }
0x28b0   : > { %12932 = vmatpush3.bf16.msra.mxu1 %v13718_v23 }
0x28b1   : > { %12933 = vmatprep.subr.bf16.mxu1 %v14031_v1 }
0x28b3   : > { %v4554_v44 = vpop.f32.mrb[108].mxu0 }
0x28b4   : > { %v12901_v45 = vpop.f32.mrb[109].mxu0  ;;  %v4555_v49 = vadd.f32 %v11578_v47, %v4554_v44  ;;  %12934 = vmatpush3.bf16.msra.mxu1 %v13719_v24 }
0x28b5   : > { %v4557_v6 = vpop.f32.mrb[110].mxu0  ;;  %12945 = vmatprep.subr.bf16.mxu1 %v14031_v1 }
0x28b6   : > { %v12902_v48 = vpop.f32.mrb[111].mxu0  ;;  %v4654_v51 = vpack.c.bf16 %v4555_v49, %v4555_v49  ;;  %v4702_v49 = vld [vmem:[%s16316_s15] sm:$0xf] }
0x28b7   : > { %12936 = vmatmul.mubr.msk.bf16.vlgmr.msra.gmra.mrb[116].mxu1 %vm848_vm1, %v14915_v50  ;;  %v5092_v53 = vsel %vm1060_vm2, %v4702_v49, 0 }
0x28b8   : > { %v4659_v52 = vsel %vm1060_vm2, %v4654_v51, 0  ;;  %12947 = vmatprep.mubr.msk.bf16.mxu1 %vm14032_vm0, %v14031_v1 }
0x28b9   : > { %12910 = vmatpush3.bf16.msra.mxu0 %v4659_v52 }
0x28ba   : > { %12923 = vmatprep.subr.bf16.mxu0 %v14031_v1 }
0x293e   : > { %v4634_v36 = vpop.f32.mrb[108].mxu1 }
0x293f   : > { %v4640_v37 = vmul.f32 0.35355338, %v4634_v36  ;;  %v12907_v38 = vpop.f32.mrb[109].mxu1 }
0x2940   : > { %v4637_v15 = vpop.f32.mrb[110].mxu1 }
0x2941   : > { %v12908_v39 = vpop.f32.mrb[111].mxu1  ;;  %v4641_v40 = vsel %vm14981_vm10, %v4640_v37, -1e+10 }
0x2942   : > { %v4642_v29 = vsel %vm1056_vm3, %v4641_v40, -inf }
0x2943   : > { %4643 = vmax.xlane.f32.xlu0 %v4642_v29 }
0x2946   : > { %v4762_v61 = vpop.f32.mrb[112].mxu1 }
0x2947   : > { %v12921_v62 = vpop.f32.mrb[113].mxu1  ;;  %v4763_v18 = vadd.f32 %v11589_v17, %v4762_v61 }
0x2948   : > { %v4765_v63 = vpop.f32.mrb[114].mxu1 }
0x2949   : > { %v12922_v0 = vpop.f32.mrb[115].mxu1  ;;  %v4898_v21 = vpack.c.bf16 %v4763_v18, %v4763_v18 }
0x29d0   : > { %v4644_v25 = vpop.xlane.xlu0 %4643 }
0x29d1   : > { %v4645_v41 = vsub.f32 %v4641_v40, %v4644_v25  ;;  %v4892_v25 = vpop.f32.mrb[116].mxu1 }
0x29d3   : > { %v4646_v42 = vmul.f32 1.442695, %v4645_v41  ;;  %v12937_v41 = vpop.f32.mrb[117].mxu1 }
0x29d5   : > { %13856 = vpow2.f32 %v4646_v42  ;;  %v4895_v42 = vpop.f32.mrb[118].mxu1 }
0x29df   : > { %v13857_v27 = vpop.eup %13856 }
0x29e0   : > { %v4648_v43 = vsel %vm1056_vm3, %v13857_v27, 0.0 }
0x29e1   : > { %4649 = vadd.xlane.f32.xlu0 %v4648_v43  ;;  %v12938_v43 = vpop.f32.mrb[119].mxu1 }
0x2a6e   : > { %v4650_v55 = vpop.xlane.xlu0 %4649 }
0x2a6f   : > { %13858 = vrcp.f32 %v4650_v55 }
0x2a79   : > { %v13859_v56 = vpop.eup %13858 }
0x2a7a   : > { %v4652_v57 = vmul.f32 %v13859_v56, %v13857_v27  ;;  %v11607_v27 = vld [vmem:[%s16390_s14 + $0x9] ss:$0 sm:$0xff] }
0x2a7b   : > { %v4893_v44 = vadd.f32 %v11607_v27, %v4892_v25  ;;  %v13721_v56 = vld [vmem:[%s16387_s13 + $0x68] sm:$0xff]  }
0x2a7c   : > { %v4653_v59 = vpack.c.bf16 %v4652_v57, %v4652_v57  ;;  %v11613_v57 = vld [vmem:[%s16316_s15 + $0x4] sm:$0xf] }
0x2a7d   : > { %v4992_v45 = vpack.c.bf16 %v4893_v44, %v4893_v44 }
0x2a7e   : > { %12912 = vmatmul.mubr.msk.bf16.vlgmr.msra.gmra.mrb[112].mxu0 %vm1056_vm3, %v4653_v59 }
0x2a7f   : > { %12924 = vmatpush3.bf16.msra.mxu0 %v13714_v58  ;;  %12927 = vmatprep.mubr.msk.bf16.mxu0 %vm14032_vm0, %v14031_v1  ;;  %v4997_v6 = vsel %vm1060_vm2, %v4992_v45, 0  ;;  %v5046_v58 = vsel %vm1060_vm2, %v11613_v57, 0 }
0x2a80   : > { %12925 = vmatprep.subr.bf16.mxu0 %v14031_v1  ;;  %12946 = vmatpush3.bf16.msra.mxu1 %v4997_v6 }
0x2a81   : > { %12957 = vmatprep.subr.bf16.mxu1 %v14031_v1 }
0x2a83   : > { %12926 = vmatpush3.bf16.msra.mxu0 %v13715_v60  ;;  %v13722_v60 = vld [vmem:[%s16387_s13 + $0x20] sm:$0xff]  }
0x2a84   : > { %12939 = vmatprep.subr.bf16.mxu0 %v14031_v1 }
0x2a86   : > { %12928 = vmatmul.mubr.msk.bf16.vlgmr.msra.gmra.mrb[116].mxu0 %vm848_vm1, %v14915_v50 }
0x2a87   : > { %12941 = vmatprep.mubr.msk.bf16.mxu0 %vm14032_vm0, %v14031_v1 }
0x2b51   : > { %v15021_v2 = vpop.f32.mrb[112].mxu0 }
0x2b52   : > { %v12913_v3 = vpop.f32.mrb[113].mxu0  ;;  %v4701_v55 = vpack.c.bf16 %v15021_v2, %v15021_v2  ;;  %v13723_v2 = vld [vmem:[%s16387_s13 + $0x28] sm:$0xff]  }
0x2b53   : > { %v4698_v4 = vpop.f32.mrb[114].mxu0 }
0x2b54   : > { %v12914_v5 = vpop.f32.mrb[115].mxu0 }
0x2b59   : > { %v4827_v8 = vpop.f32.mrb[116].mxu0 }
0x2b5a   : > { %v4828_v9 = vadd.f32 %v11598_v7, %v4827_v8  ;;  %v12929_v10 = vpop.f32.mrb[117].mxu0  ;;  %v11630_v8 = vld [vmem:[%s16390_s14 + $0x6] ss:$0 sm:$0xff] }
0x2b5b   : > { %v4830_v11 = vpop.f32.mrb[118].mxu0 }
0x2b5c   : > { %4899 = vxpose.xlu0.b32.start.end [1/1] (short) (narrow) %v4828_v9, 8  ;;  %v12930_v14 = vpop.f32.mrb[119].mxu0 }
0x2bdc   : > { %v4915_v19 = vpop.trf.xlu0 }
0x2bdd   : > { %v4931_v12 = vpack.c.bf16 %v4915_v19, %v4915_v19 }
0x2bdf   : > { %v4936_v22 = vsel %vm1060_vm2, %v4931_v12, 0 }
0x2be0   : > { %12940 = vmatpush3.bf16.msra.mxu0 %v4936_v22 }
0x2be1   : > { %12951 = vmatprep.subr.bf16.mxu0 %v14031_v1 }
0x2be3   : > { %12942 = vmatmul.mubr.msk.bf16.vlgmr.msra.gmra.mrb[120].mxu0 %vm1056_vm3, %v4898_v21 }
0x2be4   : > { %12953 = vmatprep.mubr.msk.bf16.mxu0 %vm14032_vm0, %v14031_v1  ;;  %12952 = vmatpush3.bf16.msra.mxu0 %v5046_v58 }
0x2be5   : > { %12963 = vmatprep.subr.bf16.mxu0 %v14031_v1 }
0x2cb6   : > { %v4972_v16 = vpop.f32.mrb[120].mxu0 }
0x2cb7   : > { %v4978_v26 = vmul.f32 0.35355338, %v4972_v16  ;;  %v12943_v32 = vpop.f32.mrb[121].mxu0 }
0x2cb8   : > { %v4975_v34 = vpop.f32.mrb[122].mxu0 }
0x2cb9   : > { %v12944_v35 = vpop.f32.mrb[123].mxu0  ;;  %v4979_v36 = vsel %vm14981_vm10, %v4978_v26, -1e+10  ;;  %v11621_v26 = vld [vmem:[%s16390_s14 + $0x2] ss:$0 sm:$0xff] }
0x2cba   : > { %v4980_v37 = vsel %vm1056_vm3, %v4979_v36, -inf }
0x2cbb   : > { %4981 = vmax.xlane.f32.xlu1 %v4980_v37 }
0x2d48   : > { %v4982_v38 = vpop.xlane.xlu1 %4981 }
0x2d49   : > { %v4983_v15 = vsub.f32 %v4979_v36, %v4982_v38 }
0x2d4b   : > { %v4984_v39 = vmul.f32 1.442695, %v4983_v15  ;;  %v13724_v15 = vld [vmem:[%s16387_s13 + $0xa0] sm:$0xff]  }
0x2d4d   : > { %13860 = vpow2.f32 %v4984_v39  ;;  %v13725_v39 = vld [vmem:[%s16387_s13 + $0xa8] sm:$0xff]  }
0x2d57   : > { %v13861_v40 = vpop.eup %13860 }
0x2d58   : > { %v4986_v29 = vsel %vm1056_vm3, %v13861_v40, 0.0 }
0x2d59   : > { %4987 = vadd.xlane.f32.xlu1 %v4986_v29 }
0x2de6   : > { %v4988_v47 = vpop.xlane.xlu1 %4987 }
0x2de7   : > { %13862 = vrcp.f32 %v4988_v47 }
0x2df1   : > { %v13863_v48 = vpop.eup %13862 }
0x2df2   : > { %v4990_v51 = vmul.f32 %v13863_v48, %v13861_v40 }
0x2df4   : > { %v4991_v52 = vpack.c.bf16 %v4990_v51, %v4990_v51 }
0x2df6   : > { %12948 = vmatmul.mubr.msk.bf16.vlgmr.msra.gmra.mrb[120].mxu1 %vm1056_vm3, %v4991_v52 }
0x2df7   : > { %12958 = vmatpush3.bf16.msra.mxu1 %v5092_v53  ;;  %12959 = vmatprep.mubr.msk.bf16.mxu1 %vm14032_vm0, %v14031_v1  ;;  %v11639_v53 = vld [vmem:[%s16390_s14 + $0xa] ss:$0 sm:$0xff] }
0x2df8   : > { %12971 = vmatprep.subr.bf16.mxu1 %v14031_v1 }
0x2dfe   : > { %12960 = vmatmul.mubr.msk.bf16.vlgmr.msra.gmra.mrb[124].mxu1 %vm1056_vm3, %v4701_v55 }
0x2dff   : > { %12972 = vmatpush3.bf16.msra.mxu1 %v13720_v54  ;;  %12975 = vmatprep.mubr.msk.bf16.mxu1 %vm14032_vm0, %v14031_v1 }
0x2e00   : > { %12973 = vmatprep.subr.bf16.mxu1 %v14031_v1 }
0x2e03   : > { %12974 = vmatpush3.bf16.msra.mxu1 %v13721_v56 }
0x2e04   : > { %12987 = vmatprep.subr.bf16.mxu1 %v14031_v1 }
0x2e06   : > { %12976 = vmatmul.mubr.msk.bf16.vlgmr.msra.gmra.mrb[128].mxu1 %vm848_vm1, %v14915_v50 }
0x2e07   : > { %12989 = vmatprep.mubr.msk.bf16.mxu1 %vm14032_vm0, %v14031_v1 }
0x2ec9   : > { %v5033_v59 = vpop.f32.mrb[120].mxu1 }
0x2eca   : > { %v5039_v61 = vpack.c.bf16 %v5033_v59, %v5033_v59  ;;  %v12949_v62 = vpop.f32.mrb[121].mxu1 }
0x2ecb   : > { %v5036_v63 = vpop.f32.mrb[122].mxu1  ;;  %v11645_v62 = vld [vmem:[%s16316_s15 + $0x8] sm:$0xf] }
0x2ecc   : > { %v12950_v0 = vpop.f32.mrb[123].mxu1  ;;  %12954 = vmatmul.mubr.msk.bf16.vlgmr.msra.gmra.mrb[124].mxu0 %vm1056_vm3, %v5039_v61  ;;  %v5477_v63 = vsel %vm1060_vm2, %v11645_v62, 0 }
0x2ecd   : > { %12964 = vmatpush3.bf16.msra.mxu0 %v13722_v60  ;;  %12967 = vmatprep.mubr.msk.bf16.mxu0 %vm14032_vm0, %v14031_v1  ;;  %v13728_v0 = vld [vmem:[%s16387_s13 + $0x30] sm:$0xff]  }
0x2ece   : > { %12965 = vmatprep.subr.bf16.mxu0 %v14031_v1 }
0x2ed1   : > { %v5128_v3 = vpop.f32.mrb[124].mxu1  ;;  %12966 = vmatpush3.bf16.msra.mxu0 %v13723_v2  ;;  %v13729_v2 = vld [vmem:[%s16387_s13 + $0x38] sm:$0xff]  }
0x2ed2   : > { %v12961_v4 = vpop.f32.mrb[125].mxu1  ;;  %12979 = vmatprep.subr.bf16.mxu0 %v14031_v1 }
0x2ed3   : > { %v5131_v5 = vpop.f32.mrb[126].mxu1  ;;  %v13726_v4 = vld [vmem:[%s16387_s13 + $0x70] sm:$0xff]  }
0x2ed4   : > { %v12962_v7 = vpop.f32.mrb[127].mxu1  ;;  %12968 = vmatmul.mubr.msk.bf16.vlgmr.msra.gmra.mrb[128].mxu0 %vm848_vm1, %v14915_v50 }
0x2ed5   : > { %12983 = vmatprep.mubr.msk.bf16.mxu0 %vm14032_vm0, %v14031_v1  ;;  %12980 = vmatpush3.bf16.msra.mxu0 %v13724_v15 }
0x2ed6   : > { %12981 = vmatprep.subr.bf16.mxu0 %v14031_v1 }
0x2ed9   : > { %v5258_v9 = vpop.f32.mrb[128].mxu1  ;;  %12982 = vmatpush3.bf16.msra.mxu0 %v13725_v39  ;;  %v11652_v39 = vld [vmem:[%s16390_s14 + $0x3] ss:$0 sm:$0xff] }
0x2eda   : > { %v5259_v10 = vadd.f32 %v11630_v8, %v5258_v9  ;;  %v12977_v11 = vpop.f32.mrb[129].mxu1  ;;  %12993 = vmatprep.subr.bf16.mxu0 %v14031_v1 }
0x2edb   : > { %v5261_v14 = vpop.f32.mrb[130].mxu1 }
0x2edc   : > { %v12978_v17 = vpop.f32.mrb[131].mxu1  ;;  %5330 = vxpose.xlu0.b32.start.end [1/1] (short) (narrow) %v5259_v10, 8  ;;  %12984 = vmatmul.mubr.msk.bf16.vlgmr.msra.gmra.mrb[132].mxu0 %vm848_vm1, %v14915_v50  ;;  %v13727_v10 = vld [vmem:[%s16387_s13 + $0x78] sm:$0xff]  }
0x2edd   : > { %12995 = vmatprep.mubr.msk.bf16.mxu0 %vm14032_vm0, %v14031_v1 }
0x2f5c   : > { %v5346_v18 = vpop.trf.xlu0 }
0x2f5d   : > { %v5362_v19 = vpack.c.bf16 %v5346_v18, %v5346_v18 }
0x2f5f   : > { %v5367_v12 = vsel %vm1060_vm2, %v5362_v19, 0 }
0x2f60   : > { %12988 = vmatpush3.bf16.msra.mxu1 %v5367_v12 }
0x2f61   : > { %12999 = vmatprep.subr.bf16.mxu1 %v14031_v1 }
0x2f9f   : > { %v5082_v21 = vpop.f32.mrb[124].mxu0 }
0x2fa0   : > { %v15105_v22 = vadd.f32 %v5128_v3, %v5082_v21  ;;  %v12955_v23 = vpop.f32.mrb[125].mxu0 }
0x2fa1   : > { %v5085_v24 = vpop.f32.mrb[126].mxu0 }
0x2fa2   : > { %v12956_v16 = vpop.f32.mrb[127].mxu0 }
0x2fa3   : > { %v11661_v16 = vld [vmem:[%s16390_s14 + $0x7] ss:$0 sm:$0xff] }
0x2fa7   : > { %v5193_v32 = vpop.f32.mrb[128].mxu0 }
0x2fa8   : > { %v5194_v34 = vadd.f32 %v11621_v26, %v5193_v32  ;;  %v12969_v35 = vpop.f32.mrb[129].mxu0 }
0x2fa9   : > { %v5196_v36 = vpop.f32.mrb[130].mxu0 }
0x2faa   : > { %v5329_v37 = vpack.c.bf16 %v5194_v34, %v5194_v34  ;;  %v12970_v38 = vpop.f32.mrb[131].mxu0 }
0x2fac   : > { %12990 = vmatmul.mubr.msk.bf16.vlgmr.msra.gmra.mrb[132].mxu1 %vm1056_vm3, %v5329_v37  ;;  %v11554_v37 = vld [vmem:[%s16386_s11 + $0x1] ss:$0 sm:$0xff] }
0x2fad   : > { %13001 = vmatprep.mubr.msk.bf16.mxu1 %vm14032_vm0, %v14031_v1  ;;  %13000 = vmatpush3.bf16.msra.mxu1 %v5477_v63 }
0x2fae   : > { %13013 = vmatprep.subr.bf16.mxu1 %v14031_v1 }
0x2faf   : > { %v5323_v49 = vpop.f32.mrb[132].mxu0 }
0x2fb0   : > { %v12985_v51 = vpop.f32.mrb[133].mxu0  ;;  %v5324_v55 = vadd.f32 %v11639_v53, %v5323_v49 }
0x2fb1   : > { %v5326_v52 = vpop.f32.mrb[134].mxu0 }
0x2fb2   : > { %v12986_v54 = vpop.f32.mrb[135].mxu0  ;;  %v5423_v56 = vpack.c.bf16 %v5324_v55, %v5324_v55 }
0x2fb4   : > { %v5428_v57 = vsel %vm1060_vm2, %v5423_v56, 0 }
0x2fb5   : > { %12994 = vmatpush3.bf16.msra.mxu0 %v5428_v57  ;;  %v11670_v57 = vld [vmem:[%s16390_s14 + $0xb] ss:$0 sm:$0xff] }
0x2fb6   : > { %13005 = vmatprep.subr.bf16.mxu0 %v14031_v1 }
0x307f   : > { %v5403_v40 = vpop.f32.mrb[132].mxu1 }
0x3080   : > { %v5409_v29 = vmul.f32 0.35355338, %v5403_v40  ;;  %v12991_v25 = vpop.f32.mrb[133].mxu1 }
0x3081   : > { %v5406_v41 = vpop.f32.mrb[134].mxu1 }
0x3082   : > { %v12992_v42 = vpop.f32.mrb[135].mxu1  ;;  %v5410_v27 = vsel %vm14981_vm10, %v5409_v29, -1e+10 }
0x3083   : > { %v5411_v43 = vsel %vm1056_vm3, %v5410_v27, -inf }
0x3084   : > { %5412 = vmax.xlane.f32.xlu1 %v5411_v43 }
0x3111   : > { %v5413_v44 = vpop.xlane.xlu1 %5412 }
0x3112   : > { %v5414_v45 = vsub.f32 %v5410_v27, %v5413_v44 }
0x3114   : > { %v5415_v6 = vmul.f32 1.442695, %v5414_v45 }
0x3116   : > { %13864 = vpow2.f32 %v5415_v6 }
0x3120   : > { %v13865_v47 = vpop.eup %13864 }
0x3121   : > { %v5417_v48 = vsel %vm1056_vm3, %v13865_v47, 0.0 }
0x3122   : > { %5418 = vadd.xlane.f32.xlu0 %v5417_v48 }
0x31af   : > { %v5419_v58 = vpop.xlane.xlu0 %5418 }
0x31b0   : > { %13866 = vrcp.f32 %v5419_v58 }
0x31ba   : > { %v13867_v59 = vpop.eup %13866 }
0x31bb   : > { %v5421_v60 = vmul.f32 %v13867_v59, %v13865_v47 }
0x31bd   : > { %v5422_v61 = vpack.c.bf16 %v5421_v60, %v5421_v60 }
0x31bf   : > { %12996 = vmatmul.mubr.msk.bf16.vlgmr.msra.gmra.mrb[136].mxu0 %vm1056_vm3, %v5422_v61 }
0x31c0   : > { %13009 = vmatprep.mubr.msk.bf16.mxu0 %vm14032_vm0, %v14031_v1  ;;  %13006 = vmatpush3.bf16.msra.mxu0 %v13728_v0 }
0x31c1   : > { %13007 = vmatprep.subr.bf16.mxu0 %v14031_v1 }
0x31c4   : > { %13008 = vmatpush3.bf16.msra.mxu0 %v13729_v2 }
0x31c5   : > { %13021 = vmatprep.subr.bf16.mxu0 %v14031_v1 }
0x31c7   : > { %13010 = vmatmul.mubr.msk.bf16.vlgmr.msra.gmra.mrb[140].mxu0 %vm848_vm1, %v14915_v50 }
0x31c8   : > { %13025 = vmatprep.mubr.msk.bf16.mxu0 %vm14032_vm0, %v14031_v1 }
0x3292   : > { %v5464_v3 = vpop.f32.mrb[136].mxu0 }
0x3293   : > { %v5470_v5 = vpack.c.bf16 %v5464_v3, %v5464_v3  ;;  %v12997_v7 = vpop.f32.mrb[137].mxu0  ;;  %v11676_v3 = vld [vmem:[%s16316_s15 + $0xc] sm:$0xf] }
0x3294   : > { %v5467_v8 = vpop.f32.mrb[138].mxu0 }
0x3295   : > { %v12998_v9 = vpop.f32.mrb[139].mxu0  ;;  %13002 = vmatmul.mubr.msk.bf16.vlgmr.msra.gmra.mrb[136].mxu1 %vm1056_vm3, %v5470_v5 }
0x3296   : > { %13014 = vmatpush3.bf16.msra.mxu1 %v13726_v4  ;;  %13017 = vmatprep.mubr.msk.bf16.mxu1 %vm14032_vm0, %v14031_v1  ;;  %v5863_v4 = vsel %vm1060_vm2, %v11676_v3, 0 }
0x3297   : > { %13015 = vmatprep.subr.bf16.mxu1 %v14031_v1 }
0x329a   : > { %13016 = vmatpush3.bf16.msra.mxu1 %v13727_v10  ;;  %v5579_v11 = vpop.f32.mrb[140].mxu0 }
0x329b   : > { %13029 = vmatprep.subr.bf16.mxu1 %v14031_v1  ;;  %v13011_v14 = vpop.f32.mrb[141].mxu0  ;;  %v5580_v40 = vadd.f32 %v11652_v39, %v5579_v11 }
0x329c   : > { %v5582_v17 = vpop.f32.mrb[142].mxu0 }
0x329d   : > { %13018 = vmatmul.mubr.msk.bf16.vlgmr.msra.gmra.mrb[140].mxu1 %vm848_vm1, %v14915_v50  ;;  %v13012_v18 = vpop.f32.mrb[143].mxu0  ;;  %v5715_v41 = vpack.c.bf16 %v5580_v40, %v5580_v40  ;;  %v11678_v17 = vld [vmem:[%s16317_s16] ss:$0 sm:$0xff] }
0x329e   : > { %13031 = vmatprep.mubr.msk.bf16.mxu1 %vm14032_vm0, %v14031_v1 }
0x3368   : > { %v5513_v19 = vpop.f32.mrb[136].mxu1 }
0x3369   : > { %v15170_v12 = vadd.f32 %v5513_v19, %v15105_v22  ;;  %v13003_v21 = vpop.f32.mrb[137].mxu1  ;;  %v4319_v22 = vadd.f32 %v11554_v37, %v14959_v20  ;;  %v13731_v20 = vld [vmem:[%s16387_s13 + $0xb8] sm:$0xff]   ;;  %v13732_v37 = vld [vmem:[%s16387_s13 + $0x100] sm:$0xff]  }
0x336a   : > { %v5516_v23 = vpop.f32.mrb[138].mxu1 }
0x336b   : > { %v13004_v24 = vpop.f32.mrb[139].mxu1  ;;  %v15180_v38 = vadd.f32 %v4319_v22, %v14892_v46  ;;  %v13730_v46 = vld [vmem:[%s16387_s13 + $0xb0] sm:$0xff]  }
0x336c   : > { %13022 = vmatpush3.bf16.msra.mxu0 %v13730_v46 }
0x336d   : > { %v4325_v15 = vsel %vm848_vm1, %v15180_v38, 0.0  ;;  %13023 = vmatprep.subr.bf16.mxu0 %v14031_v1 }
0x3370   : > { %v5644_v26 = vpop.f32.mrb[140].mxu1  ;;  %13024 = vmatpush3.bf16.msra.mxu0 %v13731_v20 }
0x3371   : > { %v5645_v32 = vadd.f32 %v11661_v16, %v5644_v26  ;;  %v13019_v34 = vpop.f32.mrb[141].mxu1  ;;  %13035 = vmatprep.subr.bf16.mxu0 %v14031_v1 }
0x3372   : > { %v5647_v35 = vpop.f32.mrb[142].mxu1 }
0x3373   : > { %5716 = vxpose.xlu1.b32.start.end [1/1] (short) (narrow) %v5645_v32, 8  ;;  %v13020_v36 = vpop.f32.mrb[143].mxu1  ;;  %13026 = vmatmul.mubr.msk.bf16.vlgmr.msra.gmra.mrb[144].mxu0 %vm848_vm1, %v14915_v50 }
0x3374   : > { %13037 = vmatprep.mubr.msk.bf16.mxu0 %vm14032_vm0, %v14031_v1 }
0x339a   : > { %4326 = vadd.xlane.f32.xlu1 %v4325_v15 }
0x33f3   : > { %v5732_v29 = vpop.trf.xlu1 }
0x33f4   : > { %v5748_v25 = vpack.c.bf16 %v5732_v29, %v5732_v29 }
0x33f6   : > { %v5753_v42 = vsel %vm1060_vm2, %v5748_v25, 0 }
0x33f7   : > { %13030 = vmatpush3.bf16.msra.mxu1 %v5753_v42 }
0x33f8   : > { %13041 = vmatprep.subr.bf16.mxu1 %v14031_v1 }
0x33fa   : > { %13032 = vmatmul.mubr.msk.bf16.vlgmr.msra.gmra.mrb[144].mxu1 %vm1056_vm3, %v5715_v41  ;;  %v11535_v41 = vld [vmem:[%s16383_s12 + $0x6] sm:$0x3] }
0x33fb   : > { %13043 = vmatprep.mubr.msk.bf16.mxu1 %vm14032_vm0, %v14031_v1  ;;  %13042 = vmatpush3.bf16.msra.mxu1 %v5863_v4  ;;  %v4341_v42 = vrot.slane %v11535_v41, %v14292_v28  ;;  %v4346_v20 = vrot.slane %v11535_v41, %v14557_v30 }
0x33fc   : > { %13055 = vmatprep.subr.bf16.mxu1 %v14031_v1 }
0x3427   : > { %v4327_v11 = vpop.xlane.xlu1 %4326 }
0x3428   : > { %v4328_v14 = vmul.f32 0.03125, %v4327_v11 }
0x342a   : > { %v4329_v24 = vsub.f32 %v15180_v38, %v4328_v14 }
0x342c   : > { %v4330_v35 = vmul.f32 %v4329_v24, %v4329_v24 }
0x342e   : > { %v4331_v36 = vsel %vm848_vm1, %v4330_v35, 0.0 }
0x3446   : > { %v5709_v54 = vpop.f32.mrb[144].mxu0 }
0x3447   : > { %v13027_v55 = vpop.f32.mrb[145].mxu0  ;;  %v5710_v59 = vadd.f32 %v11670_v57, %v5709_v54 }
0x3448   : > { %v5712_v56 = vpop.f32.mrb[146].mxu0 }
0x3449   : > { %v13028_v58 = vpop.f32.mrb[147].mxu0  ;;  %v5809_v60 = vpack.c.bf16 %v5710_v59, %v5710_v59 }
0x344a   : > { %v13736_v58 = vld [vmem:[%s16387_s13 + $0x140] sm:$0xff]  }
0x344b   : > { %v5814_v61 = vsel %vm1060_vm2, %v5809_v60, 0  ;;  %v13737_v60 = vld [vmem:[%s16387_s13 + $0x148] sm:$0xff]  }
0x344c   : > { %13036 = vmatpush3.bf16.msra.mxu0 %v5814_v61  ;;  %v11695_v61 = vld [vmem:[%s16390_s14 + $0x10] ss:$0 sm:$0xff] }
0x344d   : > { %13047 = vmatprep.subr.bf16.mxu0 %v14031_v1 }
0x34cd   : > { %v5789_v27 = vpop.f32.mrb[144].mxu1 }
0x34ce   : > { %v5795_v43 = vmul.f32 0.35355338, %v5789_v27  ;;  %v13033_v44 = vpop.f32.mrb[145].mxu1 }
0x34cf   : > { %v5792_v45 = vpop.f32.mrb[146].mxu1 }
0x34d0   : > { %v13034_v6 = vpop.f32.mrb[147].mxu1  ;;  %v5796_v47 = vsel %vm14981_vm10, %v5795_v43, -1e+10 }
0x34d1   : > { %v5797_v48 = vsel %vm1056_vm3, %v5796_v47, -inf  ;;  %v13734_v6 = vld [vmem:[%s16387_s13 + $0xc0] sm:$0xff]  }
0x34d2   : > { %5798 = vmax.xlane.f32.xlu0 %v5797_v48 }
0x355f   : > { %v5799_v49 = vpop.xlane.xlu0 %5798 }
0x3560   : > { %v5800_v51 = vsub.f32 %v5796_v47, %v5799_v49  ;;  %v13735_v47 = vld [vmem:[%s16387_s13 + $0xc8] sm:$0xff]  }
0x3562   : > { %v5801_v52 = vmul.f32 1.442695, %v5800_v51 }
0x3564   : > { %13868 = vpow2.f32 %v5801_v52  ;;  %v4349_v52 = vld [vmem:[%s16322_s21] sm:$0x3] }
0x3565   : > { %v5935_v55 = vrot.slane %v4349_v52, %v14557_v30 }
0x356e   : > { %v13869_v53 = vpop.eup %13868 }
0x356f   : > { %v5803_v50 = vsel %vm1056_vm3, %v13869_v53, 0.0 }
0x3570   : > { %5804 = vadd.xlane.f32.xlu0 %v5803_v50 }
0x35fd   : > { %v5805_v62 = vpop.xlane.xlu0 %5804 }
0x35fe   : > { %13870 = vrcp.f32 %v5805_v62 }
0x3608   : > { %v13871_v63 = vpop.eup %13870 }
0x3609   : > { %v5807_v0 = vmul.f32 %v13871_v63, %v13869_v53  ;;  %v5930_v53 = vrot.slane %v4349_v52, %v14292_v28 }
0x360b   : > { %v5808_v2 = vpack.c.bf16 %v5807_v0, %v5807_v0 }
0x360d   : > { %13038 = vmatmul.mubr.msk.bf16.vlgmr.msra.gmra.mrb[148].mxu0 %vm1056_vm3, %v5808_v2 }
0x360e   : > { %13051 = vmatprep.mubr.msk.bf16.mxu0 %vm14032_vm0, %v14031_v1  ;;  %13048 = vmatpush3.bf16.msra.mxu0 %v13734_v6 }
0x360f   : > { %13049 = vmatprep.subr.bf16.mxu0 %v14031_v1 }
0x3612   : > { %13050 = vmatpush3.bf16.msra.mxu0 %v13735_v47 }
0x3613   : > { %13063 = vmatprep.subr.bf16.mxu0 %v14031_v1 }
0x36e0   : > { %v5850_v5 = vpop.f32.mrb[148].mxu0 }
0x36e1   : > { %v5856_v7 = vpack.c.bf16 %v5850_v5, %v5850_v5  ;;  %v13039_v8 = vpop.f32.mrb[149].mxu0 }
0x36e2   : > { %v5853_v9 = vpop.f32.mrb[150].mxu0  ;;  %v11686_v8 = vld [vmem:[%s16390_s14 + $0xc] ss:$0 sm:$0xff] }
0x36e3   : > { %v13040_v10 = vpop.f32.mrb[151].mxu0  ;;  %13044 = vmatmul.mubr.msk.bf16.vlgmr.msra.gmra.mrb[148].mxu1 %vm1056_vm3, %v5856_v7 }
0x36e4   : > { %13059 = vmatprep.mubr.msk.bf16.mxu1 %vm14032_vm0, %v14031_v1  ;;  %13056 = vmatpush3.bf16.msra.mxu1 %v13732_v37 }
0x36e5   : > { %13057 = vmatprep.subr.bf16.mxu1 %v14031_v1 }
0x37b6   : > { %v5899_v18 = vpop.f32.mrb[148].mxu1 }
0x37b7   : > { %v5905_v19 = vadd.f32 %v5899_v18, %v15170_v12  ;;  %v13045_v21 = vpop.f32.mrb[149].mxu1  ;;  %v13733_v12 = vld [vmem:[%s16387_s13 + $0x108] sm:$0xff]  }
0x37b8   : > { %v5902_v23 = vpop.f32.mrb[150].mxu1  ;;  %13058 = vmatpush3.bf16.msra.mxu1 %v13733_v12  ;;  %v11704_v21 = vld [vmem:[%s16390_s14 + $0x14] ss:$0 sm:$0xff]  ;;  %v13741_v12 = vld [vmem:[%s16387_s13 + $0x158] sm:$0xff]  }
0x37b9   : > { %v5912_v16 = vadd.f32 %v11678_v17, %v5905_v19  ;;  %v13046_v26 = vpop.f32.mrb[151].mxu1  ;;  %13071 = vmatprep.subr.bf16.mxu1 %v14031_v1  ;;  %v13738_v17 = vld [vmem:[%s16387_s13 + $0xd0] sm:$0xff]   ;;  %v13739_v23 = vld [vmem:[%s16387_s13 + $0xd8] sm:$0xff]  }
0x37bb   : > { %v5913_v32 = vadd.f32 %v5912_v16, %v14910_v31 }
0x37bd   : > { %v5914_v34 = vsel %vm848_vm1, %v5913_v32, 0.0 }
0x37be   : > { %5915 = vadd.xlane.f32.xlu0 %v5914_v34  ;;  %v13740_v34 = vld [vmem:[%s16387_s13 + $0x150] sm:$0xff]  }
0x37c2   : > { %4332 = vadd.xlane.f32.xlu0 %v4331_v36 }
0x384b   : > { %v5916_v31 = vpop.xlane.xlu0 %5915 }
0x384c   : > { %v5917_v22 = vmul.f32 0.03125, %v5916_v31 }
0x384e   : > { %v5918_v38 = vsub.f32 %v5913_v32, %v5917_v22 }
0x384f   : > { %v4333_v15 = vpop.xlane.xlu0 %4332 }
0x3850   : > { %v4334_v39 = vmul.f32 0.03125, %v4333_v15  ;;  %v5919_v40 = vmul.f32 %v5918_v38, %v5918_v38 }
0x3852   : > { %v4335_v29 = vadd.f32 1e-05, %v4334_v39  ;;  %v5920_v25 = vsel %vm848_vm1, %v5919_v40, 0.0 }
0x3853   : > { %5921 = vadd.xlane.f32.xlu0 %v5920_v25 }
0x3854   : > { %13872 = vrsqrt.f32 %v4335_v29 }
0x385e   : > { %v13873_v46 = vpop.eup %13872 }
0x385f   : > { %v4337_v27 = vmul.f32 %v13873_v46, %v4329_v24 }
0x3861   : > { %v4342_v43 = vmul.f32 %v4341_v42, %v4337_v27 }
0x3863   : > { %v4347_v44 = vadd.f32 %v4346_v20, %v4342_v43  ;;  %v11734_v20 = vld [vmem:[%s16390_s14 + $0x15] ss:$0 sm:$0xff] }
0x3865   : > { %v15246_v45 = vpack.c.bf16 %v4347_v44, %v4347_v44 }
0x3867   : > { %13060 = vmatmul.mubr.msk.bf16.vlgmr.msra.gmra.mrb[152].mxu1 %vm848_vm1, %v15246_v45 }
0x3868   : > { %13073 = vmatprep.mubr.msk.bf16.mxu1 %vm14032_vm0, %v14031_v1 }
0x38e0   : > { %v5922_v48 = vpop.xlane.xlu0 %5921 }
0x38e1   : > { %v5923_v49 = vmul.f32 0.03125, %v5922_v48 }
0x38e3   : > { %v5924_v51 = vadd.f32 1e-05, %v5923_v49 }
0x38e5   : > { %13874 = vrsqrt.f32 %v5924_v51 }
0x38ef   : > { %v13875_v50 = vpop.eup %13874 }
0x38f0   : > { %v5926_v54 = vmul.f32 %v13875_v50, %v5918_v38 }
0x38f2   : > { %v5931_v56 = vmul.f32 %v5930_v53, %v5926_v54 }
0x38f4   : > { %v15265_v57 = vadd.f32 %v5935_v55, %v5931_v56 }
0x38f6   : > { %v15272_v59 = vpack.c.bf16 %v15265_v57, %v15265_v57 }
0x38f8   : > { %13052 = vmatmul.mubr.msk.bf16.vlgmr.msra.gmra.mrb[152].mxu0 %vm848_vm1, %v15272_v59 }
0x38f9   : > { %13064 = vmatpush3.bf16.msra.mxu0 %v13736_v58  ;;  %13067 = vmatprep.mubr.msk.bf16.mxu0 %vm14032_vm0, %v14031_v1 }
0x38fa   : > { %13065 = vmatprep.subr.bf16.mxu0 %v14031_v1 }
0x38fd   : > { %13066 = vmatpush3.bf16.msra.mxu0 %v13737_v60  ;;  %v13742_v60 = vld [vmem:[%s16387_s13 + $0x110] sm:$0xff]  }
0x38fe   : > { %13077 = vmatprep.subr.bf16.mxu0 %v14031_v1 }
0x3900   : > { %13068 = vmatmul.mubr.msk.bf16.vlgmr.msra.gmra.mrb[156].mxu0 %vm848_vm1, %v15246_v45 }
0x3901   : > { %13079 = vmatprep.mubr.msk.bf16.mxu0 %vm14032_vm0, %v14031_v1 }
0x393a   : > { %v6073_v62 = vpop.f32.mrb[152].mxu1 }
0x393b   : > { %v6074_v63 = vadd.f32 %v11695_v61, %v6073_v62  ;;  %v13061_v0 = vpop.f32.mrb[153].mxu1  ;;  %v13743_v62 = vld [vmem:[%s16387_s13 + $0x118] sm:$0xff]  }
0x393c   : > { %v6076_v2 = vpop.f32.mrb[154].mxu1 }
0x393d   : > { %6145 = vxpose.xlu0.b32.start.end [1/1] (short) (narrow) %v6074_v63, 8  ;;  %v13062_v3 = vpop.f32.mrb[155].mxu1 }
0x39bd   : > { %v6161_v4 = vpop.trf.xlu0 }
0x39be   : > { %v6177_v5 = vpack.c.bf16 %v6161_v4, %v6161_v4  ;;  %v11725_v4 = vld [vmem:[%s16390_s14 + $0x11] ss:$0 sm:$0xff] }
0x39c0   : > { %v6182_v7 = vsel %vm1060_vm2, %v6177_v5, 0 }
0x39c1   : > { %13072 = vmatpush3.bf16.msra.mxu1 %v6182_v7 }
0x39c2   : > { %13083 = vmatprep.subr.bf16.mxu1 %v14031_v1 }
0x39cb   : > { %v6005_v9 = vpop.f32.mrb[152].mxu0 }
0x39cc   : > { %v6006_v10 = vadd.f32 %v11686_v8, %v6005_v9  ;;  %v13053_v11 = vpop.f32.mrb[153].mxu0 }
0x39cd   : > { %v6008_v14 = vpop.f32.mrb[154].mxu0  ;;  %v11716_v11 = vld [vmem:[%s16390_s14 + $0xd] ss:$0 sm:$0xff] }
0x39ce   : > { %v6144_v18 = vpack.c.bf16 %v6006_v10, %v6006_v10  ;;  %v13054_v19 = vpop.f32.mrb[155].mxu0 }
0x39d0   : > { %13074 = vmatmul.mubr.msk.bf16.vlgmr.msra.gmra.mrb[156].mxu1 %vm1056_vm3, %v6144_v18 }
0x39d1   : > { %13084 = vmatpush3.bf16.msra.mxu1 %v13738_v17  ;;  %13087 = vmatprep.mubr.msk.bf16.mxu1 %vm14032_vm0, %v14031_v1 }
0x39d2   : > { %13085 = vmatprep.subr.bf16.mxu1 %v14031_v1 }
0x39d3   : > { %v6138_v24 = vpop.f32.mrb[156].mxu0 }
0x39d4   : > { %v6139_v16 = vadd.f32 %v11704_v21, %v6138_v24  ;;  %v13069_v26 = vpop.f32.mrb[157].mxu0 }
0x39d5   : > { %v6141_v32 = vpop.f32.mrb[158].mxu0  ;;  %13086 = vmatpush3.bf16.msra.mxu1 %v13739_v23 }
0x39d6   : > { %v6238_v35 = vpack.c.bf16 %v6139_v16, %v6139_v16  ;;  %v13070_v36 = vpop.f32.mrb[159].mxu0  ;;  %13099 = vmatprep.subr.bf16.mxu1 %v14031_v1 }
0x39d8   : > { %v6243_v37 = vsel %vm1060_vm2, %v6238_v35, 0  ;;  %13088 = vmatmul.mubr.msk.bf16.vlgmr.msra.gmra.mrb[160].mxu1 %vm848_vm1, %v15272_v59 }
0x39d9   : > { %13078 = vmatpush3.bf16.msra.mxu0 %v6243_v37  ;;  %13100 = vmatpush3.bf16.msra.mxu1 %v13740_v34 }
0x39da   : > { %13101 = vmatprep.subr.bf16.mxu1 %v14031_v1  ;;  %13103 = vmatprep.mubr.msk.bf16.mxu1 %vm14032_vm0, %v14031_v1 }
0x39db   : > { %13091 = vmatprep.subr.bf16.mxu0 %v14031_v1 }
0x39dd   : > { %13102 = vmatpush3.bf16.msra.mxu1 %v13741_v12 }
0x39de   : > { %13113 = vmatprep.subr.bf16.mxu1 %v14031_v1 }
0x39e0   : > { %13104 = vmatmul.mubr.msk.bf16.vlgmr.msra.gmra.mrb[164].mxu1 %vm848_vm1, %v15246_v45 }
0x39e1   : > { %13115 = vmatprep.mubr.msk.bf16.mxu1 %vm14032_vm0, %v14031_v1 }
0x3aa3   : > { %v6218_v31 = vpop.f32.mrb[156].mxu1 }
0x3aa4   : > { %v6224_v22 = vmul.f32 0.35355338, %v6218_v31  ;;  %v13075_v38 = vpop.f32.mrb[157].mxu1 }
0x3aa5   : > { %v6221_v15 = vpop.f32.mrb[158].mxu1 }
0x3aa6   : > { %v13076_v39 = vpop.f32.mrb[159].mxu1  ;;  %v6225_v40 = vsel %vm14296_vm5, %v6224_v22, -1e+10 }
0x3aa7   : > { %v6226_v29 = vsel %vm1056_vm3, %v6225_v40, -inf  ;;  %v11710_v39 = vld [vmem:[%s16316_s15 + $0x10] sm:$0xf] }
0x3aa8   : > { %6227 = vmax.xlane.f32.xlu1 %v6226_v29 }
0x3aab   : > { %v6347_v25 = vpop.f32.mrb[160].mxu1 }
0x3aac   : > { %v13089_v41 = vpop.f32.mrb[161].mxu1  ;;  %v6348_v17 = vadd.f32 %v11716_v11, %v6347_v25  ;;  %v6677_v25 = vsel %vm1060_vm2, %v11710_v39, 0  ;;  %v11748_v11 = vld [vmem:[%s16390_s14 + $0xe] ss:$0 sm:$0xff] }
0x3aad   : > { %v6350_v42 = vpop.f32.mrb[162].mxu1  ;;  %v13744_v41 = vld [vmem:[%s16387_s13 + $0x120] sm:$0xff]  }
0x3aae   : > { %v13090_v46 = vpop.f32.mrb[163].mxu1  ;;  %v6483_v21 = vpack.c.bf16 %v6348_v17, %v6348_v17 }
0x3aaf   : > { %v13745_v46 = vld [vmem:[%s16387_s13 + $0x128] sm:$0xff]  }
0x3ab3   : > { %v6477_v27 = vpop.f32.mrb[164].mxu1 }
0x3ab4   : > { %v6478_v43 = vadd.f32 %v11734_v20, %v6477_v27  ;;  %v13105_v44 = vpop.f32.mrb[165].mxu1  ;;  %v11740_v20 = vld [vmem:[%s16316_s15 + $0x14] sm:$0xf] }
0x3ab5   : > { %v6480_v6 = vpop.f32.mrb[166].mxu1  ;;  %v6631_v27 = vsel %vm1060_vm2, %v11740_v20, 0  ;;  %v13746_v44 = vld [vmem:[%s16387_s13 + $0xe0] sm:$0xff]  }
0x3ab6   : > { %v6577_v47 = vpack.c.bf16 %v6478_v43, %v6478_v43  ;;  %v13106_v48 = vpop.f32.mrb[167].mxu1 }
0x3ab8   : > { %v6582_v49 = vsel %vm1060_vm2, %v6577_v47, 0 }
0x3ab9   : > { %13114 = vmatpush3.bf16.msra.mxu1 %v6582_v49 }
0x3aba   : > { %13125 = vmatprep.subr.bf16.mxu1 %v14031_v1 }
0x3b35   : > { %v6228_v51 = vpop.xlane.xlu1 %6227 }
0x3b36   : > { %v6229_v52 = vsub.f32 %v6225_v40, %v6228_v51  ;;  %v13747_v51 = vld [vmem:[%s16387_s13 + $0xe8] sm:$0xff]  }
0x3b38   : > { %v6230_v53 = vmul.f32 1.442695, %v6229_v52 }
0x3b3a   : > { %13876 = vpow2.f32 %v6230_v53  ;;  %v13748_v53 = vld [vmem:[%s16387_s13 + $0x160] sm:$0xff]  }
0x3b44   : > { %v13877_v50 = vpop.eup %13876 }
0x3b45   : > { %v6232_v54 = vsel %vm1056_vm3, %v13877_v50, 0.0 }
0x3b46   : > { %6233 = vadd.xlane.f32.xlu1 %v6232_v54 }
0x3bd3   : > { %v6234_v55 = vpop.xlane.xlu1 %6233 }
0x3bd4   : > { %13878 = vrcp.f32 %v6234_v55 }
0x3bde   : > { %v13879_v56 = vpop.eup %13878 }
0x3bdf   : > { %v6236_v58 = vmul.f32 %v13879_v56, %v13877_v50  ;;  %v13749_v56 = vld [vmem:[%s16387_s13 + $0x168] sm:$0xff]  }
0x3be1   : > { %v6237_v61 = vpack.c.bf16 %v6236_v58, %v6236_v58  ;;  %v11757_v58 = vld [vmem:[%s16390_s14 + $0x12] ss:$0 sm:$0xff] }
0x3be3   : > { %13080 = vmatmul.mubr.msk.bf16.vlgmr.msra.gmra.mrb[160].mxu0 %vm1056_vm3, %v6237_v61 }
0x3be4   : > { %13092 = vmatpush3.bf16.msra.mxu0 %v13742_v60  ;;  %13095 = vmatprep.mubr.msk.bf16.mxu0 %vm14032_vm0, %v14031_v1 }
0x3be5   : > { %13093 = vmatprep.subr.bf16.mxu0 %v14031_v1 }
0x3be8   : > { %13094 = vmatpush3.bf16.msra.mxu0 %v13743_v62 }
0x3be9   : > { %13107 = vmatprep.subr.bf16.mxu0 %v14031_v1 }
0x3beb   : > { %13096 = vmatmul.mubr.msk.bf16.vlgmr.msra.gmra.mrb[164].mxu0 %vm848_vm1, %v15246_v45 }
0x3bec   : > { %13109 = vmatprep.mubr.msk.bf16.mxu0 %vm14032_vm0, %v14031_v1 }
0x3cb6   : > { %v6279_v63 = vpop.f32.mrb[160].mxu0 }
0x3cb7   : > { %v13081_v0 = vpop.f32.mrb[161].mxu0  ;;  %v6285_v42 = vpack.c.bf16 %v6279_v63, %v6279_v63 }
0x3cb8   : > { %v6282_v2 = vpop.f32.mrb[162].mxu0 }
0x3cb9   : > { %v13082_v3 = vpop.f32.mrb[163].mxu0 }
0x3cbe   : > { %v6412_v5 = vpop.f32.mrb[164].mxu0 }
0x3cbf   : > { %v6413_v7 = vadd.f32 %v11725_v4, %v6412_v5  ;;  %v13097_v8 = vpop.f32.mrb[165].mxu0 }
0x3cc0   : > { %v6415_v9 = vpop.f32.mrb[166].mxu0 }
0x3cc1   : > { %6484 = vxpose.xlu1.b32.start.end [1/1] (short) (narrow) %v6413_v7, 8  ;;  %v13098_v10 = vpop.f32.mrb[167].mxu0 }
0x3d41   : > { %v6500_v14 = vpop.trf.xlu1 }
0x3d42   : > { %v6516_v18 = vpack.c.bf16 %v6500_v14, %v6500_v14 }
0x3d44   : > { %v6521_v19 = vsel %vm1060_vm2, %v6516_v18, 0 }
0x3d45   : > { %13108 = vmatpush3.bf16.msra.mxu0 %v6521_v19 }
0x3d46   : > { %13119 = vmatprep.subr.bf16.mxu0 %v14031_v1 }
0x3d48   : > { %13110 = vmatmul.mubr.msk.bf16.vlgmr.msra.gmra.mrb[168].mxu0 %vm1056_vm3, %v6483_v21 }
0x3d49   : > { %13121 = vmatprep.mubr.msk.bf16.mxu0 %vm14032_vm0, %v14031_v1  ;;  %13120 = vmatpush3.bf16.msra.mxu0 %v6631_v27 }
0x3d4a   : > { %13131 = vmatprep.subr.bf16.mxu0 %v14031_v1 }
0x3e1b   : > { %v6557_v23 = vpop.f32.mrb[168].mxu0 }
0x3e1c   : > { %v6563_v24 = vmul.f32 0.35355338, %v6557_v23  ;;  %v13111_v16 = vpop.f32.mrb[169].mxu0 }
0x3e1d   : > { %v6560_v26 = vpop.f32.mrb[170].mxu0 }
0x3e1e   : > { %v13112_v32 = vpop.f32.mrb[171].mxu0  ;;  %v6564_v34 = vsel %vm14296_vm5, %v6563_v24, -1e+10  ;;  %v11766_v24 = vld [vmem:[%s16390_s14 + $0x16] ss:$0 sm:$0xff] }
0x3e1f   : > { %v6565_v35 = vsel %vm1056_vm3, %v6564_v34, -inf }
0x3e20   : > { %6566 = vmax.xlane.f32.xlu0 %v6565_v35 }
0x3ead   : > { %v6567_v36 = vpop.xlane.xlu0 %6566 }
0x3eae   : > { %v6568_v37 = vsub.f32 %v6564_v34, %v6567_v36 }
0x3eb0   : > { %v6569_v12 = vmul.f32 1.442695, %v6568_v37 }
0x3eb2   : > { %13880 = vpow2.f32 %v6569_v12 }
0x3ebc   : > { %v13881_v31 = vpop.eup %13880 }
0x3ebd   : > { %v6571_v22 = vsel %vm1056_vm3, %v13881_v31, 0.0 }
0x3ebe   : > { %6572 = vadd.xlane.f32.xlu1 %v6571_v22 }
0x3f4b   : > { %v6573_v38 = vpop.xlane.xlu1 %6572 }
0x3f4c   : > { %13882 = vrcp.f32 %v6573_v38 }
0x3f56   : > { %v13883_v15 = vpop.eup %13882 }
0x3f57   : > { %v6575_v40 = vmul.f32 %v13883_v15, %v13881_v31 }
0x3f59   : > { %v6576_v29 = vpack.c.bf16 %v6575_v40, %v6575_v40 }
0x3f5b   : > { %13116 = vmatmul.mubr.msk.bf16.vlgmr.msra.gmra.mrb[168].mxu1 %vm1056_vm3, %v6576_v29 }
0x3f5c   : > { %13126 = vmatpush3.bf16.msra.mxu1 %v6677_v25  ;;  %13127 = vmatprep.mubr.msk.bf16.mxu1 %vm14032_vm0, %v14031_v1 }
0x3f5d   : > { %13139 = vmatprep.subr.bf16.mxu1 %v14031_v1 }
0x3f63   : > { %13128 = vmatmul.mubr.msk.bf16.vlgmr.msra.gmra.mrb[172].mxu1 %vm1056_vm3, %v6285_v42 }
0x3f64   : > { %13140 = vmatpush3.bf16.msra.mxu1 %v13744_v41  ;;  %13143 = vmatprep.mubr.msk.bf16.mxu1 %vm14032_vm0, %v14031_v1 }
0x3f65   : > { %13141 = vmatprep.subr.bf16.mxu1 %v14031_v1 }
0x3f68   : > { %13142 = vmatpush3.bf16.msra.mxu1 %v13745_v46 }
0x3f69   : > { %13155 = vmatprep.subr.bf16.mxu1 %v14031_v1 }
0x3f6b   : > { %13144 = vmatmul.mubr.msk.bf16.vlgmr.msra.gmra.mrb[176].mxu1 %vm848_vm1, %v15246_v45 }
0x3f6c   : > { %13157 = vmatprep.mubr.msk.bf16.mxu1 %vm14032_vm0, %v14031_v1 }
0x402e   : > { %v6618_v43 = vpop.f32.mrb[168].mxu1 }
0x402f   : > { %v6624_v6 = vpack.c.bf16 %v6618_v43, %v6618_v43  ;;  %v13117_v47 = vpop.f32.mrb[169].mxu1 }
0x4030   : > { %v6621_v48 = vpop.f32.mrb[170].mxu1  ;;  %v13751_v47 = vld [vmem:[%s16387_s13 + $0xf8] sm:$0xff]  }
0x4031   : > { %v13118_v49 = vpop.f32.mrb[171].mxu1  ;;  %13122 = vmatmul.mubr.msk.bf16.vlgmr.msra.gmra.mrb[172].mxu0 %vm1056_vm3, %v6624_v6  ;;  %v13752_v48 = vld [vmem:[%s16387_s13 + $0x170] sm:$0xff]  }
0x4032   : > { %13132 = vmatpush3.bf16.msra.mxu0 %v13746_v44  ;;  %13135 = vmatprep.mubr.msk.bf16.mxu0 %vm14032_vm0, %v14031_v1  ;;  %v13750_v44 = vld [vmem:[%s16387_s13 + $0xf0] sm:$0xff]   ;;  %v13753_v49 = vld [vmem:[%s16387_s13 + $0x178] sm:$0xff]  }
0x4033   : > { %13133 = vmatprep.subr.bf16.mxu0 %v14031_v1 }
0x4036   : > { %v6713_v52 = vpop.f32.mrb[172].mxu1  ;;  %13134 = vmatpush3.bf16.msra.mxu0 %v13747_v51 }
0x4037   : > { %v13129_v50 = vpop.f32.mrb[173].mxu1  ;;  %13147 = vmatprep.subr.bf16.mxu0 %v14031_v1 }
0x4038   : > { %v6716_v54 = vpop.f32.mrb[174].mxu1 }
0x4039   : > { %v13130_v55 = vpop.f32.mrb[175].mxu1  ;;  %13136 = vmatmul.mubr.msk.bf16.vlgmr.msra.gmra.mrb[176].mxu0 %vm848_vm1, %v15272_v59 }
0x403a   : > { %13148 = vmatpush3.bf16.msra.mxu0 %v13748_v53  ;;  %13151 = vmatprep.mubr.msk.bf16.mxu0 %vm14032_vm0, %v14031_v1  ;;  %v13754_v53 = vld [vmem:[%s16387_s13 + $0x130] sm:$0xff]  }
0x403b   : > { %13149 = vmatprep.subr.bf16.mxu0 %v14031_v1 }
0x403e   : > { %v6843_v60 = vpop.f32.mrb[176].mxu1  ;;  %13150 = vmatpush3.bf16.msra.mxu0 %v13749_v56 }
0x403f   : > { %v6844_v61 = vadd.f32 %v11757_v58, %v6843_v60  ;;  %v13145_v62 = vpop.f32.mrb[177].mxu1  ;;  %13161 = vmatprep.subr.bf16.mxu0 %v14031_v1  ;;  %v13755_v58 = vld [vmem:[%s16387_s13 + $0x138] sm:$0xff]  }
0x4040   : > { %v6846_v63 = vpop.f32.mrb[178].mxu1 }
0x4041   : > { %13152 = vmatmul.mubr.msk.bf16.vlgmr.msra.gmra.mrb[180].mxu0 %vm848_vm1, %v15246_v45  ;;  %6915 = vxpose.xlu0.b32.start.end [1/1] (short) (narrow) %v6844_v61, 8  ;;  %v13146_v0 = vpop.f32.mrb[179].mxu1 }
0x4042   : > { %13163 = vmatprep.mubr.msk.bf16.mxu0 %vm14032_vm0, %v14031_v1  ;;  %v11797_v0 = vld [vmem:[%s16390_s14 + $0x17] ss:$0 sm:$0xff] }
0x40c1   : > { %v6931_v2 = vpop.trf.xlu0 }
0x40c2   : > { %v6947_v3 = vpack.c.bf16 %v6931_v2, %v6931_v2 }
0x40c4   : > { %v6952_v4 = vsel %vm1060_vm2, %v6947_v3, 0 }
0x40c5   : > { %13156 = vmatpush3.bf16.msra.mxu1 %v6952_v4 }
0x40c6   : > { %13167 = vmatprep.subr.bf16.mxu1 %v14031_v1 }
0x4104   : > { %v6667_v5 = vpop.f32.mrb[172].mxu0 }
0x4105   : > { %v15426_v7 = vadd.f32 %v6713_v52, %v6667_v5  ;;  %v13123_v8 = vpop.f32.mrb[173].mxu0 }
0x4106   : > { %v6670_v9 = vpop.f32.mrb[174].mxu0 }
0x4107   : > { %v13124_v10 = vpop.f32.mrb[175].mxu0 }
0x410c   : > { %v6778_v14 = vpop.f32.mrb[176].mxu0 }
0x410d   : > { %v6779_v17 = vadd.f32 %v11748_v11, %v6778_v14  ;;  %v13137_v18 = vpop.f32.mrb[177].mxu0 }
0x410e   : > { %v6781_v19 = vpop.f32.mrb[178].mxu0 }
0x410f   : > { %v6914_v21 = vpack.c.bf16 %v6779_v17, %v6779_v17  ;;  %v13138_v23 = vpop.f32.mrb[179].mxu0 }
0x4111   : > { %13158 = vmatmul.mubr.msk.bf16.vlgmr.msra.gmra.mrb[180].mxu1 %vm1056_vm3, %v6914_v21  ;;  %v11788_v21 = vld [vmem:[%s16390_s14 + $0x13] ss:$0 sm:$0xff] }
0x4112   : > { %13169 = vmatprep.mubr.msk.bf16.mxu1 %vm14032_vm0, %v14031_v1 }
0x4114   : > { %v6908_v16 = vpop.f32.mrb[180].mxu0 }
0x4115   : > { %v6909_v26 = vadd.f32 %v11766_v24, %v6908_v16  ;;  %v13153_v32 = vpop.f32.mrb[181].mxu0 }
0x4116   : > { %v6911_v34 = vpop.f32.mrb[182].mxu0 }
0x4117   : > { %v7008_v35 = vpack.c.bf16 %v6909_v26, %v6909_v26  ;;  %v13154_v36 = vpop.f32.mrb[183].mxu0  ;;  %v11779_v34 = vld [vmem:[%s16390_s14 + $0xf] ss:$0 sm:$0xff] }
0x4119   : > { %v7013_v37 = vsel %vm1060_vm2, %v7008_v35, 0 }
0x411a   : > { %13162 = vmatpush3.bf16.msra.mxu0 %v7013_v37 }
0x411b   : > { %13173 = vmatprep.subr.bf16.mxu0 %v14031_v1 }
0x41e4   : > { %v6988_v12 = vpop.f32.mrb[180].mxu1 }
0x41e5   : > { %v6994_v31 = vmul.f32 0.35355338, %v6988_v12  ;;  %v13159_v22 = vpop.f32.mrb[181].mxu1 }
0x41e6   : > { %v6991_v38 = vpop.f32.mrb[182].mxu1 }
0x41e7   : > { %v13160_v15 = vpop.f32.mrb[183].mxu1  ;;  %v6995_v39 = vsel %vm14296_vm5, %v6994_v31, -1e+10 }
0x41e8   : > { %v6996_v40 = vsel %vm1056_vm3, %v6995_v39, -inf }
0x41e9   : > { %6997 = vmax.xlane.f32.xlu1 %v6996_v40 }
0x4276   : > { %v6998_v29 = vpop.xlane.xlu1 %6997 }
0x4277   : > { %v6999_v25 = vsub.f32 %v6995_v39, %v6998_v29 }
0x4279   : > { %v7000_v41 = vmul.f32 1.442695, %v6999_v25 }
0x427b   : > { %13884 = vpow2.f32 %v7000_v41 }
0x4285   : > { %v13885_v42 = vpop.eup %13884 }
0x4286   : > { %v7002_v46 = vsel %vm1056_vm3, %v13885_v42, 0.0 }
0x4287   : > { %7003 = vadd.xlane.f32.xlu1 %v7002_v46 }
0x4314   : > { %v7004_v20 = vpop.xlane.xlu1 %7003 }
0x4315   : > { %13886 = vrcp.f32 %v7004_v20 }
0x431f   : > { %v13887_v27 = vpop.eup %13886 }
0x4320   : > { %v7006_v43 = vmul.f32 %v13887_v27, %v13885_v42 }
0x4322   : > { %v7007_v6 = vpack.c.bf16 %v7006_v43, %v7006_v43 }
0x4324   : > { %13164 = vmatmul.mubr.msk.bf16.vlgmr.msra.gmra.mrb[184].mxu0 %vm1056_vm3, %v7007_v6 }
0x4325   : > { %13174 = vmatpush3.bf16.msra.mxu0 %v13750_v44  ;;  %13177 = vmatprep.mubr.msk.bf16.mxu0 %vm14032_vm0, %v14031_v1 }
0x4326   : > { %13175 = vmatprep.subr.bf16.mxu0 %v14031_v1 }
0x4329   : > { %13176 = vmatpush3.bf16.msra.mxu0 %v13751_v47  ;;  %v11803_v47 = vld [vmem:[%s16316_s15 + $0x1c] sm:$0xf] }
0x432a   : > { %13189 = vmatprep.subr.bf16.mxu0 %v14031_v1 }
0x432c   : > { %13178 = vmatmul.mubr.msk.bf16.vlgmr.msra.gmra.mrb[188].mxu0 %vm848_vm1, %v15272_v59  ;;  %v11772_v59 = vld [vmem:[%s16316_s15 + $0x18] sm:$0xf] }
0x432d   : > { %13190 = vmatpush3.bf16.msra.mxu0 %v13752_v48  ;;  %13193 = vmatprep.mubr.msk.bf16.mxu0 %vm14032_vm0, %v14031_v1  ;;  %v7062_v51 = vsel %vm1060_vm2, %v11772_v59, 0  ;;  %v7448_v48 = vsel %vm1060_vm2, %v11803_v47, 0 }
0x432e   : > { %13191 = vmatprep.subr.bf16.mxu0 %v14031_v1  ;;  %13168 = vmatpush3.bf16.msra.mxu1 %v7062_v51 }
0x432f   : > { %13181 = vmatprep.subr.bf16.mxu1 %v14031_v1 }
0x4331   : > { %13192 = vmatpush3.bf16.msra.mxu0 %v13753_v49 }
0x4332   : > { %13203 = vmatprep.subr.bf16.mxu0 %v14031_v1 }
0x4334   : > { %13194 = vmatmul.mubr.msk.bf16.vlgmr.msra.gmra.mrb[192].mxu0 %vm848_vm1, %v15246_v45 }
0x4335   : > { %13205 = vmatprep.mubr.msk.bf16.mxu0 %vm14032_vm0, %v14031_v1 }
0x43f7   : > { %v7049_v52 = vpop.f32.mrb[184].mxu0 }
0x43f8   : > { %v7055_v50 = vpack.c.bf16 %v7049_v52, %v7049_v52  ;;  %v13165_v54 = vpop.f32.mrb[185].mxu0 }
0x43f9   : > { %v7052_v55 = vpop.f32.mrb[186].mxu0 }
0x43fa   : > { %v13166_v56 = vpop.f32.mrb[187].mxu0  ;;  %13170 = vmatmul.mubr.msk.bf16.vlgmr.msra.gmra.mrb[184].mxu1 %vm1056_vm3, %v7055_v50  ;;  %v11805_v50 = vld [vmem:[%s16317_s16 + $0x1] ss:$0 sm:$0xff] }
0x43fb   : > { %13182 = vmatpush3.bf16.msra.mxu1 %v13754_v53  ;;  %13185 = vmatprep.mubr.msk.bf16.mxu1 %vm14032_vm0, %v14031_v1 }
0x43fc   : > { %13183 = vmatprep.subr.bf16.mxu1 %v14031_v1 }
0x43ff   : > { %v7164_v60 = vpop.f32.mrb[188].mxu0  ;;  %13184 = vmatpush3.bf16.msra.mxu1 %v13755_v58 }
0x4400   : > { %v13179_v61 = vpop.f32.mrb[189].mxu0  ;;  %13197 = vmatprep.subr.bf16.mxu1 %v14031_v1  ;;  %v7165_v36 = vadd.f32 %v11779_v34, %v7164_v60  ;;  %v13760_v34 = vld [vmem:[%s16320_s19 + $0x10] sm:$0xff]  }
0x4401   : > { %v7167_v62 = vpop.f32.mrb[190].mxu0 }
0x4402   : > { %v13180_v63 = vpop.f32.mrb[191].mxu0  ;;  %13186 = vmatmul.mubr.msk.bf16.vlgmr.msra.gmra.mrb[188].mxu1 %vm848_vm1, %v15246_v45  ;;  %v7300_v12 = vpack.c.bf16 %v7165_v36, %v7165_v36  ;;  %v11807_v36 = vld [vmem:[%s16319_s18] ss:$0 sm:$0xff] }
0x4403   : > { %13199 = vmatprep.mubr.msk.bf16.mxu1 %vm14032_vm0, %v14031_v1 }
0x4407   : > { %v7294_v2 = vpop.f32.mrb[192].mxu0 }
0x4408   : > { %v7295_v3 = vadd.f32 %v11797_v0, %v7294_v2  ;;  %v13195_v4 = vpop.f32.mrb[193].mxu0 }
0x4409   : > { %v7297_v5 = vpop.f32.mrb[194].mxu0 }
0x440a   : > { %v7394_v8 = vpack.c.bf16 %v7295_v3, %v7295_v3  ;;  %v13196_v9 = vpop.f32.mrb[195].mxu0 }
0x440b   : > { %v13758_v9 = vld [vmem:[%s16320_s19] sm:$0xff]  }
0x440c   : > { %v7399_v10 = vsel %vm1060_vm2, %v7394_v8, 0  ;;  %v13756_v8 = vld [vmem:[%s16318_s17] sm:$0xff]  }
0x440d   : > { %13204 = vmatpush3.bf16.msra.mxu0 %v7399_v10  ;;  %v13759_v10 = vld [vmem:[%s16320_s19 + $0x8] sm:$0xff]  }
0x440e   : > { %13215 = vmatprep.subr.bf16.mxu0 %v14031_v1 }
0x44cd   : > { %v7098_v11 = vpop.f32.mrb[184].mxu1 }
0x44ce   : > { %v7104_v14 = vadd.f32 %v7098_v11, %v15426_v7  ;;  %v13171_v17 = vpop.f32.mrb[185].mxu1 }
0x44cf   : > { %v7101_v18 = vpop.f32.mrb[186].mxu1 }
0x44d0   : > { %v13172_v19 = vpop.f32.mrb[187].mxu1  ;;  %v11679_v18 = vld [vmem:[%s16322_s21 + $0x2] sm:$0x3] }
0x44d1   : > { %v7515_v19 = vrot.slane %v11679_v18, %v14292_v28 }
0x44d5   : > { %v7229_v23 = vpop.f32.mrb[188].mxu1 }
0x44d6   : > { %v7230_v24 = vadd.f32 %v11788_v21, %v7229_v23  ;;  %v13187_v16 = vpop.f32.mrb[189].mxu1 }
0x44d7   : > { %v7232_v26 = vpop.f32.mrb[190].mxu1 }
0x44d8   : > { %7301 = vxpose.xlu1.b32.start.end [1/1] (short) (narrow) %v7230_v24, 8  ;;  %v13188_v32 = vpop.f32.mrb[191].mxu1  ;;  %v7520_v24 = vrot.slane %v11679_v18, %v14557_v30 }
0x4558   : > { %v7317_v35 = vpop.trf.xlu1 }
0x4559   : > { %v7333_v7 = vpack.c.bf16 %v7317_v35, %v7317_v35  ;;  %v13761_v35 = vld [vmem:[%s16320_s19 + $0x18] sm:$0xff]  }
0x455b   : > { %v7338_v37 = vsel %vm1060_vm2, %v7333_v7, 0 }
0x455c   : > { %13198 = vmatpush3.bf16.msra.mxu1 %v7338_v37 }
0x455d   : > { %13209 = vmatprep.subr.bf16.mxu1 %v14031_v1 }
0x455f   : > { %13200 = vmatmul.mubr.msk.bf16.vlgmr.msra.gmra.mrb[192].mxu1 %vm1056_vm3, %v7300_v12 }
0x4560   : > { %13211 = vmatprep.mubr.msk.bf16.mxu1 %vm14032_vm0, %v14031_v1  ;;  %13210 = vmatpush3.bf16.msra.mxu1 %v7448_v48  ;;  %v13762_v48 = vld [vmem:[%s16387_s13 + $0x180] sm:$0xff]  }
0x4561   : > { %13223 = vmatprep.subr.bf16.mxu1 %v14031_v1 }
0x4632   : > { %v7374_v31 = vpop.f32.mrb[192].mxu1 }
0x4633   : > { %v7380_v22 = vmul.f32 0.35355338, %v7374_v31  ;;  %v13201_v38 = vpop.f32.mrb[193].mxu1 }
0x4634   : > { %v7377_v15 = vpop.f32.mrb[194].mxu1 }
0x4635   : > { %v13202_v39 = vpop.f32.mrb[195].mxu1  ;;  %v7381_v40 = vsel %vm14296_vm5, %v7380_v22, -1e+10 }
0x4636   : > { %v7382_v29 = vsel %vm1056_vm3, %v7381_v40, -inf  ;;  %v11811_v39 = vld [vmem:[%s16321_s20] ss:$0 sm:$0xff] }
0x4637   : > { %7383 = vmax.xlane.f32.xlu0 %v7382_v29 }
0x46c4   : > { %v7384_v25 = vpop.xlane.xlu0 %7383 }
0x46c5   : > { %v7385_v41 = vsub.f32 %v7381_v40, %v7384_v25 }
0x46c7   : > { %v7386_v42 = vmul.f32 1.442695, %v7385_v41 }
0x46c9   : > { %13888 = vpow2.f32 %v7386_v42 }
0x46d3   : > { %v13889_v46 = vpop.eup %13888 }
0x46d4   : > { %v7388_v20 = vsel %vm1056_vm3, %v13889_v46, 0.0 }
0x46d5   : > { %7389 = vadd.xlane.f32.xlu0 %v7388_v20 }
0x4762   : > { %v7390_v27 = vpop.xlane.xlu0 %7389 }
0x4763   : > { %13890 = vrcp.f32 %v7390_v27 }
0x476d   : > { %v13891_v43 = vpop.eup %13890 }
0x476e   : > { %v7392_v44 = vmul.f32 %v13891_v43, %v13889_v46 }
0x4770   : > { %v7393_v6 = vpack.c.bf16 %v7392_v44, %v7392_v44 }
0x4772   : > { %13206 = vmatmul.mubr.msk.bf16.vlgmr.msra.gmra.mrb[196].mxu0 %vm1056_vm3, %v7393_v6 }
0x4773   : > { %13219 = vmatprep.mubr.msk.bf16.mxu0 %vm14032_vm0, %v14031_v1  ;;  %13216 = vmatpush3.bf16.msra.mxu0 %v13756_v8 }
0x4774   : > { %13217 = vmatprep.subr.bf16.mxu0 %v14031_v1 }
0x4845   : > { %v7435_v49 = vpop.f32.mrb[196].mxu0 }
0x4846   : > { %v7441_v59 = vpack.c.bf16 %v7435_v49, %v7435_v49  ;;  %v13207_v51 = vpop.f32.mrb[197].mxu0  ;;  %v13763_v49 = vld [vmem:[%s16387_s13 + $0x200] sm:$0xff]  }
0x4847   : > { %v7438_v52 = vpop.f32.mrb[198].mxu0  ;;  %v13765_v51 = vld [vmem:[%s16387_s13 + $0x208] sm:$0xff]  }
0x4848   : > { %v13208_v53 = vpop.f32.mrb[199].mxu0  ;;  %13212 = vmatmul.mubr.msk.bf16.vlgmr.msra.gmra.mrb[196].mxu1 %vm1056_vm3, %v7441_v59  ;;  %v13764_v59 = vld [vmem:[%s16387_s13 + $0x188] sm:$0xff]  }
0x4849   : > { %13231 = vmatprep.mubr.msk.bf16.mxu1 %vm14032_vm0, %v14031_v1  ;;  %13224 = vmatpush3.bf16.msra.mxu1 %v13758_v9 }
0x484a   : > { %13225 = vmatprep.subr.bf16.mxu1 %v14031_v1 }
0x484d   : > { %13226 = vmatpush3.bf16.msra.mxu1 %v13759_v10 }
0x484e   : > { %13227 = vmatprep.subr.bf16.mxu1 %v14031_v1 }
0x4851   : > { %13228 = vmatpush3.bf16.msra.mxu1 %v13760_v34  ;;  %v11824_v34 = vld [vmem:[%s16390_s14 + $0x18] ss:$0 sm:$0xff] }
0x4852   : > { %13229 = vmatprep.subr.bf16.mxu1 %v14031_v1 }
0x4855   : > { %13230 = vmatpush3.bf16.msra.mxu1 %v13761_v35 }
0x4856   : > { %13251 = vmatprep.subr.bf16.mxu1 %v14031_v1 }
0x491b   : > { %v7484_v54 = vpop.f32.mrb[196].mxu1 }
0x491c   : > { %v7490_v55 = vadd.f32 %v7484_v54, %v7104_v14  ;;  %v13213_v56 = vpop.f32.mrb[197].mxu1  ;;  %v11806_v54 = vld [vmem:[%s16322_s21 + $0x4] sm:$0x3] }
0x491d   : > { %v7487_v58 = vpop.f32.mrb[198].mxu1 }
0x491e   : > { %v7497_v60 = vadd.f32 %v11805_v50, %v7490_v55  ;;  %v13214_v61 = vpop.f32.mrb[199].mxu1  ;;  %v7692_v55 = vrot.slane %v11806_v54, %v14292_v28  ;;  %v7697_v58 = vrot.slane %v11806_v54, %v14557_v30 }
0x4920   : > { %v7498_v62 = vadd.f32 %v7497_v60, %v15265_v57  ;;  %v13757_v57 = vld [vmem:[%s16318_s17 + $0x8] sm:$0xff]  }
0x4921   : > { %13218 = vmatpush3.bf16.msra.mxu0 %v13757_v57 }
0x4922   : > { %v7499_v63 = vsel %vm848_vm1, %v7498_v62, 0.0  ;;  %13235 = vmatprep.subr.bf16.mxu0 %v14031_v1 }
0x4923   : > { %7500 = vadd.xlane.f32.xlu1 %v7499_v63  ;;  %v13766_v63 = vld [vmem:[%s16387_s13 + $0x1c0] sm:$0xff]  }
0x49b0   : > { %v7501_v0 = vpop.xlane.xlu1 %7500 }
0x49b1   : > { %v7502_v2 = vmul.f32 0.03125, %v7501_v0 }
0x49b3   : > { %v7503_v3 = vsub.f32 %v7498_v62, %v7502_v2  ;;  %v13767_v2 = vld [vmem:[%s16387_s13 + $0x1c8] sm:$0xff]  }
0x49b5   : > { %v7504_v4 = vmul.f32 %v7503_v3, %v7503_v3 }
0x49b7   : > { %v7505_v5 = vsel %vm848_vm1, %v7504_v4, 0.0 }
0x49b8   : > { %7506 = vadd.xlane.f32.xlu0 %v7505_v5 }
0x4a45   : > { %v7507_v11 = vpop.xlane.xlu0 %7506 }
0x4a46   : > { %v7508_v14 = vmul.f32 0.03125, %v7507_v11 }
0x4a48   : > { %v7509_v17 = vadd.f32 1e-05, %v7508_v14 }
0x4a4a   : > { %13892 = vrsqrt.f32 %v7509_v17 }
0x4a54   : > { %v13893_v21 = vpop.eup %13892 }
0x4a55   : > { %v7511_v23 = vmul.f32 %v13893_v21, %v7503_v3  ;;  %v11842_v3 = vld [vmem:[%s16390_s14 + $0x20] ss:$0 sm:$0xff]  ;;  %v11833_v21 = vld [vmem:[%s16390_s14 + $0x1c] ss:$0 sm:$0xff] }
0x4a57   : > { %v7516_v16 = vmul.f32 %v7515_v19, %v7511_v23 }
0x4a59   : > { %v7521_v26 = vadd.f32 %v7520_v24, %v7516_v16 }
0x4a5b   : > { %v7538_v32 = vpack.c.bf16 %v7521_v26, %v7521_v26 }
0x4a5d   : > { %13220 = vmatmul.mubr.msk.bf16.vlgmr.msra.gmra.mrb[200].mxu0 %vm848_vm1, %v7538_v32 }
0x4a5e   : > { %13239 = vmatprep.mubr.msk.bf16.mxu0 %vm14032_vm0, %v14031_v1  ;;  %13236 = vmatpush3.bf16.msra.mxu0 %v13762_v48 }
0x4a5f   : > { %13237 = vmatprep.subr.bf16.mxu0 %v14031_v1 }
0x4a62   : > { %13238 = vmatpush3.bf16.msra.mxu0 %v13764_v59 }
0x4a63   : > { %13243 = vmatprep.subr.bf16.mxu0 %v14031_v1 }
0x4b30   : > { %v7594_v7 = vpop.f32.mrb[200].mxu0 }
0x4b31   : > { %v7595_v37 = vadd.f32 %v11807_v36, %v7594_v7  ;;  %v13221_v12 = vpop.f32.mrb[201].mxu0 }
0x4b32   : > { %v7597_v31 = vpop.f32.mrb[202].mxu0  ;;  %v13768_v12 = vld [vmem:[%s16387_s13 + $0x190] sm:$0xff]  }
0x4b33   : > { %v7600_v22 = vmax.f32 %v7595_v37, 0.0  ;;  %v13222_v38 = vpop.f32.mrb[203].mxu0 }
0x4b34   : > { %v13770_v38 = vld [vmem:[%s16387_s13 + $0x210] sm:$0xff]  }
0x4b35   : > { %v7601_v15 = vpack.c.bf16 %v7600_v22, %v7600_v22  ;;  %v13769_v22 = vld [vmem:[%s16387_s13 + $0x198] sm:$0xff]  }
0x4b37   : > { %13232 = vmatmul.mubr.msk.bf16.vlgmr.msra.gmra.mrb[200].mxu1 %vm2518_vm6, %v7601_v15  ;;  %v13771_v15 = vld [vmem:[%s16387_s13 + $0x218] sm:$0xff]  }
0x4b38   : > { %13255 = vmatprep.mubr.msk.bf16.mxu1 %vm14032_vm0, %v14031_v1  ;;  %13252 = vmatpush3.bf16.msra.mxu1 %v13763_v49 }
0x4b39   : > { %13253 = vmatprep.subr.bf16.mxu1 %v14031_v1 }
0x4b3c   : > { %13254 = vmatpush3.bf16.msra.mxu1 %v13765_v51 }
0x4b3d   : > { %13265 = vmatprep.subr.bf16.mxu1 %v14031_v1 }
0x4c0a   : > { %v7669_v40 = vpop.f32.mrb[200].mxu1 }
0x4c0b   : > { %v7670_v29 = vadd.f32 %v11811_v39, %v7669_v40  ;;  %v13233_v25 = vpop.f32.mrb[201].mxu1 }
0x4c0c   : > { %v7672_v41 = vpop.f32.mrb[202].mxu1 }
0x4c0d   : > { %v13234_v42 = vpop.f32.mrb[203].mxu1  ;;  %v7675_v46 = vadd.f32 %v7670_v29, %v7521_v26 }
0x4c0f   : > { %v7676_v20 = vsel %vm848_vm1, %v7675_v46, 0.0 }
0x4c10   : > { %7677 = vadd.xlane.f32.xlu0 %v7676_v20 }
0x4c9d   : > { %v7678_v27 = vpop.xlane.xlu0 %7677 }
0x4c9e   : > { %v7679_v43 = vmul.f32 0.03125, %v7678_v27 }
0x4ca0   : > { %v7680_v44 = vsub.f32 %v7675_v46, %v7679_v43 }
0x4ca2   : > { %v7681_v6 = vmul.f32 %v7680_v44, %v7680_v44 }
0x4ca4   : > { %v7682_v47 = vsel %vm848_vm1, %v7681_v6, 0.0  ;;  %v11872_v6 = vld [vmem:[%s16390_s14 + $0x21] ss:$0 sm:$0xff] }
0x4ca5   : > { %7683 = vadd.xlane.f32.xlu0 %v7682_v47 }
0x4d32   : > { %v7684_v52 = vpop.xlane.xlu0 %7683 }
0x4d33   : > { %v7685_v53 = vmul.f32 0.03125, %v7684_v52 }
0x4d35   : > { %v7686_v50 = vadd.f32 1e-05, %v7685_v53 }
0x4d37   : > { %13894 = vrsqrt.f32 %v7686_v50 }
0x4d41   : > { %v13895_v56 = vpop.eup %13894 }
0x4d42   : > { %v7688_v60 = vmul.f32 %v13895_v56, %v7680_v44 }
0x4d44   : > { %v7693_v61 = vmul.f32 %v7692_v55, %v7688_v60 }
0x4d46   : > { %v15592_v62 = vadd.f32 %v7697_v58, %v7693_v61 }
0x4d48   : > { %v15599_v0 = vpack.c.bf16 %v15592_v62, %v15592_v62 }
0x4d4a   : > { %13240 = vmatmul.mubr.msk.bf16.vlgmr.msra.gmra.mrb[204].mxu0 %vm848_vm1, %v15599_v0  ;;  %13256 = vmatmul.mubr.msk.bf16.vlgmr.msra.gmra.mrb[204].mxu1 %vm848_vm1, %v15599_v0 }
0x4d4b   : > { %13244 = vmatpush3.bf16.msra.mxu0 %v13766_v63  ;;  %13247 = vmatprep.mubr.msk.bf16.mxu0 %vm14032_vm0, %v14031_v1 }
0x4d4c   : > { %13245 = vmatprep.subr.bf16.mxu0 %v14031_v1  ;;  %13267 = vmatprep.mubr.msk.bf16.mxu1 %vm14032_vm0, %v14031_v1 }
0x4d4f   : > { %13246 = vmatpush3.bf16.msra.mxu0 %v13767_v2  ;;  %v13772_v2 = vld [vmem:[%s16387_s13 + $0x1d0] sm:$0xff]  }
0x4d50   : > { %13259 = vmatprep.subr.bf16.mxu0 %v14031_v1 }
0x4d52   : > { %13248 = vmatmul.mubr.msk.bf16.vlgmr.msra.gmra.mrb[208].mxu0 %vm848_vm1, %v15599_v0 }
0x4d53   : > { %13261 = vmatprep.mubr.msk.bf16.mxu0 %vm14032_vm0, %v14031_v1 }
0x4e1d   : > { %v7766_v4 = vpop.f32.mrb[204].mxu0  ;;  %v7896_v5 = vpop.f32.mrb[204].mxu1 }
0x4e1e   : > { %v7897_v8 = vadd.f32 %v11842_v3, %v7896_v5  ;;  %v13241_v57 = vpop.f32.mrb[205].mxu0  ;;  %v13257_v9 = vpop.f32.mrb[205].mxu1  ;;  %v7767_v36 = vadd.f32 %v11824_v34, %v7766_v4  ;;  %v13773_v4 = vld [vmem:[%s16387_s13 + $0x1d8] sm:$0xff]  }
0x4e1f   : > { %v7769_v10 = vpop.f32.mrb[206].mxu0  ;;  %v7899_v11 = vpop.f32.mrb[206].mxu1 }
0x4e20   : > { %v7996_v14 = vpack.c.bf16 %v7897_v8, %v7897_v8  ;;  %v13242_v17 = vpop.f32.mrb[207].mxu0  ;;  %v13258_v18 = vpop.f32.mrb[207].mxu1  ;;  %v7902_v31 = vpack.c.bf16 %v7767_v36, %v7767_v36  ;;  %v11863_v10 = vld [vmem:[%s16390_s14 + $0x1d] ss:$0 sm:$0xff] }
0x4e22   : > { %v8001_v19 = vsel %vm1060_vm2, %v7996_v14, 0 }
0x4e23   : > { %13266 = vmatpush3.bf16.msra.mxu1 %v8001_v19 }
0x4e24   : > { %13279 = vmatprep.subr.bf16.mxu1 %v14031_v1 }
0x4e25   : > { %v7831_v23 = vpop.f32.mrb[208].mxu0 }
0x4e26   : > { %v7832_v24 = vadd.f32 %v11833_v21, %v7831_v23  ;;  %v13249_v16 = vpop.f32.mrb[209].mxu0  ;;  %v11854_v21 = vld [vmem:[%s16390_s14 + $0x19] ss:$0 sm:$0xff] }
0x4e27   : > { %v7834_v26 = vpop.f32.mrb[210].mxu0 }
0x4e28   : > { %7903 = vxpose.xlu0.b32.start.end [1/1] (short) (narrow) %v7832_v24, 8  ;;  %v13250_v32 = vpop.f32.mrb[211].mxu0 }
0x4ea8   : > { %v7919_v35 = vpop.trf.xlu0 }
0x4ea9   : > { %v7935_v7 = vpack.c.bf16 %v7919_v35, %v7919_v35 }
0x4eab   : > { %v7940_v37 = vsel %vm1060_vm2, %v7935_v7, 0 }
0x4eac   : > { %13260 = vmatpush3.bf16.msra.mxu0 %v7940_v37 }
0x4ead   : > { %13271 = vmatprep.subr.bf16.mxu0 %v14031_v1 }
0x4eaf   : > { %13262 = vmatmul.mubr.msk.bf16.vlgmr.msra.gmra.mrb[212].mxu0 %vm1056_vm3, %v7902_v31 }
0x4eb0   : > { %13272 = vmatpush3.bf16.msra.mxu0 %v13768_v12  ;;  %13275 = vmatprep.mubr.msk.bf16.mxu0 %vm14032_vm0, %v14031_v1 }
0x4eb1   : > { %13273 = vmatprep.subr.bf16.mxu0 %v14031_v1 }
0x4eb4   : > { %13274 = vmatpush3.bf16.msra.mxu0 %v13769_v22 }
0x4eb5   : > { %13287 = vmatprep.subr.bf16.mxu0 %v14031_v1 }
0x4eb7   : > { %13276 = vmatmul.mubr.msk.bf16.vlgmr.msra.gmra.mrb[216].mxu0 %vm848_vm1, %v15599_v0 }
0x4eb8   : > { %13288 = vmatpush3.bf16.msra.mxu0 %v13770_v38  ;;  %13291 = vmatprep.mubr.msk.bf16.mxu0 %vm14032_vm0, %v14031_v1 }
0x4eb9   : > { %13289 = vmatprep.subr.bf16.mxu0 %v14031_v1 }
0x4ebc   : > { %13290 = vmatpush3.bf16.msra.mxu0 %v13771_v15 }
0x4ebd   : > { %13301 = vmatprep.subr.bf16.mxu0 %v14031_v1 }
0x4ebf   : > { %13292 = vmatmul.mubr.msk.bf16.vlgmr.msra.gmra.mrb[220].mxu0 %vm848_vm1, %v15599_v0 }
0x4ec0   : > { %13303 = vmatprep.mubr.msk.bf16.mxu0 %vm14032_vm0, %v14031_v1 }
0x4f82   : > { %v7976_v39 = vpop.f32.mrb[212].mxu0 }
0x4f83   : > { %v7982_v40 = vmul.f32 0.35355338, %v7976_v39  ;;  %v13263_v29 = vpop.f32.mrb[213].mxu0 }
0x4f84   : > { %v7979_v25 = vpop.f32.mrb[214].mxu0 }
0x4f85   : > { %v13264_v41 = vpop.f32.mrb[215].mxu0  ;;  %v7983_v42 = vsel %vm14981_vm10, %v7982_v40, -1e+10 }
0x4f86   : > { %v7984_v46 = vsel %vm1056_vm3, %v7983_v42, -inf  ;;  %v11848_v41 = vld [vmem:[%s16316_s15 + $0x20] sm:$0xf] }
0x4f87   : > { %7985 = vmax.xlane.f32.xlu1 %v7984_v46 }
0x4f8a   : > { %v8105_v20 = vpop.f32.mrb[216].mxu0 }
0x4f8b   : > { %v13277_v27 = vpop.f32.mrb[217].mxu0  ;;  %v8106_v24 = vadd.f32 %v11854_v21, %v8105_v20  ;;  %v8435_v20 = vsel %vm1060_vm2, %v11848_v41, 0  ;;  %v11886_v21 = vld [vmem:[%s16390_s14 + $0x1a] ss:$0 sm:$0xff] }
0x4f8c   : > { %v8108_v43 = vpop.f32.mrb[218].mxu0  ;;  %v13774_v27 = vld [vmem:[%s16387_s13 + $0x1e0] sm:$0xff]  }
0x4f8d   : > { %v13278_v44 = vpop.f32.mrb[219].mxu0  ;;  %v8241_v32 = vpack.c.bf16 %v8106_v24, %v8106_v24 }
0x4f8e   : > { %v13775_v44 = vld [vmem:[%s16387_s13 + $0x1e8] sm:$0xff]  }
0x4f92   : > { %v8235_v47 = vpop.f32.mrb[220].mxu0 }
0x4f93   : > { %v8236_v48 = vadd.f32 %v11872_v6, %v8235_v47  ;;  %v13293_v49 = vpop.f32.mrb[221].mxu0  ;;  %v11878_v6 = vld [vmem:[%s16316_s15 + $0x24] sm:$0xf] }
0x4f94   : > { %v8238_v59 = vpop.f32.mrb[222].mxu0  ;;  %v8389_v47 = vsel %vm1060_vm2, %v11878_v6, 0  ;;  %v13776_v49 = vld [vmem:[%s16387_s13 + $0x1a0] sm:$0xff]  }
0x4f95   : > { %v8335_v51 = vpack.c.bf16 %v8236_v48, %v8236_v48  ;;  %v13294_v52 = vpop.f32.mrb[223].mxu0 }
0x4f97   : > { %v8340_v53 = vsel %vm1060_vm2, %v8335_v51, 0 }
0x4f98   : > { %13302 = vmatpush3.bf16.msra.mxu0 %v8340_v53 }
0x4f99   : > { %13313 = vmatprep.subr.bf16.mxu0 %v14031_v1 }
0x5014   : > { %v7986_v50 = vpop.xlane.xlu1 %7985 }
0x5015   : > { %v7987_v54 = vsub.f32 %v7983_v42, %v7986_v50  ;;  %v13777_v50 = vld [vmem:[%s16387_s13 + $0x1a8] sm:$0xff]  }
0x5017   : > { %v7988_v55 = vmul.f32 1.442695, %v7987_v54 }
0x5019   : > { %13896 = vpow2.f32 %v7988_v55  ;;  %v13778_v55 = vld [vmem:[%s16387_s13 + $0x220] sm:$0xff]  }
0x5023   : > { %v13897_v56 = vpop.eup %13896 }
0x5024   : > { %v7990_v58 = vsel %vm1056_vm3, %v13897_v56, 0.0 }
0x5025   : > { %7991 = vadd.xlane.f32.xlu1 %v7990_v58 }
0x50b2   : > { %v7992_v60 = vpop.xlane.xlu1 %7991 }
0x50b3   : > { %13898 = vrcp.f32 %v7992_v60 }
0x50bd   : > { %v13899_v61 = vpop.eup %13898 }
0x50be   : > { %v7994_v63 = vmul.f32 %v13899_v61, %v13897_v56  ;;  %v13779_v61 = vld [vmem:[%s16387_s13 + $0x228] sm:$0xff]  }
0x50c0   : > { %v7995_v3 = vpack.c.bf16 %v7994_v63, %v7994_v63  ;;  %v11895_v63 = vld [vmem:[%s16390_s14 + $0x1e] ss:$0 sm:$0xff] }
0x50c2   : > { %13268 = vmatmul.mubr.msk.bf16.vlgmr.msra.gmra.mrb[208].mxu1 %vm1056_vm3, %v7995_v3 }
0x50c3   : > { %13280 = vmatpush3.bf16.msra.mxu1 %v13772_v2  ;;  %13283 = vmatprep.mubr.msk.bf16.mxu1 %vm14032_vm0, %v14031_v1 }
0x50c4   : > { %13281 = vmatprep.subr.bf16.mxu1 %v14031_v1 }
0x50c7   : > { %13282 = vmatpush3.bf16.msra.mxu1 %v13773_v4 }
0x50c8   : > { %13295 = vmatprep.subr.bf16.mxu1 %v14031_v1 }
0x50ca   : > { %13284 = vmatmul.mubr.msk.bf16.vlgmr.msra.gmra.mrb[212].mxu1 %vm848_vm1, %v15599_v0 }
0x50cb   : > { %13297 = vmatprep.mubr.msk.bf16.mxu1 %vm14032_vm0, %v14031_v1 }
0x5195   : > { %v8037_v5 = vpop.f32.mrb[208].mxu1 }
0x5196   : > { %v13269_v8 = vpop.f32.mrb[209].mxu1  ;;  %v8043_v43 = vpack.c.bf16 %v8037_v5, %v8037_v5 }
0x5197   : > { %v8040_v57 = vpop.f32.mrb[210].mxu1 }
0x5198   : > { %v13270_v9 = vpop.f32.mrb[211].mxu1 }
0x519d   : > { %v8170_v11 = vpop.f32.mrb[212].mxu1 }
0x519e   : > { %v8171_v14 = vadd.f32 %v11863_v10, %v8170_v11  ;;  %v13285_v17 = vpop.f32.mrb[213].mxu1 }
0x519f   : > { %v8173_v18 = vpop.f32.mrb[214].mxu1 }
0x51a0   : > { %8242 = vxpose.xlu1.b32.start.end [1/1] (short) (narrow) %v8171_v14, 8  ;;  %v13286_v19 = vpop.f32.mrb[215].mxu1 }
0x5220   : > { %v8258_v23 = vpop.trf.xlu1 }
0x5221   : > { %v8274_v16 = vpack.c.bf16 %v8258_v23, %v8258_v23 }
0x5223   : > { %v8279_v26 = vsel %vm1060_vm2, %v8274_v16, 0 }
0x5224   : > { %13296 = vmatpush3.bf16.msra.mxu1 %v8279_v26 }
0x5225   : > { %13307 = vmatprep.subr.bf16.mxu1 %v14031_v1 }
0x5227   : > { %13298 = vmatmul.mubr.msk.bf16.vlgmr.msra.gmra.mrb[216].mxu1 %vm1056_vm3, %v8241_v32 }
0x5228   : > { %13309 = vmatprep.mubr.msk.bf16.mxu1 %vm14032_vm0, %v14031_v1  ;;  %13308 = vmatpush3.bf16.msra.mxu1 %v8389_v47 }
0x5229   : > { %13319 = vmatprep.subr.bf16.mxu1 %v14031_v1 }
0x52fa   : > { %v8315_v34 = vpop.f32.mrb[216].mxu1 }
0x52fb   : > { %v8321_v35 = vmul.f32 0.35355338, %v8315_v34  ;;  %v13299_v36 = vpop.f32.mrb[217].mxu1 }
0x52fc   : > { %v8318_v7 = vpop.f32.mrb[218].mxu1 }
0x52fd   : > { %v13300_v37 = vpop.f32.mrb[219].mxu1  ;;  %v8322_v12 = vsel %vm14981_vm10, %v8321_v35, -1e+10  ;;  %v11904_v35 = vld [vmem:[%s16390_s14 + $0x22] ss:$0 sm:$0xff] }
0x52fe   : > { %v8323_v31 = vsel %vm1056_vm3, %v8322_v12, -inf }
0x52ff   : > { %8324 = vmax.xlane.f32.xlu0 %v8323_v31 }
0x538c   : > { %v8325_v22 = vpop.xlane.xlu0 %8324 }
0x538d   : > { %v8326_v38 = vsub.f32 %v8322_v12, %v8325_v22 }
0x538f   : > { %v8327_v15 = vmul.f32 1.442695, %v8326_v38 }
0x5391   : > { %13900 = vpow2.f32 %v8327_v15 }
0x539b   : > { %v13901_v39 = vpop.eup %13900 }
0x539c   : > { %v8329_v40 = vsel %vm1056_vm3, %v13901_v39, 0.0 }
0x539d   : > { %8330 = vadd.xlane.f32.xlu1 %v8329_v40 }
0x542a   : > { %v8331_v29 = vpop.xlane.xlu1 %8330 }
0x542b   : > { %13902 = vrcp.f32 %v8331_v29 }
0x5435   : > { %v13903_v25 = vpop.eup %13902 }
0x5436   : > { %v8333_v42 = vmul.f32 %v13903_v25, %v13901_v39 }
0x5438   : > { %v8334_v46 = vpack.c.bf16 %v8333_v42, %v8333_v42 }
0x543a   : > { %13304 = vmatmul.mubr.msk.bf16.vlgmr.msra.gmra.mrb[224].mxu0 %vm1056_vm3, %v8334_v46 }
0x543b   : > { %13314 = vmatpush3.bf16.msra.mxu0 %v8435_v20  ;;  %13315 = vmatprep.mubr.msk.bf16.mxu0 %vm14032_vm0, %v14031_v1 }
0x543c   : > { %13327 = vmatprep.subr.bf16.mxu0 %v14031_v1 }
0x5442   : > { %13316 = vmatmul.mubr.msk.bf16.vlgmr.msra.gmra.mrb[228].mxu0 %vm1056_vm3, %v8043_v43 }
0x5443   : > { %13328 = vmatpush3.bf16.msra.mxu0 %v13774_v27  ;;  %13331 = vmatprep.mubr.msk.bf16.mxu0 %vm14032_vm0, %v14031_v1 }
0x5444   : > { %13329 = vmatprep.subr.bf16.mxu0 %v14031_v1 }
0x5447   : > { %13330 = vmatpush3.bf16.msra.mxu0 %v13775_v44 }
0x5448   : > { %13343 = vmatprep.subr.bf16.mxu0 %v14031_v1 }
0x544a   : > { %13332 = vmatmul.mubr.msk.bf16.vlgmr.msra.gmra.mrb[232].mxu0 %vm848_vm1, %v15599_v0 }
0x544b   : > { %13345 = vmatprep.mubr.msk.bf16.mxu0 %vm14032_vm0, %v14031_v1 }
0x550d   : > { %v8376_v48 = vpop.f32.mrb[224].mxu0 }
0x550e   : > { %v8382_v59 = vpack.c.bf16 %v8376_v48, %v8376_v48  ;;  %v13305_v51 = vpop.f32.mrb[225].mxu0 }
0x550f   : > { %v8379_v52 = vpop.f32.mrb[226].mxu0  ;;  %v13781_v51 = vld [vmem:[%s16387_s13 + $0x1b8] sm:$0xff]  }
0x5510   : > { %v13306_v53 = vpop.f32.mrb[227].mxu0  ;;  %13310 = vmatmul.mubr.msk.bf16.vlgmr.msra.gmra.mrb[220].mxu1 %vm1056_vm3, %v8382_v59  ;;  %v13782_v52 = vld [vmem:[%s16387_s13 + $0x230] sm:$0xff]  }
0x5511   : > { %13320 = vmatpush3.bf16.msra.mxu1 %v13776_v49  ;;  %13323 = vmatprep.mubr.msk.bf16.mxu1 %vm14032_vm0, %v14031_v1  ;;  %v13780_v49 = vld [vmem:[%s16387_s13 + $0x1b0] sm:$0xff]   ;;  %v13783_v53 = vld [vmem:[%s16387_s13 + $0x238] sm:$0xff]  }
0x5512   : > { %13321 = vmatprep.subr.bf16.mxu1 %v14031_v1 }
0x5515   : > { %v8471_v54 = vpop.f32.mrb[228].mxu0  ;;  %13322 = vmatpush3.bf16.msra.mxu1 %v13777_v50  ;;  %v11910_v50 = vld [vmem:[%s16316_s15 + $0x28] sm:$0xf] }
0x5516   : > { %v13317_v56 = vpop.f32.mrb[229].mxu0  ;;  %13335 = vmatprep.subr.bf16.mxu1 %v14031_v1 }
0x5517   : > { %v8474_v58 = vpop.f32.mrb[230].mxu0  ;;  %v13784_v56 = vld [vmem:[%s16387_s13 + $0x1f0] sm:$0xff]  }
0x5518   : > { %v13318_v60 = vpop.f32.mrb[231].mxu0  ;;  %13324 = vmatmul.mubr.msk.bf16.vlgmr.msra.gmra.mrb[224].mxu1 %vm848_vm1, %v15599_v0 }
0x5519   : > { %13336 = vmatpush3.bf16.msra.mxu1 %v13778_v55  ;;  %13339 = vmatprep.mubr.msk.bf16.mxu1 %vm14032_vm0, %v14031_v1 }
0x551a   : > { %13337 = vmatprep.subr.bf16.mxu1 %v14031_v1 }
0x551d   : > { %v8601_v2 = vpop.f32.mrb[232].mxu0  ;;  %13338 = vmatpush3.bf16.msra.mxu1 %v13779_v61 }
0x551e   : > { %v8602_v3 = vadd.f32 %v11895_v63, %v8601_v2  ;;  %v13333_v4 = vpop.f32.mrb[233].mxu0  ;;  %13349 = vmatprep.subr.bf16.mxu1 %v14031_v1  ;;  %v13785_v2 = vld [vmem:[%s16387_s13 + $0x1f8] sm:$0xff]  }
0x551f   : > { %v8604_v5 = vpop.f32.mrb[234].mxu0 }
0x5520   : > { %13340 = vmatmul.mubr.msk.bf16.vlgmr.msra.gmra.mrb[228].mxu1 %vm848_vm1, %v15599_v0  ;;  %8673 = vxpose.xlu0.b32.start.end [1/1] (short) (narrow) %v8602_v3, 8  ;;  %v13334_v8 = vpop.f32.mrb[235].mxu0 }
0x5521   : > { %13351 = vmatprep.mubr.msk.bf16.mxu1 %vm14032_vm0, %v14031_v1 }
0x55a0   : > { %v8689_v57 = vpop.trf.xlu0 }
0x55a1   : > { %v8705_v9 = vpack.c.bf16 %v8689_v57, %v8689_v57  ;;  %v11935_v57 = vld [vmem:[%s16390_s14 + $0x23] ss:$0 sm:$0xff] }
0x55a3   : > { %v8710_v10 = vsel %vm1060_vm2, %v8705_v9, 0 }
0x55a4   : > { %13344 = vmatpush3.bf16.msra.mxu0 %v8710_v10 }
0x55a5   : > { %13355 = vmatprep.subr.bf16.mxu0 %v14031_v1 }
0x55e3   : > { %v8425_v11 = vpop.f32.mrb[220].mxu1 }
0x55e4   : > { %v15757_v14 = vadd.f32 %v8471_v54, %v8425_v11  ;;  %v13311_v17 = vpop.f32.mrb[221].mxu1  ;;  %v8820_v54 = vsel %vm1060_vm2, %v11910_v50, 0 }
0x55e5   : > { %v8428_v18 = vpop.f32.mrb[222].mxu1 }
0x55e6   : > { %v13312_v19 = vpop.f32.mrb[223].mxu1 }
0x55eb   : > { %v8536_v23 = vpop.f32.mrb[224].mxu1 }
0x55ec   : > { %v8537_v24 = vadd.f32 %v11886_v21, %v8536_v23  ;;  %v13325_v16 = vpop.f32.mrb[225].mxu1 }
0x55ed   : > { %v8539_v26 = vpop.f32.mrb[226].mxu1 }
0x55ee   : > { %v8672_v32 = vpack.c.bf16 %v8537_v24, %v8537_v24  ;;  %v13326_v34 = vpop.f32.mrb[227].mxu1 }
0x55f0   : > { %13346 = vmatmul.mubr.msk.bf16.vlgmr.msra.gmra.mrb[236].mxu0 %vm1056_vm3, %v8672_v32  ;;  %v11926_v32 = vld [vmem:[%s16390_s14 + $0x1f] ss:$0 sm:$0xff] }
0x55f1   : > { %13357 = vmatprep.mubr.msk.bf16.mxu0 %vm14032_vm0, %v14031_v1  ;;  %13356 = vmatpush3.bf16.msra.mxu0 %v8820_v54 }
0x55f2   : > { %13369 = vmatprep.subr.bf16.mxu0 %v14031_v1 }
0x55f3   : > { %v8666_v36 = vpop.f32.mrb[228].mxu1 }
0x55f4   : > { %v8667_v7 = vadd.f32 %v11904_v35, %v8666_v36  ;;  %v13341_v37 = vpop.f32.mrb[229].mxu1 }
0x55f5   : > { %v8669_v12 = vpop.f32.mrb[230].mxu1 }
0x55f6   : > { %v8766_v31 = vpack.c.bf16 %v8667_v7, %v8667_v7  ;;  %v13342_v22 = vpop.f32.mrb[231].mxu1  ;;  %v11917_v12 = vld [vmem:[%s16390_s14 + $0x1b] ss:$0 sm:$0xff] }
0x55f8   : > { %v8771_v38 = vsel %vm1060_vm2, %v8766_v31, 0 }
0x55f9   : > { %13350 = vmatpush3.bf16.msra.mxu1 %v8771_v38 }
0x55fa   : > { %13361 = vmatprep.subr.bf16.mxu1 %v14031_v1 }
0x56c3   : > { %v8746_v15 = vpop.f32.mrb[236].mxu0 }
0x56c4   : > { %v8752_v39 = vmul.f32 0.35355338, %v8746_v15  ;;  %v13347_v40 = vpop.f32.mrb[237].mxu0 }
0x56c5   : > { %v8749_v29 = vpop.f32.mrb[238].mxu0 }
0x56c6   : > { %v13348_v25 = vpop.f32.mrb[239].mxu0  ;;  %v8753_v41 = vsel %vm14981_vm10, %v8752_v39, -1e+10 }
0x56c7   : > { %v8754_v42 = vsel %vm1056_vm3, %v8753_v41, -inf }
0x56c8   : > { %8755 = vmax.xlane.f32.xlu1 %v8754_v42 }
0x5755   : > { %v8756_v46 = vpop.xlane.xlu1 %8755 }
0x5756   : > { %v8757_v20 = vsub.f32 %v8753_v41, %v8756_v46 }
0x5758   : > { %v8758_v27 = vmul.f32 1.442695, %v8757_v20 }
0x575a   : > { %13904 = vpow2.f32 %v8758_v27 }
0x5764   : > { %v13905_v43 = vpop.eup %13904 }
0x5765   : > { %v8760_v44 = vsel %vm1056_vm3, %v13905_v43, 0.0 }
0x5766   : > { %8761 = vadd.xlane.f32.xlu1 %v8760_v44 }
0x57f3   : > { %v8762_v6 = vpop.xlane.xlu1 %8761 }
0x57f4   : > { %13906 = vrcp.f32 %v8762_v6 }
0x57fe   : > { %v13907_v47 = vpop.eup %13906 }
0x57ff   : > { %v8764_v48 = vmul.f32 %v13907_v47, %v13905_v43 }
0x5801   : > { %v8765_v59 = vpack.c.bf16 %v8764_v48, %v8764_v48 }
0x5803   : > { %13352 = vmatmul.mubr.msk.bf16.vlgmr.msra.gmra.mrb[232].mxu1 %vm1056_vm3, %v8765_v59 }
0x5804   : > { %13362 = vmatpush3.bf16.msra.mxu1 %v13780_v49  ;;  %13365 = vmatprep.mubr.msk.bf16.mxu1 %vm14032_vm0, %v14031_v1 }
0x5805   : > { %13363 = vmatprep.subr.bf16.mxu1 %v14031_v1 }
0x5808   : > { %13364 = vmatpush3.bf16.msra.mxu1 %v13781_v51  ;;  %v9206_v51 = vsel %vm1060_vm2, %v11941_v13, 0 }
0x5809   : > { %13377 = vmatprep.subr.bf16.mxu1 %v14031_v1 }
0x580b   : > { %13366 = vmatmul.mubr.msk.bf16.vlgmr.msra.gmra.mrb[236].mxu1 %vm848_vm1, %v15599_v0 }
0x580c   : > { %13378 = vmatpush3.bf16.msra.mxu1 %v13782_v52  ;;  %13381 = vmatprep.mubr.msk.bf16.mxu1 %vm14032_vm0, %v14031_v1 }
0x580d   : > { %13379 = vmatprep.subr.bf16.mxu1 %v14031_v1 }
0x5810   : > { %13380 = vmatpush3.bf16.msra.mxu1 %v13783_v53  ;;  %v13786_v53 = vld [vmem:[%s16387_s13 + $0x280] sm:$0xff]  }
0x5811   : > { %13391 = vmatprep.subr.bf16.mxu1 %v14031_v1 }
0x5813   : > { %13382 = vmatmul.mubr.msk.bf16.vlgmr.msra.gmra.mrb[240].mxu1 %vm848_vm1, %v15599_v0 }
0x5814   : > { %13393 = vmatprep.mubr.msk.bf16.mxu1 %vm14032_vm0, %v14031_v1 }
0x58d6   : > { %v8807_v55 = vpop.f32.mrb[232].mxu1 }
0x58d7   : > { %v8813_v58 = vpack.c.bf16 %v8807_v55, %v8807_v55  ;;  %v13353_v60 = vpop.f32.mrb[233].mxu1 }
0x58d8   : > { %v8810_v61 = vpop.f32.mrb[234].mxu1  ;;  %v11943_v60 = vld [vmem:[%s16317_s16 + $0x2] ss:$0 sm:$0xff] }
0x58d9   : > { %v13354_v63 = vpop.f32.mrb[235].mxu1  ;;  %13358 = vmatmul.mubr.msk.bf16.vlgmr.msra.gmra.mrb[240].mxu0 %vm1056_vm3, %v8813_v58  ;;  %v13787_v58 = vld [vmem:[%s16387_s13 + $0x288] sm:$0xff]  }
0x58da   : > { %13370 = vmatpush3.bf16.msra.mxu0 %v13784_v56  ;;  %13373 = vmatprep.mubr.msk.bf16.mxu0 %vm14032_vm0, %v14031_v1 }
0x58db   : > { %13371 = vmatprep.subr.bf16.mxu0 %v14031_v1 }
0x58de   : > { %v8922_v3 = vpop.f32.mrb[236].mxu1  ;;  %13372 = vmatpush3.bf16.msra.mxu0 %v13785_v2 }
0x58df   : > { %v13367_v4 = vpop.f32.mrb[237].mxu1  ;;  %13385 = vmatprep.subr.bf16.mxu0 %v14031_v1 }
0x58e0   : > { %v8925_v5 = vpop.f32.mrb[238].mxu1 }
0x58e1   : > { %v13368_v8 = vpop.f32.mrb[239].mxu1  ;;  %13374 = vmatmul.mubr.msk.bf16.vlgmr.msra.gmra.mrb[244].mxu0 %vm848_vm1, %v15599_v0 }
0x58e2   : > { %13387 = vmatprep.mubr.msk.bf16.mxu0 %vm14032_vm0, %v14031_v1 }
0x58e6   : > { %v9052_v9 = vpop.f32.mrb[240].mxu1 }
0x58e7   : > { %v9053_v10 = vadd.f32 %v11935_v57, %v9052_v9  ;;  %v13383_v11 = vpop.f32.mrb[241].mxu1 }
0x58e8   : > { %v9055_v17 = vpop.f32.mrb[242].mxu1 }
0x58e9   : > { %v9152_v18 = vpack.c.bf16 %v9053_v10, %v9053_v10  ;;  %v13384_v19 = vpop.f32.mrb[243].mxu1 }
0x58eb   : > { %v9157_v21 = vsel %vm1060_vm2, %v9152_v18, 0 }
0x58ec   : > { %13392 = vmatpush3.bf16.msra.mxu1 %v9157_v21 }
0x58ed   : > { %13403 = vmatprep.subr.bf16.mxu1 %v14031_v1 }
0x59ac   : > { %v8856_v23 = vpop.f32.mrb[240].mxu0 }
0x59ad   : > { %v15827_v0 = vadd.f32 %v8856_v23, %v15757_v14  ;;  %v13359_v24 = vpop.f32.mrb[241].mxu0  ;;  %v8923_v14 = vadd.f32 %v11917_v12, %v8922_v3 }
0x59ae   : > { %v8859_v16 = vpop.f32.mrb[242].mxu0 }
0x59af   : > { %v13360_v26 = vpop.f32.mrb[243].mxu0  ;;  %v9058_v15 = vpack.c.bf16 %v8923_v14, %v8923_v14  ;;  %v11960_v16 = vld [vmem:[%s16390_s14 + $0x28] ss:$0 sm:$0xff] }
0x59b4   : > { %v8987_v34 = vpop.f32.mrb[244].mxu0 }
0x59b5   : > { %v8988_v35 = vadd.f32 %v11926_v32, %v8987_v34  ;;  %v13375_v36 = vpop.f32.mrb[245].mxu0 }
0x59b6   : > { %v8990_v7 = vpop.f32.mrb[246].mxu0  ;;  %v11817_v36 = vld [vmem:[%s16322_s21 + $0x6] sm:$0x3] }
0x59b7   : > { %9059 = vxpose.xlu1.b32.start.end [1/1] (short) (narrow) %v8988_v35, 8  ;;  %v13376_v37 = vpop.f32.mrb[247].mxu0  ;;  %v9273_v7 = vrot.slane %v11817_v36, %v14292_v28 }
0x5a37   : > { %v9075_v31 = vpop.trf.xlu1 }
0x5a38   : > { %v9091_v22 = vpack.c.bf16 %v9075_v31, %v9075_v31  ;;  %v9278_v31 = vrot.slane %v11817_v36, %v14557_v30  ;;  %v13796_v36 = vld [vmem:[%s16387_s13 + $0x290] sm:$0xff]  }
0x5a3a   : > { %v9096_v38 = vsel %vm1060_vm2, %v9091_v22, 0 }
0x5a3b   : > { %13386 = vmatpush3.bf16.msra.mxu0 %v9096_v38  ;;  %v13790_v38 = vld [vmem:[%s16387_s13 + $0x2c0] sm:$0xff]  }
0x5a3c   : > { %13397 = vmatprep.subr.bf16.mxu0 %v14031_v1 }
0x5a3e   : > { %13388 = vmatmul.mubr.msk.bf16.vlgmr.msra.gmra.mrb[248].mxu0 %vm1056_vm3, %v9058_v15 }
0x5a3f   : > { %13399 = vmatprep.mubr.msk.bf16.mxu0 %vm14032_vm0, %v14031_v1  ;;  %13398 = vmatpush3.bf16.msra.mxu0 %v9206_v51 }
0x5a40   : > { %13411 = vmatprep.subr.bf16.mxu0 %v14031_v1 }
0x5b11   : > { %v9132_v39 = vpop.f32.mrb[248].mxu0 }
0x5b12   : > { %v9138_v40 = vmul.f32 0.35355338, %v9132_v39  ;;  %v13389_v29 = vpop.f32.mrb[249].mxu0  ;;  %v13791_v39 = vld [vmem:[%s16387_s13 + $0x2c8] sm:$0xff]  }
0x5b13   : > { %v9135_v25 = vpop.f32.mrb[250].mxu0 }
0x5b14   : > { %v13390_v41 = vpop.f32.mrb[251].mxu0  ;;  %v9139_v42 = vsel %vm14981_vm10, %v9138_v40, -1e+10 }
0x5b15   : > { %v9140_v46 = vsel %vm1056_vm3, %v9139_v42, -inf  ;;  %v11951_v41 = vld [vmem:[%s16390_s14 + $0x24] ss:$0 sm:$0xff] }
0x5b16   : > { %9141 = vmax.xlane.f32.xlu0 %v9140_v46 }
0x5ba3   : > { %v9142_v20 = vpop.xlane.xlu0 %9141 }
0x5ba4   : > { %v9143_v27 = vsub.f32 %v9139_v42, %v9142_v20 }
0x5ba6   : > { %v9144_v43 = vmul.f32 1.442695, %v9143_v27 }
0x5ba8   : > { %13908 = vpow2.f32 %v9144_v43  ;;  %v13792_v43 = vld [vmem:[%s16387_s13 + $0x250] sm:$0xff]  }
0x5bb2   : > { %v13909_v44 = vpop.eup %13908 }
0x5bb3   : > { %v9146_v6 = vsel %vm1056_vm3, %v13909_v44, 0.0 }
0x5bb4   : > { %9147 = vadd.xlane.f32.xlu0 %v9146_v6 }
0x5c41   : > { %v9148_v47 = vpop.xlane.xlu0 %9147 }
0x5c42   : > { %13910 = vrcp.f32 %v9148_v47  ;;  %v11969_v47 = vld [vmem:[%s16390_s14 + $0x2c] ss:$0 sm:$0xff] }
0x5c4c   : > { %v13911_v48 = vpop.eup %13910 }
0x5c4d   : > { %v9150_v49 = vmul.f32 %v13911_v48, %v13909_v44  ;;  %v13793_v48 = vld [vmem:[%s16387_s13 + $0x258] sm:$0xff]  }
0x5c4f   : > { %v9151_v59 = vpack.c.bf16 %v9150_v49, %v9150_v49 }
0x5c51   : > { %13394 = vmatmul.mubr.msk.bf16.vlgmr.msra.gmra.mrb[244].mxu1 %vm1056_vm3, %v9151_v59 }
0x5c52   : > { %13407 = vmatprep.mubr.msk.bf16.mxu1 %vm14032_vm0, %v14031_v1 }
0x5d24   : > { %v9193_v52 = vpop.f32.mrb[244].mxu1 }
0x5d25   : > { %v9199_v50 = vpack.c.bf16 %v9193_v52, %v9193_v52  ;;  %v13395_v54 = vpop.f32.mrb[245].mxu1  ;;  %v13794_v52 = vld [vmem:[%s16387_s13 + $0x2d0] sm:$0xff]  }
0x5d26   : > { %v9196_v55 = vpop.f32.mrb[246].mxu1 }
0x5d27   : > { %v13396_v56 = vpop.f32.mrb[247].mxu1  ;;  %13400 = vmatmul.mubr.msk.bf16.vlgmr.msra.gmra.mrb[252].mxu0 %vm1056_vm3, %v9199_v50  ;;  %v13795_v55 = vld [vmem:[%s16387_s13 + $0x2d8] sm:$0xff]  }
0x5d28   : > { %13412 = vmatpush3.bf16.msra.mxu0 %v13786_v53  ;;  %13415 = vmatprep.mubr.msk.bf16.mxu0 %vm14032_vm0, %v14031_v1 }
0x5d29   : > { %13413 = vmatprep.subr.bf16.mxu0 %v14031_v1 }
0x5d2c   : > { %13414 = vmatpush3.bf16.msra.mxu0 %v13787_v58 }
0x5d2d   : > { %13427 = vmatprep.subr.bf16.mxu0 %v14031_v1 }
0x5d2f   : > { %13416 = vmatmul.mubr.msk.bf16.vlgmr.msra.gmra.mrb[0].mxu0 %vm848_vm1, %v15246_v45 }
0x5d30   : > { %13429 = vmatprep.mubr.msk.bf16.mxu0 %vm14032_vm0, %v14031_v1 }
0x5dfa   : > { %v9242_v61 = vpop.f32.mrb[252].mxu0 }
0x5dfb   : > { %v9248_v63 = vadd.f32 %v9242_v61, %v15827_v0  ;;  %v13401_v2 = vpop.f32.mrb[253].mxu0  ;;  %v13788_v0 = vld [vmem:[%s16387_s13 + $0x240] sm:$0xff]  }
0x5dfc   : > { %v9245_v3 = vpop.f32.mrb[254].mxu0  ;;  %13404 = vmatpush3.bf16.msra.mxu1 %v13788_v0 }
0x5dfd   : > { %v9255_v4 = vadd.f32 %v11943_v60, %v9248_v63  ;;  %v13402_v5 = vpop.f32.mrb[255].mxu0  ;;  %13405 = vmatprep.subr.bf16.mxu1 %v14031_v1 }
0x5dff   : > { %v9256_v8 = vadd.f32 %v9255_v4, %v15592_v62  ;;  %v13789_v62 = vld [vmem:[%s16387_s13 + $0x248] sm:$0xff]  }
0x5e00   : > { %13406 = vmatpush3.bf16.msra.mxu1 %v13789_v62 }
0x5e01   : > { %v9257_v57 = vsel %vm848_vm1, %v9256_v8, 0.0  ;;  %13419 = vmatprep.subr.bf16.mxu1 %v14031_v1 }
0x5e02   : > { %9258 = vadd.xlane.f32.xlu1 %v9257_v57  ;;  %v9412_v9 = vpop.f32.mrb[0].mxu0 }
0x5e03   : > { %v13417_v10 = vpop.f32.mrb[1].mxu0  ;;  %v9413_v26 = vadd.f32 %v11960_v16, %v9412_v9  ;;  %v11999_v9 = vld [vmem:[%s16390_s14 + $0x2d] ss:$0 sm:$0xff] }
0x5e04   : > { %v9415_v11 = vpop.f32.mrb[2].mxu0 }
0x5e05   : > { %v13418_v17 = vpop.f32.mrb[3].mxu0 }
0x5e8f   : > { %v9259_v18 = vpop.xlane.xlu1 %9258 }
0x5e90   : > { %v9260_v19 = vmul.f32 0.03125, %v9259_v18 }
0x5e92   : > { %v9261_v21 = vsub.f32 %v9256_v8, %v9260_v19 }
0x5e94   : > { %v9262_v23 = vmul.f32 %v9261_v21, %v9261_v21 }
0x5e96   : > { %v9263_v24 = vsel %vm848_vm1, %v9262_v23, 0.0 }
0x5e97   : > { %9264 = vadd.xlane.f32.xlu0 %v9263_v24 }
0x5ec4   : > { %9484 = vxpose.xlu0.b32.start.end [1/1] (short) (narrow) %v9413_v26, 8 }
0x5f24   : > { %v9265_v32 = vpop.xlane.xlu0 %9264 }
0x5f25   : > { %v9266_v34 = vmul.f32 0.03125, %v9265_v32 }
0x5f27   : > { %v9267_v35 = vadd.f32 1e-05, %v9266_v34 }
0x5f29   : > { %13912 = vrsqrt.f32 %v9267_v35 }
0x5f33   : > { %v13913_v37 = vpop.eup %13912 }
0x5f34   : > { %v9269_v12 = vmul.f32 %v13913_v37, %v9261_v21  ;;  %v13797_v37 = vld [vmem:[%s16387_s13 + $0x298] sm:$0xff]  }
0x5f36   : > { %v9274_v14 = vmul.f32 %v9273_v7, %v9269_v12 }
0x5f38   : > { %v15890_v22 = vadd.f32 %v9278_v31, %v9274_v14 }
0x5f3a   : > { %v15897_v15 = vpack.c.bf16 %v15890_v22, %v15890_v22 }
0x5f3c   : > { %13408 = vmatmul.mubr.msk.bf16.vlgmr.msra.gmra.mrb[248].mxu1 %vm848_vm1, %v15897_v15 }
0x5f3d   : > { %13420 = vmatpush3.bf16.msra.mxu1 %v13790_v38  ;;  %13423 = vmatprep.mubr.msk.bf16.mxu1 %vm14032_vm0, %v14031_v1 }
0x5f3e   : > { %13421 = vmatprep.subr.bf16.mxu1 %v14031_v1 }
0x5f41   : > { %13422 = vmatpush3.bf16.msra.mxu1 %v13791_v39  ;;  %v11990_v39 = vld [vmem:[%s16390_s14 + $0x29] ss:$0 sm:$0xff] }
0x5f42   : > { %13433 = vmatprep.subr.bf16.mxu1 %v14031_v1 }
0x5f44   : > { %13424 = vmatmul.mubr.msk.bf16.vlgmr.msra.gmra.mrb[252].mxu1 %vm848_vm1, %v15246_v45  ;;  %v9500_v40 = vpop.trf.xlu0 }
0x5f45   : > { %v9516_v29 = vpack.c.bf16 %v9500_v40, %v9500_v40  ;;  %13435 = vmatprep.mubr.msk.bf16.mxu1 %vm14032_vm0, %v14031_v1 }
0x5f47   : > { %v9521_v25 = vsel %vm1060_vm2, %v9516_v29, 0 }
0x5f48   : > { %13428 = vmatpush3.bf16.msra.mxu0 %v9521_v25 }
0x5f49   : > { %13439 = vmatprep.subr.bf16.mxu0 %v14031_v1 }
0x600f   : > { %v9347_v42 = vpop.f32.mrb[248].mxu1 }
0x6010   : > { %v9348_v46 = vadd.f32 %v11951_v41, %v9347_v42  ;;  %v13409_v20 = vpop.f32.mrb[249].mxu1 }
0x6011   : > { %v9350_v27 = vpop.f32.mrb[250].mxu1 }
0x6012   : > { %v9483_v44 = vpack.c.bf16 %v9348_v46, %v9348_v46  ;;  %v13410_v6 = vpop.f32.mrb[251].mxu1  ;;  %v11981_v46 = vld [vmem:[%s16390_s14 + $0x25] ss:$0 sm:$0xff] }
0x6014   : > { %13430 = vmatmul.mubr.msk.bf16.vlgmr.msra.gmra.mrb[4].mxu0 %vm1056_vm3, %v9483_v44 }
0x6015   : > { %13440 = vmatpush3.bf16.msra.mxu0 %v13792_v43  ;;  %13443 = vmatprep.mubr.msk.bf16.mxu0 %vm14032_vm0, %v14031_v1 }
0x6016   : > { %13441 = vmatprep.subr.bf16.mxu0 %v14031_v1 }
0x6017   : > { %v9477_v49 = vpop.f32.mrb[252].mxu1 }
0x6018   : > { %v9478_v59 = vadd.f32 %v11969_v47, %v9477_v49  ;;  %v13425_v13 = vpop.f32.mrb[253].mxu1 }
0x6019   : > { %v9480_v51 = vpop.f32.mrb[254].mxu1  ;;  %13442 = vmatpush3.bf16.msra.mxu0 %v13793_v48 }
0x601a   : > { %v9577_v53 = vpack.c.bf16 %v9478_v59, %v9478_v59  ;;  %v13426_v50 = vpop.f32.mrb[255].mxu1  ;;  %13455 = vmatprep.subr.bf16.mxu0 %v14031_v1 }
0x601c   : > { %v9582_v54 = vsel %vm1060_vm2, %v9577_v53, 0  ;;  %13444 = vmatmul.mubr.msk.bf16.vlgmr.msra.gmra.mrb[8].mxu0 %vm848_vm1, %v15897_v15 }
0x601d   : > { %13434 = vmatpush3.bf16.msra.mxu1 %v9582_v54  ;;  %13456 = vmatpush3.bf16.msra.mxu0 %v13794_v52 }
0x601e   : > { %13457 = vmatprep.subr.bf16.mxu0 %v14031_v1  ;;  %13459 = vmatprep.mubr.msk.bf16.mxu0 %vm14032_vm0, %v14031_v1 }
0x601f   : > { %13447 = vmatprep.subr.bf16.mxu1 %v14031_v1 }
0x6021   : > { %13458 = vmatpush3.bf16.msra.mxu0 %v13795_v55 }
0x6022   : > { %13469 = vmatprep.subr.bf16.mxu0 %v14031_v1 }
0x6024   : > { %13460 = vmatmul.mubr.msk.bf16.vlgmr.msra.gmra.mrb[12].mxu0 %vm848_vm1, %v15246_v45 }
0x6025   : > { %13471 = vmatprep.mubr.msk.bf16.mxu0 %vm14032_vm0, %v14031_v1 }
0x60e7   : > { %v9557_v56 = vpop.f32.mrb[4].mxu0 }
0x60e8   : > { %v9563_v58 = vmul.f32 0.35355338, %v9557_v56  ;;  %v13431_v60 = vpop.f32.mrb[5].mxu0 }
0x60e9   : > { %v9560_v61 = vpop.f32.mrb[6].mxu0 }
0x60ea   : > { %v13432_v63 = vpop.f32.mrb[7].mxu0  ;;  %v9564_v2 = vsel %vm14296_vm5, %v9563_v58, -1e+10  ;;  %v11975_v61 = vld [vmem:[%s16316_s15 + $0x30] sm:$0xf] }
0x60eb   : > { %v9565_v3 = vsel %vm1056_vm3, %v9564_v2, -inf }
0x60ec   : > { %9566 = vmax.xlane.f32.xlu1 %v9565_v3  ;;  %v10016_v3 = vsel %vm1060_vm2, %v11975_v61, 0 }
0x60ef   : > { %v9686_v4 = vpop.f32.mrb[8].mxu0 }
0x60f0   : > { %v13445_v5 = vpop.f32.mrb[9].mxu0  ;;  %v9687_v27 = vadd.f32 %v11981_v46, %v9686_v4  ;;  %v13798_v4 = vld [vmem:[%s16387_s13 + $0x2a0] sm:$0xff]  }
0x60f1   : > { %v9689_v8 = vpop.f32.mrb[10].mxu0 }
0x60f2   : > { %v13446_v57 = vpop.f32.mrb[11].mxu0  ;;  %v9822_v6 = vpack.c.bf16 %v9687_v27, %v9687_v27  ;;  %v13799_v8 = vld [vmem:[%s16387_s13 + $0x2a8] sm:$0xff]  }
0x60f3   : > { %v12005_v57 = vld [vmem:[%s16316_s15 + $0x34] sm:$0xf] }
0x60f7   : > { %v9816_v10 = vpop.f32.mrb[12].mxu0 }
0x60f8   : > { %v9817_v11 = vadd.f32 %v11999_v9, %v9816_v10  ;;  %v13461_v17 = vpop.f32.mrb[13].mxu0  ;;  %v9970_v9 = vsel %vm1060_vm2, %v12005_v57, 0 }
0x60f9   : > { %v9819_v18 = vpop.f32.mrb[14].mxu0 }
0x60fa   : > { %v9916_v19 = vpack.c.bf16 %v9817_v11, %v9817_v11  ;;  %v13462_v21 = vpop.f32.mrb[15].mxu0  ;;  %v13800_v11 = vld [vmem:[%s16387_s13 + $0x260] sm:$0xff]  }
0x60fc   : > { %v9921_v23 = vsel %vm1060_vm2, %v9916_v19, 0 }
0x60fd   : > { %13470 = vmatpush3.bf16.msra.mxu0 %v9921_v23  ;;  %v13801_v23 = vld [vmem:[%s16387_s13 + $0x268] sm:$0xff]  }
0x60fe   : > { %13481 = vmatprep.subr.bf16.mxu0 %v14031_v1 }
0x6179   : > { %v9567_v24 = vpop.xlane.xlu1 %9566 }
0x617a   : > { %v9568_v0 = vsub.f32 %v9564_v2, %v9567_v24 }
0x617c   : > { %v9569_v62 = vmul.f32 1.442695, %v9568_v0  ;;  %v13802_v0 = vld [vmem:[%s16387_s13 + $0x2e0] sm:$0xff]  }
0x617e   : > { %13914 = vpow2.f32 %v9569_v62 }
0x6188   : > { %v13915_v16 = vpop.eup %13914 }
0x6189   : > { %v9571_v26 = vsel %vm1056_vm3, %v13915_v16, 0.0 }
0x618a   : > { %9572 = vadd.xlane.f32.xlu1 %v9571_v26 }
0x6217   : > { %v9573_v32 = vpop.xlane.xlu1 %9572 }
0x6218   : > { %13916 = vrcp.f32 %v9573_v32  ;;  %v13803_v32 = vld [vmem:[%s16387_s13 + $0x2e8] sm:$0xff]  }
0x6222   : > { %v13917_v34 = vpop.eup %13916 }
0x6223   : > { %v9575_v35 = vmul.f32 %v13917_v34, %v13915_v16  ;;  %v12022_v34 = vld [vmem:[%s16390_s14 + $0x2a] ss:$0 sm:$0xff] }
0x6225   : > { %v9576_v7 = vpack.c.bf16 %v9575_v35, %v9575_v35  ;;  %10830 = vst.msk [vmem:[%s15965_s5] sm:$0xff] %vm1056_vm3, %v9575_v35 }
0x6227   : > { %13436 = vmatmul.mubr.msk.bf16.vlgmr.msra.gmra.mrb[0].mxu1 %vm1056_vm3, %v9576_v7 }
0x6228   : > { %13448 = vmatpush3.bf16.msra.mxu1 %v13796_v36  ;;  %13451 = vmatprep.mubr.msk.bf16.mxu1 %vm14032_vm0, %v14031_v1 }
0x6229   : > { %13449 = vmatprep.subr.bf16.mxu1 %v14031_v1 }
0x622c   : > { %13450 = vmatpush3.bf16.msra.mxu1 %v13797_v37 }
0x622d   : > { %13463 = vmatprep.subr.bf16.mxu1 %v14031_v1 }
0x622f   : > { %13452 = vmatmul.mubr.msk.bf16.vlgmr.msra.gmra.mrb[4].mxu1 %vm848_vm1, %v15246_v45 }
0x6230   : > { %13465 = vmatprep.mubr.msk.bf16.mxu1 %vm14032_vm0, %v14031_v1 }
0x62fa   : > { %v9618_v12 = vpop.f32.mrb[0].mxu1 }
0x62fb   : > { %v13437_v31 = vpop.f32.mrb[1].mxu1  ;;  %v9624_v5 = vpack.c.bf16 %v9618_v12, %v9618_v12 }
0x62fc   : > { %v9621_v14 = vpop.f32.mrb[2].mxu1 }
0x62fd   : > { %v13438_v38 = vpop.f32.mrb[3].mxu1 }
0x6302   : > { %v9751_v40 = vpop.f32.mrb[4].mxu1 }
0x6303   : > { %v9752_v29 = vadd.f32 %v11990_v39, %v9751_v40  ;;  %v13453_v25 = vpop.f32.mrb[5].mxu1 }
0x6304   : > { %v9754_v41 = vpop.f32.mrb[6].mxu1 }
0x6305   : > { %9823 = vxpose.xlu1.b32.start.end [1/1] (short) (narrow) %v9752_v29, 8  ;;  %v13454_v42 = vpop.f32.mrb[7].mxu1 }
0x6306   : > { %v12013_v42 = vld [vmem:[%s16390_s14 + $0x26] ss:$0 sm:$0xff] }
0x6385   : > { %v9839_v20 = vpop.trf.xlu1 }
0x6386   : > { %v9855_v43 = vpack.c.bf16 %v9839_v20, %v9839_v20 }
0x6388   : > { %v9860_v44 = vsel %vm1060_vm2, %v9855_v43, 0 }
0x6389   : > { %13464 = vmatpush3.bf16.msra.mxu1 %v9860_v44 }
0x638a   : > { %13475 = vmatprep.subr.bf16.mxu1 %v14031_v1 }
0x638c   : > { %13466 = vmatmul.mubr.msk.bf16.vlgmr.msra.gmra.mrb[8].mxu1 %vm1056_vm3, %v9822_v6 }
0x638d   : > { %13477 = vmatprep.mubr.msk.bf16.mxu1 %vm14032_vm0, %v14031_v1  ;;  %13476 = vmatpush3.bf16.msra.mxu1 %v9970_v9 }
0x638e   : > { %13487 = vmatprep.subr.bf16.mxu1 %v14031_v1 }
0x645f   : > { %v9896_v47 = vpop.f32.mrb[8].mxu1 }
0x6460   : > { %v9902_v48 = vmul.f32 0.35355338, %v9896_v47  ;;  %v13467_v49 = vpop.f32.mrb[9].mxu1  ;;  %v12031_v47 = vld [vmem:[%s16390_s14 + $0x2e] ss:$0 sm:$0xff] }
0x6461   : > { %v9899_v59 = vpop.f32.mrb[10].mxu1 }
0x6462   : > { %v13468_v13 = vpop.f32.mrb[11].mxu1  ;;  %v9903_v51 = vsel %vm14296_vm5, %v9902_v48, -1e+10 }
0x6463   : > { %v9904_v52 = vsel %vm1056_vm3, %v9903_v51, -inf }
0x6464   : > { %9905 = vmax.xlane.f32.xlu0 %v9904_v52 }
0x64f1   : > { %v9906_v53 = vpop.xlane.xlu0 %9905 }
0x64f2   : > { %v9907_v50 = vsub.f32 %v9903_v51, %v9906_v53 }
0x64f4   : > { %v9908_v54 = vmul.f32 1.442695, %v9907_v50 }
0x64f6   : > { %13918 = vpow2.f32 %v9908_v54 }
0x6500   : > { %v13919_v55 = vpop.eup %13918 }
0x6501   : > { %v9910_v56 = vsel %vm1056_vm3, %v13919_v55, 0.0 }
0x6502   : > { %9911 = vadd.xlane.f32.xlu0 %v9910_v56 }
0x658f   : > { %v9912_v58 = vpop.xlane.xlu0 %9911 }
0x6590   : > { %13920 = vrcp.f32 %v9912_v58 }
0x659a   : > { %v13921_v60 = vpop.eup %13920 }
0x659b   : > { %v9914_v63 = vmul.f32 %v13921_v60, %v13919_v55 }
0x659d   : > { %v9915_v2 = vpack.c.bf16 %v9914_v63, %v9914_v63  ;;  %10831 = vst.msk [vmem:[%s15965_s5 + $0x8] sm:$0xff] %vm1056_vm3, %v9914_v63 }
0x659f   : > { %13472 = vmatmul.mubr.msk.bf16.vlgmr.msra.gmra.mrb[16].mxu0 %vm1056_vm3, %v9915_v2 }
0x65a0   : > { %13482 = vmatpush3.bf16.msra.mxu0 %v10016_v3  ;;  %13483 = vmatprep.mubr.msk.bf16.mxu0 %vm14032_vm0, %v14031_v1 }
0x65a1   : > { %13495 = vmatprep.subr.bf16.mxu0 %v14031_v1 }
0x65a7   : > { %13484 = vmatmul.mubr.msk.bf16.vlgmr.msra.gmra.mrb[20].mxu0 %vm1056_vm3, %v9624_v5 }
0x65a8   : > { %13496 = vmatpush3.bf16.msra.mxu0 %v13798_v4  ;;  %13499 = vmatprep.mubr.msk.bf16.mxu0 %vm14032_vm0, %v14031_v1 }
0x65a9   : > { %13497 = vmatprep.subr.bf16.mxu0 %v14031_v1 }
0x65ac   : > { %13498 = vmatpush3.bf16.msra.mxu0 %v13799_v8 }
0x65ad   : > { %13511 = vmatprep.subr.bf16.mxu0 %v14031_v1 }
0x65af   : > { %13500 = vmatmul.mubr.msk.bf16.vlgmr.msra.gmra.mrb[24].mxu0 %vm848_vm1, %v15246_v45 }
0x65b0   : > { %13513 = vmatprep.mubr.msk.bf16.mxu0 %vm14032_vm0, %v14031_v1 }
0x6672   : > { %v9957_v10 = vpop.f32.mrb[16].mxu0 }
0x6673   : > { %v9963_v17 = vpack.c.bf16 %v9957_v10, %v9957_v10  ;;  %v13473_v18 = vpop.f32.mrb[17].mxu0  ;;  %v13804_v10 = vld [vmem:[%s16387_s13 + $0x270] sm:$0xff]  }
0x6674   : > { %v9960_v19 = vpop.f32.mrb[18].mxu0  ;;  %v13806_v18 = vld [vmem:[%s16387_s13 + $0x2f0] sm:$0xff]  }
0x6675   : > { %v13474_v21 = vpop.f32.mrb[19].mxu0  ;;  %13478 = vmatmul.mubr.msk.bf16.vlgmr.msra.gmra.mrb[12].mxu1 %vm1056_vm3, %v9963_v17  ;;  %v13805_v17 = vld [vmem:[%s16387_s13 + $0x278] sm:$0xff]  }
0x6676   : > { %13488 = vmatpush3.bf16.msra.mxu1 %v13800_v11  ;;  %13491 = vmatprep.mubr.msk.bf16.mxu1 %vm14032_vm0, %v14031_v1  ;;  %v13807_v19 = vld [vmem:[%s16387_s13 + $0x2f8] sm:$0xff]  }
0x6677   : > { %13489 = vmatprep.subr.bf16.mxu1 %v14031_v1 }
0x667a   : > { %v10052_v24 = vpop.f32.mrb[20].mxu0  ;;  %13490 = vmatpush3.bf16.msra.mxu1 %v13801_v23 }
0x667b   : > { %v13485_v62 = vpop.f32.mrb[21].mxu0  ;;  %13503 = vmatprep.subr.bf16.mxu1 %v14031_v1 }
0x667c   : > { %v10055_v16 = vpop.f32.mrb[22].mxu0 }
0x667d   : > { %v13486_v26 = vpop.f32.mrb[23].mxu0  ;;  %13492 = vmatmul.mubr.msk.bf16.vlgmr.msra.gmra.mrb[16].mxu1 %vm848_vm1, %v15897_v15 }
0x667e   : > { %13504 = vmatpush3.bf16.msra.mxu1 %v13802_v0  ;;  %13507 = vmatprep.mubr.msk.bf16.mxu1 %vm14032_vm0, %v14031_v1 }
0x667f   : > { %13505 = vmatprep.subr.bf16.mxu1 %v14031_v1 }
0x6682   : > { %v10182_v35 = vpop.f32.mrb[24].mxu0  ;;  %13506 = vmatpush3.bf16.msra.mxu1 %v13803_v32  ;;  %v13809_v32 = vld [vmem:[%s16387_s13 + $0x2b8] sm:$0xff]  }
0x6683   : > { %v10183_v36 = vadd.f32 %v12022_v34, %v10182_v35  ;;  %v13501_v7 = vpop.f32.mrb[25].mxu0  ;;  %13517 = vmatprep.subr.bf16.mxu1 %v14031_v1 }
0x6684   : > { %v10185_v37 = vpop.f32.mrb[26].mxu0 }
0x6685   : > { %13508 = vmatmul.mubr.msk.bf16.vlgmr.msra.gmra.mrb[20].mxu1 %vm848_vm1, %v15246_v45  ;;  %10254 = vxpose.xlu1.b32.start.end [1/1] (short) (narrow) %v10183_v36, 8  ;;  %v13502_v12 = vpop.f32.mrb[27].mxu0  ;;  %v12062_v37 = vld [vmem:[%s16390_s14 + $0x2f] ss:$0 sm:$0xff] }
0x6686   : > { %13519 = vmatprep.mubr.msk.bf16.mxu1 %vm14032_vm0, %v14031_v1 }
0x6705   : > { %v10270_v31 = vpop.trf.xlu1 }
0x6706   : > { %v10286_v14 = vpack.c.bf16 %v10270_v31, %v10270_v31 }
0x6708   : > { %v10291_v38 = vsel %vm1060_vm2, %v10286_v14, 0 }
0x6709   : > { %13512 = vmatpush3.bf16.msra.mxu0 %v10291_v38 }
0x670a   : > { %13523 = vmatprep.subr.bf16.mxu0 %v14031_v1 }
0x6748   : > { %v10006_v39 = vpop.f32.mrb[12].mxu1 }
0x6749   : > { %v16058_v40 = vadd.f32 %v10052_v24, %v10006_v39  ;;  %v13479_v29 = vpop.f32.mrb[13].mxu1  ;;  %v13808_v24 = vld [vmem:[%s16387_s13 + $0x2b0] sm:$0xff]  }
0x674a   : > { %v10009_v25 = vpop.f32.mrb[14].mxu1 }
0x674b   : > { %v13480_v41 = vpop.f32.mrb[15].mxu1 }
0x6750   : > { %v10117_v46 = vpop.f32.mrb[16].mxu1 }
0x6751   : > { %v10118_v20 = vadd.f32 %v12013_v42, %v10117_v46  ;;  %v13493_v27 = vpop.f32.mrb[17].mxu1 }
0x6752   : > { %v10120_v43 = vpop.f32.mrb[18].mxu1  ;;  %v12053_v27 = vld [vmem:[%s16390_s14 + $0x2b] ss:$0 sm:$0xff] }
0x6753   : > { %v10253_v44 = vpack.c.bf16 %v10118_v20, %v10118_v20  ;;  %v13494_v6 = vpop.f32.mrb[19].mxu1 }
0x6755   : > { %13514 = vmatmul.mubr.msk.bf16.vlgmr.msra.gmra.mrb[28].mxu0 %vm1056_vm3, %v10253_v44 }
0x6756   : > { %13525 = vmatprep.mubr.msk.bf16.mxu0 %vm14032_vm0, %v14031_v1 }
0x6758   : > { %v10247_v48 = vpop.f32.mrb[20].mxu1 }
0x6759   : > { %v10248_v49 = vadd.f32 %v12031_v47, %v10247_v48  ;;  %v13509_v59 = vpop.f32.mrb[21].mxu1 }
0x675a   : > { %v10250_v13 = vpop.f32.mrb[22].mxu1 }
0x675b   : > { %v10347_v51 = vpack.c.bf16 %v10248_v49, %v10248_v49  ;;  %v13510_v52 = vpop.f32.mrb[23].mxu1  ;;  %v12044_v49 = vld [vmem:[%s16390_s14 + $0x27] ss:$0 sm:$0xff] }
0x675d   : > { %v10352_v53 = vsel %vm1060_vm2, %v10347_v51, 0 }
0x675e   : > { %13518 = vmatpush3.bf16.msra.mxu1 %v10352_v53 }
0x675f   : > { %13529 = vmatprep.subr.bf16.mxu1 %v14031_v1 }
0x6828   : > { %v10327_v50 = vpop.f32.mrb[28].mxu0 }
0x6829   : > { %v10333_v54 = vmul.f32 0.35355338, %v10327_v50  ;;  %v13515_v55 = vpop.f32.mrb[29].mxu0 }
0x682a   : > { %v10330_v56 = vpop.f32.mrb[30].mxu0 }
0x682b   : > { %v13516_v58 = vpop.f32.mrb[31].mxu0  ;;  %v10334_v60 = vsel %vm14296_vm5, %v10333_v54, -1e+10 }
0x682c   : > { %v10335_v61 = vsel %vm1056_vm3, %v10334_v60, -inf }
0x682d   : > { %10336 = vmax.xlane.f32.xlu0 %v10335_v61 }
0x68ba   : > { %v10337_v63 = vpop.xlane.xlu0 %10336 }
0x68bb   : > { %v10338_v2 = vsub.f32 %v10334_v60, %v10337_v63 }
0x68bd   : > { %v10339_v3 = vmul.f32 1.442695, %v10338_v2 }
0x68bf   : > { %13922 = vpow2.f32 %v10339_v3 }
0x68c9   : > { %v13923_v4 = vpop.eup %13922 }
0x68ca   : > { %v10341_v5 = vsel %vm1056_vm3, %v13923_v4, 0.0 }
0x68cb   : > { %10342 = vadd.xlane.f32.xlu1 %v10341_v5 }
0x6958   : > { %v10343_v8 = vpop.xlane.xlu1 %10342 }
0x6959   : > { %13924 = vrcp.f32 %v10343_v8 }
0x6963   : > { %v13925_v57 = vpop.eup %13924 }
0x6964   : > { %v10345_v9 = vmul.f32 %v13925_v57, %v13923_v4 }
0x6966   : > { %v10346_v11 = vpack.c.bf16 %v10345_v9, %v10345_v9  ;;  %10832 = vst.msk [vmem:[%s15965_s5 + $0x10] sm:$0xff] %vm1056_vm3, %v10345_v9 }
0x6968   : > { %13520 = vmatmul.mubr.msk.bf16.vlgmr.msra.gmra.mrb[24].mxu1 %vm1056_vm3, %v10346_v11 }
0x6969   : > { %13530 = vmatpush3.bf16.msra.mxu1 %v13804_v10  ;;  %13533 = vmatprep.mubr.msk.bf16.mxu1 %vm14032_vm0, %v14031_v1  ;;  %v10787_v10 = vsel %vm1060_vm2, %v12068_v33, 0 }
0x696a   : > { %13531 = vmatprep.subr.bf16.mxu1 %v14031_v1 }
0x696d   : > { %13532 = vmatpush3.bf16.msra.mxu1 %v13805_v17 }
0x696e   : > { %13545 = vmatprep.subr.bf16.mxu1 %v14031_v1 }
0x6970   : > { %13534 = vmatmul.mubr.msk.bf16.vlgmr.msra.gmra.mrb[28].mxu1 %vm848_vm1, %v15897_v15  ;;  %v12037_v15 = vld [vmem:[%s16316_s15 + $0x38] sm:$0xf] }
0x6971   : > { %13546 = vmatpush3.bf16.msra.mxu1 %v13806_v18  ;;  %13549 = vmatprep.mubr.msk.bf16.mxu1 %vm14032_vm0, %v14031_v1  ;;  %v10401_v21 = vsel %vm1060_vm2, %v12037_v15, 0 }
0x6972   : > { %13547 = vmatprep.subr.bf16.mxu1 %v14031_v1  ;;  %13524 = vmatpush3.bf16.msra.mxu0 %v10401_v21  ;;  %v12070_v21 = vld [vmem:[%s16317_s16 + $0x3] ss:$0 sm:$0xff] }
0x6973   : > { %13537 = vmatprep.subr.bf16.mxu0 %v14031_v1 }
0x6975   : > { %13548 = vmatpush3.bf16.msra.mxu1 %v13807_v19 }
0x6976   : > { %13559 = vmatprep.subr.bf16.mxu1 %v14031_v1 }
0x6978   : > { %13550 = vmatmul.mubr.msk.bf16.vlgmr.msra.gmra.mrb[32].mxu1 %vm848_vm1, %v15246_v45 }
0x6979   : > { %13561 = vmatprep.mubr.msk.bf16.mxu1 %vm14032_vm0, %v14031_v1 }
0x6a3b   : > { %v10388_v23 = vpop.f32.mrb[24].mxu1 }
0x6a3c   : > { %v10394_v0 = vpack.c.bf16 %v10388_v23, %v10388_v23  ;;  %v13521_v62 = vpop.f32.mrb[25].mxu1 }
0x6a3d   : > { %v10391_v16 = vpop.f32.mrb[26].mxu1 }
0x6a3e   : > { %v13522_v26 = vpop.f32.mrb[27].mxu1  ;;  %13526 = vmatmul.mubr.msk.bf16.vlgmr.msra.gmra.mrb[32].mxu0 %vm1056_vm3, %v10394_v0 }
0x6a3f   : > { %13538 = vmatpush3.bf16.msra.mxu0 %v13808_v24  ;;  %13541 = vmatprep.mubr.msk.bf16.mxu0 %vm14032_vm0, %v14031_v1 }
0x6a40   : > { %13539 = vmatprep.subr.bf16.mxu0 %v14031_v1 }
0x6a43   : > { %v10503_v34 = vpop.f32.mrb[28].mxu1  ;;  %13540 = vmatpush3.bf16.msra.mxu0 %v13809_v32 }
0x6a44   : > { %v13535_v35 = vpop.f32.mrb[29].mxu1  ;;  %13553 = vmatprep.subr.bf16.mxu0 %v14031_v1  ;;  %v10504_v13 = vadd.f32 %v12044_v49, %v10503_v34 }
0x6a45   : > { %v10506_v36 = vpop.f32.mrb[30].mxu1 }
0x6a46   : > { %v13536_v7 = vpop.f32.mrb[31].mxu1  ;;  %13542 = vmatmul.mubr.msk.bf16.vlgmr.msra.gmra.mrb[36].mxu0 %vm848_vm1, %v15246_v45  ;;  %v10639_v52 = vpack.c.bf16 %v10504_v13, %v10504_v13 }
0x6a47   : > { %13555 = vmatprep.mubr.msk.bf16.mxu0 %vm14032_vm0, %v14031_v1 }
0x6a4b   : > { %v10633_v12 = vpop.f32.mrb[32].mxu1 }
0x6a4c   : > { %v10634_v31 = vadd.f32 %v12062_v37, %v10633_v12  ;;  %v13551_v14 = vpop.f32.mrb[33].mxu1 }
0x6a4d   : > { %v10636_v38 = vpop.f32.mrb[34].mxu1  ;;  %v13812_v14 = vld [vmem:[%s16320_s19 + $0x20] sm:$0xff]  }
0x6a4e   : > { %v10733_v39 = vpack.c.bf16 %v10634_v31, %v10634_v31  ;;  %v13552_v29 = vpop.f32.mrb[35].mxu1  ;;  %v13810_v31 = vld [vmem:[%s16318_s17 + $0x10] sm:$0xff]   ;;  %v13813_v38 = vld [vmem:[%s16320_s19 + $0x28] sm:$0xff]  }
0x6a50   : > { %v10738_v25 = vsel %vm1060_vm2, %v10733_v39, 0 }
0x6a51   : > { %13560 = vmatpush3.bf16.msra.mxu1 %v10738_v25 }
0x6a52   : > { %13571 = vmatprep.subr.bf16.mxu1 %v14031_v1 }
0x6b11   : > { %v10437_v41 = vpop.f32.mrb[32].mxu0 }
0x6b12   : > { %v10443_v45 = vadd.f32 %v10437_v41, %v16058_v40  ;;  %v13527_v42 = vpop.f32.mrb[33].mxu0  ;;  %v11944_v41 = vld [vmem:[%s16322_s21 + $0x8] sm:$0x3] }
0x6b13   : > { %v10440_v46 = vpop.f32.mrb[34].mxu0 }
0x6b14   : > { %v13528_v20 = vpop.f32.mrb[35].mxu0  ;;  %v10863_v46 = vrot.slane %v11944_v41, %v14557_v30 }
0x6b19   : > { %v10568_v43 = vpop.f32.mrb[36].mxu0 }
0x6b1a   : > { %v10569_v44 = vadd.f32 %v12053_v27, %v10568_v43  ;;  %v13543_v6 = vpop.f32.mrb[37].mxu0 }
0x6b1b   : > { %v10571_v47 = vpop.f32.mrb[38].mxu0  ;;  %v13814_v6 = vld [vmem:[%s16320_s19 + $0x30] sm:$0xff]  }
0x6b1c   : > { %10640 = vxpose.xlu0.b32.start.end [1/1] (short) (narrow) %v10569_v44, 8  ;;  %v13544_v48 = vpop.f32.mrb[39].mxu0  ;;  %v13815_v47 = vld [vmem:[%s16320_s19 + $0x38] sm:$0xff]  }
0x6b1d   : > { %v12086_v48 = vld [vmem:[%s16319_s18 + $0x1] ss:$0 sm:$0xff] }
0x6b9c   : > { %v10656_v59 = vpop.trf.xlu0 }
0x6b9d   : > { %v10672_v40 = vpack.c.bf16 %v10656_v59, %v10656_v59 }
0x6b9f   : > { %v10677_v51 = vsel %vm1060_vm2, %v10672_v40, 0 }
0x6ba0   : > { %13554 = vmatpush3.bf16.msra.mxu0 %v10677_v51 }
0x6ba1   : > { %13565 = vmatprep.subr.bf16.mxu0 %v14031_v1 }
0x6ba3   : > { %13556 = vmatmul.mubr.msk.bf16.vlgmr.msra.gmra.mrb[40].mxu0 %vm1056_vm3, %v10639_v52 }
0x6ba4   : > { %13567 = vmatprep.mubr.msk.bf16.mxu0 %vm14032_vm0, %v14031_v1  ;;  %13566 = vmatpush3.bf16.msra.mxu0 %v10787_v10 }
0x6ba5   : > { %13579 = vmatprep.subr.bf16.mxu0 %v14031_v1 }
0x6c76   : > { %v10713_v53 = vpop.f32.mrb[40].mxu0 }
0x6c77   : > { %v10719_v50 = vmul.f32 0.35355338, %v10713_v53  ;;  %v13557_v54 = vpop.f32.mrb[41].mxu0 }
0x6c78   : > { %v10716_v55 = vpop.f32.mrb[42].mxu0 }
0x6c79   : > { %v13558_v56 = vpop.f32.mrb[43].mxu0  ;;  %v10720_v58 = vsel %vm14296_vm5, %v10719_v50, -1e+10  ;;  %v12090_v50 = vld [vmem:[%s16321_s20 + $0x1] ss:$0 sm:$0xff] }
0x6c7a   : > { %v10721_v60 = vsel %vm1056_vm3, %v10720_v58, -inf }
0x6c7b   : > { %10722 = vmax.xlane.f32.xlu1 %v10721_v60 }
0x6d08   : > { %v10723_v61 = vpop.xlane.xlu1 %10722 }
0x6d09   : > { %v10724_v63 = vsub.f32 %v10720_v58, %v10723_v61 }
0x6d0b   : > { %v10725_v2 = vmul.f32 1.442695, %v10724_v63 }
0x6d0d   : > { %13926 = vpow2.f32 %v10725_v2 }
0x6d17   : > { %v13927_v3 = vpop.eup %13926 }
0x6d18   : > { %v10727_v4 = vsel %vm1056_vm3, %v13927_v3, 0.0 }
0x6d19   : > { %10728 = vadd.xlane.f32.xlu1 %v10727_v4 }
0x6da6   : > { %v10729_v5 = vpop.xlane.xlu1 %10728 }
0x6da7   : > { %13928 = vrcp.f32 %v10729_v5 }
0x6db1   : > { %v13929_v8 = vpop.eup %13928 }
0x6db2   : > { %v10731_v57 = vmul.f32 %v13929_v8, %v13927_v3 }
0x6db4   : > { %v10732_v9 = vpack.c.bf16 %v10731_v57, %v10731_v57  ;;  %10833 = vst.msk [vmem:[%s15965_s5 + $0x18] sm:$0xff] %vm1056_vm3, %v10731_v57  ;;  %v13816_v57 = vld [vmem:[%s16323_s22] sm:$0xff]   ;;  %s13941_s5 = scalar_lea.vmem %s13940_s9, 1024 }
0x6db5   : > { %p13943_p1 = scmp.lt.s32.totalorder %s13941_s5, %s13935_s1 }
0x6db6   : > { %13562 = vmatmul.mubr.msk.bf16.vlgmr.msra.gmra.mrb[36].mxu1 %vm1056_vm3, %v10732_v9  ;;  %v13817_v9 = vld [vmem:[%s16323_s22 + $0x8] sm:$0xff]  }
0x6db7   : > { %13575 = vmatprep.mubr.msk.bf16.mxu1 %vm14032_vm0, %v14031_v1  ;;  %13572 = vmatpush3.bf16.msra.mxu1 %v13810_v31  ;;  %p13944_p2 = por %p13943_p1, %p13942_p0 }
0x6db8   : > { %13573 = vmatprep.subr.bf16.mxu1 %v14031_v1 }
0x6db9   : > { %p13945_p3 = pnand %p13944_p2, %p13938_p13 }
0x6e89   : > { %v10774_v11 = vpop.f32.mrb[36].mxu1 }
0x6e8a   : > { %v10780_v17 = vpack.c.bf16 %v10774_v11, %v10774_v11  ;;  %v13563_v18 = vpop.f32.mrb[37].mxu1 }
0x6e8b   : > { %v10777_v19 = vpop.f32.mrb[38].mxu1 }
0x6e8c   : > { %v13564_v15 = vpop.f32.mrb[39].mxu1  ;;  %13568 = vmatmul.mubr.msk.bf16.vlgmr.msra.gmra.mrb[44].mxu0 %vm1056_vm3, %v10780_v17  ;;  %v12071_v17 = vld [vmem:[%s16322_s21 + $0xa] sm:$0x3] }
0x6e8d   : > { %13587 = vmatprep.mubr.msk.bf16.mxu0 %vm14032_vm0, %v14031_v1  ;;  %13580 = vmatpush3.bf16.msra.mxu0 %v13812_v14  ;;  %v11039_v18 = vrot.slane %v12071_v17, %v14292_v28  ;;  %v11044_v19 = vrot.slane %v12071_v17, %v14557_v30 }
0x6e8e   : > { %13581 = vmatprep.subr.bf16.mxu0 %v14031_v1 }
0x6e91   : > { %13582 = vmatpush3.bf16.msra.mxu0 %v13813_v38 }
0x6e92   : > { %13583 = vmatprep.subr.bf16.mxu0 %v14031_v1 }
0x6e95   : > { %13584 = vmatpush3.bf16.msra.mxu0 %v13814_v6 }
0x6e96   : > { %13585 = vmatprep.subr.bf16.mxu0 %v14031_v1 }
0x6e99   : > { %13586 = vmatpush3.bf16.msra.mxu0 %v13815_v47 }
0x6f5f   : > { %v10823_v23 = vpop.f32.mrb[44].mxu0 }
0x6f60   : > { %v10829_v24 = vadd.f32 %v10823_v23, %v10443_v45  ;;  %v13569_v0 = vpop.f32.mrb[45].mxu0  ;;  %v10858_v45 = vrot.slane %v11944_v41, %v14292_v28 }
0x6f61   : > { %v10826_v62 = vpop.f32.mrb[46].mxu0 }
0x6f62   : > { %v10840_v16 = vadd.f32 %v12070_v21, %v10829_v24  ;;  %v13570_v26 = vpop.f32.mrb[47].mxu0 }
0x6f64   : > { %v10841_v32 = vadd.f32 %v10840_v16, %v15890_v22  ;;  %v13811_v22 = vld [vmem:[%s16318_s17 + $0x18] sm:$0xff]  }
0x6f65   : > { %13574 = vmatpush3.bf16.msra.mxu1 %v13811_v22 }
0x6f66   : > { %v10842_v34 = vsel %vm848_vm1, %v10841_v32, 0.0  ;;  %13591 = vmatprep.subr.bf16.mxu1 %v14031_v1 }
0x6f67   : > { %10843 = vadd.xlane.f32.xlu0 %v10842_v34 }
0x6ff4   : > { %v10844_v35 = vpop.xlane.xlu0 %10843 }
0x6ff5   : > { %v10845_v36 = vmul.f32 0.03125, %v10844_v35 }
0x6ff7   : > { %v10846_v7 = vsub.f32 %v10841_v32, %v10845_v36 }
0x6ff9   : > { %v10847_v37 = vmul.f32 %v10846_v7, %v10846_v7 }
0x6ffb   : > { %v10848_v12 = vsel %vm848_vm1, %v10847_v37, 0.0 }
0x6ffc   : > { %10849 = vadd.xlane.f32.xlu1 %v10848_v12 }
0x7089   : > { %v10850_v39 = vpop.xlane.xlu1 %10849 }
0x708a   : > { %v10851_v29 = vmul.f32 0.03125, %v10850_v39 }
0x708c   : > { %v10852_v25 = vadd.f32 1e-05, %v10851_v29 }
0x708e   : > { %13930 = vrsqrt.f32 %v10852_v25 }
0x7098   : > { %v13931_v42 = vpop.eup %13930 }
0x7099   : > { %v10854_v20 = vmul.f32 %v13931_v42, %v10846_v7 }
0x709b   : > { %v10859_v27 = vmul.f32 %v10858_v45, %v10854_v20 }
0x709d   : > { %v10864_v43 = vadd.f32 %v10863_v46, %v10859_v27 }
0x709f   : > { %v10885_v44 = vpack.c.bf16 %v10864_v43, %v10864_v43 }
0x70a1   : > { %13576 = vmatmul.mubr.msk.bf16.vlgmr.msra.gmra.mrb[40].mxu1 %vm848_vm1, %v10885_v44 }
0x70a2   : > { %13595 = vmatprep.mubr.msk.bf16.mxu1 %vm14032_vm0, %v14031_v1  ;;  %13592 = vmatpush3.bf16.msra.mxu1 %v13816_v57 }
0x70a3   : > { %13593 = vmatprep.subr.bf16.mxu1 %v14031_v1 }
0x70a6   : > { %13594 = vmatpush3.bf16.msra.mxu1 %v13817_v9 }
0x7174   : > { %v10941_v49 = vpop.f32.mrb[40].mxu1 }
0x7175   : > { %v10942_v59 = vadd.f32 %v12086_v48, %v10941_v49  ;;  %v13577_v13 = vpop.f32.mrb[41].mxu1 }
0x7176   : > { %v10944_v40 = vpop.f32.mrb[42].mxu1 }
0x7177   : > { %v10947_v51 = vmax.f32 %v10942_v59, 0.0  ;;  %v13578_v52 = vpop.f32.mrb[43].mxu1 }
0x7179   : > { %v10948_v53 = vpack.c.bf16 %v10947_v51, %v10947_v51 }
0x717b   : > { %13588 = vmatmul.mubr.msk.bf16.vlgmr.msra.gmra.mrb[48].mxu0 %vm2518_vm6, %v10948_v53 }
0x724e   : > { %v11016_v54 = vpop.f32.mrb[48].mxu0 }
0x724f   : > { %v11017_v55 = vadd.f32 %v12090_v50, %v11016_v54  ;;  %v13589_v56 = vpop.f32.mrb[49].mxu0 }
0x7250   : > { %v11019_v58 = vpop.f32.mrb[50].mxu0 }
0x7251   : > { %v13590_v60 = vpop.f32.mrb[51].mxu0  ;;  %v11022_v61 = vadd.f32 %v11017_v55, %v10864_v43 }
0x7253   : > { %v11023_v63 = vsel %vm848_vm1, %v11022_v61, 0.0 }
0x7254   : > { %11024 = vadd.xlane.f32.xlu1 %v11023_v63 }
0x72e1   : > { %v11025_v2 = vpop.xlane.xlu1 %11024 }
0x72e2   : > { %v11026_v3 = vmul.f32 0.03125, %v11025_v2 }
0x72e4   : > { %v11027_v4 = vsub.f32 %v11022_v61, %v11026_v3 }
0x72e6   : > { %v11028_v5 = vmul.f32 %v11027_v4, %v11027_v4 }
0x72e8   : > { %v11029_v8 = vsel %vm848_vm1, %v11028_v5, 0.0 }
0x72e9   : > { %11030 = vadd.xlane.f32.xlu1 %v11029_v8 }
0x7376   : > { %v11031_v33 = vpop.xlane.xlu1 %11030 }
0x7377   : > { %v11032_v10 = vmul.f32 0.03125, %v11031_v33 }
0x7379   : > { %v11033_v11 = vadd.f32 1e-05, %v11032_v10 }
0x737b   : > { %13932 = vrsqrt.f32 %v11033_v11 }
0x7385   : > { %v13933_v1 = vpop.eup %13932 }
0x7386   : > { %v11035_v15 = vmul.f32 %v13933_v1, %v11027_v4 }
0x7388   : > { %v11040_v21 = vmul.f32 %v11039_v18, %v11035_v15 }
0x738a   : > { %v11045_v23 = vadd.f32 %v11044_v19, %v11040_v21 }
0x738c   : > { %v11046_v24 = vpack.c.bf16 %v11045_v23, %v11045_v23 }
0x738e   : > { %13596 = vmatmul.mubr.msk.bf16.vlgmr.msra.gmra.mrb[44].mxu1 %vm848_vm1, %v11046_v24 }
0x738f   : > { %13948 = shalt.err (!%p13945_p3)
}
0x7390   : > { %s13949_s24 = scalar_lea.hbm %s16224_s26, 512  ;;  %s13953_s3 = scalar_lea.hbm %s16395_s25, 1024 }
0x7391   : > { %p13950_p4 = scmp.ne.s32.totalorder %s16224_s26, %s13949_s24  ;;  %p13954_p9 = scmp.lt.u32.totalorder %s16224_s26, %s16395_s25 }
0x7392   : > { %p13955_p10 = scmp.lt.u32.totalorder %s13953_s3, %s13949_s24  ;;  %p13957_p12 = scmp.lt.u32.totalorder %s13949_s24, %s16224_s26 }
0x7393   : > { %p13951_p7 = pnand %p13950_p4, %p14206_p5 }
0x7394   : > { %p13956_p11 = por %p13955_p10, %p13954_p9 }
0x7395   : > { %p13952_p8 = pneg %p13951_p7 }
0x7396   : > { %p13958_p13 = por %p13957_p12, %p13956_p11 }
0x7398   : > { %p13959_p0 = pnand %p13958_p13, %p13952_p8 }
0x739a   : > { %13962 = shalt.err (!%p13959_p0)
}
0x739b   : > { %s14035_s1 = smov 128   ;;  %s14036_s5 = smov 8  }
0x739c   : > { %13600 = dma.vmem_to_hbm [thread:$0]  (%p14206_p5), %s16218_s6, 512, %s16224_s26, %s11120_s8, %s14035_s1, %s14035_s1, %s14036_s5  }
0x739d   : > { %s11274_s0 = sshll.u32 %s15959_s23, 3  ;;  %s16396_s29 = sld [smem:[#allocation29_spill]] }
0x739e   : > { %s12102_s24 = sshll.u32 %s14189_s7, 7  ;;  %s794_s9 = scalar_lea.vmem [#allocation2], %s11274_s0 }
0x739f   : > { %s11133_s10 = sshll.u32 %s794_s9, 4  ;;  %s16397_s13 = sld [smem:[#allocation30_spill]]  ;;  %s16260_s10 = int_to_ptr.vmem [resolvable:$true] %s11133_s10 }
0x73a0   : > { %s11115_s6 = scalar_lea.sflag [#allocation3], %s15959_s23  ;;  %s13963_s7 = scalar_lea.vmem %s16260_s10, 128 }
0x73a1   : > { %p13964_p1 = scmp.ne.s32.totalorder %s16260_s10, %s13963_s7  ;;  %s14037_s26 = smov [#allocation2]  }
0x73a2   : > { %s13967_s8 = sshll.u32 %s14037_s26, 4  ;;  %s13968_s8 = int_to_ptr.vmem [resolvable:$false] %s13967_s8 }
0x73a3   : > { %v12096_v28 = vld [vmem:[%s16396_s29] ss:$0 sm:$0xff]  ;;  %p13965_p2 = pnand %p13964_p1, %p14206_p5  ;;  %s13969_s11 = scalar_lea.vmem %s13968_s8, 256 }
0x73a4   : > { %p13970_p4 = scmp.lt.s32.totalorder %s16260_s10, %s13968_s8  ;;  %p13971_p7 = scmp.lt.s32.totalorder %s13969_s11, %s13963_s7 }
0x73a5   : > { %s16258_s14 = scalar_lea.hbm %s16397_s13, %s12102_s24  ;;  %p13966_p3 = pneg %p13965_p2 }
0x73a6   : > { %p13972_p8 = por %p13971_p7, %p13970_p4 }
0x73a8   : > { %p13973_p9 = pnand %p13972_p8, %p13966_p3 }
0x7461   : > { %v11107_v30 = vpop.f32.mrb[44].mxu1 }
0x7462   : > { %v11108_v0 = vadd.f32 %v12096_v28, %v11107_v30  ;;  %v13597_v62 = vpop.f32.mrb[45].mxu1 }
0x7463   : > { %v11110_v16 = vpop.f32.mrb[46].mxu1 }
0x7464   : > { %11113 = vst [vmem:[%s794_s9] sm:$0xff] %v11108_v0  ;;  %v13598_v26 = vpop.f32.mrb[47].mxu1 }
0x7465   : > { %13976 = shalt.err (!%p13973_p9)
}
0x7466   : > { %s13977_s12 = scalar_lea.hbm %s16258_s14, 128  ;;  %s13981_s5 = scalar_lea.hbm %s16397_s13, 256 }
0x7467   : > { %p13978_p10 = scmp.ne.s32.totalorder %s16258_s14, %s13977_s12  ;;  %p13982_p13 = scmp.lt.u32.totalorder %s16258_s14, %s16397_s13 }
0x7468   : > { %p13983_p0 = scmp.lt.u32.totalorder %s13981_s5, %s13977_s12  ;;  %p13985_p2 = scmp.lt.u32.totalorder %s13977_s12, %s16258_s14 }
0x7469   : > { %p13979_p11 = pnand %p13978_p10, %p14206_p5 }
0x746a   : > { %p13984_p1 = por %p13983_p0, %p13982_p13 }
0x746b   : > { %p13980_p12 = pneg %p13979_p11 }
0x746c   : > { %p13986_p3 = por %p13985_p2, %p13984_p1 }
0x746e   : > { %p13987_p4 = pnand %p13986_p3, %p13980_p12 }
0x7470   : > { %13990 = shalt.err (!%p13987_p4)
}
0x7471   : > { %13599 = dma.vmem_to_hbm [thread:$0]  (%p14206_p5), %s16260_s10, 128, %s16258_s14, %s11115_s6  }
0x7472 PF: > { %s16398_s3 = sld [smem:[#allocation10_spill]]  ;;  %s16399_s29 = sld [smem:[#allocation8_spill]] }
0x7478   : > { %p13610_p7 = scmp.ge.s32.totalorder %s16398_s3, 2  ;;  %s11161_s9 = sand.u32 1, %s16399_s29  }
0x7479   : > { %s11162_s7 = scalar_lea.sflag [#allocation3], %s11161_s9 }
0x747a   : > { %p13604_p8 = pnand %p13610_p7, %p14210_p6 }
0x747c   : > { %14008 = dma.done.wait (!%p13604_p8), %s11162_s7, 128  }
0x747d   : > { %14010 = vsyncadd (!%p13604_p8), %s11162_s7, 4294967168  ;;  %s11171_s26 = scalar_lea.sflag [#allocation5], %s11161_s9 }
0x747e   : > { %14012 = dma.done.wait (!%p13604_p8), %s11171_s26, 512  }
0x747f   : > { %14014 = vsyncadd (!%p13604_p8), %s11171_s26, 4294966784  ;;  %s16401_s30 = sld [smem:[#allocation11_spill]]  ;;  %s16402_s4 = sld [smem:[#allocation9_spill]] }
0x7480   : > { %s16403_s6 = sld [smem:[#allocation12_spill]]  ;;  %s16404_s29 = smov %s14021_s2 }
0x7485   : > { %p39_p5 = scmp.ge.s32.totalorder %s16401_s30, 4   ;;  %s16405_s2 = smov %s16402_s4 }
0x7487   :  { %41 = sbr.rel (!%p39_p5) target bundleno = 24 (0x18), region = 359 }
0x748e   :  { %11176 = vsyncpa [#allocation3], 1 }
0x748f   :  { %11178 = vsyncpa [#allocation3 + $0x1], 1 }
0x7490   :  { %11179 = vsyncpa [#allocation5], 1 }
0x7491   :  { %11181 = vsyncpa [#allocation5 + $0x1], 1 }

</bundles_post_ra>
